<compile_context>
chip_gen: v7x
topology: tpu7x:2x2x1
jax: 0.10.0
libtpu: 0.0.40
codegen_flags: <defaults>
</compile_context>

<pallas_src>
import jax
import jax.numpy as jnp
from jax import lax
from jax.experimental import pallas as pl
from jax.experimental.pallas import tpu as pltpu


# ------------------------------ fused kernel --------------------------------

def _lenet_kernel(p_ref, w1_ref, b1_ref, w2_ref, b2_ref, g_ref,
                  fb1_ref, fw2_ref, fb2_ref, fw3_ref, fb3_ref,
                  o_ref, u2_all):
    G = u2_all.shape[0]          # images per grid step (static)

    # ---- per-element conv stages (unrolled; keeps lane width / vregs small) -
    for i in range(G):
        # conv1 (3->6, k=5) + ReLU as one lane-dense matmul -> (6, 784).
        # Patch lanes are pre-permuted (wrapper) to j*196 + ph*14 + pw with
        # j = 2*(oh%2) + (ow%2), so the 2x2/s2 maxpool is a max over four
        # contiguous 196-lane slices.
        z1 = jnp.dot(w1_ref[...], p_ref[i], preferred_element_type=jnp.float32)
        z1 = jnp.maximum(z1 + b1_ref[...], 0.0)
        pooled1 = jnp.maximum(jnp.maximum(z1[:, 0:196], z1[:, 196:392]),
                              jnp.maximum(z1[:, 392:588], z1[:, 588:784]))
        # pooled1: (6, 196) f32, lane = h*14 + w of the 14x14 map.

        # conv2 (6->16, k=5): stack the 5 kh-shifted maps along sublanes and
        # contract with 5 deeper (K=30) matmuls instead of 25 K=6 dots.
        stack = jnp.concatenate(
            [pooled1[:, kh * 14: kh * 14 + 140] for kh in range(5)], axis=0)
        stack = stack.astype(jnp.bfloat16)                        # (30, 140)
        parts = [jnp.dot(w2_ref[kw], stack[:, kw:kw + 136],      # (16,30)@(30,136)
                         preferred_element_type=jnp.float32)
                 for kw in range(5)]
        acc2 = (parts[0] + parts[1]) + (parts[2] + parts[3]) + parts[4]
        s2 = jnp.maximum(acc2 + b2_ref[...], 0.0)                 # (16, 136)

        # 2x2/s2 maxpool via two shift-max passes -> (16, 121); valid values
        # sit at lanes 28*py + 2*px, junk lanes are masked by zero rows of the
        # scattered fc1 weights.
        t2 = jnp.maximum(s2[:, 0:135], s2[:, 1:136])
        u2 = jnp.maximum(t2[:, 0:121], t2[:, 14:135])
        u2_all[i] = u2.astype(jnp.bfloat16)

    # ---- fc1 (400->120), batched over the G elements of this block ----------
    parts = [jnp.dot(u2_all[:, co, :], g_ref[co],                 # (G,121)@(121,120)
                     preferred_element_type=jnp.float32)
             for co in range(16)]
    while len(parts) > 1:                                          # tree-sum
        parts = [parts[k] + parts[k + 1] for k in range(0, len(parts), 2)]
    h1 = jnp.maximum(parts[0] + fb1_ref[...], 0.0).astype(jnp.bfloat16)  # (G,120)

    # ---- fc2 (120->84) + ReLU, fc3 (84->10, padded to 128 lanes) ------------
    h2 = jnp.dot(h1, fw2_ref[...], preferred_element_type=jnp.float32)
    h2 = jnp.maximum(h2 + fb2_ref[...], 0.0).astype(jnp.bfloat16)        # (G,84)
    out = jnp.dot(h2, fw3_ref[...], preferred_element_type=jnp.float32)
    o_ref[0] = (out + fb3_ref[...]).astype(o_ref.dtype)                  # (G,128)


# ----------------------- one-time parameter preparation ---------------------

def prepare_params(params):
    (w1, b1, w2, b2, fw1, fb1, fw2, fb2, fw3, fb3) = params
    # conv1: OIHW -> (6, 75), K ordered (ci, kh, kw); bf16 for the MXU.
    w1f = w1.reshape(6, 75).astype(jnp.bfloat16)
    b1c = b1.reshape(6, 1).astype(jnp.float32)
    # conv2: grouped by kw -> (kw, co, kh*6+ci) = (5, 16, 30).
    w2g = jnp.transpose(w2, (3, 0, 2, 1)).reshape(5, 16, 30).astype(jnp.bfloat16)
    b2c = b2.reshape(16, 1).astype(jnp.float32)
    # fc1: scatter the 400 columns onto the (16 ch x 121 lanes) pooled-conv2
    # layout: feature f = co*25 + py*5 + px sits at lane 28*py + 2*px of
    # channel co; all other lanes get zero weights.
    m_idx = (28 * jnp.arange(5)[:, None] + 2 * jnp.arange(5)[None, :]).reshape(-1)
    fw1_r = jnp.transpose(fw1.reshape(120, 16, 5, 5), (1, 2, 3, 0)).reshape(16, 25, 120)
    g = jnp.zeros((16, 121, 120), jnp.float32).at[:, m_idx, :].set(fw1_r)
    g = g.astype(jnp.bfloat16)
    fb1r = fb1.reshape(1, 120).astype(jnp.float32)
    fw2t = fw2.T.astype(jnp.bfloat16)                              # (120, 84)
    fb2r = fb2.reshape(1, 84).astype(jnp.float32)
    # fc3 padded to 128 output lanes (lane-dense stores); wrapper slices to 10.
    fw3p = jnp.zeros((84, 128), jnp.float32).at[:, :10].set(fw3.T).astype(jnp.bfloat16)
    fb3p = jnp.zeros((1, 128), jnp.float32).at[:, :10].set(fb3.reshape(1, 10))
    return (w1f, b1c, w2g, b2c, g, fb1r, fw2t, fb2r, fw3p, fb3p)


# --------------------------------- forward ----------------------------------

def lenet_forward(x, prepped, *, block_b=8):
    (w1f, b1c, w2g, b2c, g, fb1r, fw2t, fb2r, fw3p, fb3p) = prepped
    B = x.shape[0]
    G = max(1, min(block_b, B))              # images per grid step
    nblk = pl.cdiv(B, G)
    B_pad = nblk * G
    if B_pad != B:
        x = jnp.concatenate(
            [x, jnp.zeros((B_pad - B,) + x.shape[1:], x.dtype)], axis=0)

    # im2col for conv1 (glue, XLA): K ordered (ci, kh, kw); output-pixel lanes
    # permuted to j*196 + ph*14 + pw so pooling inside the kernel is four
    # contiguous slices.
    cols = [x[:, :, di:di + 28, dj:dj + 28] for di in range(5) for dj in range(5)]
    p = jnp.stack(cols, axis=2).reshape(B_pad, 75, 28, 28)
    p = p.reshape(B_pad, 75, 14, 2, 14, 2).transpose(0, 1, 3, 5, 2, 4)
    p = p.reshape(B_pad, 75, 784).astype(jnp.bfloat16)

    out = pl.pallas_call(
        _lenet_kernel,
        out_shape=jax.ShapeDtypeStruct((nblk, G, 128), jnp.float32),
        grid=(nblk,),
        in_specs=[
            pl.BlockSpec((G, 75, 784), lambda b: (b, 0, 0)),       # patches
            pl.BlockSpec((6, 75), lambda b: (0, 0)),               # w1
            pl.BlockSpec((6, 1), lambda b: (0, 0)),                # b1
            pl.BlockSpec((5, 16, 30), lambda b: (0, 0, 0)),        # w2 (by kw)
            pl.BlockSpec((16, 1), lambda b: (0, 0)),               # b2
            pl.BlockSpec((16, 121, 120), lambda b: (0, 0, 0)),     # fc1 scattered
            pl.BlockSpec((1, 120), lambda b: (0, 0)),              # fb1
            pl.BlockSpec((120, 84), lambda b: (0, 0)),             # fc2
            pl.BlockSpec((1, 84), lambda b: (0, 0)),               # fb2
            pl.BlockSpec((84, 128), lambda b: (0, 0)),             # fc3 (padded)
            pl.BlockSpec((1, 128), lambda b: (0, 0)),              # fb3 (padded)
        ],
        out_specs=pl.BlockSpec((1, G, 128), lambda b: (b, 0, 0)),
        scratch_shapes=[pltpu.VMEM((G, 16, 121), jnp.bfloat16)],   # pooled conv2
        compiler_params=pltpu.CompilerParams(
            dimension_semantics=("parallel",)),
    )(p, w1f, b1c, w2g, b2c, g, fb1r, fw2t, fb2r, fw3p, fb3p)

    return out.reshape(B_pad, 128)[:B, :10]


# ------------------------------ f32 reference --------------------------------

def ref_forward(x, params):
    (w1, b1, w2, b2, fw1, fb1, fw2, fb2, fw3, fb3) = params
    dn = ('NCHW', 'OIHW', 'NCHW')
    y = lax.conv_general_dilated(x, w1, (1, 1), 'VALID', dimension_numbers=dn)
    y = jnp.maximum(y + b1[None, :, None, None], 0.0)
    B, C, H, W = y.shape
    y = y.reshape(B, C, H // 2, 2, W // 2, 2).max(axis=(3, 5))
    y = lax.conv_general_dilated(y, w2, (1, 1), 'VALID', dimension_numbers=dn)
    y = jnp.maximum(y + b2[None, :, None, None], 0.0)
    B, C, H, W = y.shape
    y = y.reshape(B, C, H // 2, 2, W // 2, 2).max(axis=(3, 5))
    flat = y.reshape(B, -1)
    h = jnp.maximum(flat @ fw1.T + fb1, 0.0)
    h = jnp.maximum(h @ fw2.T + fb2, 0.0)
    return h @ fw3.T + fb3


# ---------------------------------- main -------------------------------------

if __name__ == "__main__":
    key = jax.random.PRNGKey(0)
    keys = jax.random.split(key, 11)

    # Deterministic synthetic parameters (PyTorch module shapes, output_dim=10).
    w1 = 0.1 * jax.random.normal(keys[0], (6, 3, 5, 5), jnp.float32)
    b1 = 0.1 * jax.random.normal(keys[1], (6,), jnp.float32)
    w2 = 0.1 * jax.random.normal(keys[2], (16, 6, 5, 5), jnp.float32)
    b2 = 0.1 * jax.random.normal(keys[3], (16,), jnp.float32)
    fw1 = 0.1 * jax.random.normal(keys[4], (120, 400), jnp.float32)
    fb1 = 0.1 * jax.random.normal(keys[5], (120,), jnp.float32)
    fw2 = 0.1 * jax.random.normal(keys[6], (84, 120), jnp.float32)
    fb2 = 0.1 * jax.random.normal(keys[7], (84,), jnp.float32)
    fw3 = 0.1 * jax.random.normal(keys[8], (10, 84), jnp.float32)
    fb3 = 0.1 * jax.random.normal(keys[9], (10,), jnp.float32)
    params = (w1, b1, w2, b2, fw1, fb1, fw2, fb2, fw3, fb3)

    # LeNet expects 3x32x32 inputs (400 = 16*5*5 after the feature stack).
    # B=16 with 8 images per grid step -> 2 grid blocks (both v7x TCs used).
    B = 16
    x = jax.random.normal(keys[10], (B, 3, 32, 32), jnp.float32)

    prepped = prepare_params(params)
    fwd = jax.jit(lenet_forward)

    out = jax.block_until_ready(fwd(x, prepped))
    ref = jax.block_until_ready(ref_forward(x, params))

    assert out.shape == (B, 10), out.shape
    # bf16 matmul operands (f32 accumulation) => loosened tolerance vs f32 ref.
    assert jnp.allclose(out, ref, rtol=5e-2, atol=1e-1), (
        "mismatch vs reference: max abs diff "
        f"{float(jnp.max(jnp.abs(out - ref)))}")

    print("KERNEL_OK")
</pallas_src>

<mosaic_0001>
module attributes {stable_mosaic.version = 11 : i64} {
  func.func @_lenet_kernel(%arg0: i32, %arg1: memref<8x75x784xbf16, #tpu.memory_space<vmem>>, %arg2: memref<6x75xbf16, #tpu.memory_space<vmem>>, %arg3: memref<6x1xf32, #tpu.memory_space<vmem>>, %arg4: memref<5x16x30xbf16, #tpu.memory_space<vmem>>, %arg5: memref<16x1xf32, #tpu.memory_space<vmem>>, %arg6: memref<16x121x120xbf16, #tpu.memory_space<vmem>>, %arg7: memref<1x120xf32, #tpu.memory_space<vmem>>, %arg8: memref<120x84xbf16, #tpu.memory_space<vmem>>, %arg9: memref<1x84xf32, #tpu.memory_space<vmem>>, %arg10: memref<84x128xbf16, #tpu.memory_space<vmem>>, %arg11: memref<1x128xf32, #tpu.memory_space<vmem>>, %arg12: memref<1x8x128xf32, #tpu.memory_space<vmem>>, %arg13: memref<8x16x121xbf16, #tpu.memory_space<vmem>>) attributes {dimension_semantics = [#tpu.dimension_semantics<parallel>], iteration_bounds = array<i64: 2>, scalar_prefetch = 0 : i64, scratch_operands = 1 : i64, tpu.core_type = #tpu.core_type<tc>, window_params = [{transform_indices = @transform_0, window_bounds = array<i64: 8, 75, 784>}, {pipeline_mode = #tpu.pipeline_mode<synchronous>, transform_indices = @transform_1, window_bounds = array<i64: 6, 75>}, {pipeline_mode = #tpu.pipeline_mode<synchronous>, transform_indices = @transform_2, window_bounds = array<i64: 6, 1>}, {pipeline_mode = #tpu.pipeline_mode<synchronous>, transform_indices = @transform_3, window_bounds = array<i64: 5, 16, 30>}, {pipeline_mode = #tpu.pipeline_mode<synchronous>, transform_indices = @transform_4, window_bounds = array<i64: 16, 1>}, {pipeline_mode = #tpu.pipeline_mode<synchronous>, transform_indices = @transform_5, window_bounds = array<i64: 16, 121, 120>}, {pipeline_mode = #tpu.pipeline_mode<synchronous>, transform_indices = @transform_6, window_bounds = array<i64: 1, 120>}, {pipeline_mode = #tpu.pipeline_mode<synchronous>, transform_indices = @transform_7, window_bounds = array<i64: 120, 84>}, {pipeline_mode = #tpu.pipeline_mode<synchronous>, transform_indices = @transform_8, window_bounds = array<i64: 1, 84>}, {pipeline_mode = #tpu.pipeline_mode<synchronous>, transform_indices = @transform_9, window_bounds = array<i64: 84, 128>}, {pipeline_mode = #tpu.pipeline_mode<synchronous>, transform_indices = @transform_10, window_bounds = array<i64: 1, 128>}, {transform_indices = @transform_11, window_bounds = array<i64: 1, 8, 128>}]} {
    %c0 = arith.constant 0 : index
    %c0_0 = arith.constant 0 : index
    %0 = vector.load %arg2[%c0, %c0_0] : memref<6x75xbf16, #tpu.memory_space<vmem>>, vector<6x75xbf16>
    %c0_1 = arith.constant 0 : index
    %c0_2 = arith.constant 0 : index
    %c0_3 = arith.constant 0 : index
    %1 = vector.load %arg1[%c0_1, %c0_2, %c0_3] : memref<8x75x784xbf16, #tpu.memory_space<vmem>>, vector<1x75x784xbf16>
    %2 = vector.shape_cast %1 : vector<1x75x784xbf16> to vector<75x784xbf16>
    %cst = arith.constant dense<0.000000e+00> : vector<6x784xf32>
    %3 = tpu.matmul %0, %2, %cst {dimension_numbers = #tpu.dot_dimension_numbers<[1], [0], [0], [1], [0, 0, 1, 1], [], []>} : vector<6x75xbf16>, vector<75x784xbf16>, vector<6x784xf32> -> vector<6x784xf32>
    %c0_4 = arith.constant 0 : index
    %c0_5 = arith.constant 0 : index
    %4 = vector.load %arg3[%c0_4, %c0_5] : memref<6x1xf32, #tpu.memory_space<vmem>>, vector<6x1xf32>
    %5 = vector.broadcast %4 : vector<6x1xf32> to vector<6x784xf32>
    %6 = arith.addf %3, %5 : vector<6x784xf32>
    %cst_6 = arith.constant 0.000000e+00 : f32
    %7 = vector.broadcast %cst_6 : f32 to vector<6x784xf32>
    %8 = arith.maximumf %6, %7 : vector<6x784xf32>
    %9 = vector.extract_strided_slice %8 {offsets = [0, 0], sizes = [6, 196], strides = [1, 1]} : vector<6x784xf32> to vector<6x196xf32>
    %10 = vector.extract_strided_slice %8 {offsets = [0, 196], sizes = [6, 196], strides = [1, 1]} : vector<6x784xf32> to vector<6x196xf32>
    %11 = arith.maximumf %9, %10 : vector<6x196xf32>
    %12 = vector.extract_strided_slice %8 {offsets = [0, 392], sizes = [6, 196], strides = [1, 1]} : vector<6x784xf32> to vector<6x196xf32>
    %13 = vector.extract_strided_slice %8 {offsets = [0, 588], sizes = [6, 196], strides = [1, 1]} : vector<6x784xf32> to vector<6x196xf32>
    %14 = arith.maximumf %12, %13 : vector<6x196xf32>
    %15 = arith.maximumf %11, %14 : vector<6x196xf32>
    %16 = vector.extract_strided_slice %15 {offsets = [0, 0], sizes = [6, 140], strides = [1, 1]} : vector<6x196xf32> to vector<6x140xf32>
    %17 = vector.extract_strided_slice %15 {offsets = [0, 14], sizes = [6, 140], strides = [1, 1]} : vector<6x196xf32> to vector<6x140xf32>
    %18 = vector.extract_strided_slice %15 {offsets = [0, 28], sizes = [6, 140], strides = [1, 1]} : vector<6x196xf32> to vector<6x140xf32>
    %19 = vector.extract_strided_slice %15 {offsets = [0, 42], sizes = [6, 140], strides = [1, 1]} : vector<6x196xf32> to vector<6x140xf32>
    %20 = vector.extract_strided_slice %15 {offsets = [0, 56], sizes = [6, 140], strides = [1, 1]} : vector<6x196xf32> to vector<6x140xf32>
    %21 = tpu.concatenate %16, %17, %18, %19, %20 in 0 : vector<6x140xf32>, vector<6x140xf32>, vector<6x140xf32>, vector<6x140xf32>, vector<6x140xf32> -> vector<30x140xf32>
    %22 = arith.truncf %21 : vector<30x140xf32> to vector<30x140xbf16>
    %c0_7 = arith.constant 0 : index
    %c0_8 = arith.constant 0 : index
    %c0_9 = arith.constant 0 : index
    %23 = vector.load %arg4[%c0_7, %c0_8, %c0_9] : memref<5x16x30xbf16, #tpu.memory_space<vmem>>, vector<1x16x30xbf16>
    %24 = vector.shape_cast %23 : vector<1x16x30xbf16> to vector<16x30xbf16>
    %25 = vector.extract_strided_slice %22 {offsets = [0, 0], sizes = [30, 136], strides = [1, 1]} : vector<30x140xbf16> to vector<30x136xbf16>
    %cst_10 = arith.constant dense<0.000000e+00> : vector<16x136xf32>
    %26 = tpu.matmul %24, %25, %cst_10 {dimension_numbers = #tpu.dot_dimension_numbers<[1], [0], [0], [1], [0, 0, 1, 1], [], []>} : vector<16x30xbf16>, vector<30x136xbf16>, vector<16x136xf32> -> vector<16x136xf32>
    %c1 = arith.constant 1 : index
    %c0_11 = arith.constant 0 : index
    %c0_12 = arith.constant 0 : index
    %27 = vector.load %arg4[%c1, %c0_11, %c0_12] : memref<5x16x30xbf16, #tpu.memory_space<vmem>>, vector<1x16x30xbf16>
    %28 = vector.shape_cast %27 : vector<1x16x30xbf16> to vector<16x30xbf16>
    %29 = vector.extract_strided_slice %22 {offsets = [0, 1], sizes = [30, 136], strides = [1, 1]} : vector<30x140xbf16> to vector<30x136xbf16>
    %cst_13 = arith.constant dense<0.000000e+00> : vector<16x136xf32>
    %30 = tpu.matmul %28, %29, %cst_13 {dimension_numbers = #tpu.dot_dimension_numbers<[1], [0], [0], [1], [0, 0, 1, 1], [], []>} : vector<16x30xbf16>, vector<30x136xbf16>, vector<16x136xf32> -> vector<16x136xf32>
    %c2 = arith.constant 2 : index
    %c0_14 = arith.constant 0 : index
    %c0_15 = arith.constant 0 : index
    %31 = vector.load %arg4[%c2, %c0_14, %c0_15] : memref<5x16x30xbf16, #tpu.memory_space<vmem>>, vector<1x16x30xbf16>
    %32 = vector.shape_cast %31 : vector<1x16x30xbf16> to vector<16x30xbf16>
    %33 = vector.extract_strided_slice %22 {offsets = [0, 2], sizes = [30, 136], strides = [1, 1]} : vector<30x140xbf16> to vector<30x136xbf16>
    %cst_16 = arith.constant dense<0.000000e+00> : vector<16x136xf32>
    %34 = tpu.matmul %32, %33, %cst_16 {dimension_numbers = #tpu.dot_dimension_numbers<[1], [0], [0], [1], [0, 0, 1, 1], [], []>} : vector<16x30xbf16>, vector<30x136xbf16>, vector<16x136xf32> -> vector<16x136xf32>
    %c3 = arith.constant 3 : index
    %c0_17 = arith.constant 0 : index
    %c0_18 = arith.constant 0 : index
    %35 = vector.load %arg4[%c3, %c0_17, %c0_18] : memref<5x16x30xbf16, #tpu.memory_space<vmem>>, vector<1x16x30xbf16>
    %36 = vector.shape_cast %35 : vector<1x16x30xbf16> to vector<16x30xbf16>
    %37 = vector.extract_strided_slice %22 {offsets = [0, 3], sizes = [30, 136], strides = [1, 1]} : vector<30x140xbf16> to vector<30x136xbf16>
    %cst_19 = arith.constant dense<0.000000e+00> : vector<16x136xf32>
    %38 = tpu.matmul %36, %37, %cst_19 {dimension_numbers = #tpu.dot_dimension_numbers<[1], [0], [0], [1], [0, 0, 1, 1], [], []>} : vector<16x30xbf16>, vector<30x136xbf16>, vector<16x136xf32> -> vector<16x136xf32>
    %c4 = arith.constant 4 : index
    %c0_20 = arith.constant 0 : index
    %c0_21 = arith.constant 0 : index
    %39 = vector.load %arg4[%c4, %c0_20, %c0_21] : memref<5x16x30xbf16, #tpu.memory_space<vmem>>, vector<1x16x30xbf16>
    %40 = vector.shape_cast %39 : vector<1x16x30xbf16> to vector<16x30xbf16>
    %41 = vector.extract_strided_slice %22 {offsets = [0, 4], sizes = [30, 136], strides = [1, 1]} : vector<30x140xbf16> to vector<30x136xbf16>
    %cst_22 = arith.constant dense<0.000000e+00> : vector<16x136xf32>
    %42 = tpu.matmul %40, %41, %cst_22 {dimension_numbers = #tpu.dot_dimension_numbers<[1], [0], [0], [1], [0, 0, 1, 1], [], []>} : vector<16x30xbf16>, vector<30x136xbf16>, vector<16x136xf32> -> vector<16x136xf32>
    %43 = arith.addf %26, %30 : vector<16x136xf32>
    %44 = arith.addf %34, %38 : vector<16x136xf32>
    %45 = arith.addf %43, %44 : vector<16x136xf32>
    %46 = arith.addf %45, %42 : vector<16x136xf32>
    %c0_23 = arith.constant 0 : index
    %c0_24 = arith.constant 0 : index
    %47 = vector.load %arg5[%c0_23, %c0_24] : memref<16x1xf32, #tpu.memory_space<vmem>>, vector<16x1xf32>
    %48 = vector.broadcast %47 : vector<16x1xf32> to vector<16x136xf32>
    %49 = arith.addf %46, %48 : vector<16x136xf32>
    %cst_25 = arith.constant 0.000000e+00 : f32
    %50 = vector.broadcast %cst_25 : f32 to vector<16x136xf32>
    %51 = arith.maximumf %49, %50 : vector<16x136xf32>
    %52 = vector.extract_strided_slice %51 {offsets = [0, 0], sizes = [16, 135], strides = [1, 1]} : vector<16x136xf32> to vector<16x135xf32>
    %53 = vector.extract_strided_slice %51 {offsets = [0, 1], sizes = [16, 135], strides = [1, 1]} : vector<16x136xf32> to vector<16x135xf32>
    %54 = arith.maximumf %52, %53 : vector<16x135xf32>
    %55 = vector.extract_strided_slice %54 {offsets = [0, 0], sizes = [16, 121], strides = [1, 1]} : vector<16x135xf32> to vector<16x121xf32>
    %56 = vector.extract_strided_slice %54 {offsets = [0, 14], sizes = [16, 121], strides = [1, 1]} : vector<16x135xf32> to vector<16x121xf32>
    %57 = arith.maximumf %55, %56 : vector<16x121xf32>
    %58 = arith.truncf %57 : vector<16x121xf32> to vector<16x121xbf16>
    %c0_26 = arith.constant 0 : index
    %c0_27 = arith.constant 0 : index
    %c0_28 = arith.constant 0 : index
    %59 = vector.load %arg13[%c0_26, %c0_27, %c0_28] : memref<8x16x121xbf16, #tpu.memory_space<vmem>>, vector<1x16x121xbf16>
    %60 = vector.shape_cast %59 : vector<1x16x121xbf16> to vector<16x121xbf16>
    %61 = vector.shape_cast %58 : vector<16x121xbf16> to vector<1x16x121xbf16>
    tpu.vector_store %arg13[%c0_26, %c0_27, %c0_28], %61 {strides = array<i32>} : memref<8x16x121xbf16, #tpu.memory_space<vmem>>, vector<1x16x121xbf16>,
    %c0_29 = arith.constant 0 : index
    %c0_30 = arith.constant 0 : index
    %62 = vector.load %arg2[%c0_29, %c0_30] : memref<6x75xbf16, #tpu.memory_space<vmem>>, vector<6x75xbf16>
    %c1_31 = arith.constant 1 : index
    %c0_32 = arith.constant 0 : index
    %c0_33 = arith.constant 0 : index
    %63 = vector.load %arg1[%c1_31, %c0_32, %c0_33] : memref<8x75x784xbf16, #tpu.memory_space<vmem>>, vector<1x75x784xbf16>
    %64 = vector.shape_cast %63 : vector<1x75x784xbf16> to vector<75x784xbf16>
    %cst_34 = arith.constant dense<0.000000e+00> : vector<6x784xf32>
    %65 = tpu.matmul %62, %64, %cst_34 {dimension_numbers = #tpu.dot_dimension_numbers<[1], [0], [0], [1], [0, 0, 1, 1], [], []>} : vector<6x75xbf16>, vector<75x784xbf16>, vector<6x784xf32> -> vector<6x784xf32>
    %c0_35 = arith.constant 0 : index
    %c0_36 = arith.constant 0 : index
    %66 = vector.load %arg3[%c0_35, %c0_36] : memref<6x1xf32, #tpu.memory_space<vmem>>, vector<6x1xf32>
    %67 = vector.broadcast %66 : vector<6x1xf32> to vector<6x784xf32>
    %68 = arith.addf %65, %67 : vector<6x784xf32>
    %cst_37 = arith.constant 0.000000e+00 : f32
    %69 = vector.broadcast %cst_37 : f32 to vector<6x784xf32>
    %70 = arith.maximumf %68, %69 : vector<6x784xf32>
    %71 = vector.extract_strided_slice %70 {offsets = [0, 0], sizes = [6, 196], strides = [1, 1]} : vector<6x784xf32> to vector<6x196xf32>
    %72 = vector.extract_strided_slice %70 {offsets = [0, 196], sizes = [6, 196], strides = [1, 1]} : vector<6x784xf32> to vector<6x196xf32>
    %73 = arith.maximumf %71, %72 : vector<6x196xf32>
    %74 = vector.extract_strided_slice %70 {offsets = [0, 392], sizes = [6, 196], strides = [1, 1]} : vector<6x784xf32> to vector<6x196xf32>
    %75 = vector.extract_strided_slice %70 {offsets = [0, 588], sizes = [6, 196], strides = [1, 1]} : vector<6x784xf32> to vector<6x196xf32>
    %76 = arith.maximumf %74, %75 : vector<6x196xf32>
    %77 = arith.maximumf %73, %76 : vector<6x196xf32>
    %78 = vector.extract_strided_slice %77 {offsets = [0, 0], sizes = [6, 140], strides = [1, 1]} : vector<6x196xf32> to vector<6x140xf32>
    %79 = vector.extract_strided_slice %77 {offsets = [0, 14], sizes = [6, 140], strides = [1, 1]} : vector<6x196xf32> to vector<6x140xf32>
    %80 = vector.extract_strided_slice %77 {offsets = [0, 28], sizes = [6, 140], strides = [1, 1]} : vector<6x196xf32> to vector<6x140xf32>
    %81 = vector.extract_strided_slice %77 {offsets = [0, 42], sizes = [6, 140], strides = [1, 1]} : vector<6x196xf32> to vector<6x140xf32>
    %82 = vector.extract_strided_slice %77 {offsets = [0, 56], sizes = [6, 140], strides = [1, 1]} : vector<6x196xf32> to vector<6x140xf32>
    %83 = tpu.concatenate %78, %79, %80, %81, %82 in 0 : vector<6x140xf32>, vector<6x140xf32>, vector<6x140xf32>, vector<6x140xf32>, vector<6x140xf32> -> vector<30x140xf32>
    %84 = arith.truncf %83 : vector<30x140xf32> to vector<30x140xbf16>
    %c0_38 = arith.constant 0 : index
    %c0_39 = arith.constant 0 : index
    %c0_40 = arith.constant 0 : index
    %85 = vector.load %arg4[%c0_38, %c0_39, %c0_40] : memref<5x16x30xbf16, #tpu.memory_space<vmem>>, vector<1x16x30xbf16>
    %86 = vector.shape_cast %85 : vector<1x16x30xbf16> to vector<16x30xbf16>
    %87 = vector.extract_strided_slice %84 {offsets = [0, 0], sizes = [30, 136], strides = [1, 1]} : vector<30x140xbf16> to vector<30x136xbf16>
    %cst_41 = arith.constant dense<0.000000e+00> : vector<16x136xf32>
    %88 = tpu.matmul %86, %87, %cst_41 {dimension_numbers = #tpu.dot_dimension_numbers<[1], [0], [0], [1], [0, 0, 1, 1], [], []>} : vector<16x30xbf16>, vector<30x136xbf16>, vector<16x136xf32> -> vector<16x136xf32>
    %c1_42 = arith.constant 1 : index
    %c0_43 = arith.constant 0 : index
    %c0_44 = arith.constant 0 : index
    %89 = vector.load %arg4[%c1_42, %c0_43, %c0_44] : memref<5x16x30xbf16, #tpu.memory_space<vmem>>, vector<1x16x30xbf16>
    %90 = vector.shape_cast %89 : vector<1x16x30xbf16> to vector<16x30xbf16>
    %91 = vector.extract_strided_slice %84 {offsets = [0, 1], sizes = [30, 136], strides = [1, 1]} : vector<30x140xbf16> to vector<30x136xbf16>
    %cst_45 = arith.constant dense<0.000000e+00> : vector<16x136xf32>
    %92 = tpu.matmul %90, %91, %cst_45 {dimension_numbers = #tpu.dot_dimension_numbers<[1], [0], [0], [1], [0, 0, 1, 1], [], []>} : vector<16x30xbf16>, vector<30x136xbf16>, vector<16x136xf32> -> vector<16x136xf32>
    %c2_46 = arith.constant 2 : index
    %c0_47 = arith.constant 0 : index
    %c0_48 = arith.constant 0 : index
    %93 = vector.load %arg4[%c2_46, %c0_47, %c0_48] : memref<5x16x30xbf16, #tpu.memory_space<vmem>>, vector<1x16x30xbf16>
    %94 = vector.shape_cast %93 : vector<1x16x30xbf16> to vector<16x30xbf16>
    %95 = vector.extract_strided_slice %84 {offsets = [0, 2], sizes = [30, 136], strides = [1, 1]} : vector<30x140xbf16> to vector<30x136xbf16>
    %cst_49 = arith.constant dense<0.000000e+00> : vector<16x136xf32>
    %96 = tpu.matmul %94, %95, %cst_49 {dimension_numbers = #tpu.dot_dimension_numbers<[1], [0], [0], [1], [0, 0, 1, 1], [], []>} : vector<16x30xbf16>, vector<30x136xbf16>, vector<16x136xf32> -> vector<16x136xf32>
    %c3_50 = arith.constant 3 : index
    %c0_51 = arith.constant 0 : index
    %c0_52 = arith.constant 0 : index
    %97 = vector.load %arg4[%c3_50, %c0_51, %c0_52] : memref<5x16x30xbf16, #tpu.memory_space<vmem>>, vector<1x16x30xbf16>
    %98 = vector.shape_cast %97 : vector<1x16x30xbf16> to vector<16x30xbf16>
    %99 = vector.extract_strided_slice %84 {offsets = [0, 3], sizes = [30, 136], strides = [1, 1]} : vector<30x140xbf16> to vector<30x136xbf16>
    %cst_53 = arith.constant dense<0.000000e+00> : vector<16x136xf32>
    %100 = tpu.matmul %98, %99, %cst_53 {dimension_numbers = #tpu.dot_dimension_numbers<[1], [0], [0], [1], [0, 0, 1, 1], [], []>} : vector<16x30xbf16>, vector<30x136xbf16>, vector<16x136xf32> -> vector<16x136xf32>
    %c4_54 = arith.constant 4 : index
    %c0_55 = arith.constant 0 : index
    %c0_56 = arith.constant 0 : index
    %101 = vector.load %arg4[%c4_54, %c0_55, %c0_56] : memref<5x16x30xbf16, #tpu.memory_space<vmem>>, vector<1x16x30xbf16>
    %102 = vector.shape_cast %101 : vector<1x16x30xbf16> to vector<16x30xbf16>
    %103 = vector.extract_strided_slice %84 {offsets = [0, 4], sizes = [30, 136], strides = [1, 1]} : vector<30x140xbf16> to vector<30x136xbf16>
    %cst_57 = arith.constant dense<0.000000e+00> : vector<16x136xf32>
    %104 = tpu.matmul %102, %103, %cst_57 {dimension_numbers = #tpu.dot_dimension_numbers<[1], [0], [0], [1], [0, 0, 1, 1], [], []>} : vector<16x30xbf16>, vector<30x136xbf16>, vector<16x136xf32> -> vector<16x136xf32>
    %105 = arith.addf %88, %92 : vector<16x136xf32>
    %106 = arith.addf %96, %100 : vector<16x136xf32>
    %107 = arith.addf %105, %106 : vector<16x136xf32>
    %108 = arith.addf %107, %104 : vector<16x136xf32>
    %c0_58 = arith.constant 0 : index
    %c0_59 = arith.constant 0 : index
    %109 = vector.load %arg5[%c0_58, %c0_59] : memref<16x1xf32, #tpu.memory_space<vmem>>, vector<16x1xf32>
    %110 = vector.broadcast %109 : vector<16x1xf32> to vector<16x136xf32>
    %111 = arith.addf %108, %110 : vector<16x136xf32>
    %cst_60 = arith.constant 0.000000e+00 : f32
    %112 = vector.broadcast %cst_60 : f32 to vector<16x136xf32>
    %113 = arith.maximumf %111, %112 : vector<16x136xf32>
    %114 = vector.extract_strided_slice %113 {offsets = [0, 0], sizes = [16, 135], strides = [1, 1]} : vector<16x136xf32> to vector<16x135xf32>
    %115 = vector.extract_strided_slice %113 {offsets = [0, 1], sizes = [16, 135], strides = [1, 1]} : vector<16x136xf32> to vector<16x135xf32>
    %116 = arith.maximumf %114, %115 : vector<16x135xf32>
    %117 = vector.extract_strided_slice %116 {offsets = [0, 0], sizes = [16, 121], strides = [1, 1]} : vector<16x135xf32> to vector<16x121xf32>
    %118 = vector.extract_strided_slice %116 {offsets = [0, 14], sizes = [16, 121], strides = [1, 1]} : vector<16x135xf32> to vector<16x121xf32>
    %119 = arith.maximumf %117, %118 : vector<16x121xf32>
    %120 = arith.truncf %119 : vector<16x121xf32> to vector<16x121xbf16>
    %c1_61 = arith.constant 1 : index
    %c0_62 = arith.constant 0 : index
    %c0_63 = arith.constant 0 : index
    %121 = vector.load %arg13[%c1_61, %c0_62, %c0_63] : memref<8x16x121xbf16, #tpu.memory_space<vmem>>, vector<1x16x121xbf16>
    %122 = vector.shape_cast %121 : vector<1x16x121xbf16> to vector<16x121xbf16>
    %123 = vector.shape_cast %120 : vector<16x121xbf16> to vector<1x16x121xbf16>
    tpu.vector_store %arg13[%c1_61, %c0_62, %c0_63], %123 {strides = array<i32>} : memref<8x16x121xbf16, #tpu.memory_space<vmem>>, vector<1x16x121xbf16>,
    %c0_64 = arith.constant 0 : index
    %c0_65 = arith.constant 0 : index
    %124 = vector.load %arg2[%c0_64, %c0_65] : memref<6x75xbf16, #tpu.memory_space<vmem>>, vector<6x75xbf16>
    %c2_66 = arith.constant 2 : index
    %c0_67 = arith.constant 0 : index
    %c0_68 = arith.constant 0 : index
    %125 = vector.load %arg1[%c2_66, %c0_67, %c0_68] : memref<8x75x784xbf16, #tpu.memory_space<vmem>>, vector<1x75x784xbf16>
    %126 = vector.shape_cast %125 : vector<1x75x784xbf16> to vector<75x784xbf16>
    %cst_69 = arith.constant dense<0.000000e+00> : vector<6x784xf32>
    %127 = tpu.matmul %124, %126, %cst_69 {dimension_numbers = #tpu.dot_dimension_numbers<[1], [0], [0], [1], [0, 0, 1, 1], [], []>} : vector<6x75xbf16>, vector<75x784xbf16>, vector<6x784xf32> -> vector<6x784xf32>
    %c0_70 = arith.constant 0 : index
    %c0_71 = arith.constant 0 : index
    %128 = vector.load %arg3[%c0_70, %c0_71] : memref<6x1xf32, #tpu.memory_space<vmem>>, vector<6x1xf32>
    %129 = vector.broadcast %128 : vector<6x1xf32> to vector<6x784xf32>
    %130 = arith.addf %127, %129 : vector<6x784xf32>
    %cst_72 = arith.constant 0.000000e+00 : f32
    %131 = vector.broadcast %cst_72 : f32 to vector<6x784xf32>
    %132 = arith.maximumf %130, %131 : vector<6x784xf32>
    %133 = vector.extract_strided_slice %132 {offsets = [0, 0], sizes = [6, 196], strides = [1, 1]} : vector<6x784xf32> to vector<6x196xf32>
    %134 = vector.extract_strided_slice %132 {offsets = [0, 196], sizes = [6, 196], strides = [1, 1]} : vector<6x784xf32> to vector<6x196xf32>
    %135 = arith.maximumf %133, %134 : vector<6x196xf32>
    %136 = vector.extract_strided_slice %132 {offsets = [0, 392], sizes = [6, 196], strides = [1, 1]} : vector<6x784xf32> to vector<6x196xf32>
    %137 = vector.extract_strided_slice %132 {offsets = [0, 588], sizes = [6, 196], strides = [1, 1]} : vector<6x784xf32> to vector<6x196xf32>
    %138 = arith.maximumf %136, %137 : vector<6x196xf32>
    %139 = arith.maximumf %135, %138 : vector<6x196xf32>
    %140 = vector.extract_strided_slice %139 {offsets = [0, 0], sizes = [6, 140], strides = [1, 1]} : vector<6x196xf32> to vector<6x140xf32>
    %141 = vector.extract_strided_slice %139 {offsets = [0, 14], sizes = [6, 140], strides = [1, 1]} : vector<6x196xf32> to vector<6x140xf32>
    %142 = vector.extract_strided_slice %139 {offsets = [0, 28], sizes = [6, 140], strides = [1, 1]} : vector<6x196xf32> to vector<6x140xf32>
    %143 = vector.extract_strided_slice %139 {offsets = [0, 42], sizes = [6, 140], strides = [1, 1]} : vector<6x196xf32> to vector<6x140xf32>
    %144 = vector.extract_strided_slice %139 {offsets = [0, 56], sizes = [6, 140], strides = [1, 1]} : vector<6x196xf32> to vector<6x140xf32>
    %145 = tpu.concatenate %140, %141, %142, %143, %144 in 0 : vector<6x140xf32>, vector<6x140xf32>, vector<6x140xf32>, vector<6x140xf32>, vector<6x140xf32> -> vector<30x140xf32>
    %146 = arith.truncf %145 : vector<30x140xf32> to vector<30x140xbf16>
    %c0_73 = arith.constant 0 : index
    %c0_74 = arith.constant 0 : index
    %c0_75 = arith.constant 0 : index
    %147 = vector.load %arg4[%c0_73, %c0_74, %c0_75] : memref<5x16x30xbf16, #tpu.memory_space<vmem>>, vector<1x16x30xbf16>
    %148 = vector.shape_cast %147 : vector<1x16x30xbf16> to vector<16x30xbf16>
    %149 = vector.extract_strided_slice %146 {offsets = [0, 0], sizes = [30, 136], strides = [1, 1]} : vector<30x140xbf16> to vector<30x136xbf16>
    %cst_76 = arith.constant dense<0.000000e+00> : vector<16x136xf32>
    %150 = tpu.matmul %148, %149, %cst_76 {dimension_numbers = #tpu.dot_dimension_numbers<[1], [0], [0], [1], [0, 0, 1, 1], [], []>} : vector<16x30xbf16>, vector<30x136xbf16>, vector<16x136xf32> -> vector<16x136xf32>
    %c1_77 = arith.constant 1 : index
    %c0_78 = arith.constant 0 : index
    %c0_79 = arith.constant 0 : index
    %151 = vector.load %arg4[%c1_77, %c0_78, %c0_79] : memref<5x16x30xbf16, #tpu.memory_space<vmem>>, vector<1x16x30xbf16>
    %152 = vector.shape_cast %151 : vector<1x16x30xbf16> to vector<16x30xbf16>
    %153 = vector.extract_strided_slice %146 {offsets = [0, 1], sizes = [30, 136], strides = [1, 1]} : vector<30x140xbf16> to vector<30x136xbf16>
    %cst_80 = arith.constant dense<0.000000e+00> : vector<16x136xf32>
    %154 = tpu.matmul %152, %153, %cst_80 {dimension_numbers = #tpu.dot_dimension_numbers<[1], [0], [0], [1], [0, 0, 1, 1], [], []>} : vector<16x30xbf16>, vector<30x136xbf16>, vector<16x136xf32> -> vector<16x136xf32>
    %c2_81 = arith.constant 2 : index
    %c0_82 = arith.constant 0 : index
    %c0_83 = arith.constant 0 : index
    %155 = vector.load %arg4[%c2_81, %c0_82, %c0_83] : memref<5x16x30xbf16, #tpu.memory_space<vmem>>, vector<1x16x30xbf16>
    %156 = vector.shape_cast %155 : vector<1x16x30xbf16> to vector<16x30xbf16>
    %157 = vector.extract_strided_slice %146 {offsets = [0, 2], sizes = [30, 136], strides = [1, 1]} : vector<30x140xbf16> to vector<30x136xbf16>
    %cst_84 = arith.constant dense<0.000000e+00> : vector<16x136xf32>
    %158 = tpu.matmul %156, %157, %cst_84 {dimension_numbers = #tpu.dot_dimension_numbers<[1], [0], [0], [1], [0, 0, 1, 1], [], []>} : vector<16x30xbf16>, vector<30x136xbf16>, vector<16x136xf32> -> vector<16x136xf32>
    %c3_85 = arith.constant 3 : index
    %c0_86 = arith.constant 0 : index
    %c0_87 = arith.constant 0 : index
    %159 = vector.load %arg4[%c3_85, %c0_86, %c0_87] : memref<5x16x30xbf16, #tpu.memory_space<vmem>>, vector<1x16x30xbf16>
    %160 = vector.shape_cast %159 : vector<1x16x30xbf16> to vector<16x30xbf16>
    %161 = vector.extract_strided_slice %146 {offsets = [0, 3], sizes = [30, 136], strides = [1, 1]} : vector<30x140xbf16> to vector<30x136xbf16>
    %cst_88 = arith.constant dense<0.000000e+00> : vector<16x136xf32>
    %162 = tpu.matmul %160, %161, %cst_88 {dimension_numbers = #tpu.dot_dimension_numbers<[1], [0], [0], [1], [0, 0, 1, 1], [], []>} : vector<16x30xbf16>, vector<30x136xbf16>, vector<16x136xf32> -> vector<16x136xf32>
    %c4_89 = arith.constant 4 : index
    %c0_90 = arith.constant 0 : index
    %c0_91 = arith.constant 0 : index
    %163 = vector.load %arg4[%c4_89, %c0_90, %c0_91] : memref<5x16x30xbf16, #tpu.memory_space<vmem>>, vector<1x16x30xbf16>
    %164 = vector.shape_cast %163 : vector<1x16x30xbf16> to vector<16x30xbf16>
    %165 = vector.extract_strided_slice %146 {offsets = [0, 4], sizes = [30, 136], strides = [1, 1]} : vector<30x140xbf16> to vector<30x136xbf16>
    %cst_92 = arith.constant dense<0.000000e+00> : vector<16x136xf32>
    %166 = tpu.matmul %164, %165, %cst_92 {dimension_numbers = #tpu.dot_dimension_numbers<[1], [0], [0], [1], [0, 0, 1, 1], [], []>} : vector<16x30xbf16>, vector<30x136xbf16>, vector<16x136xf32> -> vector<16x136xf32>
    %167 = arith.addf %150, %154 : vector<16x136xf32>
    %168 = arith.addf %158, %162 : vector<16x136xf32>
    %169 = arith.addf %167, %168 : vector<16x136xf32>
    %170 = arith.addf %169, %166 : vector<16x136xf32>
    %c0_93 = arith.constant 0 : index
    %c0_94 = arith.constant 0 : index
    %171 = vector.load %arg5[%c0_93, %c0_94] : memref<16x1xf32, #tpu.memory_space<vmem>>, vector<16x1xf32>
    %172 = vector.broadcast %171 : vector<16x1xf32> to vector<16x136xf32>
    %173 = arith.addf %170, %172 : vector<16x136xf32>
    %cst_95 = arith.constant 0.000000e+00 : f32
    %174 = vector.broadcast %cst_95 : f32 to vector<16x136xf32>
    %175 = arith.maximumf %173, %174 : vector<16x136xf32>
    %176 = vector.extract_strided_slice %175 {offsets = [0, 0], sizes = [16, 135], strides = [1, 1]} : vector<16x136xf32> to vector<16x135xf32>
    %177 = vector.extract_strided_slice %175 {offsets = [0, 1], sizes = [16, 135], strides = [1, 1]} : vector<16x136xf32> to vector<16x135xf32>
    %178 = arith.maximumf %176, %177 : vector<16x135xf32>
    %179 = vector.extract_strided_slice %178 {offsets = [0, 0], sizes = [16, 121], strides = [1, 1]} : vector<16x135xf32> to vector<16x121xf32>
    %180 = vector.extract_strided_slice %178 {offsets = [0, 14], sizes = [16, 121], strides = [1, 1]} : vector<16x135xf32> to vector<16x121xf32>
    %181 = arith.maximumf %179, %180 : vector<16x121xf32>
    %182 = arith.truncf %181 : vector<16x121xf32> to vector<16x121xbf16>
    %c2_96 = arith.constant 2 : index
    %c0_97 = arith.constant 0 : index
    %c0_98 = arith.constant 0 : index
    %183 = vector.load %arg13[%c2_96, %c0_97, %c0_98] : memref<8x16x121xbf16, #tpu.memory_space<vmem>>, vector<1x16x121xbf16>
    %184 = vector.shape_cast %183 : vector<1x16x121xbf16> to vector<16x121xbf16>
    %185 = vector.shape_cast %182 : vector<16x121xbf16> to vector<1x16x121xbf16>
    tpu.vector_store %arg13[%c2_96, %c0_97, %c0_98], %185 {strides = array<i32>} : memref<8x16x121xbf16, #tpu.memory_space<vmem>>, vector<1x16x121xbf16>,
    %c0_99 = arith.constant 0 : index
    %c0_100 = arith.constant 0 : index
    %186 = vector.load %arg2[%c0_99, %c0_100] : memref<6x75xbf16, #tpu.memory_space<vmem>>, vector<6x75xbf16>
    %c3_101 = arith.constant 3 : index
    %c0_102 = arith.constant 0 : index
    %c0_103 = arith.constant 0 : index
    %187 = vector.load %arg1[%c3_101, %c0_102, %c0_103] : memref<8x75x784xbf16, #tpu.memory_space<vmem>>, vector<1x75x784xbf16>
    %188 = vector.shape_cast %187 : vector<1x75x784xbf16> to vector<75x784xbf16>
    %cst_104 = arith.constant dense<0.000000e+00> : vector<6x784xf32>
    %189 = tpu.matmul %186, %188, %cst_104 {dimension_numbers = #tpu.dot_dimension_numbers<[1], [0], [0], [1], [0, 0, 1, 1], [], []>} : vector<6x75xbf16>, vector<75x784xbf16>, vector<6x784xf32> -> vector<6x784xf32>
    %c0_105 = arith.constant 0 : index
    %c0_106 = arith.constant 0 : index
    %190 = vector.load %arg3[%c0_105, %c0_106] : memref<6x1xf32, #tpu.memory_space<vmem>>, vector<6x1xf32>
    %191 = vector.broadcast %190 : vector<6x1xf32> to vector<6x784xf32>
    %192 = arith.addf %189, %191 : vector<6x784xf32>
    %cst_107 = arith.constant 0.000000e+00 : f32
    %193 = vector.broadcast %cst_107 : f32 to vector<6x784xf32>
    %194 = arith.maximumf %192, %193 : vector<6x784xf32>
    %195 = vector.extract_strided_slice %194 {offsets = [0, 0], sizes = [6, 196], strides = [1, 1]} : vector<6x784xf32> to vector<6x196xf32>
    %196 = vector.extract_strided_slice %194 {offsets = [0, 196], sizes = [6, 196], strides = [1, 1]} : vector<6x784xf32> to vector<6x196xf32>
    %197 = arith.maximumf %195, %196 : vector<6x196xf32>
    %198 = vector.extract_strided_slice %194 {offsets = [0, 392], sizes = [6, 196], strides = [1, 1]} : vector<6x784xf32> to vector<6x196xf32>
    %199 = vector.extract_strided_slice %194 {offsets = [0, 588], sizes = [6, 196], strides = [1, 1]} : vector<6x784xf32> to vector<6x196xf32>
    %200 = arith.maximumf %198, %199 : vector<6x196xf32>
    %201 = arith.maximumf %197, %200 : vector<6x196xf32>
    %202 = vector.extract_strided_slice %201 {offsets = [0, 0], sizes = [6, 140], strides = [1, 1]} : vector<6x196xf32> to vector<6x140xf32>
    %203 = vector.extract_strided_slice %201 {offsets = [0, 14], sizes = [6, 140], strides = [1, 1]} : vector<6x196xf32> to vector<6x140xf32>
    %204 = vector.extract_strided_slice %201 {offsets = [0, 28], sizes = [6, 140], strides = [1, 1]} : vector<6x196xf32> to vector<6x140xf32>
    %205 = vector.extract_strided_slice %201 {offsets = [0, 42], sizes = [6, 140], strides = [1, 1]} : vector<6x196xf32> to vector<6x140xf32>
    %206 = vector.extract_strided_slice %201 {offsets = [0, 56], sizes = [6, 140], strides = [1, 1]} : vector<6x196xf32> to vector<6x140xf32>
    %207 = tpu.concatenate %202, %203, %204, %205, %206 in 0 : vector<6x140xf32>, vector<6x140xf32>, vector<6x140xf32>, vector<6x140xf32>, vector<6x140xf32> -> vector<30x140xf32>
    %208 = arith.truncf %207 : vector<30x140xf32> to vector<30x140xbf16>
    %c0_108 = arith.constant 0 : index
    %c0_109 = arith.constant 0 : index
    %c0_110 = arith.constant 0 : index
    %209 = vector.load %arg4[%c0_108, %c0_109, %c0_110] : memref<5x16x30xbf16, #tpu.memory_space<vmem>>, vector<1x16x30xbf16>
    %210 = vector.shape_cast %209 : vector<1x16x30xbf16> to vector<16x30xbf16>
    %211 = vector.extract_strided_slice %208 {offsets = [0, 0], sizes = [30, 136], strides = [1, 1]} : vector<30x140xbf16> to vector<30x136xbf16>
    %cst_111 = arith.constant dense<0.000000e+00> : vector<16x136xf32>
    %212 = tpu.matmul %210, %211, %cst_111 {dimension_numbers = #tpu.dot_dimension_numbers<[1], [0], [0], [1], [0, 0, 1, 1], [], []>} : vector<16x30xbf16>, vector<30x136xbf16>, vector<16x136xf32> -> vector<16x136xf32>
    %c1_112 = arith.constant 1 : index
    %c0_113 = arith.constant 0 : index
    %c0_114 = arith.constant 0 : index
    %213 = vector.load %arg4[%c1_112, %c0_113, %c0_114] : memref<5x16x30xbf16, #tpu.memory_space<vmem>>, vector<1x16x30xbf16>
    %214 = vector.shape_cast %213 : vector<1x16x30xbf16> to vector<16x30xbf16>
    %215 = vector.extract_strided_slice %208 {offsets = [0, 1], sizes = [30, 136], strides = [1, 1]} : vector<30x140xbf16> to vector<30x136xbf16>
    %cst_115 = arith.constant dense<0.000000e+00> : vector<16x136xf32>
    %216 = tpu.matmul %214, %215, %cst_115 {dimension_numbers = #tpu.dot_dimension_numbers<[1], [0], [0], [1], [0, 0, 1, 1], [], []>} : vector<16x30xbf16>, vector<30x136xbf16>, vector<16x136xf32> -> vector<16x136xf32>
    %c2_116 = arith.constant 2 : index
    %c0_117 = arith.constant 0 : index
    %c0_118 = arith.constant 0 : index
    %217 = vector.load %arg4[%c2_116, %c0_117, %c0_118] : memref<5x16x30xbf16, #tpu.memory_space<vmem>>, vector<1x16x30xbf16>
    %218 = vector.shape_cast %217 : vector<1x16x30xbf16> to vector<16x30xbf16>
    %219 = vector.extract_strided_slice %208 {offsets = [0, 2], sizes = [30, 136], strides = [1, 1]} : vector<30x140xbf16> to vector<30x136xbf16>
    %cst_119 = arith.constant dense<0.000000e+00> : vector<16x136xf32>
    %220 = tpu.matmul %218, %219, %cst_119 {dimension_numbers = #tpu.dot_dimension_numbers<[1], [0], [0], [1], [0, 0, 1, 1], [], []>} : vector<16x30xbf16>, vector<30x136xbf16>, vector<16x136xf32> -> vector<16x136xf32>
    %c3_120 = arith.constant 3 : index
    %c0_121 = arith.constant 0 : index
    %c0_122 = arith.constant 0 : index
    %221 = vector.load %arg4[%c3_120, %c0_121, %c0_122] : memref<5x16x30xbf16, #tpu.memory_space<vmem>>, vector<1x16x30xbf16>
    %222 = vector.shape_cast %221 : vector<1x16x30xbf16> to vector<16x30xbf16>
    %223 = vector.extract_strided_slice %208 {offsets = [0, 3], sizes = [30, 136], strides = [1, 1]} : vector<30x140xbf16> to vector<30x136xbf16>
    %cst_123 = arith.constant dense<0.000000e+00> : vector<16x136xf32>
    %224 = tpu.matmul %222, %223, %cst_123 {dimension_numbers = #tpu.dot_dimension_numbers<[1], [0], [0], [1], [0, 0, 1, 1], [], []>} : vector<16x30xbf16>, vector<30x136xbf16>, vector<16x136xf32> -> vector<16x136xf32>
    %c4_124 = arith.constant 4 : index
    %c0_125 = arith.constant 0 : index
    %c0_126 = arith.constant 0 : index
    %225 = vector.load %arg4[%c4_124, %c0_125, %c0_126] : memref<5x16x30xbf16, #tpu.memory_space<vmem>>, vector<1x16x30xbf16>
    %226 = vector.shape_cast %225 : vector<1x16x30xbf16> to vector<16x30xbf16>
    %227 = vector.extract_strided_slice %208 {offsets = [0, 4], sizes = [30, 136], strides = [1, 1]} : vector<30x140xbf16> to vector<30x136xbf16>
    %cst_127 = arith.constant dense<0.000000e+00> : vector<16x136xf32>
    %228 = tpu.matmul %226, %227, %cst_127 {dimension_numbers = #tpu.dot_dimension_numbers<[1], [0], [0], [1], [0, 0, 1, 1], [], []>} : vector<16x30xbf16>, vector<30x136xbf16>, vector<16x136xf32> -> vector<16x136xf32>
    %229 = arith.addf %212, %216 : vector<16x136xf32>
    %230 = arith.addf %220, %224 : vector<16x136xf32>
    %231 = arith.addf %229, %230 : vector<16x136xf32>
    %232 = arith.addf %231, %228 : vector<16x136xf32>
    %c0_128 = arith.constant 0 : index
    %c0_129 = arith.constant 0 : index
    %233 = vector.load %arg5[%c0_128, %c0_129] : memref<16x1xf32, #tpu.memory_space<vmem>>, vector<16x1xf32>
    %234 = vector.broadcast %233 : vector<16x1xf32> to vector<16x136xf32>
    %235 = arith.addf %232, %234 : vector<16x136xf32>
    %cst_130 = arith.constant 0.000000e+00 : f32
    %236 = vector.broadcast %cst_130 : f32 to vector<16x136xf32>
    %237 = arith.maximumf %235, %236 : vector<16x136xf32>
    %238 = vector.extract_strided_slice %237 {offsets = [0, 0], sizes = [16, 135], strides = [1, 1]} : vector<16x136xf32> to vector<16x135xf32>
    %239 = vector.extract_strided_slice %237 {offsets = [0, 1], sizes = [16, 135], strides = [1, 1]} : vector<16x136xf32> to vector<16x135xf32>
    %240 = arith.maximumf %238, %239 : vector<16x135xf32>
    %241 = vector.extract_strided_slice %240 {offsets = [0, 0], sizes = [16, 121], strides = [1, 1]} : vector<16x135xf32> to vector<16x121xf32>
    %242 = vector.extract_strided_slice %240 {offsets = [0, 14], sizes = [16, 121], strides = [1, 1]} : vector<16x135xf32> to vector<16x121xf32>
    %243 = arith.maximumf %241, %242 : vector<16x121xf32>
    %244 = arith.truncf %243 : vector<16x121xf32> to vector<16x121xbf16>
    %c3_131 = arith.constant 3 : index
    %c0_132 = arith.constant 0 : index
    %c0_133 = arith.constant 0 : index
    %245 = vector.load %arg13[%c3_131, %c0_132, %c0_133] : memref<8x16x121xbf16, #tpu.memory_space<vmem>>, vector<1x16x121xbf16>
    %246 = vector.shape_cast %245 : vector<1x16x121xbf16> to vector<16x121xbf16>
    %247 = vector.shape_cast %244 : vector<16x121xbf16> to vector<1x16x121xbf16>
    tpu.vector_store %arg13[%c3_131, %c0_132, %c0_133], %247 {strides = array<i32>} : memref<8x16x121xbf16, #tpu.memory_space<vmem>>, vector<1x16x121xbf16>,
    %c0_134 = arith.constant 0 : index
    %c0_135 = arith.constant 0 : index
    %248 = vector.load %arg2[%c0_134, %c0_135] : memref<6x75xbf16, #tpu.memory_space<vmem>>, vector<6x75xbf16>
    %c4_136 = arith.constant 4 : index
    %c0_137 = arith.constant 0 : index
    %c0_138 = arith.constant 0 : index
    %249 = vector.load %arg1[%c4_136, %c0_137, %c0_138] : memref<8x75x784xbf16, #tpu.memory_space<vmem>>, vector<1x75x784xbf16>
    %250 = vector.shape_cast %249 : vector<1x75x784xbf16> to vector<75x784xbf16>
    %cst_139 = arith.constant dense<0.000000e+00> : vector<6x784xf32>
    %251 = tpu.matmul %248, %250, %cst_139 {dimension_numbers = #tpu.dot_dimension_numbers<[1], [0], [0], [1], [0, 0, 1, 1], [], []>} : vector<6x75xbf16>, vector<75x784xbf16>, vector<6x784xf32> -> vector<6x784xf32>
    %c0_140 = arith.constant 0 : index
    %c0_141 = arith.constant 0 : index
    %252 = vector.load %arg3[%c0_140, %c0_141] : memref<6x1xf32, #tpu.memory_space<vmem>>, vector<6x1xf32>
    %253 = vector.broadcast %252 : vector<6x1xf32> to vector<6x784xf32>
    %254 = arith.addf %251, %253 : vector<6x784xf32>
    %cst_142 = arith.constant 0.000000e+00 : f32
    %255 = vector.broadcast %cst_142 : f32 to vector<6x784xf32>
    %256 = arith.maximumf %254, %255 : vector<6x784xf32>
    %257 = vector.extract_strided_slice %256 {offsets = [0, 0], sizes = [6, 196], strides = [1, 1]} : vector<6x784xf32> to vector<6x196xf32>
    %258 = vector.extract_strided_slice %256 {offsets = [0, 196], sizes = [6, 196], strides = [1, 1]} : vector<6x784xf32> to vector<6x196xf32>
    %259 = arith.maximumf %257, %258 : vector<6x196xf32>
    %260 = vector.extract_strided_slice %256 {offsets = [0, 392], sizes = [6, 196], strides = [1, 1]} : vector<6x784xf32> to vector<6x196xf32>
    %261 = vector.extract_strided_slice %256 {offsets = [0, 588], sizes = [6, 196], strides = [1, 1]} : vector<6x784xf32> to vector<6x196xf32>
    %262 = arith.maximumf %260, %261 : vector<6x196xf32>
    %263 = arith.maximumf %259, %262 : vector<6x196xf32>
    %264 = vector.extract_strided_slice %263 {offsets = [0, 0], sizes = [6, 140], strides = [1, 1]} : vector<6x196xf32> to vector<6x140xf32>
    %265 = vector.extract_strided_slice %263 {offsets = [0, 14], sizes = [6, 140], strides = [1, 1]} : vector<6x196xf32> to vector<6x140xf32>
    %266 = vector.extract_strided_slice %263 {offsets = [0, 28], sizes = [6, 140], strides = [1, 1]} : vector<6x196xf32> to vector<6x140xf32>
    %267 = vector.extract_strided_slice %263 {offsets = [0, 42], sizes = [6, 140], strides = [1, 1]} : vector<6x196xf32> to vector<6x140xf32>
    %268 = vector.extract_strided_slice %263 {offsets = [0, 56], sizes = [6, 140], strides = [1, 1]} : vector<6x196xf32> to vector<6x140xf32>
    %269 = tpu.concatenate %264, %265, %266, %267, %268 in 0 : vector<6x140xf32>, vector<6x140xf32>, vector<6x140xf32>, vector<6x140xf32>, vector<6x140xf32> -> vector<30x140xf32>
    %270 = arith.truncf %269 : vector<30x140xf32> to vector<30x140xbf16>
    %c0_143 = arith.constant 0 : index
    %c0_144 = arith.constant 0 : index
    %c0_145 = arith.constant 0 : index
    %271 = vector.load %arg4[%c0_143, %c0_144, %c0_145] : memref<5x16x30xbf16, #tpu.memory_space<vmem>>, vector<1x16x30xbf16>
    %272 = vector.shape_cast %271 : vector<1x16x30xbf16> to vector<16x30xbf16>
    %273 = vector.extract_strided_slice %270 {offsets = [0, 0], sizes = [30, 136], strides = [1, 1]} : vector<30x140xbf16> to vector<30x136xbf16>
    %cst_146 = arith.constant dense<0.000000e+00> : vector<16x136xf32>
    %274 = tpu.matmul %272, %273, %cst_146 {dimension_numbers = #tpu.dot_dimension_numbers<[1], [0], [0], [1], [0, 0, 1, 1], [], []>} : vector<16x30xbf16>, vector<30x136xbf16>, vector<16x136xf32> -> vector<16x136xf32>
    %c1_147 = arith.constant 1 : index
    %c0_148 = arith.constant 0 : index
    %c0_149 = arith.constant 0 : index
    %275 = vector.load %arg4[%c1_147, %c0_148, %c0_149] : memref<5x16x30xbf16, #tpu.memory_space<vmem>>, vector<1x16x30xbf16>
    %276 = vector.shape_cast %275 : vector<1x16x30xbf16> to vector<16x30xbf16>
    %277 = vector.extract_strided_slice %270 {offsets = [0, 1], sizes = [30, 136], strides = [1, 1]} : vector<30x140xbf16> to vector<30x136xbf16>
    %cst_150 = arith.constant dense<0.000000e+00> : vector<16x136xf32>
    %278 = tpu.matmul %276, %277, %cst_150 {dimension_numbers = #tpu.dot_dimension_numbers<[1], [0], [0], [1], [0, 0, 1, 1], [], []>} : vector<16x30xbf16>, vector<30x136xbf16>, vector<16x136xf32> -> vector<16x136xf32>
    %c2_151 = arith.constant 2 : index
    %c0_152 = arith.constant 0 : index
    %c0_153 = arith.constant 0 : index
    %279 = vector.load %arg4[%c2_151, %c0_152, %c0_153] : memref<5x16x30xbf16, #tpu.memory_space<vmem>>, vector<1x16x30xbf16>
    %280 = vector.shape_cast %279 : vector<1x16x30xbf16> to vector<16x30xbf16>
    %281 = vector.extract_strided_slice %270 {offsets = [0, 2], sizes = [30, 136], strides = [1, 1]} : vector<30x140xbf16> to vector<30x136xbf16>
    %cst_154 = arith.constant dense<0.000000e+00> : vector<16x136xf32>
    %282 = tpu.matmul %280, %281, %cst_154 {dimension_numbers = #tpu.dot_dimension_numbers<[1], [0], [0], [1], [0, 0, 1, 1], [], []>} : vector<16x30xbf16>, vector<30x136xbf16>, vector<16x136xf32> -> vector<16x136xf32>
    %c3_155 = arith.constant 3 : index
    %c0_156 = arith.constant 0 : index
    %c0_157 = arith.constant 0 : index
    %283 = vector.load %arg4[%c3_155, %c0_156, %c0_157] : memref<5x16x30xbf16, #tpu.memory_space<vmem>>, vector<1x16x30xbf16>
    %284 = vector.shape_cast %283 : vector<1x16x30xbf16> to vector<16x30xbf16>
    %285 = vector.extract_strided_slice %270 {offsets = [0, 3], sizes = [30, 136], strides = [1, 1]} : vector<30x140xbf16> to vector<30x136xbf16>
    %cst_158 = arith.constant dense<0.000000e+00> : vector<16x136xf32>
    %286 = tpu.matmul %284, %285, %cst_158 {dimension_numbers = #tpu.dot_dimension_numbers<[1], [0], [0], [1], [0, 0, 1, 1], [], []>} : vector<16x30xbf16>, vector<30x136xbf16>, vector<16x136xf32> -> vector<16x136xf32>
    %c4_159 = arith.constant 4 : index
    %c0_160 = arith.constant 0 : index
    %c0_161 = arith.constant 0 : index
    %287 = vector.load %arg4[%c4_159, %c0_160, %c0_161] : memref<5x16x30xbf16, #tpu.memory_space<vmem>>, vector<1x16x30xbf16>
    %288 = vector.shape_cast %287 : vector<1x16x30xbf16> to vector<16x30xbf16>
    %289 = vector.extract_strided_slice %270 {offsets = [0, 4], sizes = [30, 136], strides = [1, 1]} : vector<30x140xbf16> to vector<30x136xbf16>
    %cst_162 = arith.constant dense<0.000000e+00> : vector<16x136xf32>
    %290 = tpu.matmul %288, %289, %cst_162 {dimension_numbers = #tpu.dot_dimension_numbers<[1], [0], [0], [1], [0, 0, 1, 1], [], []>} : vector<16x30xbf16>, vector<30x136xbf16>, vector<16x136xf32> -> vector<16x136xf32>
    %291 = arith.addf %274, %278 : vector<16x136xf32>
    %292 = arith.addf %282, %286 : vector<16x136xf32>
    %293 = arith.addf %291, %292 : vector<16x136xf32>
    %294 = arith.addf %293, %290 : vector<16x136xf32>
    %c0_163 = arith.constant 0 : index
    %c0_164 = arith.constant 0 : index
    %295 = vector.load %arg5[%c0_163, %c0_164] : memref<16x1xf32, #tpu.memory_space<vmem>>, vector<16x1xf32>
    %296 = vector.broadcast %295 : vector<16x1xf32> to vector<16x136xf32>
    %297 = arith.addf %294, %296 : vector<16x136xf32>
    %cst_165 = arith.constant 0.000000e+00 : f32
    %298 = vector.broadcast %cst_165 : f32 to vector<16x136xf32>
    %299 = arith.maximumf %297, %298 : vector<16x136xf32>
    %300 = vector.extract_strided_slice %299 {offsets = [0, 0], sizes = [16, 135], strides = [1, 1]} : vector<16x136xf32> to vector<16x135xf32>
    %301 = vector.extract_strided_slice %299 {offsets = [0, 1], sizes = [16, 135], strides = [1, 1]} : vector<16x136xf32> to vector<16x135xf32>
    %302 = arith.maximumf %300, %301 : vector<16x135xf32>
    %303 = vector.extract_strided_slice %302 {offsets = [0, 0], sizes = [16, 121], strides = [1, 1]} : vector<16x135xf32> to vector<16x121xf32>
    %304 = vector.extract_strided_slice %302 {offsets = [0, 14], sizes = [16, 121], strides = [1, 1]} : vector<16x135xf32> to vector<16x121xf32>
    %305 = arith.maximumf %303, %304 : vector<16x121xf32>
    %306 = arith.truncf %305 : vector<16x121xf32> to vector<16x121xbf16>
    %c4_166 = arith.constant 4 : index
    %c0_167 = arith.constant 0 : index
    %c0_168 = arith.constant 0 : index
    %307 = vector.load %arg13[%c4_166, %c0_167, %c0_168] : memref<8x16x121xbf16, #tpu.memory_space<vmem>>, vector<1x16x121xbf16>
    %308 = vector.shape_cast %307 : vector<1x16x121xbf16> to vector<16x121xbf16>
    %309 = vector.shape_cast %306 : vector<16x121xbf16> to vector<1x16x121xbf16>
    tpu.vector_store %arg13[%c4_166, %c0_167, %c0_168], %309 {strides = array<i32>} : memref<8x16x121xbf16, #tpu.memory_space<vmem>>, vector<1x16x121xbf16>,
    %c0_169 = arith.constant 0 : index
    %c0_170 = arith.constant 0 : index
    %310 = vector.load %arg2[%c0_169, %c0_170] : memref<6x75xbf16, #tpu.memory_space<vmem>>, vector<6x75xbf16>
    %c5 = arith.constant 5 : index
    %c0_171 = arith.constant 0 : index
    %c0_172 = arith.constant 0 : index
    %311 = vector.load %arg1[%c5, %c0_171, %c0_172] : memref<8x75x784xbf16, #tpu.memory_space<vmem>>, vector<1x75x784xbf16>
    %312 = vector.shape_cast %311 : vector<1x75x784xbf16> to vector<75x784xbf16>
    %cst_173 = arith.constant dense<0.000000e+00> : vector<6x784xf32>
    %313 = tpu.matmul %310, %312, %cst_173 {dimension_numbers = #tpu.dot_dimension_numbers<[1], [0], [0], [1], [0, 0, 1, 1], [], []>} : vector<6x75xbf16>, vector<75x784xbf16>, vector<6x784xf32> -> vector<6x784xf32>
    %c0_174 = arith.constant 0 : index
    %c0_175 = arith.constant 0 : index
    %314 = vector.load %arg3[%c0_174, %c0_175] : memref<6x1xf32, #tpu.memory_space<vmem>>, vector<6x1xf32>
    %315 = vector.broadcast %314 : vector<6x1xf32> to vector<6x784xf32>
    %316 = arith.addf %313, %315 : vector<6x784xf32>
    %cst_176 = arith.constant 0.000000e+00 : f32
    %317 = vector.broadcast %cst_176 : f32 to vector<6x784xf32>
    %318 = arith.maximumf %316, %317 : vector<6x784xf32>
    %319 = vector.extract_strided_slice %318 {offsets = [0, 0], sizes = [6, 196], strides = [1, 1]} : vector<6x784xf32> to vector<6x196xf32>
    %320 = vector.extract_strided_slice %318 {offsets = [0, 196], sizes = [6, 196], strides = [1, 1]} : vector<6x784xf32> to vector<6x196xf32>
    %321 = arith.maximumf %319, %320 : vector<6x196xf32>
    %322 = vector.extract_strided_slice %318 {offsets = [0, 392], sizes = [6, 196], strides = [1, 1]} : vector<6x784xf32> to vector<6x196xf32>
    %323 = vector.extract_strided_slice %318 {offsets = [0, 588], sizes = [6, 196], strides = [1, 1]} : vector<6x784xf32> to vector<6x196xf32>
    %324 = arith.maximumf %322, %323 : vector<6x196xf32>
    %325 = arith.maximumf %321, %324 : vector<6x196xf32>
    %326 = vector.extract_strided_slice %325 {offsets = [0, 0], sizes = [6, 140], strides = [1, 1]} : vector<6x196xf32> to vector<6x140xf32>
    %327 = vector.extract_strided_slice %325 {offsets = [0, 14], sizes = [6, 140], strides = [1, 1]} : vector<6x196xf32> to vector<6x140xf32>
    %328 = vector.extract_strided_slice %325 {offsets = [0, 28], sizes = [6, 140], strides = [1, 1]} : vector<6x196xf32> to vector<6x140xf32>
    %329 = vector.extract_strided_slice %325 {offsets = [0, 42], sizes = [6, 140], strides = [1, 1]} : vector<6x196xf32> to vector<6x140xf32>
    %330 = vector.extract_strided_slice %325 {offsets = [0, 56], sizes = [6, 140], strides = [1, 1]} : vector<6x196xf32> to vector<6x140xf32>
    %331 = tpu.concatenate %326, %327, %328, %329, %330 in 0 : vector<6x140xf32>, vector<6x140xf32>, vector<6x140xf32>, vector<6x140xf32>, vector<6x140xf32> -> vector<30x140xf32>
    %332 = arith.truncf %331 : vector<30x140xf32> to vector<30x140xbf16>
    %c0_177 = arith.constant 0 : index
    %c0_178 = arith.constant 0 : index
    %c0_179 = arith.constant 0 : index
    %333 = vector.load %arg4[%c0_177, %c0_178, %c0_179] : memref<5x16x30xbf16, #tpu.memory_space<vmem>>, vector<1x16x30xbf16>
    %334 = vector.shape_cast %333 : vector<1x16x30xbf16> to vector<16x30xbf16>
    %335 = vector.extract_strided_slice %332 {offsets = [0, 0], sizes = [30, 136], strides = [1, 1]} : vector<30x140xbf16> to vector<30x136xbf16>
    %cst_180 = arith.constant dense<0.000000e+00> : vector<16x136xf32>
    %336 = tpu.matmul %334, %335, %cst_180 {dimension_numbers = #tpu.dot_dimension_numbers<[1], [0], [0], [1], [0, 0, 1, 1], [], []>} : vector<16x30xbf16>, vector<30x136xbf16>, vector<16x136xf32> -> vector<16x136xf32>
    %c1_181 = arith.constant 1 : index
    %c0_182 = arith.constant 0 : index
    %c0_183 = arith.constant 0 : index
    %337 = vector.load %arg4[%c1_181, %c0_182, %c0_183] : memref<5x16x30xbf16, #tpu.memory_space<vmem>>, vector<1x16x30xbf16>
    %338 = vector.shape_cast %337 : vector<1x16x30xbf16> to vector<16x30xbf16>
    %339 = vector.extract_strided_slice %332 {offsets = [0, 1], sizes = [30, 136], strides = [1, 1]} : vector<30x140xbf16> to vector<30x136xbf16>
    %cst_184 = arith.constant dense<0.000000e+00> : vector<16x136xf32>
    %340 = tpu.matmul %338, %339, %cst_184 {dimension_numbers = #tpu.dot_dimension_numbers<[1], [0], [0], [1], [0, 0, 1, 1], [], []>} : vector<16x30xbf16>, vector<30x136xbf16>, vector<16x136xf32> -> vector<16x136xf32>
    %c2_185 = arith.constant 2 : index
    %c0_186 = arith.constant 0 : index
    %c0_187 = arith.constant 0 : index
    %341 = vector.load %arg4[%c2_185, %c0_186, %c0_187] : memref<5x16x30xbf16, #tpu.memory_space<vmem>>, vector<1x16x30xbf16>
    %342 = vector.shape_cast %341 : vector<1x16x30xbf16> to vector<16x30xbf16>
    %343 = vector.extract_strided_slice %332 {offsets = [0, 2], sizes = [30, 136], strides = [1, 1]} : vector<30x140xbf16> to vector<30x136xbf16>
    %cst_188 = arith.constant dense<0.000000e+00> : vector<16x136xf32>
    %344 = tpu.matmul %342, %343, %cst_188 {dimension_numbers = #tpu.dot_dimension_numbers<[1], [0], [0], [1], [0, 0, 1, 1], [], []>} : vector<16x30xbf16>, vector<30x136xbf16>, vector<16x136xf32> -> vector<16x136xf32>
    %c3_189 = arith.constant 3 : index
    %c0_190 = arith.constant 0 : index
    %c0_191 = arith.constant 0 : index
    %345 = vector.load %arg4[%c3_189, %c0_190, %c0_191] : memref<5x16x30xbf16, #tpu.memory_space<vmem>>, vector<1x16x30xbf16>
    %346 = vector.shape_cast %345 : vector<1x16x30xbf16> to vector<16x30xbf16>
    %347 = vector.extract_strided_slice %332 {offsets = [0, 3], sizes = [30, 136], strides = [1, 1]} : vector<30x140xbf16> to vector<30x136xbf16>
    %cst_192 = arith.constant dense<0.000000e+00> : vector<16x136xf32>
    %348 = tpu.matmul %346, %347, %cst_192 {dimension_numbers = #tpu.dot_dimension_numbers<[1], [0], [0], [1], [0, 0, 1, 1], [], []>} : vector<16x30xbf16>, vector<30x136xbf16>, vector<16x136xf32> -> vector<16x136xf32>
    %c4_193 = arith.constant 4 : index
    %c0_194 = arith.constant 0 : index
    %c0_195 = arith.constant 0 : index
    %349 = vector.load %arg4[%c4_193, %c0_194, %c0_195] : memref<5x16x30xbf16, #tpu.memory_space<vmem>>, vector<1x16x30xbf16>
    %350 = vector.shape_cast %349 : vector<1x16x30xbf16> to vector<16x30xbf16>
    %351 = vector.extract_strided_slice %332 {offsets = [0, 4], sizes = [30, 136], strides = [1, 1]} : vector<30x140xbf16> to vector<30x136xbf16>
    %cst_196 = arith.constant dense<0.000000e+00> : vector<16x136xf32>
    %352 = tpu.matmul %350, %351, %cst_196 {dimension_numbers = #tpu.dot_dimension_numbers<[1], [0], [0], [1], [0, 0, 1, 1], [], []>} : vector<16x30xbf16>, vector<30x136xbf16>, vector<16x136xf32> -> vector<16x136xf32>
    %353 = arith.addf %336, %340 : vector<16x136xf32>
    %354 = arith.addf %344, %348 : vector<16x136xf32>
    %355 = arith.addf %353, %354 : vector<16x136xf32>
    %356 = arith.addf %355, %352 : vector<16x136xf32>
    %c0_197 = arith.constant 0 : index
    %c0_198 = arith.constant 0 : index
    %357 = vector.load %arg5[%c0_197, %c0_198] : memref<16x1xf32, #tpu.memory_space<vmem>>, vector<16x1xf32>
    %358 = vector.broadcast %357 : vector<16x1xf32> to vector<16x136xf32>
    %359 = arith.addf %356, %358 : vector<16x136xf32>
    %cst_199 = arith.constant 0.000000e+00 : f32
    %360 = vector.broadcast %cst_199 : f32 to vector<16x136xf32>
    %361 = arith.maximumf %359, %360 : vector<16x136xf32>
    %362 = vector.extract_strided_slice %361 {offsets = [0, 0], sizes = [16, 135], strides = [1, 1]} : vector<16x136xf32> to vector<16x135xf32>
    %363 = vector.extract_strided_slice %361 {offsets = [0, 1], sizes = [16, 135], strides = [1, 1]} : vector<16x136xf32> to vector<16x135xf32>
    %364 = arith.maximumf %362, %363 : vector<16x135xf32>
    %365 = vector.extract_strided_slice %364 {offsets = [0, 0], sizes = [16, 121], strides = [1, 1]} : vector<16x135xf32> to vector<16x121xf32>
    %366 = vector.extract_strided_slice %364 {offsets = [0, 14], sizes = [16, 121], strides = [1, 1]} : vector<16x135xf32> to vector<16x121xf32>
    %367 = arith.maximumf %365, %366 : vector<16x121xf32>
    %368 = arith.truncf %367 : vector<16x121xf32> to vector<16x121xbf16>
    %c5_200 = arith.constant 5 : index
    %c0_201 = arith.constant 0 : index
    %c0_202 = arith.constant 0 : index
    %369 = vector.load %arg13[%c5_200, %c0_201, %c0_202] : memref<8x16x121xbf16, #tpu.memory_space<vmem>>, vector<1x16x121xbf16>
    %370 = vector.shape_cast %369 : vector<1x16x121xbf16> to vector<16x121xbf16>
    %371 = vector.shape_cast %368 : vector<16x121xbf16> to vector<1x16x121xbf16>
    tpu.vector_store %arg13[%c5_200, %c0_201, %c0_202], %371 {strides = array<i32>} : memref<8x16x121xbf16, #tpu.memory_space<vmem>>, vector<1x16x121xbf16>,
    %c0_203 = arith.constant 0 : index
    %c0_204 = arith.constant 0 : index
    %372 = vector.load %arg2[%c0_203, %c0_204] : memref<6x75xbf16, #tpu.memory_space<vmem>>, vector<6x75xbf16>
    %c6 = arith.constant 6 : index
    %c0_205 = arith.constant 0 : index
    %c0_206 = arith.constant 0 : index
    %373 = vector.load %arg1[%c6, %c0_205, %c0_206] : memref<8x75x784xbf16, #tpu.memory_space<vmem>>, vector<1x75x784xbf16>
    %374 = vector.shape_cast %373 : vector<1x75x784xbf16> to vector<75x784xbf16>
    %cst_207 = arith.constant dense<0.000000e+00> : vector<6x784xf32>
    %375 = tpu.matmul %372, %374, %cst_207 {dimension_numbers = #tpu.dot_dimension_numbers<[1], [0], [0], [1], [0, 0, 1, 1], [], []>} : vector<6x75xbf16>, vector<75x784xbf16>, vector<6x784xf32> -> vector<6x784xf32>
    %c0_208 = arith.constant 0 : index
    %c0_209 = arith.constant 0 : index
    %376 = vector.load %arg3[%c0_208, %c0_209] : memref<6x1xf32, #tpu.memory_space<vmem>>, vector<6x1xf32>
    %377 = vector.broadcast %376 : vector<6x1xf32> to vector<6x784xf32>
    %378 = arith.addf %375, %377 : vector<6x784xf32>
    %cst_210 = arith.constant 0.000000e+00 : f32
    %379 = vector.broadcast %cst_210 : f32 to vector<6x784xf32>
    %380 = arith.maximumf %378, %379 : vector<6x784xf32>
    %381 = vector.extract_strided_slice %380 {offsets = [0, 0], sizes = [6, 196], strides = [1, 1]} : vector<6x784xf32> to vector<6x196xf32>
    %382 = vector.extract_strided_slice %380 {offsets = [0, 196], sizes = [6, 196], strides = [1, 1]} : vector<6x784xf32> to vector<6x196xf32>
    %383 = arith.maximumf %381, %382 : vector<6x196xf32>
    %384 = vector.extract_strided_slice %380 {offsets = [0, 392], sizes = [6, 196], strides = [1, 1]} : vector<6x784xf32> to vector<6x196xf32>
    %385 = vector.extract_strided_slice %380 {offsets = [0, 588], sizes = [6, 196], strides = [1, 1]} : vector<6x784xf32> to vector<6x196xf32>
    %386 = arith.maximumf %384, %385 : vector<6x196xf32>
    %387 = arith.maximumf %383, %386 : vector<6x196xf32>
    %388 = vector.extract_strided_slice %387 {offsets = [0, 0], sizes = [6, 140], strides = [1, 1]} : vector<6x196xf32> to vector<6x140xf32>
    %389 = vector.extract_strided_slice %387 {offsets = [0, 14], sizes = [6, 140], strides = [1, 1]} : vector<6x196xf32> to vector<6x140xf32>
    %390 = vector.extract_strided_slice %387 {offsets = [0, 28], sizes = [6, 140], strides = [1, 1]} : vector<6x196xf32> to vector<6x140xf32>
    %391 = vector.extract_strided_slice %387 {offsets = [0, 42], sizes = [6, 140], strides = [1, 1]} : vector<6x196xf32> to vector<6x140xf32>
    %392 = vector.extract_strided_slice %387 {offsets = [0, 56], sizes = [6, 140], strides = [1, 1]} : vector<6x196xf32> to vector<6x140xf32>
    %393 = tpu.concatenate %388, %389, %390, %391, %392 in 0 : vector<6x140xf32>, vector<6x140xf32>, vector<6x140xf32>, vector<6x140xf32>, vector<6x140xf32> -> vector<30x140xf32>
    %394 = arith.truncf %393 : vector<30x140xf32> to vector<30x140xbf16>
    %c0_211 = arith.constant 0 : index
    %c0_212 = arith.constant 0 : index
    %c0_213 = arith.constant 0 : index
    %395 = vector.load %arg4[%c0_211, %c0_212, %c0_213] : memref<5x16x30xbf16, #tpu.memory_space<vmem>>, vector<1x16x30xbf16>
    %396 = vector.shape_cast %395 : vector<1x16x30xbf16> to vector<16x30xbf16>
    %397 = vector.extract_strided_slice %394 {offsets = [0, 0], sizes = [30, 136], strides = [1, 1]} : vector<30x140xbf16> to vector<30x136xbf16>
    %cst_214 = arith.constant dense<0.000000e+00> : vector<16x136xf32>
    %398 = tpu.matmul %396, %397, %cst_214 {dimension_numbers = #tpu.dot_dimension_numbers<[1], [0], [0], [1], [0, 0, 1, 1], [], []>} : vector<16x30xbf16>, vector<30x136xbf16>, vector<16x136xf32> -> vector<16x136xf32>
    %c1_215 = arith.constant 1 : index
    %c0_216 = arith.constant 0 : index
    %c0_217 = arith.constant 0 : index
    %399 = vector.load %arg4[%c1_215, %c0_216, %c0_217] : memref<5x16x30xbf16, #tpu.memory_space<vmem>>, vector<1x16x30xbf16>
    %400 = vector.shape_cast %399 : vector<1x16x30xbf16> to vector<16x30xbf16>
    %401 = vector.extract_strided_slice %394 {offsets = [0, 1], sizes = [30, 136], strides = [1, 1]} : vector<30x140xbf16> to vector<30x136xbf16>
    %cst_218 = arith.constant dense<0.000000e+00> : vector<16x136xf32>
    %402 = tpu.matmul %400, %401, %cst_218 {dimension_numbers = #tpu.dot_dimension_numbers<[1], [0], [0], [1], [0, 0, 1, 1], [], []>} : vector<16x30xbf16>, vector<30x136xbf16>, vector<16x136xf32> -> vector<16x136xf32>
    %c2_219 = arith.constant 2 : index
    %c0_220 = arith.constant 0 : index
    %c0_221 = arith.constant 0 : index
    %403 = vector.load %arg4[%c2_219, %c0_220, %c0_221] : memref<5x16x30xbf16, #tpu.memory_space<vmem>>, vector<1x16x30xbf16>
    %404 = vector.shape_cast %403 : vector<1x16x30xbf16> to vector<16x30xbf16>
    %405 = vector.extract_strided_slice %394 {offsets = [0, 2], sizes = [30, 136], strides = [1, 1]} : vector<30x140xbf16> to vector<30x136xbf16>
    %cst_222 = arith.constant dense<0.000000e+00> : vector<16x136xf32>
    %406 = tpu.matmul %404, %405, %cst_222 {dimension_numbers = #tpu.dot_dimension_numbers<[1], [0], [0], [1], [0, 0, 1, 1], [], []>} : vector<16x30xbf16>, vector<30x136xbf16>, vector<16x136xf32> -> vector<16x136xf32>
    %c3_223 = arith.constant 3 : index
    %c0_224 = arith.constant 0 : index
    %c0_225 = arith.constant 0 : index
    %407 = vector.load %arg4[%c3_223, %c0_224, %c0_225] : memref<5x16x30xbf16, #tpu.memory_space<vmem>>, vector<1x16x30xbf16>
    %408 = vector.shape_cast %407 : vector<1x16x30xbf16> to vector<16x30xbf16>
    %409 = vector.extract_strided_slice %394 {offsets = [0, 3], sizes = [30, 136], strides = [1, 1]} : vector<30x140xbf16> to vector<30x136xbf16>
    %cst_226 = arith.constant dense<0.000000e+00> : vector<16x136xf32>
    %410 = tpu.matmul %408, %409, %cst_226 {dimension_numbers = #tpu.dot_dimension_numbers<[1], [0], [0], [1], [0, 0, 1, 1], [], []>} : vector<16x30xbf16>, vector<30x136xbf16>, vector<16x136xf32> -> vector<16x136xf32>
    %c4_227 = arith.constant 4 : index
    %c0_228 = arith.constant 0 : index
    %c0_229 = arith.constant 0 : index
    %411 = vector.load %arg4[%c4_227, %c0_228, %c0_229] : memref<5x16x30xbf16, #tpu.memory_space<vmem>>, vector<1x16x30xbf16>
    %412 = vector.shape_cast %411 : vector<1x16x30xbf16> to vector<16x30xbf16>
    %413 = vector.extract_strided_slice %394 {offsets = [0, 4], sizes = [30, 136], strides = [1, 1]} : vector<30x140xbf16> to vector<30x136xbf16>
    %cst_230 = arith.constant dense<0.000000e+00> : vector<16x136xf32>
    %414 = tpu.matmul %412, %413, %cst_230 {dimension_numbers = #tpu.dot_dimension_numbers<[1], [0], [0], [1], [0, 0, 1, 1], [], []>} : vector<16x30xbf16>, vector<30x136xbf16>, vector<16x136xf32> -> vector<16x136xf32>
    %415 = arith.addf %398, %402 : vector<16x136xf32>
    %416 = arith.addf %406, %410 : vector<16x136xf32>
    %417 = arith.addf %415, %416 : vector<16x136xf32>
    %418 = arith.addf %417, %414 : vector<16x136xf32>
    %c0_231 = arith.constant 0 : index
    %c0_232 = arith.constant 0 : index
    %419 = vector.load %arg5[%c0_231, %c0_232] : memref<16x1xf32, #tpu.memory_space<vmem>>, vector<16x1xf32>
    %420 = vector.broadcast %419 : vector<16x1xf32> to vector<16x136xf32>
    %421 = arith.addf %418, %420 : vector<16x136xf32>
    %cst_233 = arith.constant 0.000000e+00 : f32
    %422 = vector.broadcast %cst_233 : f32 to vector<16x136xf32>
    %423 = arith.maximumf %421, %422 : vector<16x136xf32>
    %424 = vector.extract_strided_slice %423 {offsets = [0, 0], sizes = [16, 135], strides = [1, 1]} : vector<16x136xf32> to vector<16x135xf32>
    %425 = vector.extract_strided_slice %423 {offsets = [0, 1], sizes = [16, 135], strides = [1, 1]} : vector<16x136xf32> to vector<16x135xf32>
    %426 = arith.maximumf %424, %425 : vector<16x135xf32>
    %427 = vector.extract_strided_slice %426 {offsets = [0, 0], sizes = [16, 121], strides = [1, 1]} : vector<16x135xf32> to vector<16x121xf32>
    %428 = vector.extract_strided_slice %426 {offsets = [0, 14], sizes = [16, 121], strides = [1, 1]} : vector<16x135xf32> to vector<16x121xf32>
    %429 = arith.maximumf %427, %428 : vector<16x121xf32>
    %430 = arith.truncf %429 : vector<16x121xf32> to vector<16x121xbf16>
    %c6_234 = arith.constant 6 : index
    %c0_235 = arith.constant 0 : index
    %c0_236 = arith.constant 0 : index
    %431 = vector.load %arg13[%c6_234, %c0_235, %c0_236] : memref<8x16x121xbf16, #tpu.memory_space<vmem>>, vector<1x16x121xbf16>
    %432 = vector.shape_cast %431 : vector<1x16x121xbf16> to vector<16x121xbf16>
    %433 = vector.shape_cast %430 : vector<16x121xbf16> to vector<1x16x121xbf16>
    tpu.vector_store %arg13[%c6_234, %c0_235, %c0_236], %433 {strides = array<i32>} : memref<8x16x121xbf16, #tpu.memory_space<vmem>>, vector<1x16x121xbf16>,
    %c0_237 = arith.constant 0 : index
    %c0_238 = arith.constant 0 : index
    %434 = vector.load %arg2[%c0_237, %c0_238] : memref<6x75xbf16, #tpu.memory_space<vmem>>, vector<6x75xbf16>
    %c7 = arith.constant 7 : index
    %c0_239 = arith.constant 0 : index
    %c0_240 = arith.constant 0 : index
    %435 = vector.load %arg1[%c7, %c0_239, %c0_240] : memref<8x75x784xbf16, #tpu.memory_space<vmem>>, vector<1x75x784xbf16>
    %436 = vector.shape_cast %435 : vector<1x75x784xbf16> to vector<75x784xbf16>
    %cst_241 = arith.constant dense<0.000000e+00> : vector<6x784xf32>
    %437 = tpu.matmul %434, %436, %cst_241 {dimension_numbers = #tpu.dot_dimension_numbers<[1], [0], [0], [1], [0, 0, 1, 1], [], []>} : vector<6x75xbf16>, vector<75x784xbf16>, vector<6x784xf32> -> vector<6x784xf32>
    %c0_242 = arith.constant 0 : index
    %c0_243 = arith.constant 0 : index
    %438 = vector.load %arg3[%c0_242, %c0_243] : memref<6x1xf32, #tpu.memory_space<vmem>>, vector<6x1xf32>
    %439 = vector.broadcast %438 : vector<6x1xf32> to vector<6x784xf32>
    %440 = arith.addf %437, %439 : vector<6x784xf32>
    %cst_244 = arith.constant 0.000000e+00 : f32
    %441 = vector.broadcast %cst_244 : f32 to vector<6x784xf32>
    %442 = arith.maximumf %440, %441 : vector<6x784xf32>
    %443 = vector.extract_strided_slice %442 {offsets = [0, 0], sizes = [6, 196], strides = [1, 1]} : vector<6x784xf32> to vector<6x196xf32>
    %444 = vector.extract_strided_slice %442 {offsets = [0, 196], sizes = [6, 196], strides = [1, 1]} : vector<6x784xf32> to vector<6x196xf32>
    %445 = arith.maximumf %443, %444 : vector<6x196xf32>
    %446 = vector.extract_strided_slice %442 {offsets = [0, 392], sizes = [6, 196], strides = [1, 1]} : vector<6x784xf32> to vector<6x196xf32>
    %447 = vector.extract_strided_slice %442 {offsets = [0, 588], sizes = [6, 196], strides = [1, 1]} : vector<6x784xf32> to vector<6x196xf32>
    %448 = arith.maximumf %446, %447 : vector<6x196xf32>
    %449 = arith.maximumf %445, %448 : vector<6x196xf32>
    %450 = vector.extract_strided_slice %449 {offsets = [0, 0], sizes = [6, 140], strides = [1, 1]} : vector<6x196xf32> to vector<6x140xf32>
    %451 = vector.extract_strided_slice %449 {offsets = [0, 14], sizes = [6, 140], strides = [1, 1]} : vector<6x196xf32> to vector<6x140xf32>
    %452 = vector.extract_strided_slice %449 {offsets = [0, 28], sizes = [6, 140], strides = [1, 1]} : vector<6x196xf32> to vector<6x140xf32>
    %453 = vector.extract_strided_slice %449 {offsets = [0, 42], sizes = [6, 140], strides = [1, 1]} : vector<6x196xf32> to vector<6x140xf32>
    %454 = vector.extract_strided_slice %449 {offsets = [0, 56], sizes = [6, 140], strides = [1, 1]} : vector<6x196xf32> to vector<6x140xf32>
    %455 = tpu.concatenate %450, %451, %452, %453, %454 in 0 : vector<6x140xf32>, vector<6x140xf32>, vector<6x140xf32>, vector<6x140xf32>, vector<6x140xf32> -> vector<30x140xf32>
    %456 = arith.truncf %455 : vector<30x140xf32> to vector<30x140xbf16>
    %c0_245 = arith.constant 0 : index
    %c0_246 = arith.constant 0 : index
    %c0_247 = arith.constant 0 : index
    %457 = vector.load %arg4[%c0_245, %c0_246, %c0_247] : memref<5x16x30xbf16, #tpu.memory_space<vmem>>, vector<1x16x30xbf16>
    %458 = vector.shape_cast %457 : vector<1x16x30xbf16> to vector<16x30xbf16>
    %459 = vector.extract_strided_slice %456 {offsets = [0, 0], sizes = [30, 136], strides = [1, 1]} : vector<30x140xbf16> to vector<30x136xbf16>
    %cst_248 = arith.constant dense<0.000000e+00> : vector<16x136xf32>
    %460 = tpu.matmul %458, %459, %cst_248 {dimension_numbers = #tpu.dot_dimension_numbers<[1], [0], [0], [1], [0, 0, 1, 1], [], []>} : vector<16x30xbf16>, vector<30x136xbf16>, vector<16x136xf32> -> vector<16x136xf32>
    %c1_249 = arith.constant 1 : index
    %c0_250 = arith.constant 0 : index
    %c0_251 = arith.constant 0 : index
    %461 = vector.load %arg4[%c1_249, %c0_250, %c0_251] : memref<5x16x30xbf16, #tpu.memory_space<vmem>>, vector<1x16x30xbf16>
    %462 = vector.shape_cast %461 : vector<1x16x30xbf16> to vector<16x30xbf16>
    %463 = vector.extract_strided_slice %456 {offsets = [0, 1], sizes = [30, 136], strides = [1, 1]} : vector<30x140xbf16> to vector<30x136xbf16>
    %cst_252 = arith.constant dense<0.000000e+00> : vector<16x136xf32>
    %464 = tpu.matmul %462, %463, %cst_252 {dimension_numbers = #tpu.dot_dimension_numbers<[1], [0], [0], [1], [0, 0, 1, 1], [], []>} : vector<16x30xbf16>, vector<30x136xbf16>, vector<16x136xf32> -> vector<16x136xf32>
    %c2_253 = arith.constant 2 : index
    %c0_254 = arith.constant 0 : index
    %c0_255 = arith.constant 0 : index
    %465 = vector.load %arg4[%c2_253, %c0_254, %c0_255] : memref<5x16x30xbf16, #tpu.memory_space<vmem>>, vector<1x16x30xbf16>
    %466 = vector.shape_cast %465 : vector<1x16x30xbf16> to vector<16x30xbf16>
    %467 = vector.extract_strided_slice %456 {offsets = [0, 2], sizes = [30, 136], strides = [1, 1]} : vector<30x140xbf16> to vector<30x136xbf16>
    %cst_256 = arith.constant dense<0.000000e+00> : vector<16x136xf32>
    %468 = tpu.matmul %466, %467, %cst_256 {dimension_numbers = #tpu.dot_dimension_numbers<[1], [0], [0], [1], [0, 0, 1, 1], [], []>} : vector<16x30xbf16>, vector<30x136xbf16>, vector<16x136xf32> -> vector<16x136xf32>
    %c3_257 = arith.constant 3 : index
    %c0_258 = arith.constant 0 : index
    %c0_259 = arith.constant 0 : index
    %469 = vector.load %arg4[%c3_257, %c0_258, %c0_259] : memref<5x16x30xbf16, #tpu.memory_space<vmem>>, vector<1x16x30xbf16>
    %470 = vector.shape_cast %469 : vector<1x16x30xbf16> to vector<16x30xbf16>
    %471 = vector.extract_strided_slice %456 {offsets = [0, 3], sizes = [30, 136], strides = [1, 1]} : vector<30x140xbf16> to vector<30x136xbf16>
    %cst_260 = arith.constant dense<0.000000e+00> : vector<16x136xf32>
    %472 = tpu.matmul %470, %471, %cst_260 {dimension_numbers = #tpu.dot_dimension_numbers<[1], [0], [0], [1], [0, 0, 1, 1], [], []>} : vector<16x30xbf16>, vector<30x136xbf16>, vector<16x136xf32> -> vector<16x136xf32>
    %c4_261 = arith.constant 4 : index
    %c0_262 = arith.constant 0 : index
    %c0_263 = arith.constant 0 : index
    %473 = vector.load %arg4[%c4_261, %c0_262, %c0_263] : memref<5x16x30xbf16, #tpu.memory_space<vmem>>, vector<1x16x30xbf16>
    %474 = vector.shape_cast %473 : vector<1x16x30xbf16> to vector<16x30xbf16>
    %475 = vector.extract_strided_slice %456 {offsets = [0, 4], sizes = [30, 136], strides = [1, 1]} : vector<30x140xbf16> to vector<30x136xbf16>
    %cst_264 = arith.constant dense<0.000000e+00> : vector<16x136xf32>
    %476 = tpu.matmul %474, %475, %cst_264 {dimension_numbers = #tpu.dot_dimension_numbers<[1], [0], [0], [1], [0, 0, 1, 1], [], []>} : vector<16x30xbf16>, vector<30x136xbf16>, vector<16x136xf32> -> vector<16x136xf32>
    %477 = arith.addf %460, %464 : vector<16x136xf32>
    %478 = arith.addf %468, %472 : vector<16x136xf32>
    %479 = arith.addf %477, %478 : vector<16x136xf32>
    %480 = arith.addf %479, %476 : vector<16x136xf32>
    %c0_265 = arith.constant 0 : index
    %c0_266 = arith.constant 0 : index
    %481 = vector.load %arg5[%c0_265, %c0_266] : memref<16x1xf32, #tpu.memory_space<vmem>>, vector<16x1xf32>
    %482 = vector.broadcast %481 : vector<16x1xf32> to vector<16x136xf32>
    %483 = arith.addf %480, %482 : vector<16x136xf32>
    %cst_267 = arith.constant 0.000000e+00 : f32
    %484 = vector.broadcast %cst_267 : f32 to vector<16x136xf32>
    %485 = arith.maximumf %483, %484 : vector<16x136xf32>
    %486 = vector.extract_strided_slice %485 {offsets = [0, 0], sizes = [16, 135], strides = [1, 1]} : vector<16x136xf32> to vector<16x135xf32>
    %487 = vector.extract_strided_slice %485 {offsets = [0, 1], sizes = [16, 135], strides = [1, 1]} : vector<16x136xf32> to vector<16x135xf32>
    %488 = arith.maximumf %486, %487 : vector<16x135xf32>
    %489 = vector.extract_strided_slice %488 {offsets = [0, 0], sizes = [16, 121], strides = [1, 1]} : vector<16x135xf32> to vector<16x121xf32>
    %490 = vector.extract_strided_slice %488 {offsets = [0, 14], sizes = [16, 121], strides = [1, 1]} : vector<16x135xf32> to vector<16x121xf32>
    %491 = arith.maximumf %489, %490 : vector<16x121xf32>
    %492 = arith.truncf %491 : vector<16x121xf32> to vector<16x121xbf16>
    %c7_268 = arith.constant 7 : index
    %c0_269 = arith.constant 0 : index
    %c0_270 = arith.constant 0 : index
    %493 = vector.load %arg13[%c7_268, %c0_269, %c0_270] : memref<8x16x121xbf16, #tpu.memory_space<vmem>>, vector<1x16x121xbf16>
    %494 = vector.shape_cast %493 : vector<1x16x121xbf16> to vector<16x121xbf16>
    %495 = vector.shape_cast %492 : vector<16x121xbf16> to vector<1x16x121xbf16>
    tpu.vector_store %arg13[%c7_268, %c0_269, %c0_270], %495 {strides = array<i32>} : memref<8x16x121xbf16, #tpu.memory_space<vmem>>, vector<1x16x121xbf16>,
    %c0_271 = arith.constant 0 : index
    %c0_272 = arith.constant 0 : index
    %c0_273 = arith.constant 0 : index
    %496 = vector.load %arg13[%c0_271, %c0_272, %c0_273] : memref<8x16x121xbf16, #tpu.memory_space<vmem>>, vector<8x1x121xbf16>
    %497 = vector.shape_cast %496 : vector<8x1x121xbf16> to vector<8x121xbf16>
    %c0_274 = arith.constant 0 : index
    %c0_275 = arith.constant 0 : index
    %c0_276 = arith.constant 0 : index
    %498 = vector.load %arg6[%c0_274, %c0_275, %c0_276] : memref<16x121x120xbf16, #tpu.memory_space<vmem>>, vector<1x121x120xbf16>
    %499 = vector.shape_cast %498 : vector<1x121x120xbf16> to vector<121x120xbf16>
    %cst_277 = arith.constant dense<0.000000e+00> : vector<8x120xf32>
    %500 = tpu.matmul %497, %499, %cst_277 {dimension_numbers = #tpu.dot_dimension_numbers<[1], [0], [0], [1], [0, 0, 1, 1], [], []>} : vector<8x121xbf16>, vector<121x120xbf16>, vector<8x120xf32> -> vector<8x120xf32>
    %c0_278 = arith.constant 0 : index
    %c1_279 = arith.constant 1 : index
    %c0_280 = arith.constant 0 : index
    %501 = vector.load %arg13[%c0_278, %c1_279, %c0_280] : memref<8x16x121xbf16, #tpu.memory_space<vmem>>, vector<8x1x121xbf16>
    %502 = vector.shape_cast %501 : vector<8x1x121xbf16> to vector<8x121xbf16>
    %c1_281 = arith.constant 1 : index
    %c0_282 = arith.constant 0 : index
    %c0_283 = arith.constant 0 : index
    %503 = vector.load %arg6[%c1_281, %c0_282, %c0_283] : memref<16x121x120xbf16, #tpu.memory_space<vmem>>, vector<1x121x120xbf16>
    %504 = vector.shape_cast %503 : vector<1x121x120xbf16> to vector<121x120xbf16>
    %cst_284 = arith.constant dense<0.000000e+00> : vector<8x120xf32>
    %505 = tpu.matmul %502, %504, %cst_284 {dimension_numbers = #tpu.dot_dimension_numbers<[1], [0], [0], [1], [0, 0, 1, 1], [], []>} : vector<8x121xbf16>, vector<121x120xbf16>, vector<8x120xf32> -> vector<8x120xf32>
    %c0_285 = arith.constant 0 : index
    %c2_286 = arith.constant 2 : index
    %c0_287 = arith.constant 0 : index
    %506 = vector.load %arg13[%c0_285, %c2_286, %c0_287] : memref<8x16x121xbf16, #tpu.memory_space<vmem>>, vector<8x1x121xbf16>
    %507 = vector.shape_cast %506 : vector<8x1x121xbf16> to vector<8x121xbf16>
    %c2_288 = arith.constant 2 : index
    %c0_289 = arith.constant 0 : index
    %c0_290 = arith.constant 0 : index
    %508 = vector.load %arg6[%c2_288, %c0_289, %c0_290] : memref<16x121x120xbf16, #tpu.memory_space<vmem>>, vector<1x121x120xbf16>
    %509 = vector.shape_cast %508 : vector<1x121x120xbf16> to vector<121x120xbf16>
    %cst_291 = arith.constant dense<0.000000e+00> : vector<8x120xf32>
    %510 = tpu.matmul %507, %509, %cst_291 {dimension_numbers = #tpu.dot_dimension_numbers<[1], [0], [0], [1], [0, 0, 1, 1], [], []>} : vector<8x121xbf16>, vector<121x120xbf16>, vector<8x120xf32> -> vector<8x120xf32>
    %c0_292 = arith.constant 0 : index
    %c3_293 = arith.constant 3 : index
    %c0_294 = arith.constant 0 : index
    %511 = vector.load %arg13[%c0_292, %c3_293, %c0_294] : memref<8x16x121xbf16, #tpu.memory_space<vmem>>, vector<8x1x121xbf16>
    %512 = vector.shape_cast %511 : vector<8x1x121xbf16> to vector<8x121xbf16>
    %c3_295 = arith.constant 3 : index
    %c0_296 = arith.constant 0 : index
    %c0_297 = arith.constant 0 : index
    %513 = vector.load %arg6[%c3_295, %c0_296, %c0_297] : memref<16x121x120xbf16, #tpu.memory_space<vmem>>, vector<1x121x120xbf16>
    %514 = vector.shape_cast %513 : vector<1x121x120xbf16> to vector<121x120xbf16>
    %cst_298 = arith.constant dense<0.000000e+00> : vector<8x120xf32>
    %515 = tpu.matmul %512, %514, %cst_298 {dimension_numbers = #tpu.dot_dimension_numbers<[1], [0], [0], [1], [0, 0, 1, 1], [], []>} : vector<8x121xbf16>, vector<121x120xbf16>, vector<8x120xf32> -> vector<8x120xf32>
    %c0_299 = arith.constant 0 : index
    %c4_300 = arith.constant 4 : index
    %c0_301 = arith.constant 0 : index
    %516 = vector.load %arg13[%c0_299, %c4_300, %c0_301] : memref<8x16x121xbf16, #tpu.memory_space<vmem>>, vector<8x1x121xbf16>
    %517 = vector.shape_cast %516 : vector<8x1x121xbf16> to vector<8x121xbf16>
    %c4_302 = arith.constant 4 : index
    %c0_303 = arith.constant 0 : index
    %c0_304 = arith.constant 0 : index
    %518 = vector.load %arg6[%c4_302, %c0_303, %c0_304] : memref<16x121x120xbf16, #tpu.memory_space<vmem>>, vector<1x121x120xbf16>
    %519 = vector.shape_cast %518 : vector<1x121x120xbf16> to vector<121x120xbf16>
    %cst_305 = arith.constant dense<0.000000e+00> : vector<8x120xf32>
    %520 = tpu.matmul %517, %519, %cst_305 {dimension_numbers = #tpu.dot_dimension_numbers<[1], [0], [0], [1], [0, 0, 1, 1], [], []>} : vector<8x121xbf16>, vector<121x120xbf16>, vector<8x120xf32> -> vector<8x120xf32>
    %c0_306 = arith.constant 0 : index
    %c5_307 = arith.constant 5 : index
    %c0_308 = arith.constant 0 : index
    %521 = vector.load %arg13[%c0_306, %c5_307, %c0_308] : memref<8x16x121xbf16, #tpu.memory_space<vmem>>, vector<8x1x121xbf16>
    %522 = vector.shape_cast %521 : vector<8x1x121xbf16> to vector<8x121xbf16>
    %c5_309 = arith.constant 5 : index
    %c0_310 = arith.constant 0 : index
    %c0_311 = arith.constant 0 : index
    %523 = vector.load %arg6[%c5_309, %c0_310, %c0_311] : memref<16x121x120xbf16, #tpu.memory_space<vmem>>, vector<1x121x120xbf16>
    %524 = vector.shape_cast %523 : vector<1x121x120xbf16> to vector<121x120xbf16>
    %cst_312 = arith.constant dense<0.000000e+00> : vector<8x120xf32>
    %525 = tpu.matmul %522, %524, %cst_312 {dimension_numbers = #tpu.dot_dimension_numbers<[1], [0], [0], [1], [0, 0, 1, 1], [], []>} : vector<8x121xbf16>, vector<121x120xbf16>, vector<8x120xf32> -> vector<8x120xf32>
    %c0_313 = arith.constant 0 : index
    %c6_314 = arith.constant 6 : index
    %c0_315 = arith.constant 0 : index
    %526 = vector.load %arg13[%c0_313, %c6_314, %c0_315] : memref<8x16x121xbf16, #tpu.memory_space<vmem>>, vector<8x1x121xbf16>
    %527 = vector.shape_cast %526 : vector<8x1x121xbf16> to vector<8x121xbf16>
    %c6_316 = arith.constant 6 : index
    %c0_317 = arith.constant 0 : index
    %c0_318 = arith.constant 0 : index
    %528 = vector.load %arg6[%c6_316, %c0_317, %c0_318] : memref<16x121x120xbf16, #tpu.memory_space<vmem>>, vector<1x121x120xbf16>
    %529 = vector.shape_cast %528 : vector<1x121x120xbf16> to vector<121x120xbf16>
    %cst_319 = arith.constant dense<0.000000e+00> : vector<8x120xf32>
    %530 = tpu.matmul %527, %529, %cst_319 {dimension_numbers = #tpu.dot_dimension_numbers<[1], [0], [0], [1], [0, 0, 1, 1], [], []>} : vector<8x121xbf16>, vector<121x120xbf16>, vector<8x120xf32> -> vector<8x120xf32>
    %c0_320 = arith.constant 0 : index
    %c7_321 = arith.constant 7 : index
    %c0_322 = arith.constant 0 : index
    %531 = vector.load %arg13[%c0_320, %c7_321, %c0_322] : memref<8x16x121xbf16, #tpu.memory_space<vmem>>, vector<8x1x121xbf16>
    %532 = vector.shape_cast %531 : vector<8x1x121xbf16> to vector<8x121xbf16>
    %c7_323 = arith.constant 7 : index
    %c0_324 = arith.constant 0 : index
    %c0_325 = arith.constant 0 : index
    %533 = vector.load %arg6[%c7_323, %c0_324, %c0_325] : memref<16x121x120xbf16, #tpu.memory_space<vmem>>, vector<1x121x120xbf16>
    %534 = vector.shape_cast %533 : vector<1x121x120xbf16> to vector<121x120xbf16>
    %cst_326 = arith.constant dense<0.000000e+00> : vector<8x120xf32>
    %535 = tpu.matmul %532, %534, %cst_326 {dimension_numbers = #tpu.dot_dimension_numbers<[1], [0], [0], [1], [0, 0, 1, 1], [], []>} : vector<8x121xbf16>, vector<121x120xbf16>, vector<8x120xf32> -> vector<8x120xf32>
    %c0_327 = arith.constant 0 : index
    %c8 = arith.constant 8 : index
    %c0_328 = arith.constant 0 : index
    %536 = vector.load %arg13[%c0_327, %c8, %c0_328] : memref<8x16x121xbf16, #tpu.memory_space<vmem>>, vector<8x1x121xbf16>
    %537 = vector.shape_cast %536 : vector<8x1x121xbf16> to vector<8x121xbf16>
    %c8_329 = arith.constant 8 : index
    %c0_330 = arith.constant 0 : index
    %c0_331 = arith.constant 0 : index
    %538 = vector.load %arg6[%c8_329, %c0_330, %c0_331] : memref<16x121x120xbf16, #tpu.memory_space<vmem>>, vector<1x121x120xbf16>
    %539 = vector.shape_cast %538 : vector<1x121x120xbf16> to vector<121x120xbf16>
    %cst_332 = arith.constant dense<0.000000e+00> : vector<8x120xf32>
    %540 = tpu.matmul %537, %539, %cst_332 {dimension_numbers = #tpu.dot_dimension_numbers<[1], [0], [0], [1], [0, 0, 1, 1], [], []>} : vector<8x121xbf16>, vector<121x120xbf16>, vector<8x120xf32> -> vector<8x120xf32>
    %c0_333 = arith.constant 0 : index
    %c9 = arith.constant 9 : index
    %c0_334 = arith.constant 0 : index
    %541 = vector.load %arg13[%c0_333, %c9, %c0_334] : memref<8x16x121xbf16, #tpu.memory_space<vmem>>, vector<8x1x121xbf16>
    %542 = vector.shape_cast %541 : vector<8x1x121xbf16> to vector<8x121xbf16>
    %c9_335 = arith.constant 9 : index
    %c0_336 = arith.constant 0 : index
    %c0_337 = arith.constant 0 : index
    %543 = vector.load %arg6[%c9_335, %c0_336, %c0_337] : memref<16x121x120xbf16, #tpu.memory_space<vmem>>, vector<1x121x120xbf16>
    %544 = vector.shape_cast %543 : vector<1x121x120xbf16> to vector<121x120xbf16>
    %cst_338 = arith.constant dense<0.000000e+00> : vector<8x120xf32>
    %545 = tpu.matmul %542, %544, %cst_338 {dimension_numbers = #tpu.dot_dimension_numbers<[1], [0], [0], [1], [0, 0, 1, 1], [], []>} : vector<8x121xbf16>, vector<121x120xbf16>, vector<8x120xf32> -> vector<8x120xf32>
    %c0_339 = arith.constant 0 : index
    %c10 = arith.constant 10 : index
    %c0_340 = arith.constant 0 : index
    %546 = vector.load %arg13[%c0_339, %c10, %c0_340] : memref<8x16x121xbf16, #tpu.memory_space<vmem>>, vector<8x1x121xbf16>
    %547 = vector.shape_cast %546 : vector<8x1x121xbf16> to vector<8x121xbf16>
    %c10_341 = arith.constant 10 : index
    %c0_342 = arith.constant 0 : index
    %c0_343 = arith.constant 0 : index
    %548 = vector.load %arg6[%c10_341, %c0_342, %c0_343] : memref<16x121x120xbf16, #tpu.memory_space<vmem>>, vector<1x121x120xbf16>
    %549 = vector.shape_cast %548 : vector<1x121x120xbf16> to vector<121x120xbf16>
    %cst_344 = arith.constant dense<0.000000e+00> : vector<8x120xf32>
    %550 = tpu.matmul %547, %549, %cst_344 {dimension_numbers = #tpu.dot_dimension_numbers<[1], [0], [0], [1], [0, 0, 1, 1], [], []>} : vector<8x121xbf16>, vector<121x120xbf16>, vector<8x120xf32> -> vector<8x120xf32>
    %c0_345 = arith.constant 0 : index
    %c11 = arith.constant 11 : index
    %c0_346 = arith.constant 0 : index
    %551 = vector.load %arg13[%c0_345, %c11, %c0_346] : memref<8x16x121xbf16, #tpu.memory_space<vmem>>, vector<8x1x121xbf16>
    %552 = vector.shape_cast %551 : vector<8x1x121xbf16> to vector<8x121xbf16>
    %c11_347 = arith.constant 11 : index
    %c0_348 = arith.constant 0 : index
    %c0_349 = arith.constant 0 : index
    %553 = vector.load %arg6[%c11_347, %c0_348, %c0_349] : memref<16x121x120xbf16, #tpu.memory_space<vmem>>, vector<1x121x120xbf16>
    %554 = vector.shape_cast %553 : vector<1x121x120xbf16> to vector<121x120xbf16>
    %cst_350 = arith.constant dense<0.000000e+00> : vector<8x120xf32>
    %555 = tpu.matmul %552, %554, %cst_350 {dimension_numbers = #tpu.dot_dimension_numbers<[1], [0], [0], [1], [0, 0, 1, 1], [], []>} : vector<8x121xbf16>, vector<121x120xbf16>, vector<8x120xf32> -> vector<8x120xf32>
    %c0_351 = arith.constant 0 : index
    %c12 = arith.constant 12 : index
    %c0_352 = arith.constant 0 : index
    %556 = vector.load %arg13[%c0_351, %c12, %c0_352] : memref<8x16x121xbf16, #tpu.memory_space<vmem>>, vector<8x1x121xbf16>
    %557 = vector.shape_cast %556 : vector<8x1x121xbf16> to vector<8x121xbf16>
    %c12_353 = arith.constant 12 : index
    %c0_354 = arith.constant 0 : index
    %c0_355 = arith.constant 0 : index
    %558 = vector.load %arg6[%c12_353, %c0_354, %c0_355] : memref<16x121x120xbf16, #tpu.memory_space<vmem>>, vector<1x121x120xbf16>
    %559 = vector.shape_cast %558 : vector<1x121x120xbf16> to vector<121x120xbf16>
    %cst_356 = arith.constant dense<0.000000e+00> : vector<8x120xf32>
    %560 = tpu.matmul %557, %559, %cst_356 {dimension_numbers = #tpu.dot_dimension_numbers<[1], [0], [0], [1], [0, 0, 1, 1], [], []>} : vector<8x121xbf16>, vector<121x120xbf16>, vector<8x120xf32> -> vector<8x120xf32>
    %c0_357 = arith.constant 0 : index
    %c13 = arith.constant 13 : index
    %c0_358 = arith.constant 0 : index
    %561 = vector.load %arg13[%c0_357, %c13, %c0_358] : memref<8x16x121xbf16, #tpu.memory_space<vmem>>, vector<8x1x121xbf16>
    %562 = vector.shape_cast %561 : vector<8x1x121xbf16> to vector<8x121xbf16>
    %c13_359 = arith.constant 13 : index
    %c0_360 = arith.constant 0 : index
    %c0_361 = arith.constant 0 : index
    %563 = vector.load %arg6[%c13_359, %c0_360, %c0_361] : memref<16x121x120xbf16, #tpu.memory_space<vmem>>, vector<1x121x120xbf16>
    %564 = vector.shape_cast %563 : vector<1x121x120xbf16> to vector<121x120xbf16>
    %cst_362 = arith.constant dense<0.000000e+00> : vector<8x120xf32>
    %565 = tpu.matmul %562, %564, %cst_362 {dimension_numbers = #tpu.dot_dimension_numbers<[1], [0], [0], [1], [0, 0, 1, 1], [], []>} : vector<8x121xbf16>, vector<121x120xbf16>, vector<8x120xf32> -> vector<8x120xf32>
    %c0_363 = arith.constant 0 : index
    %c14 = arith.constant 14 : index
    %c0_364 = arith.constant 0 : index
    %566 = vector.load %arg13[%c0_363, %c14, %c0_364] : memref<8x16x121xbf16, #tpu.memory_space<vmem>>, vector<8x1x121xbf16>
    %567 = vector.shape_cast %566 : vector<8x1x121xbf16> to vector<8x121xbf16>
    %c14_365 = arith.constant 14 : index
    %c0_366 = arith.constant 0 : index
    %c0_367 = arith.constant 0 : index
    %568 = vector.load %arg6[%c14_365, %c0_366, %c0_367] : memref<16x121x120xbf16, #tpu.memory_space<vmem>>, vector<1x121x120xbf16>
    %569 = vector.shape_cast %568 : vector<1x121x120xbf16> to vector<121x120xbf16>
    %cst_368 = arith.constant dense<0.000000e+00> : vector<8x120xf32>
    %570 = tpu.matmul %567, %569, %cst_368 {dimension_numbers = #tpu.dot_dimension_numbers<[1], [0], [0], [1], [0, 0, 1, 1], [], []>} : vector<8x121xbf16>, vector<121x120xbf16>, vector<8x120xf32> -> vector<8x120xf32>
    %c0_369 = arith.constant 0 : index
    %c15 = arith.constant 15 : index
    %c0_370 = arith.constant 0 : index
    %571 = vector.load %arg13[%c0_369, %c15, %c0_370] : memref<8x16x121xbf16, #tpu.memory_space<vmem>>, vector<8x1x121xbf16>
    %572 = vector.shape_cast %571 : vector<8x1x121xbf16> to vector<8x121xbf16>
    %c15_371 = arith.constant 15 : index
    %c0_372 = arith.constant 0 : index
    %c0_373 = arith.constant 0 : index
    %573 = vector.load %arg6[%c15_371, %c0_372, %c0_373] : memref<16x121x120xbf16, #tpu.memory_space<vmem>>, vector<1x121x120xbf16>
    %574 = vector.shape_cast %573 : vector<1x121x120xbf16> to vector<121x120xbf16>
    %cst_374 = arith.constant dense<0.000000e+00> : vector<8x120xf32>
    %575 = tpu.matmul %572, %574, %cst_374 {dimension_numbers = #tpu.dot_dimension_numbers<[1], [0], [0], [1], [0, 0, 1, 1], [], []>} : vector<8x121xbf16>, vector<121x120xbf16>, vector<8x120xf32> -> vector<8x120xf32>
    %576 = arith.addf %500, %505 : vector<8x120xf32>
    %577 = arith.addf %510, %515 : vector<8x120xf32>
    %578 = arith.addf %520, %525 : vector<8x120xf32>
    %579 = arith.addf %530, %535 : vector<8x120xf32>
    %580 = arith.addf %540, %545 : vector<8x120xf32>
    %581 = arith.addf %550, %555 : vector<8x120xf32>
    %582 = arith.addf %560, %565 : vector<8x120xf32>
    %583 = arith.addf %570, %575 : vector<8x120xf32>
    %584 = arith.addf %576, %577 : vector<8x120xf32>
    %585 = arith.addf %578, %579 : vector<8x120xf32>
    %586 = arith.addf %580, %581 : vector<8x120xf32>
    %587 = arith.addf %582, %583 : vector<8x120xf32>
    %588 = arith.addf %584, %585 : vector<8x120xf32>
    %589 = arith.addf %586, %587 : vector<8x120xf32>
    %590 = arith.addf %588, %589 : vector<8x120xf32>
    %c0_375 = arith.constant 0 : index
    %c0_376 = arith.constant 0 : index
    %591 = vector.load %arg7[%c0_375, %c0_376] : memref<1x120xf32, #tpu.memory_space<vmem>>, vector<1x120xf32>
    %592 = vector.broadcast %591 : vector<1x120xf32> to vector<8x120xf32>
    %593 = arith.addf %590, %592 : vector<8x120xf32>
    %cst_377 = arith.constant 0.000000e+00 : f32
    %594 = vector.broadcast %cst_377 : f32 to vector<8x120xf32>
    %595 = arith.maximumf %593, %594 : vector<8x120xf32>
    %596 = arith.truncf %595 : vector<8x120xf32> to vector<8x120xbf16>
    %c0_378 = arith.constant 0 : index
    %c0_379 = arith.constant 0 : index
    %597 = vector.load %arg8[%c0_378, %c0_379] : memref<120x84xbf16, #tpu.memory_space<vmem>>, vector<120x84xbf16>
    %cst_380 = arith.constant dense<0.000000e+00> : vector<8x84xf32>
    %598 = tpu.matmul %596, %597, %cst_380 {dimension_numbers = #tpu.dot_dimension_numbers<[1], [0], [0], [1], [0, 0, 1, 1], [], []>} : vector<8x120xbf16>, vector<120x84xbf16>, vector<8x84xf32> -> vector<8x84xf32>
    %c0_381 = arith.constant 0 : index
    %c0_382 = arith.constant 0 : index
    %599 = vector.load %arg9[%c0_381, %c0_382] : memref<1x84xf32, #tpu.memory_space<vmem>>, vector<1x84xf32>
    %600 = vector.broadcast %599 : vector<1x84xf32> to vector<8x84xf32>
    %601 = arith.addf %598, %600 : vector<8x84xf32>
    %cst_383 = arith.constant 0.000000e+00 : f32
    %602 = vector.broadcast %cst_383 : f32 to vector<8x84xf32>
    %603 = arith.maximumf %601, %602 : vector<8x84xf32>
    %604 = arith.truncf %603 : vector<8x84xf32> to vector<8x84xbf16>
    %c0_384 = arith.constant 0 : index
    %c0_385 = arith.constant 0 : index
    %605 = vector.load %arg10[%c0_384, %c0_385] : memref<84x128xbf16, #tpu.memory_space<vmem>>, vector<84x128xbf16>
    %cst_386 = arith.constant dense<0.000000e+00> : vector<8x128xf32>
    %606 = tpu.matmul %604, %605, %cst_386 {dimension_numbers = #tpu.dot_dimension_numbers<[1], [0], [0], [1], [0, 0, 1, 1], [], []>} : vector<8x84xbf16>, vector<84x128xbf16>, vector<8x128xf32> -> vector<8x128xf32>
    %c0_387 = arith.constant 0 : index
    %c0_388 = arith.constant 0 : index
    %607 = vector.load %arg11[%c0_387, %c0_388] : memref<1x128xf32, #tpu.memory_space<vmem>>, vector<1x128xf32>
    %608 = vector.broadcast %607 : vector<1x128xf32> to vector<8x128xf32>
    %609 = arith.addf %606, %608 : vector<8x128xf32>
    %c0_389 = arith.constant 0 : index
    %c0_390 = arith.constant 0 : index
    %c0_391 = arith.constant 0 : index
    %610 = vector.load %arg12[%c0_389, %c0_390, %c0_391] : memref<1x8x128xf32, #tpu.memory_space<vmem>>, vector<1x8x128xf32>
    %611 = vector.shape_cast %610 : vector<1x8x128xf32> to vector<8x128xf32>
    %612 = vector.shape_cast %609 : vector<8x128xf32> to vector<1x8x128xf32>
    tpu.vector_store %arg12[%c0_389, %c0_390, %c0_391], %612 {strides = array<i32>} : memref<1x8x128xf32, #tpu.memory_space<vmem>>, vector<1x8x128xf32>,
    return
  }
  func.func @transform_0(%arg0: i32) -> (i32, i32, i32) {
    %c0_i32 = arith.constant 0 : i32
    %c0_i32_0 = arith.constant 0 : i32
    %c0_i32_1 = arith.constant 0 : i32
    return %arg0, %c0_i32, %c0_i32_0 : i32, i32, i32
  }
  func.func @transform_1(%arg0: i32) -> (i32, i32) {
    %c0_i32 = arith.constant 0 : i32
    %c0_i32_0 = arith.constant 0 : i32
    %c0_i32_1 = arith.constant 0 : i32
    return %c0_i32, %c0_i32_0 : i32, i32
  }
  func.func @transform_2(%arg0: i32) -> (i32, i32) {
    %c0_i32 = arith.constant 0 : i32
    %c0_i32_0 = arith.constant 0 : i32
    %c0_i32_1 = arith.constant 0 : i32
    return %c0_i32, %c0_i32_0 : i32, i32
  }
  func.func @transform_3(%arg0: i32) -> (i32, i32, i32) {
    %c0_i32 = arith.constant 0 : i32
    %c0_i32_0 = arith.constant 0 : i32
    %c0_i32_1 = arith.constant 0 : i32
    %c0_i32_2 = arith.constant 0 : i32
    return %c0_i32, %c0_i32_0, %c0_i32_1 : i32, i32, i32
  }
  func.func @transform_4(%arg0: i32) -> (i32, i32) {
    %c0_i32 = arith.constant 0 : i32
    %c0_i32_0 = arith.constant 0 : i32
    %c0_i32_1 = arith.constant 0 : i32
    return %c0_i32, %c0_i32_0 : i32, i32
  }
  func.func @transform_5(%arg0: i32) -> (i32, i32, i32) {
    %c0_i32 = arith.constant 0 : i32
    %c0_i32_0 = arith.constant 0 : i32
    %c0_i32_1 = arith.constant 0 : i32
    %c0_i32_2 = arith.constant 0 : i32
    return %c0_i32, %c0_i32_0, %c0_i32_1 : i32, i32, i32
  }
  func.func @transform_6(%arg0: i32) -> (i32, i32) {
    %c0_i32 = arith.constant 0 : i32
    %c0_i32_0 = arith.constant 0 : i32
    %c0_i32_1 = arith.constant 0 : i32
    return %c0_i32, %c0_i32_0 : i32, i32
  }
  func.func @transform_7(%arg0: i32) -> (i32, i32) {
    %c0_i32 = arith.constant 0 : i32
    %c0_i32_0 = arith.constant 0 : i32
    %c0_i32_1 = arith.constant 0 : i32
    return %c0_i32, %c0_i32_0 : i32, i32
  }
  func.func @transform_8(%arg0: i32) -> (i32, i32) {
    %c0_i32 = arith.constant 0 : i32
    %c0_i32_0 = arith.constant 0 : i32
    %c0_i32_1 = arith.constant 0 : i32
    return %c0_i32, %c0_i32_0 : i32, i32
  }
  func.func @transform_9(%arg0: i32) -> (i32, i32) {
    %c0_i32 = arith.constant 0 : i32
    %c0_i32_0 = arith.constant 0 : i32
    %c0_i32_1 = arith.constant 0 : i32
    return %c0_i32, %c0_i32_0 : i32, i32
  }
  func.func @transform_10(%arg0: i32) -> (i32, i32) {
    %c0_i32 = arith.constant 0 : i32
    %c0_i32_0 = arith.constant 0 : i32
    %c0_i32_1 = arith.constant 0 : i32
    return %c0_i32, %c0_i32_0 : i32, i32
  }
  func.func @transform_11(%arg0: i32) -> (i32, i32, i32) {
    %c0_i32 = arith.constant 0 : i32
    %c0_i32_0 = arith.constant 0 : i32
    %c0_i32_1 = arith.constant 0 : i32
    return %arg0, %c0_i32, %c0_i32_0 : i32, i32, i32
  }
}

</mosaic_0001>

<bundles_post_ra>
// kernel: lenet_forward.1
= control target key start
LH: loop header
LB: loop body
LE: loop exit
PB: predicated region body
PF: predicated region fallthrough
CT: control target
= control target key end

     0   :  { %s16967_s0 = inlined_call_operand.vmem [shape: bf16[16,75,784], index: 0, kind: input, shape index: {}]   ;;  %s16968_s1 = inlined_call_operand.vmem [shape: bf16[6,75], index: 1, kind: input, shape index: {}]   ;;  %s16969_s2 = inlined_call_operand.vmem [shape: f32[6,1], index: 2, kind: input, shape index: {}]   ;;  %s16970_s3 = inlined_call_operand.vmem [shape: bf16[5,16,30], index: 3, kind: input, shape index: {}]   ;;  %s16971_s4 = inlined_call_operand.vmem [shape: f32[16,1], index: 4, kind: input, shape index: {}]   ;;  %s16972_s5 = inlined_call_operand.vmem [shape: bf16[16,121,120], index: 5, kind: input, shape index: {}]   ;;  %s16973_s6 = inlined_call_operand.vmem [shape: f32[1,120], index: 6, kind: input, shape index: {}]   ;;  %s16974_s7 = inlined_call_operand.vmem [shape: bf16[120,84], index: 7, kind: input, shape index: {}]   ;;  %s16975_s8 = inlined_call_operand.vmem [shape: f32[1,84], index: 8, kind: input, shape index: {}]   ;;  %s16976_s9 = inlined_call_operand.vmem [shape: bf16[84,128], index: 9, kind: input, shape index: {}]   ;;  %s16977_s10 = inlined_call_operand.vmem [shape: f32[1,128], index: 10, kind: input, shape index: {}]   ;;  %s16978_s11 = inlined_call_operand.hbm [shape: f32[2,8,128], index: 11, kind: output, shape index: {}]  }
   0x1   :  { %17066 = sst [smem:[#allocation30_spill]] %s16967_s0 }
   0x2   :  { %16 = vsyncpa [#allocation4], 0 }
   0x3   :  { %18 = vsyncpa [#allocation4 + $0x1], 0  ;;  %s13489_s17 = smov 0   ;;  %s13491_s18 = smov 0  }
   0x4   :  { %s13493_s19 = smov 0   ;;  %s13495_s20 = smov 0  }
   0x5 LB: > { %17067 = sst [smem:[#allocation6_spill]] %s13408_s19  ;;  %s13510_s21 = sadd.s32 4294967295, %s13412_s20   ;;  %s13412_s20 = sphi %s13495_s20, %s17292_s20   ;;  %s13408_s19 = sphi %s13493_s19, %s17289_s19   ;;  %s13404_s18 = sphi %s13491_s18, %s17291_s18   ;;  %s13400_s17 = sphi %s13489_s17, %s17290_s17  }
   0x6   : > { %s10278_s22 = sadd.s32 4294967294, %s13412_s20   ;;  %s13514_s23 = sadd.s32 1, %s13412_s20  }
   0x7   : > { %s267_s24 = sadd.s32 1, %s13408_s19  ;;  %s264_s25 = ssub.s32 %s13412_s20, %s13514_s23 }
   0x8   : > { %p277_p0 = scmp.ne.s32.totalorder %s13408_s19, %s13404_s18  ;;  %p265_p1 = scmp.eq.s32.totalorder %s264_s25, 0 }
   0x9   : > { %p278_p2 = scmp.eq.s32.totalorder %s13510_s21, 1  ;;  %p283_p3 = scmp.ne.s32.totalorder %s13404_s18, %s13400_s17 }
   0xa   : > { %p284_p4 = scmp.eq.s32.totalorder %s10278_s22, 1  ;;  %p10281_p7 = scmp.ge.s32.totalorder %s13412_s20, 1 }
   0xb   : > { %s13525_s26 = scalar_select %p265_p1, %s13408_s19, %s267_s24  }
   0xc   : > { %p13527_p5 = por %p278_p2, %p277_p0  ;;  %p13531_p6 = por %p284_p4, %p283_p3 }
   0xd   : > { %17068 = sst [smem:[#allocation7_spill]] %s13525_s26  ;;  %p342_p8 = scmp.lt.s32.totalorder %s13412_s20, 3 }
   0xf   : > { %p343_p9 = pnand %p10281_p7, %p342_p8 }
  0x11   : > { %346 = sbr.rel (%p343_p9) target bundleno = 7692 (0x1e0c), region = 64 }
  0x18   : > { %s10283_s29 = sshll.u32 %s13510_s21, 3  ;;  %v13414_v0 = vmov 0   ;;  %v432_v1 = vld [vmem:[%s16969_s2] sm:$0x3f]  ;;  %s17071_s0 = sld [smem:[#allocation30_spill]]  ;;  %vm16985_vm0 = vcmask 1044480  }
  0x19   : > { %p384_p10 = scmp.lt.s32.totalorder %s10283_s29, 15  ;;  %672 = vmatprep.mubr.bf16.mxu0 %v13414_v0  ;;  %713 = vmatprep.mubr.bf16.mxu1 %v13414_v0  ;;  %vm616_vm1 = vcmask 1045504   ;;  %v17004_v11 = vmov 65535   ;;  %v391_v30 = vld [vmem:[%s16968_s1] sm:$0x7]  ;;  %vm611_vm2 = vcmask 613376  }
  0x1a   : > { %12326 = vset.pattern.permute.xlu0 %v13414_v0  ;;  %12607 = vset.pattern.permute.xlu1 %v13414_v0  ;;  %v617_v12 = vsel %vm16985_vm0, 4294967295, %v17004_v11  ;;  %v17005_v33 = vmov 0.0   ;;  %vm13417_vm3 = vmmov 0   ;;  %s16999_s25 = smov 60   ;;  %vm819_vm4 = vcmask 490496   ;;  %s16991_s14 = smov 114  }
  0x1b   : > { %s17294_s29 = smov (!%p384_p10, %s10283_s29), 15  ;;  %435 = vperm.xlu0 %12326, %v432_v1   ;;  %v13569_v20 = vsel %vm616_vm1, %v617_v12, 0  ;;  %vm847_vm5 = vcmask 982016   ;;  %s16989_s15 = smov 72   ;;  %vm871_vm6 = vcmask 818176   ;;  %vm861_vm7 = vcmask 932864  }
  0x1c   : > { %s12272_s13 = smul.u32 280, %s17294_s29  ;;  %s16995_s29 = smov 120   ;;  %vm895_vm8 = vcmask 1043456   ;;  %vm889_vm9 = vcmask 588800   ;;  %vm16994_vm10 = vcmask 703488   ;;  %vm898_vm11 = vcmask 1041408  }
  0x1d   : > { %s16987_s22 = smov 86   ;;  %s16979_s24 = smov 127   ;;  %vm16993_vm12 = vcmask 1039360   ;;  %vm936_vm13 = vcmask 1046528   ;;  %vm1005_vm14 = vcmask 1022976   ;;  %vm932_vm15 = vcmask 244736  }
  0x1e   : > { %s13548_s16 = scalar_lea.vmem %s17071_s0, %s12272_s13  ;;  %s16997_s13 = smov 100   ;;  %vm16986_vm0 = vcmask 1014784  }
  0x1f   : > { %v12768_v2 = vld [vmem:[%s13548_s16 + $0x4] ss:$28 sps:$4 sm:$0xff]   ;;  %v12770_v3 = vld [vmem:[%s13548_s16 + $0xc] ss:$28 sps:$4 sm:$0xff]   ;;  %v12774_v6 = vld [vmem:[%s13548_s16 + $0x3c] ss:$28 sps:$4 sm:$0xff]  }
  0x20   : > { %640 = vmatprep.subr.bf16.mxu0 %v12768_v2  ;;  %v12772_v4 = vld [vmem:[%s13548_s16] ss:$28 sps:$4 sm:$0xff]   ;;  %v12773_v5 = vld [vmem:[%s13548_s16 + $0x8] ss:$28 sps:$4 sm:$0xff]   ;;  %681 = vmatprep.subr.bf16.mxu1 %v12770_v3  ;;  %v12778_v8 = vld [vmem:[%s13548_s16 + $0x38] ss:$28 sps:$4 sm:$0xff]  }
  0x21   : > { %641 = vmatpush1.bf16.msra.mxu0 %v12772_v4  ;;  %682 = vmatpush1.bf16.msra.mxu1 %v12773_v5  ;;  %v12776_v7 = vld [vmem:[%s13548_s16 + $0x44] ss:$28 sps:$4 sm:$0xff]   ;;  %v12780_v10 = vld [vmem:[%s13548_s16 + $0x74] ss:$28 sps:$4 sm:$0xff]   ;;  %v12782_v13 = vld [vmem:[%s13548_s16 + $0x7c] ss:$28 sps:$4 sm:$0xff]  }
  0x22   : > { %642 = vmatprep.subr.bf16.mxu0 %v12774_v6  ;;  %v12779_v9 = vld [vmem:[%s13548_s16 + $0x40] ss:$28 sps:$4 sm:$0xff]   ;;  %683 = vmatprep.subr.bf16.mxu1 %v12776_v7  ;;  %v12784_v14 = vld [vmem:[%s13548_s16 + $0x70] ss:$28 sps:$4 sm:$0xff]   ;;  %v12785_v15 = vld [vmem:[%s13548_s16 + $0x78] ss:$28 sps:$4 sm:$0xff]  }
  0x23   : > { %v12786_v16 = vld [vmem:[%s13548_s16 + $0xac] ss:$28 sps:$4 sm:$0xff]   ;;  %v12788_v17 = vld [vmem:[%s13548_s16 + $0xb4] ss:$28 sps:$4 sm:$0xff]   ;;  %v12808_v37 = vld [vmem:[%s13548_s16 + $0x84] ss:$28 sps:$4 sm:$0xff]  }
  0x24   : > { %v12790_v18 = vld [vmem:[%s13548_s16 + $0xa8] ss:$28 sps:$4 sm:$0xff]   ;;  %v12791_v19 = vld [vmem:[%s13548_s16 + $0xb0] ss:$28 sps:$4 sm:$0xff]   ;;  %v12801_v32 = vld [vmem:[%s13548_s16 + $0x18] ss:$28 sps:$4 sm:$0xff]  }
  0x25   : > { %643 = vmatpush1.bf16.msra.mxu0 %v12778_v8  ;;  %684 = vmatpush1.bf16.msra.mxu1 %v12779_v9  ;;  %v12792_v21 = vld [vmem:[%s13548_s16 + $0xe4] ss:$28 sps:$4 sm:$0x3f]   ;;  %v12794_v22 = vld [vmem:[%s13548_s16 + $0xec] ss:$28 sps:$4 sm:$0x3f]  }
  0x26   : > { %644 = vmatprep.subr.bf16.mxu0 %v12780_v10  ;;  %685 = vmatprep.subr.bf16.mxu1 %v12782_v13  ;;  %v623_v23 = vand.u32 %v12792_v21, %v13569_v20  ;;  %v12796_v24 = vld [vmem:[%s13548_s16 + $0xe0] ss:$28 sps:$4 sm:$0x3f]   ;;  %v12797_v25 = vld [vmem:[%s13548_s16 + $0xe8] ss:$28 sps:$4 sm:$0x3f]   ;;  %v629_v26 = vand.u32 %v12794_v22, %v13569_v20 }
  0x27   : > { %v620_v27 = vand.u32 %v12796_v24, %v13569_v20  ;;  %v626_v28 = vand.u32 %v12797_v25, %v13569_v20  ;;  %v12800_v29 = vld [vmem:[%s13548_s16 + $0x14] ss:$28 sps:$4 sm:$0xff]   ;;  %v12804_v34 = vld [vmem:[%s13548_s16 + $0x4c] ss:$28 sps:$4 sm:$0xff]   ;;  %v12806_v38 = vld [vmem:[%s13548_s16 + $0x80] ss:$28 sps:$4 sm:$0xff]  }
  0x28   : > { %v12798_v31 = vld [vmem:[%s13548_s16 + $0x10] ss:$28 sps:$4 sm:$0xff]   ;;  %v12802_v35 = vld [vmem:[%s13548_s16 + $0x48] ss:$28 sps:$4 sm:$0xff]   ;;  %v12812_v40 = vld [vmem:[%s13548_s16 + $0xbc] ss:$28 sps:$4 sm:$0xff]  }
  0x29   : > { %645 = vmatpush1.bf16.msra.mxu0 %v12784_v14  ;;  %686 = vmatpush1.bf16.msra.mxu1 %v12785_v15  ;;  %v12805_v36 = vld [vmem:[%s13548_s16 + $0x50] ss:$28 sps:$4 sm:$0xff]   ;;  %v12809_v39 = vld [vmem:[%s13548_s16 + $0x88] ss:$28 sps:$4 sm:$0xff]   ;;  %v12810_v42 = vld [vmem:[%s13548_s16 + $0xb8] ss:$28 sps:$4 sm:$0xff]  }
  0x2a   : > { %646 = vmatprep.subr.bf16.mxu0 %v12786_v16  ;;  %687 = vmatprep.subr.bf16.mxu1 %v12788_v17  ;;  %v12816_v41 = vld [vmem:[%s13548_s16 + $0xf4] ss:$28 sps:$4 sm:$0x3f]   ;;  %v12813_v43 = vld [vmem:[%s13548_s16 + $0xc0] ss:$28 sps:$4 sm:$0xff]   ;;  %s16983_s30 = smov 125  }
  0x2b   : > { %v12814_v44 = vld [vmem:[%s13548_s16 + $0xf0] ss:$28 sps:$4 sm:$0x3f]   ;;  %v12817_v45 = vld [vmem:[%s13548_s16 + $0xf8] ss:$28 sps:$4 sm:$0x3f]   ;;  %v635_v46 = vand.u32 %v12816_v41, %v13569_v20 }
  0x2c   : > { %v632_v47 = vand.u32 %v12814_v44, %v13569_v20  ;;  %v638_v48 = vand.u32 %v12817_v45, %v13569_v20  ;;  %v12835_v41 = vld [vmem:[%s13548_s16 + $0x124] ss:$28 sps:$4 sm:$0xff]   ;;  %v12838_v44 = vld [vmem:[%s13548_s16 + $0x15c] ss:$28 sps:$4 sm:$0xff]   ;;  %s16981_s12 = smov 124   ;;  %s17087_s0 = smov 100  }
  0x2d   : > { %647 = vmatpush1.bf16.msra.mxu0 %v12790_v18  ;;  %688 = vmatpush1.bf16.msra.mxu1 %v12791_v19  ;;  %v12836_v45 = vld [vmem:[%s13548_s16 + $0x158] ss:$28 sps:$4 sm:$0xff]  }
  0x2e   : > { %648 = vmatprep.subr.bf16.mxu0 %v623_v23  ;;  %689 = vmatprep.subr.bf16.mxu1 %v629_v26 }
  0x31   : > { %649 = vmatpush1.bf16.msra.mxu0 %v620_v27  ;;  %690 = vmatpush1.bf16.msra.mxu1 %v626_v28  ;;  %v12818_v28 = vld [vmem:[%s13548_s16 + $0x118] ss:$28 sps:$4 sm:$0xff]  }
  0x32   : > { %722 = vmatprep.subr.bf16.mxu0 %v12800_v29  ;;  %11676 = vmatprep.subr.bf16.mxu1 %v17005_v33  ;;  %v12820_v29 = vld [vmem:[%s13548_s16 + $0x11c] ss:$28 sps:$4 sm:$0xff]  }
  0x34   : > { %10320 = vmatmul.mubr.msk.bf16.vlgmr.msra.gmra.mrb[0].mxu0 %vm611_vm2, %v391_v30  ;;  %10321 = vmatmul.mubr.msk.bf16.vlgmr.msra.gmra.mrb[0].mxu1 %vm611_vm2, %v391_v30 }
  0x35   : > { %723 = vmatpush1.bf16.msra.mxu0 %v12798_v31  ;;  %11677 = vmatpush3.bf16.msra.mxu1 %v12801_v32  ;;  %v12821_v31 = vld [vmem:[%s13548_s16 + $0x150] ss:$28 sps:$4 sm:$0xff]  }
  0x36   : > { %724 = vmatprep.subr.bf16.mxu0 %v12804_v34  ;;  %11678 = vmatprep.subr.bf16.mxu1 %v17005_v33  ;;  %v12826_v32 = vld [vmem:[%s13548_s16 + $0x18c] ss:$28 sps:$4 sm:$0xff]  }
  0x37   : > { %754 = vmatprep.mubr.bf16.mxu0 %v13414_v0  ;;  %11686 = vmatprep.mubr.msk.bf16.mxu1 %vm13417_vm3, %v17005_v33  ;;  %v12824_v34 = vld [vmem:[%s13548_s16 + $0x188] ss:$28 sps:$4 sm:$0xff]  }
  0x39   : > { %725 = vmatpush1.bf16.msra.mxu0 %v12802_v35  ;;  %11679 = vmatpush3.bf16.msra.mxu1 %v12805_v36  ;;  %v12829_v35 = vld [vmem:[%s13548_s16 + $0x1c4] ss:$28 sps:$4 sm:$0xff]   ;;  %v12832_v36 = vld [vmem:[%s13548_s16 + $0x1fc] ss:$28 sps:$4 sm:$0x3f]  }
  0x3a   : > { %726 = vmatprep.subr.bf16.mxu0 %v12808_v37  ;;  %11680 = vmatprep.subr.bf16.mxu1 %v17005_v33  ;;  %v12827_v37 = vld [vmem:[%s13548_s16 + $0x1c0] ss:$28 sps:$4 sm:$0xff]  }
  0x3d   : > { %727 = vmatpush1.bf16.msra.mxu0 %v12806_v38  ;;  %11681 = vmatpush3.bf16.msra.mxu1 %v12809_v39  ;;  %v12830_v38 = vld [vmem:[%s13548_s16 + $0x1f8] ss:$28 sps:$4 sm:$0x3f]   ;;  %v1562_v39 = vand.u32 %v12832_v36, %v13569_v20 }
  0x3e   : > { %728 = vmatprep.subr.bf16.mxu0 %v12812_v40  ;;  %11682 = vmatprep.subr.bf16.mxu1 %v17005_v33  ;;  %v1559_v40 = vand.u32 %v12830_v38, %v13569_v20 }
  0x41   : > { %729 = vmatpush1.bf16.msra.mxu0 %v12810_v42  ;;  %11683 = vmatpush3.bf16.msra.mxu1 %v12813_v43  ;;  %v12833_v42 = vld [vmem:[%s13548_s16 + $0x120] ss:$28 sps:$4 sm:$0xff]  }
  0x42   : > { %730 = vmatprep.subr.bf16.mxu0 %v635_v46  ;;  %11684 = vmatprep.subr.bf16.mxu1 %v17005_v33  ;;  %v13653_v43 = vld [vmem:[%s16968_s1] sm:$0x7]  ;;  %v12841_v46 = vld [vmem:[%s13548_s16 + $0x194] ss:$28 sps:$4 sm:$0xff]  }
  0x45   : > { %731 = vmatpush1.bf16.msra.mxu0 %v632_v47  ;;  %11685 = vmatpush3.bf16.msra.mxu1 %v638_v48  ;;  %v12839_v47 = vld [vmem:[%s13548_s16 + $0x190] ss:$28 sps:$4 sm:$0xff]  }
  0x46   : > { %1579 = vmatprep.subr.bf16.mxu1 %v12820_v29  ;;  %v12844_v48 = vld [vmem:[%s13548_s16 + $0x1cc] ss:$28 sps:$4 sm:$0xff]  }
  0x48   : > { %10322 = vmatmul.mubr.msk.bf16.vlgmr.msra.gmra.mrb[4].mxu0 %vm611_vm2, %v391_v30  ;;  %11687 = vmatmul.mubr.msk.bf16.vlgmr.msra.gmra.mrb[4].mxu1 %vm611_vm2, %v391_v30  ;;  %v12823_v30 = vld [vmem:[%s13548_s16 + $0x154] ss:$28 sps:$4 sm:$0xff]  }
  0x49   : > { %1611 = vmatprep.mubr.bf16.mxu1 %v13414_v0  ;;  %975 = vmatprep.mubr.bf16.mxu0 %v13414_v0 }
  0x4a   : > { %1580 = vmatpush1.bf16.msra.mxu1 %v12818_v28 }
  0x4b   : > { %1581 = vmatprep.subr.bf16.mxu1 %v12823_v30 }
  0x4e   : > { %1582 = vmatpush1.bf16.msra.mxu1 %v12821_v31 }
  0x4f   : > { %1583 = vmatprep.subr.bf16.mxu1 %v12826_v32 }
  0x52   : > { %1584 = vmatpush1.bf16.msra.mxu1 %v12824_v34 }
  0x53   : > { %1585 = vmatprep.subr.bf16.mxu1 %v12829_v35 }
  0x56   : > { %1586 = vmatpush1.bf16.msra.mxu1 %v12827_v37 }
  0x57   : > { %1587 = vmatprep.subr.bf16.mxu1 %v1562_v39 }
  0x5a   : > { %1588 = vmatpush1.bf16.msra.mxu1 %v1559_v40 }
  0x5b   : > { %1620 = vmatprep.subr.bf16.mxu1 %v12835_v41 }
  0x5d   : > { %10422 = vmatmul.mubr.msk.bf16.vlgmr.msra.gmra.mrb[8].mxu1 %vm611_vm2, %v13653_v43 }
  0x5e   : > { %1621 = vmatpush1.bf16.msra.mxu1 %v12833_v42  ;;  %1652 = vmatprep.mubr.bf16.mxu1 %v13414_v0 }
  0x5f   : > { %1622 = vmatprep.subr.bf16.mxu1 %v12838_v44 }
  0x62   : > { %1623 = vmatpush1.bf16.msra.mxu1 %v12836_v45 }
  0x63   : > { %1624 = vmatprep.subr.bf16.mxu1 %v12841_v46 }
  0x66   : > { %1625 = vmatpush1.bf16.msra.mxu1 %v12839_v47 }
  0x67   : > { %1626 = vmatprep.subr.bf16.mxu1 %v12844_v48 }
  0x9a   : > { %v13616_v57 = vpop.permute.xlu0 %435 }
 0x107   : > { %v13614_v49 = vpop.f32.mrb[0].mxu0  ;;  %v715_v50 = vpop.f32.mrb[0].mxu1 }
 0x108   : > { %v676_v51 = vpop.f32.mrb[1].mxu0  ;;  %v717_v52 = vpop.f32.mrb[1].mxu1  ;;  %v716_v59 = vadd.f32 %v715_v50, %v13616_v57  ;;  %v12847_v50 = vld [vmem:[%s13548_s16 + $0x204] ss:$28 sps:$4 sm:$0x3f]  }
 0x109   : > { %v678_v53 = vpop.f32.mrb[2].mxu0  ;;  %v719_v54 = vpop.f32.mrb[2].mxu1  ;;  %v13619_v58 = vadd.f32 %v676_v51, %v13616_v57  ;;  %v718_v14 = vadd.f32 %v717_v52, %v13616_v57  ;;  %v12842_v51 = vld [vmem:[%s13548_s16 + $0x1c8] ss:$28 sps:$4 sm:$0xff]  }
 0x10a   : > { %v679_v55 = vpop.f32.mrb[3].mxu0  ;;  %v720_v56 = vpop.f32.mrb[3].mxu1  ;;  %v805_v7 = vmax.f32 %v716_v59, 0.0  ;;  %v12845_v52 = vld [vmem:[%s13548_s16 + $0x200] ss:$28 sps:$4 sm:$0x3f]   ;;  %v1568_v53 = vand.u32 %v12847_v50, %v13569_v20  ;;  %1627 = vmatpush1.bf16.msra.mxu1 %v12842_v51 }
 0x10b   : > { %v804_v6 = vmax.f32 %v13619_v58, 0.0  ;;  %v806_v17 = vmax.f32 %v718_v14, 0.0  ;;  %v1565_v54 = vand.u32 %v12845_v52, %v13569_v20  ;;  %v12848_v55 = vld [vmem:[%s13548_s16 + $0x130] ss:$28 sps:$4 sm:$0xff]   ;;  %v12849_v56 = vld [vmem:[%s13548_s16 + $0x168] ss:$28 sps:$4 sm:$0xff]  }
 0x10c   : > { %1628 = vmatprep.subr.bf16.mxu1 %v1568_v53  ;;  %v12850_v59 = vld [vmem:[%s13548_s16 + $0x1a0] ss:$28 sps:$4 sm:$0xff]  }
 0x10d   : > { %v12332_v16 = vpack.i.bf16 %v805_v7, %v804_v6 }
 0x10e   : > { %1629 = vmatpush1.bf16.msra.mxu1 %v1565_v54 }
 0x10f   : > { %11690 = vmatprep.subr.bf16.mxu1 %v17005_v33 }
 0x111   : > { %10423 = vmatmul.mubr.msk.bf16.vlgmr.msra.gmra.mrb[12].mxu1 %vm611_vm2, %v13653_v43 }
 0x112   : > { %11691 = vmatpush3.bf16.msra.mxu1 %v12848_v55  ;;  %11700 = vmatprep.mubr.msk.bf16.mxu1 %vm13417_vm3, %v17005_v33 }
 0x113   : > { %11692 = vmatprep.subr.bf16.mxu1 %v17005_v33 }
 0x116   : > { %11693 = vmatpush3.bf16.msra.mxu1 %v12849_v56 }
 0x117   : > { %11694 = vmatprep.subr.bf16.mxu1 %v17005_v33 }
 0x11a   : > { %11695 = vmatpush3.bf16.msra.mxu1 %v12850_v59 }
 0x11b   : > { %v756_v60 = vpop.f32.mrb[4].mxu0  ;;  %v797_v61 = vpop.f32.mrb[4].mxu1  ;;  %11696 = vmatprep.subr.bf16.mxu1 %v17005_v33 }
 0x11c   : > { %v757_v62 = vadd.f32 %v756_v60, %v13616_v57  ;;  %v798_v63 = vadd.f32 %v797_v61, %v13616_v57  ;;  %v758_v1 = vpop.f32.mrb[5].mxu0  ;;  %v11688_v2 = vpop.f32.mrb[5].mxu1  ;;  %v12851_v60 = vld [vmem:[%s13548_s16 + $0x1d8] ss:$28 sps:$4 sm:$0xff]  }
 0x11d   : > { %v759_v3 = vadd.f32 %v758_v1, %v13616_v57  ;;  %v760_v4 = vpop.f32.mrb[6].mxu0  ;;  %v800_v5 = vpop.f32.mrb[6].mxu1  ;;  %v12852_v61 = vld [vmem:[%s13548_s16 + $0x210] ss:$28 sps:$4 sm:$0x3f]  }
 0x11e   : > { %v807_v8 = vmax.f32 %v757_v62, 0.0  ;;  %v809_v9 = vmax.f32 %v798_v63, 0.0  ;;  %v761_v10 = vpop.f32.mrb[7].mxu0  ;;  %v11689_v12 = vpop.f32.mrb[7].mxu1  ;;  %11697 = vmatpush3.bf16.msra.mxu1 %v12851_v60  ;;  %v1577_v62 = vand.u32 %v12852_v61, %v13569_v20  ;;  %v675_v4 = vadd.f32 %v13614_v49, %v13616_v57  ;;  %v1376_v61 = vld [vmem:[%s16969_s2] sm:$0x3f] }
 0x11f   : > { %v808_v13 = vmax.f32 %v759_v3, 0.0  ;;  %11698 = vmatprep.subr.bf16.mxu1 %v17005_v33 }
 0x120   : > { %833 = vrot.lane.b32.xlu1 %v809_v9, %s16999_s25 }
 0x121   : > { %v12327_v15 = vpack.i.bf16 %v808_v13, %v807_v8 }
 0x122   : > { %11699 = vmatpush3.bf16.msra.mxu1 %v1577_v62 }
 0x123   : > { %12328 = vrot.lane.b32.xlu0 %v12327_v15, %s16999_s25 }
 0x124   : > { %12333 = vrot.lane.b32.xlu1 %v12332_v16, %s16999_s25 }
 0x125   : > { %11701 = vmatmul.mubr.msk.bf16.vlgmr.msra.gmra.mrb[16].mxu1 %vm611_vm2, %v13653_v43 }
 0x126   : > { %2531 = vmatprep.mubr.bf16.mxu1 %v13414_v0 }
 0x127   : > { %817 = vrot.lane.b32.xlu0 %v806_v17, %s16999_s25 }
 0x130   : > { %v13741_v54 = vpop.f32.mrb[8].mxu1 }
 0x131   : > { %v13745_v55 = vpop.f32.mrb[9].mxu1 }
 0x132   : > { %v1617_v56 = vpop.f32.mrb[10].mxu1 }
 0x133   : > { %v1618_v59 = vpop.f32.mrb[11].mxu1  ;;  %v12872_v56 = vld [vmem:[%s13548_s16 + $0x20c] ss:$28 sps:$4 sm:$0x3f]  }
 0x134   : > { %v12867_v59 = vld [vmem:[%s13548_s16 + $0x1d0] ss:$28 sps:$4 sm:$0xff]  }
 0x192   : > { %v834_v22 = vpop.permute.xlu1 %833 }
 0x195   : > { %v12329_v18 = vpop.permute.xlu0 %12328 }
 0x196   : > { %v12331_v19 = vunpack.i.h.bf16 %v12329_v18  ;;  %v12330_v21 = vunpack.i.l.bf16 %v12329_v18  ;;  %v12334_v63 = vpop.permute.xlu1 %12333 }
 0x197   : > { %v12336_v1 = vunpack.i.h.bf16 %v12334_v63  ;;  %v12335_v2 = vunpack.i.l.bf16 %v12334_v63 }
 0x198   : > { %v835_v23 = vsel %vm819_vm4, %v12330_v21, %v12331_v19  ;;  %v836_v24 = vsel %vm819_vm4, %v12331_v19, %v834_v22 }
 0x199   : > { %v839_v25 = vmax.f32 %v806_v17, %v835_v23  ;;  %v840_v26 = vmax.f32 %v807_v8, %v836_v24  ;;  %v818_v3 = vpop.permute.xlu0 %817  ;;  %v820_v7 = vsel %vm819_vm4, %v12335_v2, %v12336_v1  ;;  %v803_v8 = vmax.f32 %v675_v4, 0.0 }
 0x19a   : > { %v821_v5 = vsel %vm819_vm4, %v12336_v1, %v818_v3 }
 0x19b   : > { %v12337_v27 = vpack.i.bf16 %v840_v26, %v839_v25  ;;  %v825_v10 = vmax.f32 %v804_v6, %v821_v5  ;;  %v824_v14 = vmax.f32 %v803_v8, %v820_v7 }
 0x19d   : > { %12338 = vrot.lane.b32.xlu1 %v12337_v27, %s16995_s29 }
 0x1e4   : > { %v13751_v60 = vpop.f32.mrb[12].mxu1 }
 0x1e5   : > { %v13756_v62 = vpop.f32.mrb[13].mxu1 }
 0x1e6   : > { %v1658_v63 = vpop.f32.mrb[14].mxu1 }
 0x1e7   : > { %v1659_v1 = vpop.f32.mrb[15].mxu1 }
 0x1f8   : > { %v13758_v2 = vpop.f32.mrb[16].mxu1 }
 0x1f9   : > { %v11702_v3 = vpop.f32.mrb[17].mxu1 }
 0x1fa   : > { %v1739_v4 = vpop.f32.mrb[18].mxu1 }
 0x1fb   : > { %v11703_v5 = vpop.f32.mrb[19].mxu1 }
 0x20f   : > { %v12339_v9 = vpop.permute.xlu1 %12338 }
 0x210   : > { %v12341_v12 = vunpack.i.h.bf16 %v12339_v9  ;;  %v12340_v13 = vunpack.i.l.bf16 %v12339_v9 }
 0x212   : > { %v848_v15 = vsel %vm847_vm5, %v12340_v13, %v12341_v12  ;;  %v852_v16 = vmax.f32 %v825_v10, %v12341_v12 }
 0x213   : > { %v851_v17 = vmax.f32 %v824_v14, %v848_v15 }
 0x214   : > { %v866_v18 = vrot.slane %v852_v16, 4  ;;  %v856_v19 = vrot.slane %v852_v16, 2  ;;  %v876_v24 = vrot.slane %v852_v16, 6 }
 0x215   : > { %v865_v49 = vrot.slane %v851_v17, 4  ;;  %v855_v57 = vrot.slane %v851_v17, 2  ;;  %v875_v23 = vrot.slane %v851_v17, 6  ;;  %v12357_v58 = vpack.i.bf16 %v852_v16, %v851_v17 }
 0x217   : > { %v12347_v21 = vpack.i.bf16 %v866_v18, %v865_v49  ;;  %v12342_v22 = vpack.i.bf16 %v856_v19, %v855_v57  ;;  %v12352_v6 = vpack.i.bf16 %v876_v24, %v875_v23  ;;  %v12854_v24 = vld [vmem:[%s16970_s3 + $0x18] sm:$0xff]  }
 0x219   : > { %12348 = vrot.lane.b32.xlu1 %v12347_v21, %s16997_s13  ;;  %12343 = vrot.lane.b32.xlu0 %v12342_v22, %s16991_s14 }
 0x21d   : > { %12358 = vrot.lane.b32.xlu1 %v12357_v58, %s16989_s15  ;;  %12353 = vrot.lane.b32.xlu0 %v12352_v6, %s16987_s22 }
 0x28b   : > { %v12349_v25 = vpop.permute.xlu1 %12348  ;;  %v12344_v26 = vpop.permute.xlu0 %12343 }
 0x28c   : > { %v12351_v27 = vunpack.i.h.bf16 %v12349_v25  ;;  %v12350_v28 = vunpack.i.l.bf16 %v12349_v25  ;;  %v12346_v29 = vunpack.i.h.bf16 %v12344_v26  ;;  %v12345_v30 = vunpack.i.l.bf16 %v12344_v26 }
 0x28e   : > { %v872_v31 = vsel %vm871_vm6, %v12350_v28, %v12351_v27  ;;  %v894_v32 = vsel %vm616_vm1, %v852_v16, %v12346_v29  ;;  %v897_v34 = vsel %vm895_vm8, %v12346_v29, %v12351_v27  ;;  %v862_v35 = vsel %vm861_vm7, %v12345_v30, %v12346_v29  ;;  %v12853_v16 = vld [vmem:[%s16970_s3 + $0x8] sm:$0xff]   ;;  %v12855_v28 = vld [vmem:[%s16970_s3 + $0x20] sm:$0xff]  }
 0x28f   : > { %v13701_v36 = vpack.c.bf16 %v897_v34, %v894_v32  ;;  %v893_v37 = vsel %vm616_vm1, %v851_v17, %v862_v35  ;;  %v896_v38 = vsel %vm895_vm8, %v862_v35, %v872_v31  ;;  %v12359_v39 = vpop.permute.xlu1 %12358  ;;  %v12354_v40 = vpop.permute.xlu0 %12353  ;;  %v12856_v34 = vld [vmem:[%s16970_s3] sm:$0xff]  }
 0x290   : > { %v13705_v41 = vpack.c.bf16 %v896_v38, %v893_v37  ;;  %v12361_v42 = vunpack.i.h.bf16 %v12359_v39  ;;  %v12360_v44 = vunpack.i.l.bf16 %v12359_v39  ;;  %v12356_v45 = vunpack.i.h.bf16 %v12354_v40 }
 0x291   : > { %v12355_v46 = vunpack.i.l.bf16 %v12354_v40  ;;  %921 = vrot.lane.b32.xlu1 %v13701_v36, %s16979_s24 }
 0x292   : > { %v890_v47 = vsel %vm889_vm9, %v12360_v44, %v12361_v42  ;;  %v900_v48 = vsel %vm898_vm11, %v12351_v27, %v12356_v45  ;;  %919 = vrot.lane.b32.xlu0 %v13705_v41, %s16979_s24 }
 0x293   : > { %v13713_v50 = vpack.c.bf16 %v12361_v42, %v900_v48  ;;  %v882_v51 = vsel %vm16994_vm10, %v12355_v46, %v12356_v45  ;;  %v12859_v42 = vld [vmem:[%s13548_s16 + $0x12c] ss:$28 sps:$4 sm:$0xff]   ;;  %v12860_v46 = vld [vmem:[%s16970_s3 + $0x10] sm:$0xff]   ;;  %v12863_v48 = vld [vmem:[%s13548_s16 + $0x164] ss:$28 sps:$4 sm:$0xff]  }
 0x294   : > { %v899_v52 = vsel %vm898_vm11, %v872_v31, %v882_v51  ;;  %v12866_v51 = vld [vmem:[%s13548_s16 + $0x19c] ss:$28 sps:$4 sm:$0xff]  }
 0x295   : > { %v13717_v53 = vpack.c.bf16 %v890_v47, %v899_v52  ;;  %925 = vrot.lane.b32.xlu1 %v13713_v50, %s16979_s24  ;;  %v12857_v47 = vld [vmem:[%s13548_s16 + $0x128] ss:$28 sps:$4 sm:$0xff]   ;;  %v12864_v52 = vld [vmem:[%s13548_s16 + $0x198] ss:$28 sps:$4 sm:$0xff]  }
 0x297   : > { %923 = vrot.lane.b32.xlu0 %v13717_v53, %s16979_s24  ;;  %s17001_s24 = smov 126   ;;  %v1144_v31 = vsel %vm936_vm13, %v13717_v53, 0 }
 0x299   : > { %999 = vrot.lane.b32.xlu1 %v13701_v36, %s16983_s30 }
 0x29b   : > { %997 = vrot.lane.b32.xlu0 %v13705_v41, %s16983_s30 }
 0x29d   : > { %1003 = vrot.lane.b32.xlu1 %v13713_v50, %s16983_s30 }
 0x29f   : > { %1001 = vrot.lane.b32.xlu0 %v13717_v53, %s16983_s30  ;;  %s17072_s30 = smov 127  }
 0x2a1   : > { %1072 = vrot.lane.b32.xlu1 %v13701_v36, %s16981_s12 }
 0x2a3   : > { %1070 = vrot.lane.b32.xlu0 %v13705_v41, %s16981_s12 }
 0x2a5   : > { %1076 = vrot.lane.b32.xlu1 %v13713_v50, %s16981_s12 }
 0x2a7   : > { %1074 = vrot.lane.b32.xlu0 %v13717_v53, %s16981_s12  ;;  %s17073_s12 = smov 125  }
 0x2a9   : > { %1199 = vrot.lane.b32.xlu1 %v13701_v36, %s17001_s24 }
 0x2ab   : > { %1197 = vrot.lane.b32.xlu0 %v13705_v41, %s17001_s24 }
 0x2ad   : > { %1203 = vrot.lane.b32.xlu1 %v13713_v50, %s17001_s24 }
 0x2af   : > { %1201 = vrot.lane.b32.xlu0 %v13717_v53, %s17001_s24  ;;  %v12869_v53 = vld [vmem:[%s13548_s16 + $0x1d4] ss:$28 sps:$4 sm:$0xff]  }
 0x2b3   : > { %1379 = vperm.xlu0 %12326, %v1376_v61   ;;  %v12870_v61 = vld [vmem:[%s13548_s16 + $0x208] ss:$28 sps:$4 sm:$0x3f]  }
 0x2b4   : > { %v1571_v63 = vand.u32 %v12870_v61, %v13569_v20  ;;  %v12906_v61 = vld [vmem:[%s13548_s16 + $0x2f0] ss:$28 sps:$4 sm:$0xff]  }
 0x303   : > { %v922_v7 = vpop.permute.xlu1 %921 }
 0x304   : > { %943 = vmatprep.subr.bf16.mxu0 %v922_v7  ;;  %v920_v8 = vpop.permute.xlu0 %919 }
 0x305   : > { %v928_v9 = vsel %vm16993_vm12, %v920_v8, %v922_v7 }
 0x306   : > { %944 = vmatpush1.bf16.msra.mxu0 %v928_v9 }
 0x307   : > { %v926_v10 = vpop.permute.xlu1 %925 }
 0x308   : > { %10327 = vmatprep.subr.msk.bf16.mxu0 %vm936_vm13, %v926_v10 }
 0x309   : > { %v924_v12 = vpop.permute.xlu0 %923 }
 0x30a   : > { %v929_v13 = vsel %vm16993_vm12, %v924_v12, %v926_v10 }
 0x30b   : > { %v938_v14 = vsel %vm936_vm13, %v929_v13, 0  ;;  %v1000_v15 = vpop.permute.xlu1 %999 }
 0x30c   : > { %946 = vmatpush1.bf16.msra.mxu0 %v938_v14 }
 0x30d   : > { %1019 = vmatprep.subr.bf16.mxu0 %v1000_v15  ;;  %v998_v17 = vpop.permute.xlu0 %997 }
 0x30e   : > { %v1006_v18 = vsel %vm1005_vm14, %v998_v17, %v1000_v15 }
 0x30f   : > { %10328 = vmatmul.mubr.msk.bf16.vlgmr.msra.gmra.mrb[8].mxu0 %vm932_vm15, %v12853_v16  ;;  %v1004_v19 = vpop.permute.xlu1 %1003 }
 0x310   : > { %1020 = vmatpush1.bf16.msra.mxu0 %v1006_v18  ;;  %1051 = vmatprep.mubr.bf16.mxu0 %v13414_v0 }
 0x311   : > { %10334 = vmatprep.subr.msk.bf16.mxu0 %vm936_vm13, %v1004_v19  ;;  %v1002_v49 = vpop.permute.xlu0 %1001 }
 0x312   : > { %v1007_v57 = vsel %vm1005_vm14, %v1002_v49, %v1004_v19 }
 0x313   : > { %v1014_v21 = vsel %vm936_vm13, %v1007_v57, 0  ;;  %v1073_v22 = vpop.permute.xlu1 %1072 }
 0x314   : > { %1022 = vmatpush1.bf16.msra.mxu0 %v1014_v21 }
 0x315   : > { %1092 = vmatprep.subr.bf16.mxu0 %v1073_v22  ;;  %v1071_v23 = vpop.permute.xlu0 %1070 }
 0x316   : > { %v1079_v25 = vsel %vm16986_vm0, %v1071_v23, %v1073_v22 }
 0x317   : > { %v1077_v58 = vpop.permute.xlu1 %1076 }
 0x319   : > { %v1075_v6 = vpop.permute.xlu0 %1074 }
 0x31a   : > { %v1080_v26 = vsel %vm16986_vm0, %v1075_v6, %v1077_v58  ;;  %vm1205_vm0 = vcmask 1031168   ;;  %v12873_v6 = vld [vmem:[%s13548_s16 + $0x230] ss:$28 sps:$4 sm:$0xff]  }
 0x31b   : > { %10335 = vmatmul.mubr.msk.bf16.vlgmr.msra.gmra.mrb[8].mxu0 %vm932_vm15, %v12854_v24  ;;  %v1087_v27 = vsel %vm936_vm13, %v1080_v26, 0  ;;  %v1200_v30 = vpop.permute.xlu1 %1199  ;;  %v12878_v26 = vld [vmem:[%s13548_s16 + $0x26c] ss:$28 sps:$4 sm:$0xff]  }
 0x31c   : > { %1093 = vmatpush1.bf16.msra.mxu0 %v1079_v25  ;;  %1124 = vmatprep.mubr.bf16.mxu0 %v13414_v0  ;;  %v12875_v25 = vld [vmem:[%s13548_s16 + $0x234] ss:$28 sps:$4 sm:$0xff]  }
 0x31d   : > { %10339 = vmatprep.subr.msk.bf16.mxu0 %vm936_vm13, %v1077_v58  ;;  %v1198_v29 = vpop.permute.xlu0 %1197  ;;  %2499 = vmatprep.subr.bf16.mxu1 %v12875_v25 }
 0x31e   : > { %v1206_v37 = vsel %vm1205_vm0, %v1198_v29, %v1200_v30  ;;  %2500 = vmatpush1.bf16.msra.mxu1 %v12873_v6  ;;  %v12879_v29 = vld [vmem:[%s13548_s16 + $0x2a0] ss:$28 sps:$4 sm:$0xff]  }
 0x31f   : > { %v1204_v35 = vpop.permute.xlu1 %1203  ;;  %2501 = vmatprep.subr.bf16.mxu1 %v12878_v26 }
 0x320   : > { %1095 = vmatpush1.bf16.msra.mxu0 %v1087_v27  ;;  %v12876_v27 = vld [vmem:[%s13548_s16 + $0x268] ss:$28 sps:$4 sm:$0xff]  }
 0x321   : > { %1149 = vmatprep.subr.bf16.mxu0 %v13701_v36  ;;  %v1202_v32 = vpop.permute.xlu0 %1201 }
 0x322   : > { %v1207_v39 = vsel %vm1205_vm0, %v1202_v32, %v1204_v35  ;;  %2502 = vmatpush1.bf16.msra.mxu1 %v12876_v27  ;;  %v12882_v32 = vld [vmem:[%s13548_s16 + $0x2d8] ss:$28 sps:$4 sm:$0xff]  }
 0x323   : > { %v1214_v44 = vsel %vm936_vm13, %v1207_v39, 0  ;;  %v12888_v39 = vld [vmem:[%s13548_s16 + $0x238] ss:$28 sps:$4 sm:$0xff]  }
 0x327   : > { %10340 = vmatmul.mubr.msk.bf16.vlgmr.msra.gmra.mrb[8].mxu0 %vm932_vm15, %v12855_v28  ;;  %v12881_v28 = vld [vmem:[%s13548_s16 + $0x2a4] ss:$28 sps:$4 sm:$0xff]  }
 0x328   : > { %1150 = vmatpush1.bf16.msra.mxu0 %v13705_v41  ;;  %1181 = vmatprep.mubr.bf16.mxu0 %v13414_v0 }
 0x329   : > { %10342 = vmatprep.subr.msk.bf16.mxu0 %vm936_vm13, %v13713_v50  ;;  %v12861_v50 = vld [vmem:[%s13548_s16 + $0x160] ss:$28 sps:$4 sm:$0xff]   ;;  %2503 = vmatprep.subr.bf16.mxu1 %v12881_v28 }
 0x32a   : > { %2504 = vmatpush1.bf16.msra.mxu1 %v12879_v29 }
 0x32c   : > { %1152 = vmatpush1.bf16.msra.mxu0 %v1144_v31  ;;  %v12887_v31 = vld [vmem:[%s13548_s16 + $0x314] ss:$28 sps:$4 sm:$0x3f]  }
 0x32d   : > { %1219 = vmatprep.subr.bf16.mxu0 %v1200_v30  ;;  %v12884_v30 = vld [vmem:[%s13548_s16 + $0x2dc] ss:$28 sps:$4 sm:$0xff]  }
 0x32e   : > { %2505 = vmatprep.subr.bf16.mxu1 %v12884_v30 }
 0x32f   : > { %2506 = vmatpush1.bf16.msra.mxu1 %v12882_v32 }
 0x332   : > { %v13796_v36 = vpop.permute.xlu0 %1379 }
 0x333   : > { %10343 = vmatmul.mubr.msk.bf16.vlgmr.msra.gmra.mrb[8].mxu0 %vm932_vm15, %v12856_v34  ;;  %v1737_v38 = vadd.f32 %v13758_v2, %v13796_v36  ;;  %v1657_v41 = vadd.f32 %v13756_v62, %v13796_v36  ;;  %v1574_v62 = vand.u32 %v12872_v56, %v13569_v20  ;;  %v1655_v12 = vadd.f32 %v13751_v60, %v13796_v36  ;;  %v12885_v34 = vld [vmem:[%s13548_s16 + $0x310] ss:$28 sps:$4 sm:$0x3f]   ;;  %v12904_v56 = vld [vmem:[%s13548_s16 + $0x280] ss:$28 sps:$4 sm:$0xff]  }
 0x334   : > { %1220 = vmatpush1.bf16.msra.mxu0 %v1206_v37  ;;  %1251 = vmatprep.mubr.bf16.mxu0 %v13414_v0  ;;  %v2479_v37 = vand.u32 %v12885_v34, %v13569_v20 }
 0x335   : > { %10345 = vmatprep.subr.msk.bf16.mxu0 %vm936_vm13, %v1204_v35  ;;  %v1748_v40 = vmax.f32 %v1737_v38, 0.0  ;;  %v1745_v45 = vmax.f32 %v1657_v41, 0.0  ;;  %v1744_v18 = vmax.f32 %v1655_v12, 0.0  ;;  %v2482_v35 = vand.u32 %v12887_v31, %v13569_v20  ;;  %v12890_v38 = vld [vmem:[%s13548_s16 + $0x23c] ss:$28 sps:$4 sm:$0xff]  }
 0x336   : > { %v12893_v41 = vld [vmem:[%s13548_s16 + $0x274] ss:$28 sps:$4 sm:$0xff]  }
 0x337   : > { %1771 = vrot.lane.b32.xlu0 %v1748_v40, %s16999_s25  ;;  %2507 = vmatprep.subr.bf16.mxu1 %v2482_v35  ;;  %v13871_v40 = vld [vmem:[%s16968_s1] sm:$0x7] }
 0x338   : > { %1222 = vmatpush1.bf16.msra.mxu0 %v1214_v44  ;;  %2508 = vmatpush1.bf16.msra.mxu1 %v2479_v37  ;;  %v12896_v44 = vld [vmem:[%s13548_s16 + $0x2ac] ss:$28 sps:$4 sm:$0xff]  }
 0x339   : > { %1661 = vmatprep.subr.bf16.mxu0 %v12859_v42  ;;  %2540 = vmatprep.subr.bf16.mxu1 %v12890_v38  ;;  %v12891_v42 = vld [vmem:[%s13548_s16 + $0x270] ss:$28 sps:$4 sm:$0xff]  }
 0x33b   : > { %1756 = vrot.lane.b32.xlu0 %v1745_v45, %s16999_s25  ;;  %10524 = vmatmul.mubr.msk.bf16.vlgmr.msra.gmra.mrb[20].mxu1 %vm611_vm2, %v13871_v40 }
 0x33c   : > { %2541 = vmatpush1.bf16.msra.mxu1 %v12888_v39  ;;  %2572 = vmatprep.mubr.bf16.mxu1 %v13414_v0 }
 0x33d   : > { %2542 = vmatprep.subr.bf16.mxu1 %v12893_v41 }
 0x33f   : > { %10346 = vmatmul.mubr.msk.bf16.vlgmr.msra.gmra.mrb[8].mxu0 %vm932_vm15, %v12860_v46  ;;  %v12899_v46 = vld [vmem:[%s13548_s16 + $0x2e4] ss:$28 sps:$4 sm:$0xff]  }
 0x340   : > { %1662 = vmatpush1.bf16.msra.mxu0 %v12857_v47  ;;  %1693 = vmatprep.mubr.bf16.mxu0 %v13414_v0  ;;  %v12902_v47 = vld [vmem:[%s13548_s16 + $0x31c] ss:$28 sps:$4 sm:$0x3f]  }
 0x341   : > { %1663 = vmatprep.subr.bf16.mxu0 %v12863_v48  ;;  %2543 = vmatpush1.bf16.msra.mxu1 %v12891_v42  ;;  %v12897_v48 = vld [vmem:[%s13548_s16 + $0x2e0] ss:$28 sps:$4 sm:$0xff]  }
 0x342   : > { %2544 = vmatprep.subr.bf16.mxu1 %v12896_v44 }
 0x344   : > { %1664 = vmatpush1.bf16.msra.mxu0 %v12861_v50  ;;  %v12900_v50 = vld [vmem:[%s13548_s16 + $0x318] ss:$28 sps:$4 sm:$0x3f]  }
 0x345   : > { %1665 = vmatprep.subr.bf16.mxu0 %v12866_v51  ;;  %v2488_v51 = vand.u32 %v12902_v47, %v13569_v20 }
 0x348   : > { %1666 = vmatpush1.bf16.msra.mxu0 %v12864_v52  ;;  %v2485_v52 = vand.u32 %v12900_v50, %v13569_v20 }
 0x349   : > { %1667 = vmatprep.subr.bf16.mxu0 %v12869_v53  ;;  %v12903_v53 = vld [vmem:[%s13548_s16 + $0x248] ss:$28 sps:$4 sm:$0xff]  }
 0x34c   : > { %1668 = vmatpush1.bf16.msra.mxu0 %v12867_v59  ;;  %v12905_v59 = vld [vmem:[%s13548_s16 + $0x2b8] ss:$28 sps:$4 sm:$0xff]  }
 0x34d   : > { %1669 = vmatprep.subr.bf16.mxu0 %v1574_v62  ;;  %v12907_v62 = vld [vmem:[%s13548_s16 + $0x328] ss:$28 sps:$4 sm:$0x3f]  }
 0x350   : > { %1670 = vmatpush1.bf16.msra.mxu0 %v1571_v63  ;;  %v2497_v63 = vand.u32 %v12907_v62, %v13569_v20 }
 0x353   : > { %10424 = vmatmul.mubr.msk.bf16.vlgmr.msra.gmra.mrb[12].mxu0 %vm611_vm2, %v13653_v43  ;;  %v13842_v43 = vadd.f32 %v13745_v55, %v13796_v36 }
 0x354   : > { %1902 = vmatprep.mubr.bf16.mxu0 %v13414_v0 }
 0x355   : > { %v1743_v17 = vmax.f32 %v13842_v43, 0.0 }
 0x357   : > { %v12367_v19 = vpack.i.bf16 %v1744_v18, %v1743_v17 }
 0x3a9   : > { %v1772_v57 = vpop.permute.xlu0 %1771 }
 0x412   : > { %v13830_v1 = vpop.f32.mrb[8].mxu0 }
 0x413   : > { %v13832_v2 = vpop.f32.mrb[9].mxu0 }
 0x414   : > { %v13834_v3 = vpop.f32.mrb[10].mxu0 }
 0x415   : > { %v13836_v4 = vpop.f32.mrb[11].mxu0 }
 0x426   : > { %v1695_v5 = vpop.f32.mrb[12].mxu0 }
 0x427   : > { %v1696_v7 = vadd.f32 %v1695_v5, %v13796_v36  ;;  %v1697_v8 = vpop.f32.mrb[13].mxu0 }
 0x428   : > { %v1698_v9 = vadd.f32 %v1697_v8, %v13796_v36  ;;  %v1699_v10 = vpop.f32.mrb[14].mxu0 }
 0x429   : > { %v1746_v13 = vmax.f32 %v1696_v7, 0.0  ;;  %v1700_v14 = vpop.f32.mrb[15].mxu0  ;;  %v1757_v10 = vpop.permute.xlu0 %1756 }
 0x42a   : > { %v1747_v15 = vmax.f32 %v1698_v9, 0.0  ;;  %v1614_v9 = vadd.f32 %v13741_v54, %v13796_v36 }
 0x42c   : > { %v12362_v16 = vpack.i.bf16 %v1747_v15, %v1746_v13  ;;  %v1742_v14 = vmax.f32 %v1614_v9, 0.0 }
 0x42e   : > { %12363 = vrot.lane.b32.xlu1 %v12362_v16, %s16999_s25 }
 0x432   : > { %12368 = vrot.lane.b32.xlu1 %v12367_v19, %s16999_s25 }
 0x4a0   : > { %v12364_v55 = vpop.permute.xlu1 %12363 }
 0x4a1   : > { %v12366_v60 = vunpack.i.h.bf16 %v12364_v55  ;;  %v12365_v49 = vunpack.i.l.bf16 %v12364_v55 }
 0x4a3   : > { %v1773_v21 = vsel %vm819_vm4, %v12365_v49, %v12366_v60  ;;  %v1774_v22 = vsel %vm819_vm4, %v12366_v60, %v1772_v57 }
 0x4a4   : > { %v1777_v23 = vmax.f32 %v1745_v45, %v1773_v21  ;;  %v1778_v24 = vmax.f32 %v1746_v13, %v1774_v22  ;;  %v12894_v45 = vld [vmem:[%s13548_s16 + $0x2a8] ss:$28 sps:$4 sm:$0xff]   ;;  %v12369_v5 = vpop.permute.xlu1 %12368 }
 0x4a5   : > { %2545 = vmatpush1.bf16.msra.mxu1 %v12894_v45  ;;  %v12371_v7 = vunpack.i.h.bf16 %v12369_v5  ;;  %v12370_v8 = vunpack.i.l.bf16 %v12369_v5 }
 0x4a6   : > { %v12372_v58 = vpack.i.bf16 %v1778_v24, %v1777_v23  ;;  %2546 = vmatprep.subr.bf16.mxu1 %v12899_v46 }
 0x4a7   : > { %v1759_v12 = vsel %vm819_vm4, %v12371_v7, %v1757_v10  ;;  %v1758_v13 = vsel %vm819_vm4, %v12370_v8, %v12371_v7  ;;  %v2296_v8 = vld [vmem:[%s16969_s2] sm:$0x3f] }
 0x4a8   : > { %12373 = vrot.lane.b32.xlu1 %v12372_v58, %s16995_s29  ;;  %v1763_v19 = vmax.f32 %v1743_v17, %v1759_v12  ;;  %v1762_v55 = vmax.f32 %v1742_v14, %v1758_v13 }
 0x4a9   : > { %2547 = vmatpush1.bf16.msra.mxu1 %v12897_v48 }
 0x4aa   : > { %2548 = vmatprep.subr.bf16.mxu1 %v2488_v51 }
 0x4ad   : > { %2549 = vmatpush1.bf16.msra.mxu1 %v2485_v52 }
 0x4ae   : > { %11704 = vmatprep.subr.bf16.mxu1 %v17005_v33 }
 0x4b0   : > { %10525 = vmatmul.mubr.msk.bf16.vlgmr.msra.gmra.mrb[24].mxu1 %vm611_vm2, %v13871_v40 }
 0x4b1   : > { %11705 = vmatpush3.bf16.msra.mxu1 %v12903_v53  ;;  %11714 = vmatprep.mubr.msk.bf16.mxu1 %vm13417_vm3, %v17005_v33 }
 0x4b2   : > { %11706 = vmatprep.subr.bf16.mxu1 %v17005_v33 }
 0x4b5   : > { %11707 = vmatpush3.bf16.msra.mxu1 %v12904_v56 }
 0x4b6   : > { %11708 = vmatprep.subr.bf16.mxu1 %v17005_v33 }
 0x4b9   : > { %11709 = vmatpush3.bf16.msra.mxu1 %v12905_v59 }
 0x4ba   : > { %11710 = vmatprep.subr.bf16.mxu1 %v17005_v33 }
 0x4bd   : > { %11711 = vmatpush3.bf16.msra.mxu1 %v12906_v61  ;;  %v13959_v61 = vpop.f32.mrb[20].mxu1 }
 0x4be   : > { %11712 = vmatprep.subr.bf16.mxu1 %v17005_v33  ;;  %v13963_v62 = vpop.f32.mrb[21].mxu1 }
 0x4c1   : > { %11713 = vmatpush3.bf16.msra.mxu1 %v2497_v63  ;;  %v2537_v63 = vpop.f32.mrb[22].mxu1 }
 0x4c2   : > { %v2538_v5 = vpop.f32.mrb[23].mxu1  ;;  %v12916_v63 = vld [vmem:[%s13548_s16 + $0x278] ss:$28 sps:$4 sm:$0xff]  }
 0x4c3   : > { %v12921_v5 = vld [vmem:[%s13548_s16 + $0x2b4] ss:$28 sps:$4 sm:$0xff]  }
 0x4c4   : > { %11715 = vmatmul.mubr.msk.bf16.vlgmr.msra.gmra.mrb[28].mxu1 %vm611_vm2, %v13871_v40 }
 0x4c5   : > { %3451 = vmatprep.mubr.bf16.mxu1 %v13414_v0 }
 0x51a   : > { %v12374_v15 = vpop.permute.xlu1 %12373 }
 0x51b   : > { %v12376_v16 = vunpack.i.h.bf16 %v12374_v15  ;;  %v12375_v18 = vunpack.i.l.bf16 %v12374_v15 }
 0x51d   : > { %v1785_v60 = vsel %vm847_vm5, %v12375_v18, %v12376_v16  ;;  %v1789_v49 = vmax.f32 %v1763_v19, %v12376_v16 }
 0x51e   : > { %v1788_v57 = vmax.f32 %v1762_v55, %v1785_v60 }
 0x51f   : > { %v1802_v21 = vrot.slane %v1789_v49, 4  ;;  %v1793_v22 = vrot.slane %v1789_v49, 2  ;;  %v1811_v6 = vrot.slane %v1789_v49, 6 }
 0x520   : > { %v1801_v54 = vrot.slane %v1788_v57, 4  ;;  %v1792_v36 = vrot.slane %v1788_v57, 2  ;;  %v1810_v58 = vrot.slane %v1788_v57, 6  ;;  %v12392_v25 = vpack.i.bf16 %v1789_v49, %v1788_v57 }
 0x522   : > { %v12382_v23 = vpack.i.bf16 %v1802_v21, %v1801_v54  ;;  %v12377_v24 = vpack.i.bf16 %v1793_v22, %v1792_v36  ;;  %v12387_v43 = vpack.i.bf16 %v1811_v6, %v1810_v58  ;;  %v12908_v54 = vld [vmem:[%s16970_s3 + $0x8] sm:$0xff]  }
 0x524   : > { %12383 = vrot.lane.b32.xlu1 %v12382_v23, %s16997_s13  ;;  %12378 = vrot.lane.b32.xlu0 %v12377_v24, %s16991_s14  ;;  %s17077_s14 = smov 114  }
 0x528   : > { %12393 = vrot.lane.b32.xlu1 %v12392_v25, %s16989_s15  ;;  %12388 = vrot.lane.b32.xlu0 %v12387_v43, %s16987_s22  ;;  %s17074_s22 = smov 124   ;;  %s17078_s15 = smov 72  }
 0x583   : > { %v13969_v7 = vpop.f32.mrb[24].mxu1 }
 0x584   : > { %v13974_v9 = vpop.f32.mrb[25].mxu1 }
 0x585   : > { %v2578_v10 = vpop.f32.mrb[26].mxu1 }
 0x586   : > { %v2579_v12 = vpop.f32.mrb[27].mxu1  ;;  %v12927_v10 = vld [vmem:[%s13548_s16 + $0x324] ss:$28 sps:$4 sm:$0x3f]  }
 0x587   : > { %v12922_v12 = vld [vmem:[%s13548_s16 + $0x2e8] ss:$28 sps:$4 sm:$0xff]  }
 0x596   : > { %v12384_v17 = vpop.permute.xlu1 %12383  ;;  %v12379_v26 = vpop.permute.xlu0 %12378 }
 0x597   : > { %v12386_v27 = vunpack.i.h.bf16 %v12384_v17  ;;  %v12385_v28 = vunpack.i.l.bf16 %v12384_v17  ;;  %v12381_v29 = vunpack.i.h.bf16 %v12379_v26  ;;  %v12380_v30 = vunpack.i.l.bf16 %v12379_v26  ;;  %v2656_v13 = vpop.f32.mrb[28].mxu1  ;;  %v12909_v26 = vld [vmem:[%s16970_s3 + $0x18] sm:$0xff]  }
 0x598   : > { %v11716_v14 = vpop.f32.mrb[29].mxu1 }
 0x599   : > { %v1807_v31 = vsel %vm871_vm6, %v12385_v28, %v12386_v27  ;;  %v1827_v32 = vsel %vm616_vm1, %v1789_v49, %v12381_v29  ;;  %v1829_v34 = vsel %vm895_vm8, %v12381_v29, %v12386_v27  ;;  %v1798_v35 = vsel %vm861_vm7, %v12380_v30, %v12381_v29  ;;  %v2659_v15 = vpop.f32.mrb[30].mxu1 }
 0x59a   : > { %v13919_v37 = vpack.c.bf16 %v1829_v34, %v1827_v32  ;;  %v1826_v38 = vsel %vm616_vm1, %v1788_v57, %v1798_v35  ;;  %v1828_v39 = vsel %vm895_vm8, %v1798_v35, %v1807_v31  ;;  %v12394_v41 = vpop.permute.xlu1 %12393  ;;  %v12389_v42 = vpop.permute.xlu0 %12388  ;;  %v12910_v32 = vld [vmem:[%s16970_s3 + $0x20] sm:$0xff]   ;;  %v2494_v14 = vand.u32 %v12927_v10, %v13569_v20  ;;  %v12955_v10 = vld [vmem:[%s13548_s16 + $0x430] ss:$28 sps:$4 sm:$0x3f]  }
 0x59b   : > { %v13923_v44 = vpack.c.bf16 %v1828_v39, %v1826_v38  ;;  %v12396_v45 = vunpack.i.h.bf16 %v12394_v41  ;;  %v12395_v46 = vunpack.i.l.bf16 %v12394_v41  ;;  %v12391_v47 = vunpack.i.h.bf16 %v12389_v42  ;;  %v11717_v16 = vpop.f32.mrb[31].mxu1  ;;  %v12911_v39 = vld [vmem:[%s16970_s3] sm:$0xff]  }
 0x59c   : > { %v12390_v48 = vunpack.i.l.bf16 %v12389_v42  ;;  %1851 = vrot.lane.b32.xlu1 %v13919_v37, %s17072_s30 }
 0x59d   : > { %v1823_v50 = vsel %vm889_vm9, %v12395_v46, %v12396_v45  ;;  %v1831_v51 = vsel %vm898_vm11, %v12386_v27, %v12391_v47  ;;  %1849 = vrot.lane.b32.xlu0 %v13923_v44, %s17072_s30 }
 0x59e   : > { %v13931_v52 = vpack.c.bf16 %v12396_v45, %v1831_v51  ;;  %v1816_v53 = vsel %vm16994_vm10, %v12390_v48, %v12391_v47 }
 0x59f   : > { %v1830_v56 = vsel %vm898_vm11, %v1807_v31, %v1816_v53  ;;  %v12915_v53 = vld [vmem:[%s16970_s3 + $0x10] sm:$0xff]  }
 0x5a0   : > { %v13935_v59 = vpack.c.bf16 %v1823_v50, %v1830_v56  ;;  %1855 = vrot.lane.b32.xlu1 %v13931_v52, %s17072_s30  ;;  %v12914_v50 = vld [vmem:[%s13548_s16 + $0x244] ss:$28 sps:$4 sm:$0xff]  }
 0x5a1   : > { %v12912_v56 = vld [vmem:[%s13548_s16 + $0x240] ss:$28 sps:$4 sm:$0xff]  }
 0x5a2   : > { %1853 = vrot.lane.b32.xlu0 %v13935_v59, %s17072_s30  ;;  %v2066_v38 = vsel %vm936_vm13, %v13935_v59, 0 }
 0x5a4   : > { %1924 = vrot.lane.b32.xlu1 %v13919_v37, %s17073_s12 }
 0x5a6   : > { %1922 = vrot.lane.b32.xlu0 %v13923_v44, %s17073_s12 }
 0x5a8   : > { %1928 = vrot.lane.b32.xlu1 %v13931_v52, %s17073_s12 }
 0x5aa   : > { %1926 = vrot.lane.b32.xlu0 %v13935_v59, %s17073_s12 }
 0x5ac   : > { %1995 = vrot.lane.b32.xlu1 %v13919_v37, %s17074_s22 }
 0x5ae   : > { %1993 = vrot.lane.b32.xlu0 %v13923_v44, %s17074_s22 }
 0x5b0   : > { %1999 = vrot.lane.b32.xlu1 %v13931_v52, %s17074_s22 }
 0x5b2   : > { %1997 = vrot.lane.b32.xlu0 %v13935_v59, %s17074_s22 }
 0x5b4   : > { %2121 = vrot.lane.b32.xlu1 %v13919_v37, %s17001_s24 }
 0x5b6   : > { %2119 = vrot.lane.b32.xlu0 %v13923_v44, %s17001_s24 }
 0x5b8   : > { %2125 = vrot.lane.b32.xlu1 %v13931_v52, %s17001_s24 }
 0x5ba   : > { %2123 = vrot.lane.b32.xlu0 %v13935_v59, %s17001_s24  ;;  %v12918_v59 = vld [vmem:[%s13548_s16 + $0x27c] ss:$28 sps:$4 sm:$0xff]  }
 0x5be   : > { %2299 = vperm.xlu0 %12326, %v2296_v8   ;;  %v12919_v8 = vld [vmem:[%s13548_s16 + $0x2b0] ss:$28 sps:$4 sm:$0xff]  }
 0x60e   : > { %v1852_v18 = vpop.permute.xlu1 %1851 }
 0x60f   : > { %1870 = vmatprep.subr.bf16.mxu0 %v1852_v18  ;;  %v1850_v19 = vpop.permute.xlu0 %1849 }
 0x610   : > { %v1857_v55 = vsel %vm16993_vm12, %v1850_v19, %v1852_v18 }
 0x611   : > { %1871 = vmatpush1.bf16.msra.mxu0 %v1857_v55 }
 0x612   : > { %v1856_v60 = vpop.permute.xlu1 %1855 }
 0x613   : > { %10429 = vmatprep.subr.msk.bf16.mxu0 %vm936_vm13, %v1856_v60 }
 0x614   : > { %v1854_v49 = vpop.permute.xlu0 %1853 }
 0x615   : > { %v1858_v57 = vsel %vm16993_vm12, %v1854_v49, %v1856_v60  ;;  %vm17075_vm12 = vcmask 1014784  }
 0x616   : > { %v1865_v21 = vsel %vm936_vm13, %v1858_v57, 0  ;;  %v1925_v22 = vpop.permute.xlu1 %1924  ;;  %vm17076_vm10 = vmmov %vm17075_vm12 }
 0x617   : > { %1873 = vmatpush1.bf16.msra.mxu0 %v1865_v21 }
 0x618   : > { %1943 = vmatprep.subr.bf16.mxu0 %v1925_v22  ;;  %v1923_v36 = vpop.permute.xlu0 %1922 }
 0x619   : > { %v1930_v23 = vsel %vm1005_vm14, %v1923_v36, %v1925_v22 }
 0x61a   : > { %10430 = vmatmul.mubr.msk.bf16.vlgmr.msra.gmra.mrb[16].mxu0 %vm932_vm15, %v12908_v54  ;;  %v1929_v24 = vpop.permute.xlu1 %1928 }
 0x61b   : > { %1944 = vmatpush1.bf16.msra.mxu0 %v1930_v23  ;;  %1975 = vmatprep.mubr.bf16.mxu0 %v13414_v0 }
 0x61c   : > { %10436 = vmatprep.subr.msk.bf16.mxu0 %vm936_vm13, %v1929_v24  ;;  %v1927_v58 = vpop.permute.xlu0 %1926 }
 0x61d   : > { %v1931_v6 = vsel %vm1005_vm14, %v1927_v58, %v1929_v24 }
 0x61e   : > { %v1938_v25 = vsel %vm936_vm13, %v1931_v6, 0  ;;  %v1996_v43 = vpop.permute.xlu1 %1995 }
 0x61f   : > { %1946 = vmatpush1.bf16.msra.mxu0 %v1938_v25 }
 0x620   : > { %2014 = vmatprep.subr.bf16.mxu0 %v1996_v43  ;;  %v1994_v17 = vpop.permute.xlu0 %1993 }
 0x621   : > { %v2001_v29 = vsel %vm17075_vm12, %v1994_v17, %v1996_v43  ;;  %vm17081_vm12 = vcmask 1039360  }
 0x622   : > { %v2000_v27 = vpop.permute.xlu1 %1999 }
 0x624   : > { %v1998_v28 = vpop.permute.xlu0 %1997 }
 0x625   : > { %v2002_v30 = vsel %vm17076_vm10, %v1998_v28, %v2000_v27  ;;  %vm17080_vm10 = vcmask 703488  }
 0x626   : > { %10437 = vmatmul.mubr.msk.bf16.vlgmr.msra.gmra.mrb[16].mxu0 %vm932_vm15, %v12909_v26  ;;  %v2009_v31 = vsel %vm936_vm13, %v2002_v30, 0  ;;  %v2122_v35 = vpop.permute.xlu1 %2121 }
 0x627   : > { %2015 = vmatpush1.bf16.msra.mxu0 %v2001_v29  ;;  %2046 = vmatprep.mubr.bf16.mxu0 %v13414_v0 }
 0x628   : > { %10441 = vmatprep.subr.msk.bf16.mxu0 %vm936_vm13, %v2000_v27  ;;  %v2120_v34 = vpop.permute.xlu0 %2119 }
 0x62a   : > { %v2126_v41 = vpop.permute.xlu1 %2125 }
 0x62b   : > { %2017 = vmatpush1.bf16.msra.mxu0 %v2009_v31 }
 0x62c   : > { %2071 = vmatprep.subr.bf16.mxu0 %v13919_v37  ;;  %v2124_v37 = vpop.permute.xlu0 %2123 }
 0x62d   : > { %v2128_v46 = vsel %vm1205_vm0, %v2124_v37, %v2126_v41  ;;  %v12936_v37 = vld [vmem:[%s13548_s16 + $0x3bc] ss:$28 sps:$4 sm:$0xff]  }
 0x62e   : > { %v2135_v51 = vsel %vm936_vm13, %v2128_v46, 0  ;;  %v12940_v46 = vld [vmem:[%s13548_s16 + $0x428] ss:$28 sps:$4 sm:$0x3f]  }
 0x632   : > { %10442 = vmatmul.mubr.msk.bf16.vlgmr.msra.gmra.mrb[16].mxu0 %vm932_vm15, %v12910_v32  ;;  %v12928_v32 = vld [vmem:[%s13548_s16 + $0x348] ss:$28 sps:$4 sm:$0xff]  }
 0x633   : > { %2072 = vmatpush1.bf16.msra.mxu0 %v13923_v44  ;;  %2103 = vmatprep.mubr.bf16.mxu0 %v13414_v0  ;;  %v2127_v44 = vsel %vm1205_vm0, %v2120_v34, %v2122_v35  ;;  %v12930_v34 = vld [vmem:[%s13548_s16 + $0x34c] ss:$28 sps:$4 sm:$0xff]  }
 0x634   : > { %10444 = vmatprep.subr.msk.bf16.mxu0 %vm936_vm13, %v13931_v52  ;;  %3419 = vmatprep.subr.bf16.mxu1 %v12930_v34 }
 0x635   : > { %3420 = vmatpush1.bf16.msra.mxu1 %v12928_v32 }
 0x637   : > { %2074 = vmatpush1.bf16.msra.mxu0 %v2066_v38  ;;  %v12931_v38 = vld [vmem:[%s13548_s16 + $0x380] ss:$28 sps:$4 sm:$0xff]  }
 0x638   : > { %2140 = vmatprep.subr.bf16.mxu0 %v2122_v35  ;;  %v12933_v35 = vld [vmem:[%s13548_s16 + $0x384] ss:$28 sps:$4 sm:$0xff]  }
 0x639   : > { %3421 = vmatprep.subr.bf16.mxu1 %v12933_v35 }
 0x63a   : > { %3422 = vmatpush1.bf16.msra.mxu1 %v12931_v38 }
 0x63b   : > { %3423 = vmatprep.subr.bf16.mxu1 %v12936_v37 }
 0x63d   : > { %v14012_v42 = vpop.permute.xlu0 %2299 }
 0x63e   : > { %10445 = vmatmul.mubr.msk.bf16.vlgmr.msra.gmra.mrb[16].mxu0 %vm932_vm15, %v12911_v39  ;;  %v2657_v45 = vadd.f32 %v2656_v13, %v14012_v42  ;;  %v2577_v48 = vadd.f32 %v13974_v9, %v14012_v42  ;;  %v12924_v9 = vld [vmem:[%s13548_s16 + $0x2ec] ss:$28 sps:$4 sm:$0xff]   ;;  %v12925_v13 = vld [vmem:[%s13548_s16 + $0x320] ss:$28 sps:$4 sm:$0x3f]   ;;  %v2575_v54 = vadd.f32 %v13969_v7, %v14012_v42 }
 0x63f   : > { %2141 = vmatpush1.bf16.msra.mxu0 %v2127_v44  ;;  %2172 = vmatprep.mubr.bf16.mxu0 %v13414_v0  ;;  %v2491_v15 = vand.u32 %v12925_v13, %v13569_v20  ;;  %v12934_v39 = vld [vmem:[%s13548_s16 + $0x3b8] ss:$28 sps:$4 sm:$0xff]   ;;  %v12942_v44 = vld [vmem:[%s13548_s16 + $0x42c] ss:$28 sps:$4 sm:$0x3f]   ;;  %v3405_v13 = vand.u32 %v12955_v10, %v13569_v20 }
 0x640   : > { %10447 = vmatprep.subr.msk.bf16.mxu0 %vm936_vm13, %v2126_v41  ;;  %v2668_v47 = vmax.f32 %v2657_v45, 0.0  ;;  %v2665_v52 = vmax.f32 %v2577_v48, 0.0  ;;  %v2664_v25 = vmax.f32 %v2575_v54, 0.0  ;;  %v12939_v41 = vld [vmem:[%s13548_s16 + $0x3f4] ss:$28 sps:$4 sm:$0xff]   ;;  %3424 = vmatpush1.bf16.msra.mxu1 %v12934_v39  ;;  %v3399_v48 = vand.u32 %v12940_v46, %v13569_v20 }
 0x641   : > { %v12937_v45 = vld [vmem:[%s13548_s16 + $0x3f0] ss:$28 sps:$4 sm:$0xff]   ;;  %3425 = vmatprep.subr.bf16.mxu1 %v12939_v41 }
 0x642   : > { %2691 = vrot.lane.b32.xlu0 %v2668_v47, %s16999_s25  ;;  %v3402_v47 = vand.u32 %v12942_v44, %v13569_v20 }
 0x643   : > { %2143 = vmatpush1.bf16.msra.mxu0 %v2135_v51  ;;  %v12943_v51 = vld [vmem:[%s13548_s16 + $0x350] ss:$28 sps:$4 sm:$0xff]  }
 0x644   : > { %2581 = vmatprep.subr.bf16.mxu0 %v12914_v50  ;;  %3426 = vmatpush1.bf16.msra.mxu1 %v12937_v45  ;;  %v12945_v50 = vld [vmem:[%s13548_s16 + $0x354] ss:$28 sps:$4 sm:$0xff]  }
 0x645   : > { %3427 = vmatprep.subr.bf16.mxu1 %v3402_v47 }
 0x646   : > { %2676 = vrot.lane.b32.xlu0 %v2665_v52, %s16999_s25 }
 0x648   : > { %3428 = vmatpush1.bf16.msra.mxu1 %v3399_v48 }
 0x649   : > { %3460 = vmatprep.subr.bf16.mxu1 %v12945_v50 }
 0x64a   : > { %10448 = vmatmul.mubr.msk.bf16.vlgmr.msra.gmra.mrb[16].mxu0 %vm932_vm15, %v12915_v53  ;;  %v12948_v53 = vld [vmem:[%s13548_s16 + $0x38c] ss:$28 sps:$4 sm:$0xff]  }
 0x64b   : > { %2582 = vmatpush1.bf16.msra.mxu0 %v12912_v56  ;;  %2613 = vmatprep.mubr.bf16.mxu0 %v13414_v0  ;;  %v12946_v56 = vld [vmem:[%s13548_s16 + $0x388] ss:$28 sps:$4 sm:$0xff]  }
 0x64c   : > { %2583 = vmatprep.subr.bf16.mxu0 %v12918_v59  ;;  %v12951_v59 = vld [vmem:[%s13548_s16 + $0x3c4] ss:$28 sps:$4 sm:$0xff]  }
 0x64f   : > { %2584 = vmatpush1.bf16.msra.mxu0 %v12916_v63  ;;  %v12949_v63 = vld [vmem:[%s13548_s16 + $0x3c0] ss:$28 sps:$4 sm:$0xff]  }
 0x650   : > { %2585 = vmatprep.subr.bf16.mxu0 %v12921_v5  ;;  %v12954_v5 = vld [vmem:[%s13548_s16 + $0x3fc] ss:$28 sps:$4 sm:$0xff]  }
 0x653   : > { %2586 = vmatpush1.bf16.msra.mxu0 %v12919_v8  ;;  %v12957_v8 = vld [vmem:[%s13548_s16 + $0x434] ss:$28 sps:$4 sm:$0x3f]  }
 0x654   : > { %2587 = vmatprep.subr.bf16.mxu0 %v12924_v9  ;;  %v12952_v9 = vld [vmem:[%s13548_s16 + $0x3f8] ss:$28 sps:$4 sm:$0xff]  }
 0x657   : > { %2588 = vmatpush1.bf16.msra.mxu0 %v12922_v12  ;;  %v3408_v12 = vand.u32 %v12957_v8, %v13569_v20 }
 0x658   : > { %2589 = vmatprep.subr.bf16.mxu0 %v2494_v14  ;;  %v12958_v14 = vld [vmem:[%s13548_s16 + $0x360] ss:$28 sps:$4 sm:$0xff]  }
 0x65b   : > { %2590 = vmatpush1.bf16.msra.mxu0 %v2491_v15  ;;  %v12959_v15 = vld [vmem:[%s13548_s16 + $0x398] ss:$28 sps:$4 sm:$0xff]  }
 0x65e   : > { %10526 = vmatmul.mubr.msk.bf16.vlgmr.msra.gmra.mrb[20].mxu0 %vm611_vm2, %v13871_v40  ;;  %v14057_v40 = vadd.f32 %v13963_v62, %v14012_v42 }
 0x65f   : > { %2822 = vmatprep.mubr.bf16.mxu0 %v13414_v0 }
 0x660   : > { %v2663_v6 = vmax.f32 %v14057_v40, 0.0 }
 0x662   : > { %v12402_v43 = vpack.i.bf16 %v2664_v25, %v2663_v6 }
 0x6b4   : > { %v2692_v26 = vpop.permute.xlu0 %2691 }
 0x71d   : > { %v14045_v16 = vpop.f32.mrb[16].mxu0 }
 0x71e   : > { %v14047_v18 = vpop.f32.mrb[17].mxu0 }
 0x71f   : > { %v14049_v19 = vpop.f32.mrb[18].mxu0 }
 0x720   : > { %v14051_v55 = vpop.f32.mrb[19].mxu0 }
 0x731   : > { %v2615_v60 = vpop.f32.mrb[20].mxu0 }
 0x732   : > { %v2616_v49 = vadd.f32 %v2615_v60, %v14012_v42  ;;  %v2617_v57 = vpop.f32.mrb[21].mxu0  ;;  %v12960_v60 = vld [vmem:[%s13548_s16 + $0x3d0] ss:$28 sps:$4 sm:$0xff]  }
 0x733   : > { %v2618_v21 = vadd.f32 %v2617_v57, %v14012_v42  ;;  %v2619_v22 = vpop.f32.mrb[22].mxu0  ;;  %v12962_v57 = vld [vmem:[%s13548_s16 + $0x440] ss:$28 sps:$4 sm:$0x3f]  }
 0x734   : > { %v2666_v36 = vmax.f32 %v2616_v49, 0.0  ;;  %v2620_v23 = vpop.f32.mrb[23].mxu0  ;;  %v12961_v49 = vld [vmem:[%s13548_s16 + $0x408] ss:$28 sps:$4 sm:$0xff]  }
 0x735   : > { %v2667_v24 = vmax.f32 %v2618_v21, 0.0  ;;  %v3417_v21 = vand.u32 %v12962_v57, %v13569_v20  ;;  %v2534_v23 = vadd.f32 %v13959_v61, %v14012_v42 }
 0x737   : > { %v12397_v58 = vpack.i.bf16 %v2667_v24, %v2666_v36  ;;  %v2677_v24 = vpop.permute.xlu0 %2676 }
 0x739   : > { %12398 = vrot.lane.b32.xlu1 %v12397_v58, %s16999_s25 }
 0x73d   : > { %12403 = vrot.lane.b32.xlu1 %v12402_v43, %s16999_s25  ;;  %v2662_v43 = vmax.f32 %v2534_v23, 0.0  ;;  %s17085_s25 = smov 60  }
 0x7ab   : > { %v12399_v62 = vpop.permute.xlu1 %12398 }
 0x7ac   : > { %v12401_v7 = vunpack.i.h.bf16 %v12399_v62  ;;  %v12400_v17 = vunpack.i.l.bf16 %v12399_v62 }
 0x7ae   : > { %v2693_v27 = vsel %vm819_vm4, %v12400_v17, %v12401_v7  ;;  %v2694_v28 = vsel %vm819_vm4, %v12401_v7, %v2692_v26 }
 0x7af   : > { %v2697_v29 = vmax.f32 %v2665_v52, %v2693_v27  ;;  %v2698_v30 = vmax.f32 %v2666_v36, %v2694_v28  ;;  %v14086_v52 = vld [vmem:[%s16968_s1] sm:$0x7]  ;;  %v12404_v22 = vpop.permute.xlu1 %12403 }
 0x7b0   : > { %10626 = vmatmul.mubr.msk.bf16.vlgmr.msra.gmra.mrb[32].mxu1 %vm611_vm2, %v14086_v52  ;;  %v12406_v54 = vunpack.i.h.bf16 %v12404_v22  ;;  %v12405_v36 = vunpack.i.l.bf16 %v12404_v22 }
 0x7b1   : > { %v12407_v31 = vpack.i.bf16 %v2698_v30, %v2697_v29  ;;  %3461 = vmatpush1.bf16.msra.mxu1 %v12943_v51  ;;  %3492 = vmatprep.mubr.bf16.mxu1 %v13414_v0 }
 0x7b2   : > { %3462 = vmatprep.subr.bf16.mxu1 %v12948_v53  ;;  %v2679_v58 = vsel %vm819_vm4, %v12406_v54, %v2677_v24  ;;  %v2678_v25 = vsel %vm819_vm4, %v12405_v36, %v12406_v54 }
 0x7b3   : > { %12408 = vrot.lane.b32.xlu1 %v12407_v31, %s16995_s29  ;;  %v2683_v26 = vmax.f32 %v2663_v6, %v2679_v58  ;;  %v2682_v27 = vmax.f32 %v2662_v43, %v2678_v25  ;;  %s17079_s29 = smov 86   ;;  %v3216_v25 = vld [vmem:[%s16969_s2] sm:$0x3f] }
 0x7b5   : > { %3463 = vmatpush1.bf16.msra.mxu1 %v12946_v56 }
 0x7b6   : > { %3464 = vmatprep.subr.bf16.mxu1 %v12951_v59 }
 0x7b9   : > { %3465 = vmatpush1.bf16.msra.mxu1 %v12949_v63 }
 0x7ba   : > { %3466 = vmatprep.subr.bf16.mxu1 %v12954_v5 }
 0x7bd   : > { %3467 = vmatpush1.bf16.msra.mxu1 %v12952_v9 }
 0x7be   : > { %3468 = vmatprep.subr.bf16.mxu1 %v3408_v12 }
 0x7c1   : > { %3469 = vmatpush1.bf16.msra.mxu1 %v3405_v13 }
 0x7c2   : > { %11718 = vmatprep.subr.bf16.mxu1 %v17005_v33 }
 0x7c4   : > { %10627 = vmatmul.mubr.msk.bf16.vlgmr.msra.gmra.mrb[36].mxu1 %vm611_vm2, %v14086_v52 }
 0x7c5   : > { %11719 = vmatpush3.bf16.msra.mxu1 %v12958_v14  ;;  %11728 = vmatprep.mubr.msk.bf16.mxu1 %vm13417_vm3, %v17005_v33 }
 0x7c6   : > { %11720 = vmatprep.subr.bf16.mxu1 %v17005_v33 }
 0x7c9   : > { %11721 = vmatpush3.bf16.msra.mxu1 %v12959_v15 }
 0x7ca   : > { %11722 = vmatprep.subr.bf16.mxu1 %v17005_v33 }
 0x7cd   : > { %11723 = vmatpush3.bf16.msra.mxu1 %v12960_v60 }
 0x7ce   : > { %11724 = vmatprep.subr.bf16.mxu1 %v17005_v33 }
 0x7d1   : > { %11725 = vmatpush3.bf16.msra.mxu1 %v12961_v49 }
 0x7d2   : > { %11726 = vmatprep.subr.bf16.mxu1 %v17005_v33 }
 0x7d5   : > { %11727 = vmatpush3.bf16.msra.mxu1 %v3417_v21 }
 0x7d8   : > { %11729 = vmatmul.mubr.msk.bf16.vlgmr.msra.gmra.mrb[40].mxu1 %vm611_vm2, %v14086_v52 }
 0x7d9   : > { %4371 = vmatprep.mubr.bf16.mxu1 %v13414_v0 }
 0x825   : > { %v12409_v62 = vpop.permute.xlu1 %12408 }
 0x826   : > { %v12411_v7 = vunpack.i.h.bf16 %v12409_v62  ;;  %v12410_v17 = vunpack.i.l.bf16 %v12409_v62 }
 0x828   : > { %v2705_v28 = vsel %vm847_vm5, %v12410_v17, %v12411_v7  ;;  %v2709_v29 = vmax.f32 %v2683_v26, %v12411_v7 }
 0x829   : > { %v2708_v30 = vmax.f32 %v2682_v27, %v2705_v28 }
 0x82a   : > { %v2722_v31 = vrot.slane %v2709_v29, 4  ;;  %v2713_v32 = vrot.slane %v2709_v29, 2  ;;  %v2731_v37 = vrot.slane %v2709_v29, 6 }
 0x82b   : > { %v2721_v61 = vrot.slane %v2708_v30, 4  ;;  %v2712_v42 = vrot.slane %v2708_v30, 2  ;;  %v2730_v38 = vrot.slane %v2708_v30, 6  ;;  %v12427_v39 = vpack.i.bf16 %v2709_v29, %v2708_v30 }
 0x82d   : > { %v12417_v34 = vpack.i.bf16 %v2722_v31, %v2721_v61  ;;  %v12412_v35 = vpack.i.bf16 %v2713_v32, %v2712_v42  ;;  %v12422_v40 = vpack.i.bf16 %v2731_v37, %v2730_v38  ;;  %v12963_v38 = vld [vmem:[%s16970_s3 + $0x8] sm:$0xff]  }
 0x82f   : > { %12418 = vrot.lane.b32.xlu1 %v12417_v34, %s16997_s13  ;;  %12413 = vrot.lane.b32.xlu0 %v12412_v35, %s17077_s14  ;;  %s17089_s13 = smov 126  }
 0x833   : > { %12428 = vrot.lane.b32.xlu1 %v12427_v39, %s17078_s15  ;;  %12423 = vrot.lane.b32.xlu0 %v12422_v40, %s17079_s29 }
 0x883   : > { %v14174_v54 = vpop.f32.mrb[32].mxu1 }
 0x884   : > { %v14178_v36 = vpop.f32.mrb[33].mxu1 }
 0x885   : > { %v3457_v23 = vpop.f32.mrb[34].mxu1 }
 0x886   : > { %v3458_v24 = vpop.f32.mrb[35].mxu1 }
 0x887   : > { %v12970_v24 = vld [vmem:[%s16970_s3 + $0x10] sm:$0xff]  }
 0x897   : > { %v14184_v58 = vpop.f32.mrb[36].mxu1 }
 0x898   : > { %v14189_v43 = vpop.f32.mrb[37].mxu1 }
 0x899   : > { %v3498_v62 = vpop.f32.mrb[38].mxu1 }
 0x89a   : > { %v3499_v7 = vpop.f32.mrb[39].mxu1  ;;  %v12971_v62 = vld [vmem:[%s13548_s16 + $0x390] ss:$28 sps:$4 sm:$0xff]  }
 0x89b   : > { %v12976_v7 = vld [vmem:[%s13548_s16 + $0x3cc] ss:$28 sps:$4 sm:$0xff]  }
 0x8a1   : > { %v12419_v6 = vpop.permute.xlu1 %12418  ;;  %v12414_v41 = vpop.permute.xlu0 %12413 }
 0x8a2   : > { %v12421_v44 = vunpack.i.h.bf16 %v12419_v6  ;;  %v12420_v45 = vunpack.i.l.bf16 %v12419_v6  ;;  %v12416_v46 = vunpack.i.h.bf16 %v12414_v41  ;;  %v12415_v47 = vunpack.i.l.bf16 %v12414_v41 }
 0x8a4   : > { %v2727_v48 = vsel %vm871_vm6, %v12420_v45, %v12421_v44  ;;  %v2747_v50 = vsel %vm616_vm1, %v2709_v29, %v12416_v46  ;;  %v2749_v51 = vsel %vm895_vm8, %v12416_v46, %v12421_v44  ;;  %v2718_v53 = vsel %vm861_vm7, %v12415_v47, %v12416_v46  ;;  %v12964_v47 = vld [vmem:[%s16970_s3 + $0x18] sm:$0xff]  }
 0x8a5   : > { %v14134_v56 = vpack.c.bf16 %v2749_v51, %v2747_v50  ;;  %v2746_v59 = vsel %vm616_vm1, %v2708_v30, %v2718_v53  ;;  %v2748_v63 = vsel %vm895_vm8, %v2718_v53, %v2727_v48  ;;  %v12429_v5 = vpop.permute.xlu1 %12428  ;;  %v12424_v8 = vpop.permute.xlu0 %12423 }
 0x8a6   : > { %v14138_v9 = vpack.c.bf16 %v2748_v63, %v2746_v59  ;;  %v12431_v10 = vunpack.i.h.bf16 %v12429_v5  ;;  %v12430_v12 = vunpack.i.l.bf16 %v12429_v5  ;;  %v12426_v13 = vunpack.i.h.bf16 %v12424_v8  ;;  %v12965_v63 = vld [vmem:[%s16970_s3 + $0x20] sm:$0xff]  }
 0x8a7   : > { %v12425_v14 = vunpack.i.l.bf16 %v12424_v8  ;;  %2771 = vrot.lane.b32.xlu1 %v14134_v56, %s17072_s30 }
 0x8a8   : > { %v2743_v15 = vsel %vm889_vm9, %v12430_v12, %v12431_v10  ;;  %v2751_v60 = vsel %vm898_vm11, %v12421_v44, %v12426_v13  ;;  %2769 = vrot.lane.b32.xlu0 %v14138_v9, %s17072_s30  ;;  %v12966_v12 = vld [vmem:[%s16970_s3] sm:$0xff]  }
 0x8a9   : > { %v14146_v49 = vpack.c.bf16 %v12431_v10, %v2751_v60  ;;  %v2736_v57 = vsel %vm17080_vm10, %v12425_v14, %v12426_v13  ;;  %vm17082_vm10 = vmmov %vm17081_vm12 }
 0x8aa   : > { %v2750_v21 = vsel %vm898_vm11, %v2727_v48, %v2736_v57 }
 0x8ab   : > { %v14150_v22 = vpack.c.bf16 %v2743_v15, %v2750_v21  ;;  %2775 = vrot.lane.b32.xlu1 %v14146_v49, %s17072_s30  ;;  %v3576_v17 = vpop.f32.mrb[40].mxu1  ;;  %v12969_v21 = vld [vmem:[%s13548_s16 + $0x35c] ss:$28 sps:$4 sm:$0xff]  }
 0x8ac   : > { %v11730_v26 = vpop.f32.mrb[41].mxu1 }
 0x8ad   : > { %2773 = vrot.lane.b32.xlu0 %v14150_v22, %s17072_s30  ;;  %v3579_v27 = vpop.f32.mrb[42].mxu1  ;;  %v2986_v10 = vsel %vm936_vm13, %v14150_v22, 0  ;;  %v12979_v26 = vld [vmem:[%s13548_s16 + $0x404] ss:$28 sps:$4 sm:$0xff]  }
 0x8ae   : > { %v11731_v28 = vpop.f32.mrb[43].mxu1  ;;  %v12982_v27 = vld [vmem:[%s13548_s16 + $0x43c] ss:$28 sps:$4 sm:$0x3f]  }
 0x8af   : > { %2844 = vrot.lane.b32.xlu1 %v14134_v56, %s17073_s12  ;;  %v12977_v28 = vld [vmem:[%s13548_s16 + $0x400] ss:$28 sps:$4 sm:$0xff]  }
 0x8b1   : > { %2842 = vrot.lane.b32.xlu0 %v14138_v9, %s17073_s12 }
 0x8b3   : > { %2848 = vrot.lane.b32.xlu1 %v14146_v49, %s17073_s12 }
 0x8b5   : > { %2846 = vrot.lane.b32.xlu0 %v14150_v22, %s17073_s12 }
 0x8b7   : > { %2915 = vrot.lane.b32.xlu1 %v14134_v56, %s17074_s22 }
 0x8b9   : > { %2913 = vrot.lane.b32.xlu0 %v14138_v9, %s17074_s22 }
 0x8bb   : > { %2919 = vrot.lane.b32.xlu1 %v14146_v49, %s17074_s22 }
 0x8bd   : > { %2917 = vrot.lane.b32.xlu0 %v14150_v22, %s17074_s22 }
 0x8bf   : > { %3041 = vrot.lane.b32.xlu1 %v14134_v56, %s17001_s24 }
 0x8c1   : > { %3039 = vrot.lane.b32.xlu0 %v14138_v9, %s17001_s24 }
 0x8c3   : > { %3045 = vrot.lane.b32.xlu1 %v14146_v49, %s17001_s24 }
 0x8c5   : > { %3043 = vrot.lane.b32.xlu0 %v14150_v22, %s17001_s24  ;;  %s17086_s24 = smov 120  }
 0x8c9   : > { %3219 = vperm.xlu0 %12326, %v3216_v25   ;;  %v12967_v25 = vld [vmem:[%s13548_s16 + $0x358] ss:$28 sps:$4 sm:$0xff]  }
 0x919   : > { %v2772_v29 = vpop.permute.xlu1 %2771 }
 0x91a   : > { %2790 = vmatprep.subr.bf16.mxu0 %v2772_v29  ;;  %v2770_v30 = vpop.permute.xlu0 %2769 }
 0x91b   : > { %v2777_v31 = vsel %vm17081_vm12, %v2770_v30, %v2772_v29  ;;  %vm17083_vm12 = vcmask 1014784   ;;  %v12980_v29 = vld [vmem:[%s13548_s16 + $0x438] ss:$28 sps:$4 sm:$0x3f]   ;;  %v3414_v30 = vand.u32 %v12982_v27, %v13569_v20 }
 0x91c   : > { %2791 = vmatpush1.bf16.msra.mxu0 %v2777_v31  ;;  %v3411_v31 = vand.u32 %v12980_v29, %v13569_v20  ;;  %v13004_v27 = vld [vmem:[%s13548_s16 + $0x4d8] ss:$28 sps:$4 sm:$0xff]   ;;  %v13012_v29 = vld [vmem:[%s13548_s16 + $0x54c] ss:$28 sps:$4 sm:$0x3f]  }
 0x91d   : > { %v2776_v32 = vpop.permute.xlu1 %2775 }
 0x91e   : > { %10531 = vmatprep.subr.msk.bf16.mxu0 %vm936_vm13, %v2776_v32 }
 0x91f   : > { %v2774_v61 = vpop.permute.xlu0 %2773 }
 0x920   : > { %v2778_v42 = vsel %vm17082_vm10, %v2774_v61, %v2776_v32  ;;  %vm17084_vm10 = vmmov %vm17083_vm12 }
 0x921   : > { %v2785_v34 = vsel %vm936_vm13, %v2778_v42, 0  ;;  %v2845_v35 = vpop.permute.xlu1 %2844 }
 0x922   : > { %2793 = vmatpush1.bf16.msra.mxu0 %v2785_v34 }
 0x923   : > { %2863 = vmatprep.subr.bf16.mxu0 %v2845_v35  ;;  %v2843_v37 = vpop.permute.xlu0 %2842 }
 0x924   : > { %v2850_v39 = vsel %vm1005_vm14, %v2843_v37, %v2845_v35 }
 0x925   : > { %10532 = vmatmul.mubr.msk.bf16.vlgmr.msra.gmra.mrb[24].mxu0 %vm932_vm15, %v12963_v38  ;;  %v2849_v40 = vpop.permute.xlu1 %2848 }
 0x926   : > { %2864 = vmatpush1.bf16.msra.mxu0 %v2850_v39  ;;  %2895 = vmatprep.mubr.bf16.mxu0 %v13414_v0 }
 0x927   : > { %10538 = vmatprep.subr.msk.bf16.mxu0 %vm936_vm13, %v2849_v40  ;;  %v2847_v6 = vpop.permute.xlu0 %2846 }
 0x928   : > { %v2851_v41 = vsel %vm1005_vm14, %v2847_v6, %v2849_v40 }
 0x929   : > { %v2858_v44 = vsel %vm936_vm13, %v2851_v41, 0  ;;  %v2916_v45 = vpop.permute.xlu1 %2915 }
 0x92a   : > { %2866 = vmatpush1.bf16.msra.mxu0 %v2858_v44 }
 0x92b   : > { %2934 = vmatprep.subr.bf16.mxu0 %v2916_v45  ;;  %v2914_v46 = vpop.permute.xlu0 %2913 }
 0x92c   : > { %v2921_v51 = vsel %vm17083_vm12, %v2914_v46, %v2916_v45  ;;  %vm17088_vm12 = vcmask 703488  }
 0x92d   : > { %v2920_v48 = vpop.permute.xlu1 %2919 }
 0x92f   : > { %v2918_v50 = vpop.permute.xlu0 %2917 }
 0x930   : > { %v2922_v53 = vsel %vm17084_vm10, %v2918_v50, %v2920_v48  ;;  %vm17090_vm10 = vcmask 1039360  }
 0x931   : > { %10539 = vmatmul.mubr.msk.bf16.vlgmr.msra.gmra.mrb[24].mxu0 %vm932_vm15, %v12964_v47  ;;  %v2929_v59 = vsel %vm936_vm13, %v2922_v53, 0  ;;  %v3042_v8 = vpop.permute.xlu1 %3041 }
 0x932   : > { %2935 = vmatpush1.bf16.msra.mxu0 %v2921_v51  ;;  %2966 = vmatprep.mubr.bf16.mxu0 %v13414_v0 }
 0x933   : > { %10543 = vmatprep.subr.msk.bf16.mxu0 %vm936_vm13, %v2920_v48  ;;  %v3040_v5 = vpop.permute.xlu0 %3039 }
 0x935   : > { %v3046_v13 = vpop.permute.xlu1 %3045 }
 0x936   : > { %2937 = vmatpush1.bf16.msra.mxu0 %v2929_v59 }
 0x937   : > { %2991 = vmatprep.subr.bf16.mxu0 %v14134_v56  ;;  %v3044_v56 = vpop.permute.xlu0 %3043 }
 0x938   : > { %v3048_v60 = vsel %vm1205_vm0, %v3044_v56, %v3046_v13  ;;  %v12983_v56 = vld [vmem:[%s13548_s16 + $0x460] ss:$28 sps:$4 sm:$0xff]  }
 0x939   : > { %v3055_v22 = vsel %vm936_vm13, %v3048_v60, 0  ;;  %v12989_v60 = vld [vmem:[%s13548_s16 + $0x4d0] ss:$28 sps:$4 sm:$0xff]  }
 0x93d   : > { %10544 = vmatmul.mubr.msk.bf16.vlgmr.msra.gmra.mrb[24].mxu0 %vm932_vm15, %v12965_v63 }
 0x93e   : > { %2992 = vmatpush1.bf16.msra.mxu0 %v14138_v9  ;;  %3023 = vmatprep.mubr.bf16.mxu0 %v13414_v0  ;;  %v3047_v9 = vsel %vm1205_vm0, %v3040_v5, %v3042_v8 }
 0x93f   : > { %10546 = vmatprep.subr.msk.bf16.mxu0 %vm936_vm13, %v14146_v49 }
 0x942   : > { %2994 = vmatpush1.bf16.msra.mxu0 %v2986_v10 }
 0x943   : > { %3060 = vmatprep.subr.bf16.mxu0 %v3042_v8 }
 0x948   : > { %v14227_v14 = vpop.permute.xlu0 %3219 }
 0x949   : > { %10547 = vmatmul.mubr.msk.bf16.vlgmr.msra.gmra.mrb[24].mxu0 %vm932_vm15, %v12966_v12  ;;  %v3577_v15 = vadd.f32 %v3576_v17, %v14227_v14  ;;  %v3497_v57 = vadd.f32 %v14189_v43, %v14227_v14  ;;  %v12973_v43 = vld [vmem:[%s13548_s16 + $0x394] ss:$28 sps:$4 sm:$0xff]   ;;  %v12974_v17 = vld [vmem:[%s13548_s16 + $0x3c8] ss:$28 sps:$4 sm:$0xff]   ;;  %v3495_v6 = vadd.f32 %v14184_v58, %v14227_v14 }
 0x94a   : > { %3061 = vmatpush1.bf16.msra.mxu0 %v3047_v9  ;;  %3092 = vmatprep.mubr.bf16.mxu0 %v13414_v0  ;;  %v12985_v12 = vld [vmem:[%s13548_s16 + $0x464] ss:$28 sps:$4 sm:$0xff]   ;;  %v12986_v9 = vld [vmem:[%s13548_s16 + $0x498] ss:$28 sps:$4 sm:$0xff]  }
 0x94b   : > { %10549 = vmatprep.subr.msk.bf16.mxu0 %vm936_vm13, %v3046_v13  ;;  %v3588_v49 = vmax.f32 %v3577_v15, 0.0  ;;  %v3585_v23 = vmax.f32 %v3497_v57, 0.0  ;;  %v3584_v48 = vmax.f32 %v3495_v6, 0.0  ;;  %v12988_v13 = vld [vmem:[%s13548_s16 + $0x49c] ss:$28 sps:$4 sm:$0xff]   ;;  %4339 = vmatprep.subr.bf16.mxu1 %v12985_v12 }
 0x94c   : > { %4340 = vmatpush1.bf16.msra.mxu1 %v12983_v56  ;;  %v12991_v15 = vld [vmem:[%s13548_s16 + $0x4d4] ss:$28 sps:$4 sm:$0xff]   ;;  %v12997_v57 = vld [vmem:[%s13548_s16 + $0x544] ss:$28 sps:$4 sm:$0x3f]  }
 0x94d   : > { %3611 = vrot.lane.b32.xlu0 %v3588_v49, %s17085_s25  ;;  %4341 = vmatprep.subr.bf16.mxu1 %v12988_v13  ;;  %v12994_v49 = vld [vmem:[%s13548_s16 + $0x50c] ss:$28 sps:$4 sm:$0xff]   ;;  %v13016_v6 = vld [vmem:[%s13548_s16 + $0x520] ss:$28 sps:$4 sm:$0xff]  }
 0x94e   : > { %3063 = vmatpush1.bf16.msra.mxu0 %v3055_v22  ;;  %v12995_v22 = vld [vmem:[%s13548_s16 + $0x540] ss:$28 sps:$4 sm:$0x3f]  }
 0x94f   : > { %3501 = vmatprep.subr.bf16.mxu0 %v12969_v21  ;;  %v12992_v21 = vld [vmem:[%s13548_s16 + $0x508] ss:$28 sps:$4 sm:$0xff]  }
 0x950   : > { %4342 = vmatpush1.bf16.msra.mxu1 %v12986_v9 }
 0x951   : > { %3596 = vrot.lane.b32.xlu0 %v3585_v23, %s17085_s25  ;;  %4343 = vmatprep.subr.bf16.mxu1 %v12991_v15 }
 0x954   : > { %4344 = vmatpush1.bf16.msra.mxu1 %v12989_v60 }
 0x955   : > { %10550 = vmatmul.mubr.msk.bf16.vlgmr.msra.gmra.mrb[24].mxu0 %vm932_vm15, %v12970_v24  ;;  %4345 = vmatprep.subr.bf16.mxu1 %v12994_v49  ;;  %v4319_v24 = vand.u32 %v12995_v22, %v13569_v20 }
 0x956   : > { %3502 = vmatpush1.bf16.msra.mxu0 %v12967_v25  ;;  %3533 = vmatprep.mubr.bf16.mxu0 %v13414_v0  ;;  %v13000_v25 = vld [vmem:[%s13548_s16 + $0x46c] ss:$28 sps:$4 sm:$0xff]  }
 0x957   : > { %3503 = vmatprep.subr.bf16.mxu0 %v12973_v43  ;;  %v12998_v43 = vld [vmem:[%s13548_s16 + $0x468] ss:$28 sps:$4 sm:$0xff]  }
 0x958   : > { %4346 = vmatpush1.bf16.msra.mxu1 %v12992_v21 }
 0x95a   : > { %3504 = vmatpush1.bf16.msra.mxu0 %v12971_v62  ;;  %v14301_v62 = vld [vmem:[%s16968_s1] sm:$0x7] }
 0x95b   : > { %3505 = vmatprep.subr.bf16.mxu0 %v12976_v7  ;;  %v13003_v7 = vld [vmem:[%s13548_s16 + $0x4a4] ss:$28 sps:$4 sm:$0xff]  }
 0x95e   : > { %3506 = vmatpush1.bf16.msra.mxu0 %v12974_v17  ;;  %v13001_v17 = vld [vmem:[%s13548_s16 + $0x4a0] ss:$28 sps:$4 sm:$0xff]  }
 0x95f   : > { %3507 = vmatprep.subr.bf16.mxu0 %v12979_v26  ;;  %v13006_v26 = vld [vmem:[%s13548_s16 + $0x4dc] ss:$28 sps:$4 sm:$0xff]  }
 0x962   : > { %3508 = vmatpush1.bf16.msra.mxu0 %v12977_v28  ;;  %v13009_v28 = vld [vmem:[%s13548_s16 + $0x514] ss:$28 sps:$4 sm:$0xff]  }
 0x963   : > { %3509 = vmatprep.subr.bf16.mxu0 %v3414_v30  ;;  %v13007_v30 = vld [vmem:[%s13548_s16 + $0x510] ss:$28 sps:$4 sm:$0xff]  }
 0x966   : > { %3510 = vmatpush1.bf16.msra.mxu0 %v3411_v31  ;;  %v13010_v31 = vld [vmem:[%s13548_s16 + $0x548] ss:$28 sps:$4 sm:$0x3f]  }
 0x969   : > { %10628 = vmatmul.mubr.msk.bf16.vlgmr.msra.gmra.mrb[28].mxu0 %vm611_vm2, %v14086_v52  ;;  %v14272_v52 = vadd.f32 %v14178_v36, %v14227_v14 }
 0x96a   : > { %3742 = vmatprep.mubr.bf16.mxu0 %v13414_v0 }
 0x96b   : > { %v3583_v47 = vmax.f32 %v14272_v52, 0.0 }
 0x96d   : > { %v12437_v50 = vpack.i.bf16 %v3584_v48, %v3583_v47 }
 0x9bf   : > { %v3612_v53 = vpop.permute.xlu0 %3611 }
 0xa28   : > { %v14260_v32 = vpop.f32.mrb[24].mxu0 }
 0xa29   : > { %v14262_v61 = vpop.f32.mrb[25].mxu0 }
 0xa2a   : > { %v14264_v42 = vpop.f32.mrb[26].mxu0 }
 0xa2b   : > { %v14266_v34 = vpop.f32.mrb[27].mxu0 }
 0xa3c   : > { %v3535_v35 = vpop.f32.mrb[28].mxu0 }
 0xa3d   : > { %v3536_v38 = vadd.f32 %v3535_v35, %v14227_v14  ;;  %v3537_v37 = vpop.f32.mrb[29].mxu0  ;;  %v4328_v35 = vand.u32 %v13012_v29, %v13569_v20 }
 0xa3e   : > { %v3538_v39 = vadd.f32 %v3537_v37, %v14227_v14  ;;  %v3539_v40 = vpop.f32.mrb[30].mxu0  ;;  %v13013_v37 = vld [vmem:[%s13548_s16 + $0x478] ss:$28 sps:$4 sm:$0xff]  }
 0xa3f   : > { %v3586_v41 = vmax.f32 %v3536_v38, 0.0  ;;  %v3540_v44 = vpop.f32.mrb[31].mxu0  ;;  %v4325_v38 = vand.u32 %v13010_v31, %v13569_v20  ;;  %v13015_v40 = vld [vmem:[%s13548_s16 + $0x4e8] ss:$28 sps:$4 sm:$0xff]  }
 0xa40   : > { %v3587_v45 = vmax.f32 %v3538_v39, 0.0  ;;  %v13014_v39 = vld [vmem:[%s13548_s16 + $0x4b0] ss:$28 sps:$4 sm:$0xff]  }
 0xa42   : > { %v12432_v46 = vpack.i.bf16 %v3587_v45, %v3586_v41 }
 0xa44   : > { %12433 = vrot.lane.b32.xlu1 %v12432_v46, %s17085_s25 }
 0xa48   : > { %12438 = vrot.lane.b32.xlu1 %v12437_v50, %s17085_s25  ;;  %v3454_v50 = vadd.f32 %v14174_v54, %v14227_v14 }
 0xab6   : > { %v12434_v36 = vpop.permute.xlu1 %12433 }
 0xab7   : > { %v12436_v58 = vunpack.i.h.bf16 %v12434_v36  ;;  %v12435_v51 = vunpack.i.l.bf16 %v12434_v36  ;;  %v3597_v36 = vpop.permute.xlu0 %3596 }
 0xab9   : > { %v3613_v59 = vsel %vm819_vm4, %v12435_v51, %v12436_v58  ;;  %v3614_v63 = vsel %vm819_vm4, %v12436_v58, %v3612_v53  ;;  %v3582_v53 = vmax.f32 %v3454_v50, 0.0 }
 0xaba   : > { %v3617_v5 = vmax.f32 %v3585_v23, %v3613_v59  ;;  %v3618_v8 = vmax.f32 %v3586_v41, %v3614_v63  ;;  %v4322_v23 = vand.u32 %v12997_v57, %v13569_v20  ;;  %v13017_v41 = vld [vmem:[%s13548_s16 + $0x558] ss:$28 sps:$4 sm:$0x3f]   ;;  %v12439_v45 = vpop.permute.xlu1 %12438 }
 0xabb   : > { %v4337_v44 = vand.u32 %v13017_v41, %v13569_v20  ;;  %v12441_v46 = vunpack.i.h.bf16 %v12439_v45  ;;  %v12440_v48 = vunpack.i.l.bf16 %v12439_v45 }
 0xabc   : > { %v12442_v10 = vpack.i.bf16 %v3618_v8, %v3617_v5  ;;  %4347 = vmatprep.subr.bf16.mxu1 %v4322_v23 }
 0xabd   : > { %4348 = vmatpush1.bf16.msra.mxu1 %v4319_v24  ;;  %v3599_v58 = vsel %vm819_vm4, %v12441_v46, %v3597_v36  ;;  %v3598_v51 = vsel %vm819_vm4, %v12440_v48, %v12441_v46 }
 0xabe   : > { %12443 = vrot.lane.b32.xlu1 %v12442_v10, %s17086_s24  ;;  %4380 = vmatprep.subr.bf16.mxu1 %v13000_v25  ;;  %v3603_v8 = vmax.f32 %v3583_v47, %v3599_v58  ;;  %v3602_v10 = vmax.f32 %v3582_v53, %v3598_v51 }
 0xac0   : > { %10728 = vmatmul.mubr.msk.bf16.vlgmr.msra.gmra.mrb[44].mxu1 %vm611_vm2, %v14301_v62 }
 0xac1   : > { %4381 = vmatpush1.bf16.msra.mxu1 %v12998_v43  ;;  %4412 = vmatprep.mubr.bf16.mxu1 %v13414_v0 }
 0xac2   : > { %4382 = vmatprep.subr.bf16.mxu1 %v13003_v7 }
 0xac5   : > { %4383 = vmatpush1.bf16.msra.mxu1 %v13001_v17 }
 0xac6   : > { %4384 = vmatprep.subr.bf16.mxu1 %v13006_v26 }
 0xac9   : > { %4385 = vmatpush1.bf16.msra.mxu1 %v13004_v27 }
 0xaca   : > { %4386 = vmatprep.subr.bf16.mxu1 %v13009_v28 }
 0xacd   : > { %4387 = vmatpush1.bf16.msra.mxu1 %v13007_v30 }
 0xace   : > { %4388 = vmatprep.subr.bf16.mxu1 %v4328_v35 }
 0xad1   : > { %4389 = vmatpush1.bf16.msra.mxu1 %v4325_v38 }
 0xad2   : > { %11732 = vmatprep.subr.bf16.mxu1 %v17005_v33 }
 0xad4   : > { %10729 = vmatmul.mubr.msk.bf16.vlgmr.msra.gmra.mrb[48].mxu1 %vm611_vm2, %v14301_v62 }
 0xad5   : > { %11733 = vmatpush3.bf16.msra.mxu1 %v13013_v37  ;;  %11742 = vmatprep.mubr.msk.bf16.mxu1 %vm13417_vm3, %v17005_v33 }
 0xad6   : > { %11734 = vmatprep.subr.bf16.mxu1 %v17005_v33 }
 0xad9   : > { %11735 = vmatpush3.bf16.msra.mxu1 %v13014_v39 }
 0xada   : > { %11736 = vmatprep.subr.bf16.mxu1 %v17005_v33 }
 0xadd   : > { %11737 = vmatpush3.bf16.msra.mxu1 %v13015_v40 }
 0xade   : > { %11738 = vmatprep.subr.bf16.mxu1 %v17005_v33 }
 0xae1   : > { %11739 = vmatpush3.bf16.msra.mxu1 %v13016_v6 }
 0xae2   : > { %11740 = vmatprep.subr.bf16.mxu1 %v17005_v33 }
 0xae5   : > { %11741 = vmatpush3.bf16.msra.mxu1 %v4337_v44 }
 0xae8   : > { %11743 = vmatmul.mubr.msk.bf16.vlgmr.msra.gmra.mrb[52].mxu1 %vm611_vm2, %v14301_v62 }
 0xae9   : > { %5291 = vmatprep.mubr.bf16.mxu1 %v13414_v0 }
 0xb30   : > { %v12444_v59 = vpop.permute.xlu1 %12443 }
 0xb31   : > { %v12446_v63 = vunpack.i.h.bf16 %v12444_v59  ;;  %v12445_v5 = vunpack.i.l.bf16 %v12444_v59 }
 0xb33   : > { %v3625_v56 = vsel %vm847_vm5, %v12445_v5, %v12446_v63  ;;  %v3629_v12 = vmax.f32 %v3603_v8, %v12446_v63  ;;  %v4136_v5 = vld [vmem:[%s16969_s2] sm:$0x3f] }
 0xb34   : > { %v3628_v13 = vmax.f32 %v3602_v10, %v3625_v56 }
 0xb35   : > { %v3642_v9 = vrot.slane %v3629_v12, 4  ;;  %v3633_v15 = vrot.slane %v3629_v12, 2  ;;  %v3651_v21 = vrot.slane %v3629_v12, 6 }
 0xb36   : > { %v3641_v54 = vrot.slane %v3628_v13, 4  ;;  %v3632_v14 = vrot.slane %v3628_v13, 2  ;;  %v3650_v57 = vrot.slane %v3628_v13, 6  ;;  %v12462_v22 = vpack.i.bf16 %v3629_v12, %v3628_v13 }
 0xb38   : > { %v12452_v60 = vpack.i.bf16 %v3642_v9, %v3641_v54  ;;  %v12447_v49 = vpack.i.bf16 %v3633_v15, %v3632_v14  ;;  %v12457_v52 = vpack.i.bf16 %v3651_v21, %v3650_v57 }
 0xb3a   : > { %12453 = vrot.lane.b32.xlu1 %v12452_v60, %s17087_s0  ;;  %12448 = vrot.lane.b32.xlu0 %v12447_v49, %s17077_s14 }
 0xb3e   : > { %12463 = vrot.lane.b32.xlu1 %v12462_v22, %s17078_s15  ;;  %12458 = vrot.lane.b32.xlu0 %v12457_v52, %s17079_s29 }
 0xb93   : > { %v14389_v58 = vpop.f32.mrb[44].mxu1 }
 0xb94   : > { %v14393_v51 = vpop.f32.mrb[45].mxu1 }
 0xb95   : > { %v4377_v53 = vpop.f32.mrb[46].mxu1 }
 0xb96   : > { %v4378_v59 = vpop.f32.mrb[47].mxu1 }
 0xba7   : > { %v14399_v63 = vpop.f32.mrb[48].mxu1 }
 0xba8   : > { %v14404_v8 = vpop.f32.mrb[49].mxu1 }
 0xba9   : > { %v4418_v10 = vpop.f32.mrb[50].mxu1 }
 0xbaa   : > { %v4419_v56 = vpop.f32.mrb[51].mxu1 }
 0xbac   : > { %v12454_v47 = vpop.permute.xlu1 %12453  ;;  %v12449_v23 = vpop.permute.xlu0 %12448 }
 0xbad   : > { %v12456_v24 = vunpack.i.h.bf16 %v12454_v47  ;;  %v12455_v25 = vunpack.i.l.bf16 %v12454_v47  ;;  %v12451_v43 = vunpack.i.h.bf16 %v12449_v23  ;;  %v12450_v7 = vunpack.i.l.bf16 %v12449_v23  ;;  %v13018_v47 = vld [vmem:[%s16970_s3 + $0x8] sm:$0xff]  }
 0xbaf   : > { %v3647_v17 = vsel %vm871_vm6, %v12455_v25, %v12456_v24  ;;  %v3667_v26 = vsel %vm616_vm1, %v3629_v12, %v12451_v43  ;;  %v3669_v27 = vsel %vm895_vm8, %v12451_v43, %v12456_v24  ;;  %v3638_v28 = vsel %vm861_vm7, %v12450_v7, %v12451_v43 }
 0xbb0   : > { %v14349_v29 = vpack.c.bf16 %v3669_v27, %v3667_v26  ;;  %v3666_v30 = vsel %vm616_vm1, %v3628_v13, %v3638_v28  ;;  %v3668_v31 = vsel %vm895_vm8, %v3638_v28, %v3647_v17  ;;  %v12464_v35 = vpop.permute.xlu1 %12463  ;;  %v12459_v38 = vpop.permute.xlu0 %12458  ;;  %v13019_v28 = vld [vmem:[%s16970_s3 + $0x18] sm:$0xff]  }
 0xbb1   : > { %v14353_v37 = vpack.c.bf16 %v3668_v31, %v3666_v30  ;;  %v12466_v39 = vunpack.i.h.bf16 %v12464_v35  ;;  %v12465_v40 = vunpack.i.l.bf16 %v12464_v35  ;;  %v12461_v6 = vunpack.i.h.bf16 %v12459_v38 }
 0xbb2   : > { %v12460_v41 = vunpack.i.l.bf16 %v12459_v38  ;;  %3691 = vrot.lane.b32.xlu1 %v14349_v29, %s17072_s30 }
 0xbb3   : > { %v3663_v44 = vsel %vm889_vm9, %v12465_v40, %v12466_v39  ;;  %v3671_v45 = vsel %vm898_vm11, %v12456_v24, %v12461_v6  ;;  %3689 = vrot.lane.b32.xlu0 %v14353_v37, %s17072_s30  ;;  %v13020_v40 = vld [vmem:[%s16970_s3 + $0x20] sm:$0xff]  }
 0xbb4   : > { %v14361_v46 = vpack.c.bf16 %v12466_v39, %v3671_v45  ;;  %v3656_v48 = vsel %vm17088_vm12, %v12460_v41, %v12461_v6  ;;  %vm17091_vm12 = vmmov %vm17090_vm10  ;;  %v13021_v45 = vld [vmem:[%s16970_s3] sm:$0xff]  }
 0xbb5   : > { %v3670_v50 = vsel %vm898_vm11, %v3647_v17, %v3656_v48 }
 0xbb6   : > { %v14365_v36 = vpack.c.bf16 %v3663_v44, %v3670_v50  ;;  %3695 = vrot.lane.b32.xlu1 %v14361_v46, %s17072_s30 }
 0xbb8   : > { %3693 = vrot.lane.b32.xlu0 %v14365_v36, %s17072_s30  ;;  %v3906_v44 = vsel %vm936_vm13, %v14365_v36, 0 }
 0xbba   : > { %3764 = vrot.lane.b32.xlu1 %v14349_v29, %s17073_s12 }
 0xbbb   : > { %v4496_v12 = vpop.f32.mrb[52].mxu1 }
 0xbbc   : > { %3762 = vrot.lane.b32.xlu0 %v14353_v37, %s17073_s12  ;;  %v11744_v13 = vpop.f32.mrb[53].mxu1 }
 0xbbd   : > { %v4499_v9 = vpop.f32.mrb[54].mxu1  ;;  %v13028_v13 = vld [vmem:[%s13548_s16 + $0x4ac] ss:$28 sps:$4 sm:$0xff]  }
 0xbbe   : > { %3768 = vrot.lane.b32.xlu1 %v14361_v46, %s17073_s12  ;;  %v11745_v15 = vpop.f32.mrb[55].mxu1  ;;  %v13026_v9 = vld [vmem:[%s13548_s16 + $0x4a8] ss:$28 sps:$4 sm:$0xff]  }
 0xbbf   : > { %v13031_v15 = vld [vmem:[%s13548_s16 + $0x4e4] ss:$28 sps:$4 sm:$0xff]  }
 0xbc0   : > { %3766 = vrot.lane.b32.xlu0 %v14365_v36, %s17073_s12 }
 0xbc2   : > { %3835 = vrot.lane.b32.xlu1 %v14349_v29, %s17074_s22 }
 0xbc4   : > { %3833 = vrot.lane.b32.xlu0 %v14353_v37, %s17074_s22 }
 0xbc6   : > { %3839 = vrot.lane.b32.xlu1 %v14361_v46, %s17074_s22 }
 0xbc8   : > { %3837 = vrot.lane.b32.xlu0 %v14365_v36, %s17074_s22 }
 0xbca   : > { %3961 = vrot.lane.b32.xlu1 %v14349_v29, %s17089_s13 }
 0xbcc   : > { %3959 = vrot.lane.b32.xlu0 %v14353_v37, %s17089_s13 }
 0xbce   : > { %3965 = vrot.lane.b32.xlu1 %v14361_v46, %s17089_s13 }
 0xbd0   : > { %3963 = vrot.lane.b32.xlu0 %v14365_v36, %s17089_s13 }
 0xbd4   : > { %4139 = vperm.xlu0 %12326, %v4136_v5   ;;  %v13024_v5 = vld [vmem:[%s13548_s16 + $0x474] ss:$28 sps:$4 sm:$0xff]  }
 0xc24   : > { %v3692_v54 = vpop.permute.xlu1 %3691 }
 0xc25   : > { %3710 = vmatprep.subr.bf16.mxu0 %v3692_v54  ;;  %v3690_v14 = vpop.permute.xlu0 %3689 }
 0xc26   : > { %v3697_v60 = vsel %vm17090_vm10, %v3690_v14, %v3692_v54  ;;  %vm17092_vm10 = vcmask 1014784   ;;  %v13029_v54 = vld [vmem:[%s13548_s16 + $0x4e0] ss:$28 sps:$4 sm:$0xff]  }
 0xc27   : > { %3711 = vmatpush1.bf16.msra.mxu0 %v3697_v60  ;;  %v13034_v14 = vld [vmem:[%s13548_s16 + $0x51c] ss:$28 sps:$4 sm:$0xff]   ;;  %v13037_v60 = vld [vmem:[%s13548_s16 + $0x554] ss:$28 sps:$4 sm:$0x3f]  }
 0xc28   : > { %v3696_v49 = vpop.permute.xlu1 %3695 }
 0xc29   : > { %10633 = vmatprep.subr.msk.bf16.mxu0 %vm936_vm13, %v3696_v49 }
 0xc2a   : > { %v3694_v57 = vpop.permute.xlu0 %3693 }
 0xc2b   : > { %v3698_v21 = vsel %vm17091_vm12, %v3694_v57, %v3696_v49  ;;  %vm17093_vm12 = vmmov %vm17092_vm10  ;;  %v13032_v49 = vld [vmem:[%s13548_s16 + $0x518] ss:$28 sps:$4 sm:$0xff]   ;;  %v13035_v57 = vld [vmem:[%s13548_s16 + $0x550] ss:$28 sps:$4 sm:$0x3f]  }
 0xc2c   : > { %v3705_v22 = vsel %vm936_vm13, %v3698_v21, 0  ;;  %v3765_v52 = vpop.permute.xlu1 %3764  ;;  %v4334_v21 = vand.u32 %v13037_v60, %v13569_v20  ;;  %v14516_v60 = vld [vmem:[%s16968_s1] sm:$0x7] }
 0xc2d   : > { %3713 = vmatpush1.bf16.msra.mxu0 %v3705_v22  ;;  %v4331_v22 = vand.u32 %v13035_v57, %v13569_v20  ;;  %v13056_v57 = vld [vmem:[%s13548_s16 + $0x5b8] ss:$28 sps:$4 sm:$0xff]  }
 0xc2e   : > { %3783 = vmatprep.subr.bf16.mxu0 %v3765_v52  ;;  %v3763_v23 = vpop.permute.xlu0 %3762 }
 0xc2f   : > { %v3770_v24 = vsel %vm1005_vm14, %v3763_v23, %v3765_v52 }
 0xc30   : > { %10634 = vmatmul.mubr.msk.bf16.vlgmr.msra.gmra.mrb[32].mxu0 %vm932_vm15, %v13018_v47  ;;  %v3769_v25 = vpop.permute.xlu1 %3768 }
 0xc31   : > { %3784 = vmatpush1.bf16.msra.mxu0 %v3770_v24  ;;  %3815 = vmatprep.mubr.bf16.mxu0 %v13414_v0 }
 0xc32   : > { %10640 = vmatprep.subr.msk.bf16.mxu0 %vm936_vm13, %v3769_v25  ;;  %v3767_v43 = vpop.permute.xlu0 %3766 }
 0xc33   : > { %v3771_v7 = vsel %vm1005_vm14, %v3767_v43, %v3769_v25 }
 0xc34   : > { %v3778_v17 = vsel %vm936_vm13, %v3771_v7, 0  ;;  %v3836_v26 = vpop.permute.xlu1 %3835 }
 0xc35   : > { %3786 = vmatpush1.bf16.msra.mxu0 %v3778_v17 }
 0xc36   : > { %3854 = vmatprep.subr.bf16.mxu0 %v3836_v26  ;;  %v3834_v27 = vpop.permute.xlu0 %3833 }
 0xc37   : > { %v3841_v35 = vsel %vm17092_vm10, %v3834_v27, %v3836_v26  ;;  %vm17094_vm10 = vcmask 703488  }
 0xc38   : > { %v3840_v30 = vpop.permute.xlu1 %3839 }
 0xc3a   : > { %v3838_v31 = vpop.permute.xlu0 %3837 }
 0xc3b   : > { %v3842_v38 = vsel %vm17093_vm12, %v3838_v31, %v3840_v30  ;;  %vm17095_vm12 = vcmask 1039360  }
 0xc3c   : > { %10641 = vmatmul.mubr.msk.bf16.vlgmr.msra.gmra.mrb[32].mxu0 %vm932_vm15, %v13019_v28  ;;  %v3849_v39 = vsel %vm936_vm13, %v3842_v38, 0  ;;  %v3962_v41 = vpop.permute.xlu1 %3961 }
 0xc3d   : > { %3855 = vmatpush1.bf16.msra.mxu0 %v3841_v35  ;;  %3886 = vmatprep.mubr.bf16.mxu0 %v13414_v0 }
 0xc3e   : > { %10645 = vmatprep.subr.msk.bf16.mxu0 %vm936_vm13, %v3840_v30  ;;  %v3960_v6 = vpop.permute.xlu0 %3959 }
 0xc40   : > { %v3966_v48 = vpop.permute.xlu1 %3965 }
 0xc41   : > { %3857 = vmatpush1.bf16.msra.mxu0 %v3849_v39 }
 0xc42   : > { %3911 = vmatprep.subr.bf16.mxu0 %v14349_v29  ;;  %v3964_v29 = vpop.permute.xlu0 %3963 }
 0xc43   : > { %v3968_v36 = vsel %vm1205_vm0, %v3964_v29, %v3966_v48 }
 0xc44   : > { %v3975_v10 = vsel %vm936_vm13, %v3968_v36, 0  ;;  %v13040_v36 = vld [vmem:[%s13548_s16 + $0x57c] ss:$28 sps:$4 sm:$0xff]  }
 0xc45   : > { %5259 = vmatprep.subr.bf16.mxu1 %v13040_v36 }
 0xc48   : > { %10646 = vmatmul.mubr.msk.bf16.vlgmr.msra.gmra.mrb[32].mxu0 %vm932_vm15, %v13020_v40 }
 0xc49   : > { %3912 = vmatpush1.bf16.msra.mxu0 %v14353_v37  ;;  %3943 = vmatprep.mubr.bf16.mxu0 %v13414_v0  ;;  %v3967_v37 = vsel %vm1205_vm0, %v3960_v6, %v3962_v41 }
 0xc4a   : > { %10648 = vmatprep.subr.msk.bf16.mxu0 %vm936_vm13, %v14361_v46 }
 0xc4d   : > { %3914 = vmatpush1.bf16.msra.mxu0 %v3906_v44 }
 0xc4e   : > { %3980 = vmatprep.subr.bf16.mxu0 %v3962_v41 }
 0xc53   : > { %v14442_v50 = vpop.permute.xlu0 %4139 }
 0xc54   : > { %10649 = vmatmul.mubr.msk.bf16.vlgmr.msra.gmra.mrb[32].mxu0 %vm932_vm15, %v13021_v45  ;;  %v4497_v46 = vadd.f32 %v4496_v12, %v14442_v50  ;;  %v4417_v59 = vadd.f32 %v14404_v8, %v14442_v50  ;;  %v13025_v12 = vld [vmem:[%s16970_s3 + $0x10] sm:$0xff]   ;;  %v4415_v27 = vadd.f32 %v14399_v63, %v14442_v50 }
 0xc55   : > { %3981 = vmatpush1.bf16.msra.mxu0 %v3967_v37  ;;  %4012 = vmatprep.mubr.bf16.mxu0 %v13414_v0  ;;  %v13022_v8 = vld [vmem:[%s13548_s16 + $0x470] ss:$28 sps:$4 sm:$0xff]  }
 0xc56   : > { %10651 = vmatprep.subr.msk.bf16.mxu0 %vm936_vm13, %v3966_v48  ;;  %v4508_v53 = vmax.f32 %v4497_v46, 0.0  ;;  %v4505_v56 = vmax.f32 %v4417_v59, 0.0  ;;  %v4504_v39 = vmax.f32 %v4415_v27, 0.0  ;;  %v13038_v46 = vld [vmem:[%s13548_s16 + $0x578] ss:$28 sps:$4 sm:$0xff]  }
 0xc57   : > { %5260 = vmatpush1.bf16.msra.mxu1 %v13038_v46  ;;  %v13041_v59 = vld [vmem:[%s13548_s16 + $0x5b0] ss:$28 sps:$4 sm:$0xff]  }
 0xc58   : > { %4531 = vrot.lane.b32.xlu0 %v4508_v53, %s17085_s25  ;;  %v13043_v53 = vld [vmem:[%s13548_s16 + $0x5b4] ss:$28 sps:$4 sm:$0xff]  }
 0xc59   : > { %3983 = vmatpush1.bf16.msra.mxu0 %v3975_v10  ;;  %5261 = vmatprep.subr.bf16.mxu1 %v13043_v53  ;;  %v13044_v10 = vld [vmem:[%s13548_s16 + $0x5e8] ss:$28 sps:$4 sm:$0xff]  }
 0xc5a   : > { %4421 = vmatprep.subr.bf16.mxu0 %v13024_v5  ;;  %v13046_v5 = vld [vmem:[%s13548_s16 + $0x5ec] ss:$28 sps:$4 sm:$0xff]  }
 0xc5b   : > { %5262 = vmatpush1.bf16.msra.mxu1 %v13041_v59 }
 0xc5c   : > { %4516 = vrot.lane.b32.xlu0 %v4505_v56, %s17085_s25  ;;  %5263 = vmatprep.subr.bf16.mxu1 %v13046_v5 }
 0xc5f   : > { %5264 = vmatpush1.bf16.msra.mxu1 %v13044_v10 }
 0xc60   : > { %10652 = vmatmul.mubr.msk.bf16.vlgmr.msra.gmra.mrb[32].mxu0 %vm932_vm15, %v13025_v12  ;;  %v13052_v12 = vld [vmem:[%s13548_s16 + $0x65c] ss:$28 sps:$4 sm:$0x3f]  }
 0xc61   : > { %4422 = vmatpush1.bf16.msra.mxu0 %v13022_v8  ;;  %4453 = vmatprep.mubr.bf16.mxu0 %v13414_v0  ;;  %v13047_v8 = vld [vmem:[%s13548_s16 + $0x620] ss:$28 sps:$4 sm:$0xff]  }
 0xc62   : > { %4423 = vmatprep.subr.bf16.mxu0 %v13028_v13  ;;  %v13050_v13 = vld [vmem:[%s13548_s16 + $0x658] ss:$28 sps:$4 sm:$0x3f]  }
 0xc65   : > { %4424 = vmatpush1.bf16.msra.mxu0 %v13026_v9  ;;  %v5242_v9 = vand.u32 %v13052_v12, %v13569_v20 }
 0xc66   : > { %4425 = vmatprep.subr.bf16.mxu0 %v13031_v15  ;;  %v5239_v15 = vand.u32 %v13050_v13, %v13569_v20 }
 0xc69   : > { %4426 = vmatpush1.bf16.msra.mxu0 %v13029_v54  ;;  %v13055_v54 = vld [vmem:[%s13548_s16 + $0x584] ss:$28 sps:$4 sm:$0xff]  }
 0xc6a   : > { %4427 = vmatprep.subr.bf16.mxu0 %v13034_v14  ;;  %v13053_v14 = vld [vmem:[%s13548_s16 + $0x580] ss:$28 sps:$4 sm:$0xff]  }
 0xc6d   : > { %4428 = vmatpush1.bf16.msra.mxu0 %v13032_v49  ;;  %v13058_v49 = vld [vmem:[%s13548_s16 + $0x5bc] ss:$28 sps:$4 sm:$0xff]  }
 0xc6e   : > { %4429 = vmatprep.subr.bf16.mxu0 %v4334_v21  ;;  %v13061_v21 = vld [vmem:[%s13548_s16 + $0x5f4] ss:$28 sps:$4 sm:$0xff]  }
 0xc71   : > { %4430 = vmatpush1.bf16.msra.mxu0 %v4331_v22  ;;  %v13059_v22 = vld [vmem:[%s13548_s16 + $0x5f0] ss:$28 sps:$4 sm:$0xff]  }
 0xc74   : > { %10730 = vmatmul.mubr.msk.bf16.vlgmr.msra.gmra.mrb[36].mxu0 %vm611_vm2, %v14301_v62  ;;  %v14487_v62 = vadd.f32 %v14393_v51, %v14442_v50 }
 0xc75   : > { %4662 = vmatprep.mubr.bf16.mxu0 %v13414_v0 }
 0xc76   : > { %v4503_v38 = vmax.f32 %v14487_v62, 0.0 }
 0xc78   : > { %v12472_v40 = vpack.i.bf16 %v4504_v39, %v4503_v38  ;;  %v13072_v39 = vld [vmem:[%s13548_s16 + $0x670] ss:$28 sps:$4 sm:$0x3f]  }
 0xcca   : > { %v4532_v41 = vpop.permute.xlu0 %4531 }
 0xd33   : > { %v14475_v52 = vpop.f32.mrb[32].mxu0 }
 0xd34   : > { %v14477_v47 = vpop.f32.mrb[33].mxu0 }
 0xd35   : > { %v14479_v23 = vpop.f32.mrb[34].mxu0 }
 0xd36   : > { %v14481_v24 = vpop.f32.mrb[35].mxu0 }
 0xd47   : > { %v4455_v25 = vpop.f32.mrb[36].mxu0 }
 0xd48   : > { %v4456_v43 = vadd.f32 %v4455_v25, %v14442_v50  ;;  %v4457_v7 = vpop.f32.mrb[37].mxu0  ;;  %v13064_v25 = vld [vmem:[%s13548_s16 + $0x62c] ss:$28 sps:$4 sm:$0xff]  }
 0xd49   : > { %v4458_v17 = vadd.f32 %v4457_v7, %v14442_v50  ;;  %v4459_v26 = vpop.f32.mrb[38].mxu0  ;;  %v13062_v7 = vld [vmem:[%s13548_s16 + $0x628] ss:$28 sps:$4 sm:$0xff]  }
 0xd4a   : > { %v4506_v28 = vmax.f32 %v4456_v43, 0.0  ;;  %v4460_v30 = vpop.f32.mrb[39].mxu0  ;;  %v13067_v43 = vld [vmem:[%s13548_s16 + $0x664] ss:$28 sps:$4 sm:$0x3f]  }
 0xd4b   : > { %v4507_v31 = vmax.f32 %v4458_v17, 0.0  ;;  %v13065_v17 = vld [vmem:[%s13548_s16 + $0x660] ss:$28 sps:$4 sm:$0x3f]   ;;  %v5248_v26 = vand.u32 %v13067_v43, %v13569_v20  ;;  %v13069_v30 = vld [vmem:[%s13548_s16 + $0x5c8] ss:$28 sps:$4 sm:$0xff]  }
 0xd4c   : > { %v5245_v27 = vand.u32 %v13065_v17, %v13569_v20 }
 0xd4d   : > { %v12467_v35 = vpack.i.bf16 %v4507_v31, %v4506_v28  ;;  %v13070_v31 = vld [vmem:[%s13548_s16 + $0x600] ss:$28 sps:$4 sm:$0xff]  }
 0xd4f   : > { %12468 = vrot.lane.b32.xlu1 %v12467_v35, %s17085_s25  ;;  %v13071_v35 = vld [vmem:[%s13548_s16 + $0x638] ss:$28 sps:$4 sm:$0xff]  }
 0xd53   : > { %12473 = vrot.lane.b32.xlu1 %v12472_v40, %s17085_s25  ;;  %v5257_v40 = vand.u32 %v13072_v39, %v13569_v20 }
 0xdc1   : > { %v12469_v51 = vpop.permute.xlu1 %12468 }
 0xdc2   : > { %v12471_v63 = vunpack.i.h.bf16 %v12469_v51  ;;  %v12470_v6 = vunpack.i.l.bf16 %v12469_v51 }
 0xdc4   : > { %v4534_v44 = vsel %vm819_vm4, %v12471_v63, %v4532_v41  ;;  %v4533_v29 = vsel %vm819_vm4, %v12470_v6, %v12471_v63  ;;  %v4374_v41 = vadd.f32 %v14389_v58, %v14442_v50 }
 0xdc5   : > { %v4538_v45 = vmax.f32 %v4506_v28, %v4534_v44  ;;  %v4537_v48 = vmax.f32 %v4505_v56, %v4533_v29  ;;  %v13049_v56 = vld [vmem:[%s13548_s16 + $0x624] ss:$28 sps:$4 sm:$0xff]   ;;  %v13068_v28 = vld [vmem:[%s13548_s16 + $0x590] ss:$28 sps:$4 sm:$0xff]   ;;  %v12474_v51 = vpop.permute.xlu1 %12473  ;;  %v4517_v44 = vpop.permute.xlu0 %4516 }
 0xdc6   : > { %5265 = vmatprep.subr.bf16.mxu1 %v13049_v56  ;;  %v12476_v63 = vunpack.i.h.bf16 %v12474_v51  ;;  %v12475_v6 = vunpack.i.l.bf16 %v12474_v51 }
 0xdc7   : > { %v12477_v37 = vpack.i.bf16 %v4538_v45, %v4537_v48  ;;  %5266 = vmatpush1.bf16.msra.mxu1 %v13047_v8  ;;  %v4502_v48 = vmax.f32 %v4374_v41, 0.0 }
 0xdc8   : > { %5267 = vmatprep.subr.bf16.mxu1 %v5242_v9  ;;  %v4519_v29 = vsel %vm819_vm4, %v12476_v63, %v4517_v44  ;;  %v4518_v45 = vsel %vm819_vm4, %v12475_v6, %v12476_v63 }
 0xdc9   : > { %12478 = vrot.lane.b32.xlu1 %v12477_v37, %s17086_s24  ;;  %v4523_v53 = vmax.f32 %v4503_v38, %v4519_v29  ;;  %v4522_v59 = vmax.f32 %v4502_v48, %v4518_v45 }
 0xdcb   : > { %5268 = vmatpush1.bf16.msra.mxu1 %v5239_v15 }
 0xdcc   : > { %5300 = vmatprep.subr.bf16.mxu1 %v13055_v54 }
 0xdce   : > { %10830 = vmatmul.mubr.msk.bf16.vlgmr.msra.gmra.mrb[56].mxu1 %vm611_vm2, %v14516_v60 }
 0xdcf   : > { %5301 = vmatpush1.bf16.msra.mxu1 %v13053_v14  ;;  %5332 = vmatprep.mubr.bf16.mxu1 %v13414_v0 }
 0xdd0   : > { %5302 = vmatprep.subr.bf16.mxu1 %v13058_v49 }
 0xdd3   : > { %5303 = vmatpush1.bf16.msra.mxu1 %v13056_v57 }
 0xdd4   : > { %5304 = vmatprep.subr.bf16.mxu1 %v13061_v21 }
 0xdd7   : > { %5305 = vmatpush1.bf16.msra.mxu1 %v13059_v22 }
 0xdd8   : > { %5306 = vmatprep.subr.bf16.mxu1 %v13064_v25 }
 0xddb   : > { %5307 = vmatpush1.bf16.msra.mxu1 %v13062_v7 }
 0xddc   : > { %5308 = vmatprep.subr.bf16.mxu1 %v5248_v26 }
 0xddf   : > { %5309 = vmatpush1.bf16.msra.mxu1 %v5245_v27 }
 0xde0   : > { %11746 = vmatprep.subr.bf16.mxu1 %v17005_v33 }
 0xde2   : > { %10831 = vmatmul.mubr.msk.bf16.vlgmr.msra.gmra.mrb[60].mxu1 %vm611_vm2, %v14516_v60 }
 0xde3   : > { %11747 = vmatpush3.bf16.msra.mxu1 %v13068_v28  ;;  %11756 = vmatprep.mubr.msk.bf16.mxu1 %vm13417_vm3, %v17005_v33 }
 0xde4   : > { %11748 = vmatprep.subr.bf16.mxu1 %v17005_v33 }
 0xde7   : > { %11749 = vmatpush3.bf16.msra.mxu1 %v13069_v30 }
 0xde8   : > { %11750 = vmatprep.subr.bf16.mxu1 %v17005_v33 }
 0xdeb   : > { %11751 = vmatpush3.bf16.msra.mxu1 %v13070_v31 }
 0xdec   : > { %11752 = vmatprep.subr.bf16.mxu1 %v17005_v33 }
 0xdef   : > { %11753 = vmatpush3.bf16.msra.mxu1 %v13071_v35 }
 0xdf0   : > { %11754 = vmatprep.subr.bf16.mxu1 %v17005_v33 }
 0xdf3   : > { %11755 = vmatpush3.bf16.msra.mxu1 %v5257_v40 }
 0xdf6   : > { %11757 = vmatmul.mubr.msk.bf16.vlgmr.msra.gmra.mrb[64].mxu1 %vm611_vm2, %v14516_v60 }
 0xdf7   : > { %6211 = vmatprep.mubr.bf16.mxu1 %v13414_v0 }
 0xe3b   : > { %v12479_v37 = vpop.permute.xlu1 %12478 }
 0xe3c   : > { %v12481_v46 = vunpack.i.h.bf16 %v12479_v37  ;;  %v12480_v36 = vunpack.i.l.bf16 %v12479_v37 }
 0xe3e   : > { %v4545_v5 = vsel %vm847_vm5, %v12480_v36, %v12481_v46  ;;  %v4549_v10 = vmax.f32 %v4523_v53, %v12481_v46 }
 0xe3f   : > { %v4548_v56 = vmax.f32 %v4522_v59, %v4545_v5 }
 0xe40   : > { %v4562_v12 = vrot.slane %v4549_v10, 4  ;;  %v4553_v8 = vrot.slane %v4549_v10, 2  ;;  %v4571_v54 = vrot.slane %v4549_v10, 6 }
 0xe41   : > { %v4561_v58 = vrot.slane %v4548_v56, 4  ;;  %v4552_v50 = vrot.slane %v4548_v56, 2  ;;  %v4570_v15 = vrot.slane %v4548_v56, 6  ;;  %v12497_v14 = vpack.i.bf16 %v4549_v10, %v4548_v56 }
 0xe43   : > { %v12487_v13 = vpack.i.bf16 %v4562_v12, %v4561_v58  ;;  %v12482_v9 = vpack.i.bf16 %v4553_v8, %v4552_v50  ;;  %v12492_v62 = vpack.i.bf16 %v4571_v54, %v4570_v15 }
 0xe45   : > { %12488 = vrot.lane.b32.xlu1 %v12487_v13, %s17087_s0  ;;  %12483 = vrot.lane.b32.xlu0 %v12482_v9, %s17077_s14 }
 0xe49   : > { %12498 = vrot.lane.b32.xlu1 %v12497_v14, %s17078_s15  ;;  %12493 = vrot.lane.b32.xlu0 %v12492_v62, %s17079_s29 }
 0xea1   : > { %v14604_v46 = vpop.f32.mrb[56].mxu1 }
 0xea2   : > { %v14608_v36 = vpop.f32.mrb[57].mxu1 }
 0xea3   : > { %v5297_v53 = vpop.f32.mrb[58].mxu1 }
 0xea4   : > { %v5298_v59 = vpop.f32.mrb[59].mxu1 }
 0xea5   : > { %v13076_v59 = vld [vmem:[%s16970_s3] sm:$0xff]  }
 0xeb5   : > { %v14614_v5 = vpop.f32.mrb[60].mxu1 }
 0xeb7   : > { %v12489_v38 = vpop.permute.xlu1 %12488  ;;  %v12484_v49 = vpop.permute.xlu0 %12483 }
 0xeb8   : > { %v12491_v57 = vunpack.i.h.bf16 %v12489_v38  ;;  %v12490_v21 = vunpack.i.l.bf16 %v12489_v38  ;;  %v12486_v22 = vunpack.i.h.bf16 %v12484_v49  ;;  %v12485_v25 = vunpack.i.l.bf16 %v12484_v49 }
 0xeba   : > { %v4567_v43 = vsel %vm871_vm6, %v12490_v21, %v12491_v57  ;;  %v4587_v7 = vsel %vm616_vm1, %v4549_v10, %v12486_v22  ;;  %v4589_v17 = vsel %vm895_vm8, %v12486_v22, %v12491_v57  ;;  %v4558_v26 = vsel %vm861_vm7, %v12485_v25, %v12486_v22  ;;  %v5056_v10 = vld [vmem:[%s16969_s2] sm:$0x3f]  ;;  %v13073_v22 = vld [vmem:[%s16970_s3 + $0x8] sm:$0xff]  }
 0xebb   : > { %v14564_v27 = vpack.c.bf16 %v4589_v17, %v4587_v7  ;;  %v4586_v28 = vsel %vm616_vm1, %v4548_v56, %v4558_v26  ;;  %v4588_v30 = vsel %vm895_vm8, %v4558_v26, %v4567_v43  ;;  %v12499_v31 = vpop.permute.xlu1 %12498  ;;  %v12494_v35 = vpop.permute.xlu0 %12493 }
 0xebc   : > { %v14568_v39 = vpack.c.bf16 %v4588_v30, %v4586_v28  ;;  %v12501_v40 = vunpack.i.h.bf16 %v12499_v31  ;;  %v12500_v51 = vunpack.i.l.bf16 %v12499_v31  ;;  %v12496_v63 = vunpack.i.h.bf16 %v12494_v35  ;;  %v14619_v56 = vpop.f32.mrb[61].mxu1 }
 0xebd   : > { %v12495_v6 = vunpack.i.l.bf16 %v12494_v35  ;;  %4611 = vrot.lane.b32.xlu1 %v14564_v27, %s17072_s30  ;;  %v5338_v12 = vpop.f32.mrb[62].mxu1  ;;  %v13074_v35 = vld [vmem:[%s16970_s3 + $0x18] sm:$0xff]  }
 0xebe   : > { %v4583_v41 = vsel %vm889_vm9, %v12500_v51, %v12501_v40  ;;  %v4591_v44 = vsel %vm898_vm11, %v12491_v57, %v12496_v63  ;;  %4609 = vrot.lane.b32.xlu0 %v14568_v39, %s17072_s30  ;;  %v5339_v8 = vpop.f32.mrb[63].mxu1 }
 0xebf   : > { %v14576_v29 = vpack.c.bf16 %v12501_v40, %v4591_v44  ;;  %v4576_v45 = vsel %vm17094_vm10, %v12495_v6, %v12496_v63  ;;  %vm17096_vm10 = vmmov %vm17095_vm12  ;;  %v13075_v44 = vld [vmem:[%s16970_s3 + $0x20] sm:$0xff]  }
 0xec0   : > { %v4590_v48 = vsel %vm898_vm11, %v4567_v43, %v4576_v45 }
 0xec1   : > { %v14580_v37 = vpack.c.bf16 %v4583_v41, %v4590_v48  ;;  %4615 = vrot.lane.b32.xlu1 %v14576_v29, %s17072_s30 }
 0xec3   : > { %4613 = vrot.lane.b32.xlu0 %v14580_v37, %s17072_s30  ;;  %v4826_v53 = vsel %vm936_vm13, %v14580_v37, 0 }
 0xec5   : > { %4684 = vrot.lane.b32.xlu1 %v14564_v27, %s17073_s12 }
 0xec7   : > { %4682 = vrot.lane.b32.xlu0 %v14568_v39, %s17073_s12 }
 0xec9   : > { %4688 = vrot.lane.b32.xlu1 %v14576_v29, %s17073_s12  ;;  %v5416_v58 = vpop.f32.mrb[64].mxu1 }
 0xeca   : > { %v11758_v50 = vpop.f32.mrb[65].mxu1 }
 0xecb   : > { %4686 = vrot.lane.b32.xlu0 %v14580_v37, %s17073_s12  ;;  %v5419_v13 = vpop.f32.mrb[66].mxu1 }
 0xecc   : > { %v11759_v9 = vpop.f32.mrb[67].mxu1  ;;  %v13079_v13 = vld [vmem:[%s13548_s16 + $0x58c] ss:$28 sps:$4 sm:$0xff]  }
 0xecd   : > { %4755 = vrot.lane.b32.xlu1 %v14564_v27, %s17074_s22 }
 0xecf   : > { %4753 = vrot.lane.b32.xlu0 %v14568_v39, %s17074_s22 }
 0xed1   : > { %4759 = vrot.lane.b32.xlu1 %v14576_v29, %s17074_s22 }
 0xed3   : > { %4757 = vrot.lane.b32.xlu0 %v14580_v37, %s17074_s22 }
 0xed5   : > { %4881 = vrot.lane.b32.xlu1 %v14564_v27, %s17089_s13 }
 0xed7   : > { %4879 = vrot.lane.b32.xlu0 %v14568_v39, %s17089_s13 }
 0xed9   : > { %4885 = vrot.lane.b32.xlu1 %v14576_v29, %s17089_s13 }
 0xedb   : > { %4883 = vrot.lane.b32.xlu0 %v14580_v37, %s17089_s13 }
 0xedf   : > { %5059 = vperm.xlu0 %12326, %v5056_v10  }
 0xf2f   : > { %v4612_v15 = vpop.permute.xlu1 %4611 }
 0xf30   : > { %4630 = vmatprep.subr.bf16.mxu0 %v4612_v15  ;;  %v4610_v54 = vpop.permute.xlu0 %4609 }
 0xf31   : > { %v4617_v14 = vsel %vm17095_vm12, %v4610_v54, %v4612_v15  ;;  %vm17097_vm12 = vcmask 1014784   ;;  %v13080_v15 = vld [vmem:[%s16970_s3 + $0x10] sm:$0xff]   ;;  %v13083_v54 = vld [vmem:[%s13548_s16 + $0x5c4] ss:$28 sps:$4 sm:$0xff]  }
 0xf32   : > { %4631 = vmatpush1.bf16.msra.mxu0 %v4617_v14  ;;  %v13081_v14 = vld [vmem:[%s13548_s16 + $0x5c0] ss:$28 sps:$4 sm:$0xff]  }
 0xf33   : > { %v4616_v62 = vpop.permute.xlu1 %4615 }
 0xf34   : > { %10735 = vmatprep.subr.msk.bf16.mxu0 %vm936_vm13, %v4616_v62 }
 0xf35   : > { %v4614_v38 = vpop.permute.xlu0 %4613 }
 0xf36   : > { %v4618_v49 = vsel %vm17096_vm10, %v4614_v38, %v4616_v62  ;;  %vm17098_vm10 = vmmov %vm17097_vm12  ;;  %v13086_v62 = vld [vmem:[%s13548_s16 + $0x5fc] ss:$28 sps:$4 sm:$0xff]  }
 0xf37   : > { %v4625_v57 = vsel %vm936_vm13, %v4618_v49, 0  ;;  %v4685_v21 = vpop.permute.xlu1 %4684  ;;  %v13084_v38 = vld [vmem:[%s13548_s16 + $0x5f8] ss:$28 sps:$4 sm:$0xff]  }
 0xf38   : > { %4633 = vmatpush1.bf16.msra.mxu0 %v4625_v57  ;;  %v13089_v49 = vld [vmem:[%s13548_s16 + $0x634] ss:$28 sps:$4 sm:$0xff]   ;;  %v13092_v57 = vld [vmem:[%s13548_s16 + $0x66c] ss:$28 sps:$4 sm:$0x3f]  }
 0xf39   : > { %4703 = vmatprep.subr.bf16.mxu0 %v4685_v21  ;;  %v4683_v25 = vpop.permute.xlu0 %4682 }
 0xf3a   : > { %v4690_v43 = vsel %vm1005_vm14, %v4683_v25, %v4685_v21  ;;  %v13087_v21 = vld [vmem:[%s13548_s16 + $0x630] ss:$28 sps:$4 sm:$0xff]   ;;  %v5254_v25 = vand.u32 %v13092_v57, %v13569_v20 }
 0xf3b   : > { %10736 = vmatmul.mubr.msk.bf16.vlgmr.msra.gmra.mrb[40].mxu0 %vm932_vm15, %v13073_v22  ;;  %v4689_v7 = vpop.permute.xlu1 %4688  ;;  %v13090_v22 = vld [vmem:[%s13548_s16 + $0x668] ss:$28 sps:$4 sm:$0x3f]  }
 0xf3c   : > { %4704 = vmatpush1.bf16.msra.mxu0 %v4690_v43  ;;  %4735 = vmatprep.mubr.bf16.mxu0 %v13414_v0  ;;  %v5251_v43 = vand.u32 %v13090_v22, %v13569_v20  ;;  %v13110_v22 = vld [vmem:[%s13548_s16 + $0x69c] ss:$28 sps:$4 sm:$0xff]  }
 0xf3d   : > { %10742 = vmatprep.subr.msk.bf16.mxu0 %vm936_vm13, %v4689_v7  ;;  %v4687_v17 = vpop.permute.xlu0 %4686 }
 0xf3e   : > { %v4691_v26 = vsel %vm1005_vm14, %v4687_v17, %v4689_v7 }
 0xf3f   : > { %v4698_v28 = vsel %vm936_vm13, %v4691_v26, 0  ;;  %v4756_v30 = vpop.permute.xlu1 %4755 }
 0xf40   : > { %4706 = vmatpush1.bf16.msra.mxu0 %v4698_v28 }
 0xf41   : > { %4774 = vmatprep.subr.bf16.mxu0 %v4756_v30  ;;  %v4754_v31 = vpop.permute.xlu0 %4753 }
 0xf42   : > { %v4761_v63 = vsel %vm17097_vm12, %v4754_v31, %v4756_v30  ;;  %vm17099_vm12 = vcmask 703488  }
 0xf43   : > { %v4760_v40 = vpop.permute.xlu1 %4759 }
 0xf45   : > { %v4758_v51 = vpop.permute.xlu0 %4757 }
 0xf46   : > { %v4762_v6 = vsel %vm17098_vm10, %v4758_v51, %v4760_v40  ;;  %vm17100_vm10 = vcmask 1039360  }
 0xf47   : > { %10743 = vmatmul.mubr.msk.bf16.vlgmr.msra.gmra.mrb[40].mxu0 %vm932_vm15, %v13074_v35  ;;  %v4769_v41 = vsel %vm936_vm13, %v4762_v6, 0  ;;  %v4882_v48 = vpop.permute.xlu1 %4881 }
 0xf48   : > { %4775 = vmatpush1.bf16.msra.mxu0 %v4761_v63  ;;  %4806 = vmatprep.mubr.bf16.mxu0 %v13414_v0 }
 0xf49   : > { %10747 = vmatprep.subr.msk.bf16.mxu0 %vm936_vm13, %v4760_v40  ;;  %v4880_v45 = vpop.permute.xlu0 %4879 }
 0xf4b   : > { %v4886_v10 = vpop.permute.xlu1 %4885 }
 0xf4c   : > { %4777 = vmatpush1.bf16.msra.mxu0 %v4769_v41 }
 0xf4d   : > { %4831 = vmatprep.subr.bf16.mxu0 %v14564_v27  ;;  %v4884_v27 = vpop.permute.xlu0 %4883 }
 0xf4e   : > { %v4888_v37 = vsel %vm1205_vm0, %v4884_v27, %v4886_v10 }
 0xf4f   : > { %v4895_v9 = vsel %vm936_vm13, %v4888_v37, 0 }
 0xf53   : > { %10748 = vmatmul.mubr.msk.bf16.vlgmr.msra.gmra.mrb[40].mxu0 %vm932_vm15, %v13075_v44 }
 0xf54   : > { %4832 = vmatpush1.bf16.msra.mxu0 %v14568_v39  ;;  %4863 = vmatprep.mubr.bf16.mxu0 %v13414_v0  ;;  %v4887_v39 = vsel %vm1205_vm0, %v4880_v45, %v4882_v48 }
 0xf55   : > { %10750 = vmatprep.subr.msk.bf16.mxu0 %vm936_vm13, %v14576_v29 }
 0xf58   : > { %4834 = vmatpush1.bf16.msra.mxu0 %v4826_v53 }
 0xf59   : > { %4900 = vmatprep.subr.bf16.mxu0 %v4882_v48 }
 0xf5e   : > { %v14657_v12 = vpop.permute.xlu0 %5059 }
 0xf5f   : > { %10751 = vmatmul.mubr.msk.bf16.vlgmr.msra.gmra.mrb[40].mxu0 %vm932_vm15, %v13076_v59  ;;  %v5417_v29 = vadd.f32 %v5416_v58, %v14657_v12  ;;  %v5337_v50 = vadd.f32 %v14619_v56, %v14657_v12  ;;  %v13077_v56 = vld [vmem:[%s13548_s16 + $0x588] ss:$28 sps:$4 sm:$0xff]   ;;  %v5335_v63 = vadd.f32 %v14614_v5, %v14657_v12 }
 0xf60   : > { %4901 = vmatpush1.bf16.msra.mxu0 %v4887_v39  ;;  %4932 = vmatprep.mubr.bf16.mxu0 %v13414_v0 }
 0xf61   : > { %10753 = vmatprep.subr.msk.bf16.mxu0 %vm936_vm13, %v4886_v10  ;;  %v5428_v8 = vmax.f32 %v5417_v29, 0.0  ;;  %v5425_v58 = vmax.f32 %v5337_v50, 0.0  ;;  %v5424_v53 = vmax.f32 %v5335_v63, 0.0  ;;  %v13122_v63 = vld [vmem:[%s13548_s16 + $0x77c] ss:$28 sps:$4 sm:$0x3f]  }
 0xf63   : > { %5451 = vrot.lane.b32.xlu0 %v5428_v8, %s17085_s25 }
 0xf64   : > { %4903 = vmatpush1.bf16.msra.mxu0 %v4895_v9  ;;  %v13095_v9 = vld [vmem:[%s13548_s16 + $0x694] ss:$28 sps:$4 sm:$0xff]  }
 0xf65   : > { %5341 = vmatprep.subr.bf16.mxu0 %v13079_v13  ;;  %v13093_v13 = vld [vmem:[%s13548_s16 + $0x690] ss:$28 sps:$4 sm:$0xff]   ;;  %6179 = vmatprep.subr.bf16.mxu1 %v13095_v9 }
 0xf66   : > { %6180 = vmatpush1.bf16.msra.mxu1 %v13093_v13 }
 0xf67   : > { %5436 = vrot.lane.b32.xlu0 %v5425_v58, %s17085_s25 }
 0xf6b   : > { %10754 = vmatmul.mubr.msk.bf16.vlgmr.msra.gmra.mrb[40].mxu0 %vm932_vm15, %v13080_v15  ;;  %v13098_v15 = vld [vmem:[%s13548_s16 + $0x6cc] ss:$28 sps:$4 sm:$0xff]  }
 0xf6c   : > { %5342 = vmatpush1.bf16.msra.mxu0 %v13077_v56  ;;  %5373 = vmatprep.mubr.bf16.mxu0 %v13414_v0  ;;  %v13096_v56 = vld [vmem:[%s13548_s16 + $0x6c8] ss:$28 sps:$4 sm:$0xff]  }
 0xf6d   : > { %5343 = vmatprep.subr.bf16.mxu0 %v13083_v54  ;;  %6181 = vmatprep.subr.bf16.mxu1 %v13098_v15  ;;  %v13101_v54 = vld [vmem:[%s13548_s16 + $0x704] ss:$28 sps:$4 sm:$0xff]  }
 0xf6e   : > { %6182 = vmatpush1.bf16.msra.mxu1 %v13096_v56 }
 0xf6f   : > { %6183 = vmatprep.subr.bf16.mxu1 %v13101_v54 }
 0xf70   : > { %5344 = vmatpush1.bf16.msra.mxu0 %v13081_v14  ;;  %v13099_v14 = vld [vmem:[%s13548_s16 + $0x700] ss:$28 sps:$4 sm:$0xff]  }
 0xf71   : > { %5345 = vmatprep.subr.bf16.mxu0 %v13086_v62  ;;  %v13107_v62 = vld [vmem:[%s13548_s16 + $0x774] ss:$28 sps:$4 sm:$0x3f]  }
 0xf72   : > { %6184 = vmatpush1.bf16.msra.mxu1 %v13099_v14  ;;  %v6162_v57 = vand.u32 %v13107_v62, %v13569_v20 }
 0xf74   : > { %5346 = vmatpush1.bf16.msra.mxu0 %v13084_v38  ;;  %v13102_v38 = vld [vmem:[%s13548_s16 + $0x738] ss:$28 sps:$4 sm:$0xff]  }
 0xf75   : > { %5347 = vmatprep.subr.bf16.mxu0 %v13089_v49  ;;  %v13105_v49 = vld [vmem:[%s13548_s16 + $0x770] ss:$28 sps:$4 sm:$0x3f]  }
 0xf78   : > { %5348 = vmatpush1.bf16.msra.mxu0 %v13087_v21  ;;  %v6159_v21 = vand.u32 %v13105_v49, %v13569_v20 }
 0xf79   : > { %5349 = vmatprep.subr.bf16.mxu0 %v5254_v25  ;;  %v13108_v25 = vld [vmem:[%s13548_s16 + $0x698] ss:$28 sps:$4 sm:$0xff]  }
 0xf7c   : > { %5350 = vmatpush1.bf16.msra.mxu0 %v5251_v43  ;;  %v14731_v43 = vld [vmem:[%s16968_s1] sm:$0x7] }
 0xf7f   : > { %10832 = vmatmul.mubr.msk.bf16.vlgmr.msra.gmra.mrb[44].mxu0 %vm611_vm2, %v14516_v60  ;;  %v14702_v60 = vadd.f32 %v14608_v36, %v14657_v12 }
 0xf80   : > { %5582 = vmatprep.mubr.bf16.mxu0 %v13414_v0 }
 0xf81   : > { %v5423_v48 = vmax.f32 %v14702_v60, 0.0 }
 0xf83   : > { %v12507_v27 = vpack.i.bf16 %v5424_v53, %v5423_v48  ;;  %v13123_v53 = vld [vmem:[%s13548_s16 + $0x6a8] ss:$28 sps:$4 sm:$0xff]  }
 0xfd5   : > { %v5452_v10 = vpop.permute.xlu0 %5451 }
0x103e   : > { %v14690_v7 = vpop.f32.mrb[40].mxu0 }
0x103f   : > { %v14692_v17 = vpop.f32.mrb[41].mxu0 }
0x1040   : > { %v14694_v26 = vpop.f32.mrb[42].mxu0 }
0x1041   : > { %v14696_v28 = vpop.f32.mrb[43].mxu0 }
0x1052   : > { %v5375_v30 = vpop.f32.mrb[44].mxu0 }
0x1053   : > { %v5376_v31 = vadd.f32 %v5375_v30, %v14657_v12  ;;  %v5377_v35 = vpop.f32.mrb[45].mxu0  ;;  %v13113_v30 = vld [vmem:[%s13548_s16 + $0x6d4] ss:$28 sps:$4 sm:$0xff]  }
0x1054   : > { %v5378_v40 = vadd.f32 %v5377_v35, %v14657_v12  ;;  %v5379_v51 = vpop.f32.mrb[46].mxu0  ;;  %v13116_v35 = vld [vmem:[%s13548_s16 + $0x70c] ss:$28 sps:$4 sm:$0xff]  }
0x1055   : > { %v5426_v6 = vmax.f32 %v5376_v31, 0.0  ;;  %v5380_v41 = vpop.f32.mrb[47].mxu0  ;;  %v13111_v31 = vld [vmem:[%s13548_s16 + $0x6d0] ss:$28 sps:$4 sm:$0xff]   ;;  %v13119_v51 = vld [vmem:[%s13548_s16 + $0x744] ss:$28 sps:$4 sm:$0xff]  }
0x1056   : > { %v5427_v44 = vmax.f32 %v5378_v40, 0.0  ;;  %v13114_v40 = vld [vmem:[%s13548_s16 + $0x708] ss:$28 sps:$4 sm:$0xff]   ;;  %v13120_v41 = vld [vmem:[%s13548_s16 + $0x778] ss:$28 sps:$4 sm:$0x3f]  }
0x1058   : > { %v12502_v45 = vpack.i.bf16 %v5427_v44, %v5426_v6  ;;  %v6168_v44 = vand.u32 %v13122_v63, %v13569_v20 }
0x105a   : > { %12503 = vrot.lane.b32.xlu1 %v12502_v45, %s17085_s25  ;;  %v6165_v45 = vand.u32 %v13120_v41, %v13569_v20 }
0x105e   : > { %12508 = vrot.lane.b32.xlu1 %v12507_v27, %s17085_s25  ;;  %v13124_v27 = vld [vmem:[%s13548_s16 + $0x6e0] ss:$28 sps:$4 sm:$0xff]  }
0x10cc   : > { %v12504_v36 = vpop.permute.xlu1 %12503 }
0x10cd   : > { %v12506_v5 = vunpack.i.h.bf16 %v12504_v36  ;;  %v12505_v59 = vunpack.i.l.bf16 %v12504_v36  ;;  %v13125_v36 = vld [vmem:[%s13548_s16 + $0x718] ss:$28 sps:$4 sm:$0xff]  }
0x10cf   : > { %v5454_v39 = vsel %vm819_vm4, %v12506_v5, %v5452_v10  ;;  %v5453_v29 = vsel %vm819_vm4, %v12505_v59, %v12506_v5  ;;  %v13126_v5 = vld [vmem:[%s13548_s16 + $0x750] ss:$28 sps:$4 sm:$0xff]   ;;  %v13127_v59 = vld [vmem:[%s13548_s16 + $0x788] ss:$28 sps:$4 sm:$0x3f]  }
0x10d0   : > { %v5458_v37 = vmax.f32 %v5426_v6, %v5454_v39  ;;  %v5457_v8 = vmax.f32 %v5425_v58, %v5453_v29  ;;  %v13104_v58 = vld [vmem:[%s13548_s16 + $0x73c] ss:$28 sps:$4 sm:$0xff]   ;;  %v6177_v10 = vand.u32 %v13127_v59, %v13569_v20  ;;  %v12509_v39 = vpop.permute.xlu1 %12508 }
0x10d1   : > { %6185 = vmatprep.subr.bf16.mxu1 %v13104_v58  ;;  %v13117_v6 = vld [vmem:[%s13548_s16 + $0x740] ss:$28 sps:$4 sm:$0xff]   ;;  %v12511_v29 = vunpack.i.h.bf16 %v12509_v39 }
0x10d2   : > { %v12512_v50 = vpack.i.bf16 %v5458_v37, %v5457_v8  ;;  %6186 = vmatpush1.bf16.msra.mxu1 %v13102_v38  ;;  %v12510_v37 = vunpack.i.l.bf16 %v12509_v39  ;;  %v5294_v8 = vadd.f32 %v14604_v46, %v14657_v12 }
0x10d3   : > { %6187 = vmatprep.subr.bf16.mxu1 %v6162_v57 }
0x10d4   : > { %12513 = vrot.lane.b32.xlu1 %v12512_v50, %s17086_s24  ;;  %v5437_v50 = vpop.permute.xlu0 %5436  ;;  %v5438_v9 = vsel %vm819_vm4, %v12510_v37, %v12511_v29  ;;  %v5422_v15 = vmax.f32 %v5294_v8, 0.0 }
0x10d5   : > { %v5439_v13 = vsel %vm819_vm4, %v12511_v29, %v5437_v50 }
0x10d6   : > { %6188 = vmatpush1.bf16.msra.mxu1 %v6159_v21  ;;  %v5443_v58 = vmax.f32 %v5423_v48, %v5439_v13  ;;  %v5442_v62 = vmax.f32 %v5422_v15, %v5438_v9 }
0x10d7   : > { %6220 = vmatprep.subr.bf16.mxu1 %v13110_v22 }
0x10d9   : > { %10932 = vmatmul.mubr.msk.bf16.vlgmr.msra.gmra.mrb[68].mxu1 %vm611_vm2, %v14731_v43 }
0x10da   : > { %6221 = vmatpush1.bf16.msra.mxu1 %v13108_v25  ;;  %6252 = vmatprep.mubr.bf16.mxu1 %v13414_v0 }
0x10db   : > { %6222 = vmatprep.subr.bf16.mxu1 %v13113_v30 }
0x10de   : > { %6223 = vmatpush1.bf16.msra.mxu1 %v13111_v31 }
0x10df   : > { %6224 = vmatprep.subr.bf16.mxu1 %v13116_v35 }
0x10e2   : > { %6225 = vmatpush1.bf16.msra.mxu1 %v13114_v40 }
0x10e3   : > { %6226 = vmatprep.subr.bf16.mxu1 %v13119_v51 }
0x10e6   : > { %6227 = vmatpush1.bf16.msra.mxu1 %v13117_v6 }
0x10e7   : > { %6228 = vmatprep.subr.bf16.mxu1 %v6168_v44 }
0x10ea   : > { %6229 = vmatpush1.bf16.msra.mxu1 %v6165_v45 }
0x10eb   : > { %11760 = vmatprep.subr.bf16.mxu1 %v17005_v33 }
0x10ed   : > { %10933 = vmatmul.mubr.msk.bf16.vlgmr.msra.gmra.mrb[72].mxu1 %vm611_vm2, %v14731_v43 }
0x10ee   : > { %11761 = vmatpush3.bf16.msra.mxu1 %v13123_v53  ;;  %11770 = vmatprep.mubr.msk.bf16.mxu1 %vm13417_vm3, %v17005_v33 }
0x10ef   : > { %11762 = vmatprep.subr.bf16.mxu1 %v17005_v33 }
0x10f2   : > { %11763 = vmatpush3.bf16.msra.mxu1 %v13124_v27 }
0x10f3   : > { %11764 = vmatprep.subr.bf16.mxu1 %v17005_v33 }
0x10f6   : > { %11765 = vmatpush3.bf16.msra.mxu1 %v13125_v36 }
0x10f7   : > { %11766 = vmatprep.subr.bf16.mxu1 %v17005_v33 }
0x10fa   : > { %11767 = vmatpush3.bf16.msra.mxu1 %v13126_v5 }
0x10fb   : > { %11768 = vmatprep.subr.bf16.mxu1 %v17005_v33 }
0x10fe   : > { %11769 = vmatpush3.bf16.msra.mxu1 %v6177_v10 }
0x1101   : > { %11771 = vmatmul.mubr.msk.bf16.vlgmr.msra.gmra.mrb[76].mxu1 %vm611_vm2, %v14731_v43 }
0x1102   : > { %7131 = vmatprep.mubr.bf16.mxu1 %v13414_v0 }
0x1146   : > { %v12514_v56 = vpop.permute.xlu1 %12513 }
0x1147   : > { %v12516_v54 = vunpack.i.h.bf16 %v12514_v56  ;;  %v12515_v14 = vunpack.i.l.bf16 %v12514_v56 }
0x1149   : > { %v5465_v38 = vsel %vm847_vm5, %v12515_v14, %v12516_v54  ;;  %v5469_v49 = vmax.f32 %v5443_v58, %v12516_v54 }
0x114a   : > { %v5468_v57 = vmax.f32 %v5442_v62, %v5465_v38 }
0x114b   : > { %v5482_v21 = vrot.slane %v5469_v49, 4  ;;  %v5473_v22 = vrot.slane %v5469_v49, 2  ;;  %v5491_v35 = vrot.slane %v5469_v49, 6 }
0x114c   : > { %v5481_v46 = vrot.slane %v5468_v57, 4  ;;  %v5472_v12 = vrot.slane %v5468_v57, 2  ;;  %v5490_v31 = vrot.slane %v5468_v57, 6  ;;  %v12532_v40 = vpack.i.bf16 %v5469_v49, %v5468_v57 }
0x114e   : > { %v12522_v25 = vpack.i.bf16 %v5482_v21, %v5481_v46  ;;  %v12517_v30 = vpack.i.bf16 %v5473_v22, %v5472_v12  ;;  %v12527_v60 = vpack.i.bf16 %v5491_v35, %v5490_v31  ;;  %v5976_v46 = vld [vmem:[%s16969_s2] sm:$0x3f] }
0x1150   : > { %12523 = vrot.lane.b32.xlu1 %v12522_v25, %s17087_s0  ;;  %12518 = vrot.lane.b32.xlu0 %v12517_v30, %s17077_s14 }
0x1154   : > { %12533 = vrot.lane.b32.xlu1 %v12532_v40, %s17078_s15  ;;  %12528 = vrot.lane.b32.xlu0 %v12527_v60, %s17079_s29 }
0x11ac   : > { %v14819_v38 = vpop.f32.mrb[68].mxu1 }
0x11c2   : > { %v12524_v48 = vpop.permute.xlu1 %12523  ;;  %v12519_v51 = vpop.permute.xlu0 %12518 }
0x11c3   : > { %v12526_v63 = vunpack.i.h.bf16 %v12524_v48  ;;  %v12525_v6 = vunpack.i.l.bf16 %v12524_v48  ;;  %v12521_v41 = vunpack.i.h.bf16 %v12519_v51  ;;  %v12520_v44 = vunpack.i.l.bf16 %v12519_v51 }
0x11c5   : > { %v5487_v45 = vsel %vm871_vm6, %v12525_v6, %v12526_v63  ;;  %v5507_v53 = vsel %vm616_vm1, %v5469_v49, %v12521_v41  ;;  %v5509_v27 = vsel %vm895_vm8, %v12521_v41, %v12526_v63  ;;  %v5478_v36 = vsel %vm861_vm7, %v12520_v44, %v12521_v41  ;;  %v14823_v49 = vpop.f32.mrb[69].mxu1 }
0x11c6   : > { %v14779_v5 = vpack.c.bf16 %v5509_v27, %v5507_v53  ;;  %v5506_v59 = vsel %vm616_vm1, %v5468_v57, %v5478_v36  ;;  %v5508_v10 = vsel %vm895_vm8, %v5478_v36, %v5487_v45  ;;  %v12534_v39 = vpop.permute.xlu1 %12533  ;;  %v12529_v29 = vpop.permute.xlu0 %12528  ;;  %v13128_v27 = vld [vmem:[%s16970_s3 + $0x8] sm:$0xff]  }
0x11c7   : > { %v14783_v37 = vpack.c.bf16 %v5508_v10, %v5506_v59  ;;  %v12536_v8 = vunpack.i.h.bf16 %v12534_v39  ;;  %v12535_v50 = vunpack.i.l.bf16 %v12534_v39  ;;  %v12531_v13 = vunpack.i.h.bf16 %v12529_v29  ;;  %v6217_v57 = vpop.f32.mrb[70].mxu1 }
0x11c8   : > { %v12530_v9 = vunpack.i.l.bf16 %v12529_v29  ;;  %5531 = vrot.lane.b32.xlu1 %v14779_v5, %s17072_s30  ;;  %v6218_v21 = vpop.f32.mrb[71].mxu1 }
0x11c9   : > { %v5503_v15 = vsel %vm889_vm9, %v12535_v50, %v12536_v8  ;;  %v5511_v56 = vsel %vm898_vm11, %v12526_v63, %v12531_v13  ;;  %5529 = vrot.lane.b32.xlu0 %v14783_v37, %s17072_s30  ;;  %v14829_v22 = vpop.f32.mrb[72].mxu1  ;;  %v13130_v21 = vld [vmem:[%s16970_s3 + $0x20] sm:$0xff]  }
0x11ca   : > { %v14791_v54 = vpack.c.bf16 %v12536_v8, %v5511_v56  ;;  %v5496_v14 = vsel %vm17099_vm12, %v12530_v9, %v12531_v13  ;;  %v14834_v12 = vpop.f32.mrb[73].mxu1  ;;  %vm17101_vm12 = vmmov %vm17100_vm10  ;;  %v13129_v9 = vld [vmem:[%s16970_s3 + $0x18] sm:$0xff]  }
0x11cb   : > { %v5510_v58 = vsel %vm898_vm11, %v5487_v45, %v5496_v14  ;;  %v6258_v25 = vpop.f32.mrb[74].mxu1 }
0x11cc   : > { %v14795_v62 = vpack.c.bf16 %v5503_v15, %v5510_v58  ;;  %5535 = vrot.lane.b32.xlu1 %v14791_v54, %s17072_s30  ;;  %v6259_v30 = vpop.f32.mrb[75].mxu1 }
0x11ce   : > { %5533 = vrot.lane.b32.xlu0 %v14795_v62, %s17072_s30  ;;  %v5746_v30 = vsel %vm936_vm13, %v14795_v62, 0 }
0x11d0   : > { %5604 = vrot.lane.b32.xlu1 %v14779_v5, %s17073_s12 }
0x11d2   : > { %5602 = vrot.lane.b32.xlu0 %v14783_v37, %s17073_s12 }
0x11d4   : > { %5608 = vrot.lane.b32.xlu1 %v14791_v54, %s17073_s12  ;;  %v6336_v31 = vpop.f32.mrb[76].mxu1 }
0x11d5   : > { %v11772_v35 = vpop.f32.mrb[77].mxu1 }
0x11d6   : > { %5606 = vrot.lane.b32.xlu0 %v14795_v62, %s17073_s12  ;;  %v6339_v40 = vpop.f32.mrb[78].mxu1  ;;  %v13131_v35 = vld [vmem:[%s16970_s3] sm:$0xff]  }
0x11d7   : > { %v11773_v60 = vpop.f32.mrb[79].mxu1 }
0x11d8   : > { %5675 = vrot.lane.b32.xlu1 %v14779_v5, %s17074_s22 }
0x11da   : > { %5673 = vrot.lane.b32.xlu0 %v14783_v37, %s17074_s22 }
0x11dc   : > { %5679 = vrot.lane.b32.xlu1 %v14791_v54, %s17074_s22 }
0x11de   : > { %5677 = vrot.lane.b32.xlu0 %v14795_v62, %s17074_s22 }
0x11e0   : > { %5801 = vrot.lane.b32.xlu1 %v14779_v5, %s17089_s13 }
0x11e2   : > { %5799 = vrot.lane.b32.xlu0 %v14783_v37, %s17089_s13 }
0x11e4   : > { %5805 = vrot.lane.b32.xlu1 %v14791_v54, %s17089_s13 }
0x11e6   : > { %5803 = vrot.lane.b32.xlu0 %v14795_v62, %s17089_s13 }
0x11ea   : > { %5979 = vperm.xlu0 %12326, %v5976_v46  }
0x123a   : > { %v5532_v48 = vpop.permute.xlu1 %5531 }
0x123b   : > { %5550 = vmatprep.subr.bf16.mxu0 %v5532_v48  ;;  %v5530_v51 = vpop.permute.xlu0 %5529 }
0x123c   : > { %v5537_v63 = vsel %vm17100_vm10, %v5530_v51, %v5532_v48  ;;  %vm17102_vm10 = vcmask 1014784  }
0x123d   : > { %5551 = vmatpush1.bf16.msra.mxu0 %v5537_v63  ;;  %v13134_v63 = vld [vmem:[%s13548_s16 + $0x6a4] ss:$28 sps:$4 sm:$0xff]  }
0x123e   : > { %v5536_v6 = vpop.permute.xlu1 %5535 }
0x123f   : > { %10837 = vmatprep.subr.msk.bf16.mxu0 %vm936_vm13, %v5536_v6 }
0x1240   : > { %v5534_v41 = vpop.permute.xlu0 %5533 }
0x1241   : > { %v5538_v44 = vsel %vm17101_vm12, %v5534_v41, %v5536_v6  ;;  %vm17103_vm12 = vmmov %vm17102_vm10  ;;  %v13135_v41 = vld [vmem:[%s16970_s3 + $0x10] sm:$0xff]  }
0x1242   : > { %v5545_v45 = vsel %vm936_vm13, %v5538_v44, 0  ;;  %v5605_v53 = vpop.permute.xlu1 %5604  ;;  %v13138_v44 = vld [vmem:[%s13548_s16 + $0x6dc] ss:$28 sps:$4 sm:$0xff]  }
0x1243   : > { %5553 = vmatpush1.bf16.msra.mxu0 %v5545_v45  ;;  %v13136_v45 = vld [vmem:[%s13548_s16 + $0x6d8] ss:$28 sps:$4 sm:$0xff]  }
0x1244   : > { %5623 = vmatprep.subr.bf16.mxu0 %v5605_v53  ;;  %v5603_v36 = vpop.permute.xlu0 %5602 }
0x1245   : > { %v5610_v59 = vsel %vm1005_vm14, %v5603_v36, %v5605_v53  ;;  %v13141_v53 = vld [vmem:[%s13548_s16 + $0x714] ss:$28 sps:$4 sm:$0xff]   ;;  %v13144_v36 = vld [vmem:[%s13548_s16 + $0x74c] ss:$28 sps:$4 sm:$0xff]  }
0x1246   : > { %10838 = vmatmul.mubr.msk.bf16.vlgmr.msra.gmra.mrb[48].mxu0 %vm932_vm15, %v13128_v27  ;;  %v5609_v10 = vpop.permute.xlu1 %5608  ;;  %v13139_v27 = vld [vmem:[%s13548_s16 + $0x710] ss:$28 sps:$4 sm:$0xff]  }
0x1247   : > { %5624 = vmatpush1.bf16.msra.mxu0 %v5610_v59  ;;  %5655 = vmatprep.mubr.bf16.mxu0 %v13414_v0  ;;  %v13147_v59 = vld [vmem:[%s13548_s16 + $0x784] ss:$28 sps:$4 sm:$0x3f]  }
0x1248   : > { %10844 = vmatprep.subr.msk.bf16.mxu0 %vm936_vm13, %v5609_v10  ;;  %v5607_v39 = vpop.permute.xlu0 %5606 }
0x1249   : > { %v5611_v29 = vsel %vm1005_vm14, %v5607_v39, %v5609_v10  ;;  %v13142_v10 = vld [vmem:[%s13548_s16 + $0x748] ss:$28 sps:$4 sm:$0xff]   ;;  %v13145_v39 = vld [vmem:[%s13548_s16 + $0x780] ss:$28 sps:$4 sm:$0x3f]  }
0x124a   : > { %v5618_v8 = vsel %vm936_vm13, %v5611_v29, 0  ;;  %v5676_v50 = vpop.permute.xlu1 %5675  ;;  %v6174_v29 = vand.u32 %v13147_v59, %v13569_v20  ;;  %v13154_v59 = vld [vmem:[%s13548_s16 + $0x818] ss:$28 sps:$4 sm:$0xff]  }
0x124b   : > { %5626 = vmatpush1.bf16.msra.mxu0 %v5618_v8  ;;  %v6171_v8 = vand.u32 %v13145_v39, %v13569_v20  ;;  %v13157_v39 = vld [vmem:[%s13548_s16 + $0x850] ss:$28 sps:$4 sm:$0xff]  }
0x124c   : > { %5694 = vmatprep.subr.bf16.mxu0 %v5676_v50  ;;  %v5674_v13 = vpop.permute.xlu0 %5673 }
0x124d   : > { %v5681_v14 = vsel %vm17102_vm10, %v5674_v13, %v5676_v50  ;;  %vm17104_vm10 = vcmask 703488  }
0x124e   : > { %v5680_v15 = vpop.permute.xlu1 %5679 }
0x1250   : > { %v5678_v56 = vpop.permute.xlu0 %5677 }
0x1251   : > { %v5682_v58 = vsel %vm17103_vm12, %v5678_v56, %v5680_v15  ;;  %vm17105_vm12 = vcmask 1039360  }
0x1252   : > { %10845 = vmatmul.mubr.msk.bf16.vlgmr.msra.gmra.mrb[48].mxu0 %vm932_vm15, %v13129_v9  ;;  %v5689_v57 = vsel %vm936_vm13, %v5682_v58, 0  ;;  %v5802_v25 = vpop.permute.xlu1 %5801 }
0x1253   : > { %5695 = vmatpush1.bf16.msra.mxu0 %v5681_v14  ;;  %5726 = vmatprep.mubr.bf16.mxu0 %v13414_v0 }
0x1254   : > { %10849 = vmatprep.subr.msk.bf16.mxu0 %vm936_vm13, %v5680_v15  ;;  %v5800_v46 = vpop.permute.xlu0 %5799 }
0x1256   : > { %v5806_v40 = vpop.permute.xlu1 %5805 }
0x1257   : > { %5697 = vmatpush1.bf16.msra.mxu0 %v5689_v57 }
0x1258   : > { %5751 = vmatprep.subr.bf16.mxu0 %v14779_v5  ;;  %v5804_v5 = vpop.permute.xlu0 %5803 }
0x1259   : > { %v5808_v62 = vsel %vm1205_vm0, %v5804_v5, %v5806_v40 }
0x125a   : > { %v5815_v6 = vsel %vm936_vm13, %v5808_v62, 0 }
0x125e   : > { %10850 = vmatmul.mubr.msk.bf16.vlgmr.msra.gmra.mrb[48].mxu0 %vm932_vm15, %v13130_v21 }
0x125f   : > { %5752 = vmatpush1.bf16.msra.mxu0 %v14783_v37  ;;  %5783 = vmatprep.mubr.bf16.mxu0 %v13414_v0  ;;  %v5807_v37 = vsel %vm1205_vm0, %v5800_v46, %v5802_v25 }
0x1260   : > { %10852 = vmatprep.subr.msk.bf16.mxu0 %vm936_vm13, %v14791_v54 }
0x1263   : > { %5754 = vmatpush1.bf16.msra.mxu0 %v5746_v30 }
0x1264   : > { %5820 = vmatprep.subr.bf16.mxu0 %v5802_v25 }
0x1269   : > { %v14872_v60 = vpop.permute.xlu0 %5979 }
0x126a   : > { %10853 = vmatmul.mubr.msk.bf16.vlgmr.msra.gmra.mrb[48].mxu0 %vm932_vm15, %v13131_v35  ;;  %v6337_v54 = vadd.f32 %v6336_v31, %v14872_v60  ;;  %v6257_v51 = vadd.f32 %v14834_v12, %v14872_v60  ;;  %v13132_v12 = vld [vmem:[%s13548_s16 + $0x6a0] ss:$28 sps:$4 sm:$0xff]   ;;  %v6255_v46 = vadd.f32 %v14829_v22, %v14872_v60 }
0x126b   : > { %5821 = vmatpush1.bf16.msra.mxu0 %v5807_v37  ;;  %5852 = vmatprep.mubr.bf16.mxu0 %v13414_v0 }
0x126c   : > { %10855 = vmatprep.subr.msk.bf16.mxu0 %vm936_vm13, %v5806_v40  ;;  %v6348_v48 = vmax.f32 %v6337_v54, 0.0  ;;  %v6345_v31 = vmax.f32 %v6257_v51, 0.0  ;;  %v6344_v37 = vmax.f32 %v6255_v46, 0.0  ;;  %v13166_v46 = vld [vmem:[%s13548_s16 + $0x7e8] ss:$28 sps:$4 sm:$0xff]  }
0x126e   : > { %6371 = vrot.lane.b32.xlu0 %v6348_v48, %s17085_s25 }
0x126f   : > { %5823 = vmatpush1.bf16.msra.mxu0 %v5815_v6 }
0x1270   : > { %6261 = vmatprep.subr.bf16.mxu0 %v13134_v63 }
0x1272   : > { %6356 = vrot.lane.b32.xlu0 %v6345_v31, %s17085_s25 }
0x1276   : > { %10856 = vmatmul.mubr.msk.bf16.vlgmr.msra.gmra.mrb[48].mxu0 %vm932_vm15, %v13135_v41 }
0x1277   : > { %6262 = vmatpush1.bf16.msra.mxu0 %v13132_v12  ;;  %6293 = vmatprep.mubr.bf16.mxu0 %v13414_v0 }
0x1278   : > { %6263 = vmatprep.subr.bf16.mxu0 %v13138_v44  ;;  %v13148_v44 = vld [vmem:[%s13548_s16 + $0x7a8] ss:$28 sps:$4 sm:$0xff]  }
0x127b   : > { %6264 = vmatpush1.bf16.msra.mxu0 %v13136_v45  ;;  %v13150_v45 = vld [vmem:[%s13548_s16 + $0x7ac] ss:$28 sps:$4 sm:$0xff]  }
0x127c   : > { %6265 = vmatprep.subr.bf16.mxu0 %v13141_v53  ;;  %v13153_v53 = vld [vmem:[%s13548_s16 + $0x7e4] ss:$28 sps:$4 sm:$0xff]   ;;  %7099 = vmatprep.subr.bf16.mxu1 %v13150_v45 }
0x127d   : > { %7100 = vmatpush1.bf16.msra.mxu1 %v13148_v44 }
0x127e   : > { %7101 = vmatprep.subr.bf16.mxu1 %v13153_v53  ;;  %v6214_v53 = vadd.f32 %v14819_v38, %v14872_v60 }
0x127f   : > { %6266 = vmatpush1.bf16.msra.mxu0 %v13139_v27  ;;  %v13151_v27 = vld [vmem:[%s13548_s16 + $0x7e0] ss:$28 sps:$4 sm:$0xff]  }
0x1280   : > { %6267 = vmatprep.subr.bf16.mxu0 %v13144_v36  ;;  %v13156_v36 = vld [vmem:[%s13548_s16 + $0x81c] ss:$28 sps:$4 sm:$0xff]  }
0x1281   : > { %7102 = vmatpush1.bf16.msra.mxu1 %v13151_v27 }
0x1282   : > { %7103 = vmatprep.subr.bf16.mxu1 %v13156_v36 }
0x1283   : > { %6268 = vmatpush1.bf16.msra.mxu0 %v13142_v10  ;;  %v13162_v10 = vld [vmem:[%s13548_s16 + $0x88c] ss:$28 sps:$4 sm:$0x3f]  }
0x1284   : > { %6269 = vmatprep.subr.bf16.mxu0 %v6174_v29  ;;  %v13160_v29 = vld [vmem:[%s13548_s16 + $0x888] ss:$28 sps:$4 sm:$0x3f]  }
0x1285   : > { %7104 = vmatpush1.bf16.msra.mxu1 %v13154_v59 }
0x1287   : > { %6270 = vmatpush1.bf16.msra.mxu0 %v6171_v8  ;;  %v7082_v8 = vand.u32 %v13162_v10, %v13569_v20 }
0x128a   : > { %10934 = vmatmul.mubr.msk.bf16.vlgmr.msra.gmra.mrb[52].mxu0 %vm611_vm2, %v14731_v43  ;;  %v14917_v43 = vadd.f32 %v14823_v49, %v14872_v60 }
0x128b   : > { %6502 = vmatprep.mubr.bf16.mxu0 %v13414_v0 }
0x128c   : > { %v6343_v40 = vmax.f32 %v14917_v43, 0.0 }
0x128e   : > { %v12542_v54 = vpack.i.bf16 %v6344_v37, %v6343_v40  ;;  %v13172_v37 = vld [vmem:[%s13548_s16 + $0x858] ss:$28 sps:$4 sm:$0xff]  }
0x12e0   : > { %v6372_v48 = vpop.permute.xlu0 %6371 }
0x12e4   : > { %v6357_v27 = vpop.permute.xlu0 %6356 }
0x1349   : > { %v14905_v50 = vpop.f32.mrb[48].mxu0 }
0x134a   : > { %v14907_v13 = vpop.f32.mrb[49].mxu0 }
0x134b   : > { %v14909_v9 = vpop.f32.mrb[50].mxu0 }
0x134c   : > { %v14911_v15 = vpop.f32.mrb[51].mxu0 }
0x135d   : > { %v6295_v56 = vpop.f32.mrb[52].mxu0 }
0x135e   : > { %v6296_v14 = vadd.f32 %v6295_v56, %v14872_v60  ;;  %v6297_v58 = vpop.f32.mrb[53].mxu0  ;;  %v7079_v56 = vand.u32 %v13160_v29, %v13569_v20 }
0x135f   : > { %v6298_v57 = vadd.f32 %v6297_v58, %v14872_v60  ;;  %v6299_v21 = vpop.f32.mrb[54].mxu0  ;;  %v13163_v58 = vld [vmem:[%s13548_s16 + $0x7b0] ss:$28 sps:$4 sm:$0xff]  }
0x1360   : > { %v6346_v25 = vmax.f32 %v6296_v14, 0.0  ;;  %v6300_v30 = vpop.f32.mrb[55].mxu0  ;;  %v13165_v14 = vld [vmem:[%s13548_s16 + $0x7b4] ss:$28 sps:$4 sm:$0xff]   ;;  %v13168_v21 = vld [vmem:[%s13548_s16 + $0x7ec] ss:$28 sps:$4 sm:$0xff]  }
0x1361   : > { %v6347_v5 = vmax.f32 %v6298_v57, 0.0  ;;  %v14946_v57 = vld [vmem:[%s16968_s1] sm:$0x7] }
0x1362   : > { %v13169_v30 = vld [vmem:[%s13548_s16 + $0x820] ss:$28 sps:$4 sm:$0xff]  }
0x1363   : > { %v12537_v35 = vpack.i.bf16 %v6347_v5, %v6346_v25  ;;  %v13174_v5 = vld [vmem:[%s13548_s16 + $0x85c] ss:$28 sps:$4 sm:$0xff]  }
0x1365   : > { %12538 = vrot.lane.b32.xlu1 %v12537_v35, %s17085_s25  ;;  %v13177_v35 = vld [vmem:[%s13548_s16 + $0x894] ss:$28 sps:$4 sm:$0x3f]  }
0x1369   : > { %12543 = vrot.lane.b32.xlu1 %v12542_v54, %s17085_s25  ;;  %v13175_v54 = vld [vmem:[%s13548_s16 + $0x890] ss:$28 sps:$4 sm:$0x3f]  }
0x13d7   : > { %v12539_v49 = vpop.permute.xlu1 %12538 }
0x13d8   : > { %v12541_v22 = vunpack.i.h.bf16 %v12539_v49  ;;  %v12540_v62 = vunpack.i.l.bf16 %v12539_v49  ;;  %v7088_v49 = vand.u32 %v13177_v35, %v13569_v20 }
0x13da   : > { %v6374_v51 = vsel %vm819_vm4, %v12541_v22, %v6372_v48  ;;  %v6373_v63 = vsel %vm819_vm4, %v12540_v62, %v12541_v22  ;;  %v7085_v22 = vand.u32 %v13175_v54, %v13569_v20  ;;  %v13178_v62 = vld [vmem:[%s13548_s16 + $0x7c0] ss:$28 sps:$4 sm:$0xff]   ;;  %v13179_v48 = vld [vmem:[%s13548_s16 + $0x7f8] ss:$28 sps:$4 sm:$0xff]  }
0x13db   : > { %v6378_v6 = vmax.f32 %v6346_v25, %v6374_v51  ;;  %v6377_v41 = vmax.f32 %v6345_v31, %v6373_v63  ;;  %v13159_v31 = vld [vmem:[%s13548_s16 + $0x854] ss:$28 sps:$4 sm:$0xff]   ;;  %v13171_v25 = vld [vmem:[%s13548_s16 + $0x824] ss:$28 sps:$4 sm:$0xff]  }
0x13dc   : > { %7105 = vmatprep.subr.bf16.mxu1 %v13159_v31  ;;  %v13180_v51 = vld [vmem:[%s13548_s16 + $0x830] ss:$28 sps:$4 sm:$0xff]   ;;  %v13181_v63 = vld [vmem:[%s13548_s16 + $0x868] ss:$28 sps:$4 sm:$0xff]   ;;  %v6342_v31 = vmax.f32 %v6214_v53, 0.0 }
0x13dd   : > { %v12547_v12 = vpack.i.bf16 %v6378_v6, %v6377_v41  ;;  %7106 = vmatpush1.bf16.msra.mxu1 %v13157_v39  ;;  %v13182_v6 = vld [vmem:[%s13548_s16 + $0x8a0] ss:$28 sps:$4 sm:$0x3f]  }
0x13de   : > { %7107 = vmatprep.subr.bf16.mxu1 %v7082_v8  ;;  %v7097_v41 = vand.u32 %v13182_v6, %v13569_v20 }
0x13df   : > { %12548 = vrot.lane.b32.xlu1 %v12547_v12, %s17086_s24  ;;  %v12544_v12 = vpop.permute.xlu1 %12543 }
0x13e0   : > { %v12546_v44 = vunpack.i.h.bf16 %v12544_v12  ;;  %v12545_v45 = vunpack.i.l.bf16 %v12544_v12 }
0x13e1   : > { %7108 = vmatpush1.bf16.msra.mxu1 %v7079_v56 }
0x13e2   : > { %7140 = vmatprep.subr.bf16.mxu1 %v13165_v14  ;;  %v6359_v36 = vsel %vm819_vm4, %v12546_v44, %v6357_v27  ;;  %v6358_v59 = vsel %vm819_vm4, %v12545_v45, %v12546_v44 }
0x13e3   : > { %v6363_v8 = vmax.f32 %v6343_v40, %v6359_v36  ;;  %v6362_v56 = vmax.f32 %v6342_v31, %v6358_v59 }
0x13e4   : > { %11034 = vmatmul.mubr.msk.bf16.vlgmr.msra.gmra.mrb[80].mxu1 %vm611_vm2, %v14946_v57 }
0x13e5   : > { %7141 = vmatpush1.bf16.msra.mxu1 %v13163_v58  ;;  %7172 = vmatprep.mubr.bf16.mxu1 %v13414_v0 }
0x13e6   : > { %7142 = vmatprep.subr.bf16.mxu1 %v13168_v21 }
0x13e9   : > { %7143 = vmatpush1.bf16.msra.mxu1 %v13166_v46 }
0x13ea   : > { %7144 = vmatprep.subr.bf16.mxu1 %v13171_v25 }
0x13ed   : > { %7145 = vmatpush1.bf16.msra.mxu1 %v13169_v30 }
0x13ee   : > { %7146 = vmatprep.subr.bf16.mxu1 %v13174_v5 }
0x13f1   : > { %7147 = vmatpush1.bf16.msra.mxu1 %v13172_v37 }
0x13f2   : > { %7148 = vmatprep.subr.bf16.mxu1 %v7088_v49 }
0x13f5   : > { %7149 = vmatpush1.bf16.msra.mxu1 %v7085_v22 }
0x13f6   : > { %11774 = vmatprep.subr.bf16.mxu1 %v17005_v33 }
0x13f8   : > { %11035 = vmatmul.mubr.msk.bf16.vlgmr.msra.gmra.mrb[84].mxu1 %vm611_vm2, %v14946_v57 }
0x13f9   : > { %11775 = vmatpush3.bf16.msra.mxu1 %v13178_v62  ;;  %11784 = vmatprep.mubr.msk.bf16.mxu1 %vm13417_vm3, %v17005_v33 }
0x13fa   : > { %11776 = vmatprep.subr.bf16.mxu1 %v17005_v33 }
0x13fd   : > { %11777 = vmatpush3.bf16.msra.mxu1 %v13179_v48 }
0x13fe   : > { %11778 = vmatprep.subr.bf16.mxu1 %v17005_v33 }
0x1401   : > { %11779 = vmatpush3.bf16.msra.mxu1 %v13180_v51 }
0x1402   : > { %11780 = vmatprep.subr.bf16.mxu1 %v17005_v33 }
0x1405   : > { %11781 = vmatpush3.bf16.msra.mxu1 %v13181_v63 }
0x1406   : > { %11782 = vmatprep.subr.bf16.mxu1 %v17005_v33 }
0x1409   : > { %11783 = vmatpush3.bf16.msra.mxu1 %v7097_v41 }
0x140a   : > { %11788 = vmatprep.subr.bf16.mxu1 %v17005_v33 }
0x140c   : > { %11785 = vmatmul.mubr.msk.bf16.vlgmr.msra.gmra.mrb[88].mxu1 %vm611_vm2, %v14946_v57 }
0x140d   : > { %11804 = vmatprep.mubr.msk.bf16.mxu1 %vm13417_vm3, %v17005_v33 }
0x1451   : > { %v12549_v10 = vpop.permute.xlu1 %12548 }
0x1452   : > { %v12551_v39 = vunpack.i.h.bf16 %v12549_v10  ;;  %v12550_v29 = vunpack.i.l.bf16 %v12549_v10 }
0x1454   : > { %v6385_v14 = vsel %vm847_vm5, %v12550_v29, %v12551_v39  ;;  %v6389_v58 = vmax.f32 %v6363_v8, %v12551_v39 }
0x1455   : > { %v6388_v21 = vmax.f32 %v6362_v56, %v6385_v14 }
0x1456   : > { %v6402_v46 = vrot.slane %v6389_v58, 4  ;;  %v6393_v25 = vrot.slane %v6389_v58, 2  ;;  %v6411_v37 = vrot.slane %v6389_v58, 6 }
0x1457   : > { %v6401_v38 = vrot.slane %v6388_v21, 4  ;;  %v6392_v60 = vrot.slane %v6388_v21, 2  ;;  %v6410_v35 = vrot.slane %v6388_v21, 6  ;;  %v12567_v54 = vpack.i.bf16 %v6389_v58, %v6388_v21 }
0x1459   : > { %v12557_v30 = vpack.i.bf16 %v6402_v46, %v6401_v38  ;;  %v12552_v5 = vpack.i.bf16 %v6393_v25, %v6392_v60  ;;  %v12562_v43 = vpack.i.bf16 %v6411_v37, %v6410_v35  ;;  %v6896_v35 = vld [vmem:[%s16969_s2] sm:$0x3f] }
0x145b   : > { %12558 = vrot.lane.b32.xlu1 %v12557_v30, %s17087_s0  ;;  %12553 = vrot.lane.b32.xlu0 %v12552_v5, %s17077_s14 }
0x145f   : > { %12568 = vrot.lane.b32.xlu1 %v12567_v54, %s17078_s15  ;;  %12563 = vrot.lane.b32.xlu0 %v12562_v43, %s17079_s29 }
0x14b7   : > { %v15036_v25 = vpop.f32.mrb[80].mxu1 }
0x14b8   : > { %v15040_v38 = vpop.f32.mrb[81].mxu1 }
0x14b9   : > { %v7137_v60 = vpop.f32.mrb[82].mxu1 }
0x14ba   : > { %v7138_v30 = vpop.f32.mrb[83].mxu1 }
0x14cb   : > { %v15046_v5 = vpop.f32.mrb[84].mxu1 }
0x14cc   : > { %v15051_v37 = vpop.f32.mrb[85].mxu1 }
0x14cd   : > { %v12559_v40 = vpop.permute.xlu1 %12558  ;;  %v12554_v49 = vpop.permute.xlu0 %12553 }
0x14ce   : > { %v12561_v22 = vunpack.i.h.bf16 %v12559_v40  ;;  %v12560_v62 = vunpack.i.l.bf16 %v12559_v40  ;;  %v12556_v48 = vunpack.i.h.bf16 %v12554_v49  ;;  %v12555_v51 = vunpack.i.l.bf16 %v12554_v49  ;;  %v7178_v54 = vpop.f32.mrb[86].mxu1 }
0x14cf   : > { %v7179_v43 = vpop.f32.mrb[87].mxu1 }
0x14d0   : > { %v6407_v63 = vsel %vm871_vm6, %v12560_v62, %v12561_v22  ;;  %v6427_v6 = vsel %vm616_vm1, %v6389_v58, %v12556_v48  ;;  %v6429_v41 = vsel %vm895_vm8, %v12556_v48, %v12561_v22  ;;  %v6398_v12 = vsel %vm861_vm7, %v12555_v51, %v12556_v48 }
0x14d1   : > { %v14996_v44 = vpack.c.bf16 %v6429_v41, %v6427_v6  ;;  %v6426_v45 = vsel %vm616_vm1, %v6388_v21, %v6398_v12  ;;  %v6428_v53 = vsel %vm895_vm8, %v6398_v12, %v6407_v63  ;;  %v12569_v27 = vpop.permute.xlu1 %12568  ;;  %v12564_v36 = vpop.permute.xlu0 %12563 }
0x14d2   : > { %v15000_v59 = vpack.c.bf16 %v6428_v53, %v6426_v45  ;;  %v12571_v31 = vunpack.i.h.bf16 %v12569_v27  ;;  %v12570_v10 = vunpack.i.l.bf16 %v12569_v27  ;;  %v12566_v39 = vunpack.i.h.bf16 %v12564_v36  ;;  %v13183_v27 = vld [vmem:[%s16970_s3 + $0x8] sm:$0xff]  }
0x14d3   : > { %v12565_v29 = vunpack.i.l.bf16 %v12564_v36  ;;  %6451 = vrot.lane.b32.xlu1 %v14996_v44, %s17072_s30 }
0x14d4   : > { %v6423_v8 = vsel %vm889_vm9, %v12570_v10, %v12571_v31  ;;  %v6431_v56 = vsel %vm898_vm11, %v12561_v22, %v12566_v39  ;;  %6449 = vrot.lane.b32.xlu0 %v15000_v59, %s17072_s30 }
0x14d5   : > { %v15008_v14 = vpack.c.bf16 %v12571_v31, %v6431_v56  ;;  %v6416_v58 = vsel %vm17104_vm10, %v12565_v29, %v12566_v39  ;;  %vm17106_vm10 = vmmov %vm17105_vm12 }
0x14d6   : > { %v6430_v21 = vsel %vm898_vm11, %v6407_v63, %v6416_v58 }
0x14d7   : > { %v15012_v46 = vpack.c.bf16 %v6423_v8, %v6430_v21  ;;  %6455 = vrot.lane.b32.xlu1 %v15008_v14, %s17072_s30  ;;  %v13184_v21 = vld [vmem:[%s16970_s3 + $0x18] sm:$0xff]  }
0x14d9   : > { %6453 = vrot.lane.b32.xlu0 %v15012_v46, %s17072_s30 }
0x14db   : > { %6524 = vrot.lane.b32.xlu1 %v14996_v44, %s17073_s12 }
0x14dd   : > { %6522 = vrot.lane.b32.xlu0 %v15000_v59, %s17073_s12 }
0x14df   : > { %6528 = vrot.lane.b32.xlu1 %v15008_v14, %s17073_s12  ;;  %v7256_v40 = vpop.f32.mrb[88].mxu1 }
0x14e0   : > { %v11786_v49 = vpop.f32.mrb[89].mxu1 }
0x14e1   : > { %6526 = vrot.lane.b32.xlu0 %v15012_v46, %s17073_s12  ;;  %v7259_v22 = vpop.f32.mrb[90].mxu1  ;;  %v13185_v49 = vld [vmem:[%s16970_s3 + $0x20] sm:$0xff]  }
0x14e2   : > { %v11787_v62 = vpop.f32.mrb[91].mxu1 }
0x14e3   : > { %6595 = vrot.lane.b32.xlu1 %v14996_v44, %s17074_s22 }
0x14e5   : > { %6593 = vrot.lane.b32.xlu0 %v15000_v59, %s17074_s22 }
0x14e7   : > { %6599 = vrot.lane.b32.xlu1 %v15008_v14, %s17074_s22 }
0x14e9   : > { %6597 = vrot.lane.b32.xlu0 %v15012_v46, %s17074_s22 }
0x14eb   : > { %6721 = vrot.lane.b32.xlu1 %v14996_v44, %s17089_s13 }
0x14ed   : > { %6719 = vrot.lane.b32.xlu0 %v15000_v59, %s17089_s13 }
0x14ef   : > { %6725 = vrot.lane.b32.xlu1 %v15008_v14, %s17089_s13 }
0x14f1   : > { %6723 = vrot.lane.b32.xlu0 %v15012_v46, %s17089_s13 }
0x14f5   : > { %6899 = vperm.xlu0 %12326, %v6896_v35  }
0x1545   : > { %v6452_v48 = vpop.permute.xlu1 %6451 }
0x1546   : > { %6470 = vmatprep.subr.bf16.mxu0 %v6452_v48  ;;  %v6450_v51 = vpop.permute.xlu0 %6449 }
0x1547   : > { %v6457_v63 = vsel %vm17105_vm12, %v6450_v51, %v6452_v48  ;;  %vm17107_vm12 = vcmask 1014784   ;;  %v6666_v48 = vsel %vm936_vm13, %v15012_v46, 0  ;;  %v13186_v51 = vld [vmem:[%s16970_s3] sm:$0xff]  }
0x1548   : > { %6471 = vmatpush1.bf16.msra.mxu0 %v6457_v63 }
0x1549   : > { %v6456_v6 = vpop.permute.xlu1 %6455 }
0x154a   : > { %10939 = vmatprep.subr.msk.bf16.mxu0 %vm936_vm13, %v6456_v6 }
0x154b   : > { %v6454_v41 = vpop.permute.xlu0 %6453 }
0x154c   : > { %v6458_v12 = vsel %vm17106_vm10, %v6454_v41, %v6456_v6  ;;  %vm17108_vm10 = vmmov %vm17107_vm12 }
0x154d   : > { %v6465_v45 = vsel %vm936_vm13, %v6458_v12, 0  ;;  %v6525_v53 = vpop.permute.xlu1 %6524 }
0x154e   : > { %6473 = vmatpush1.bf16.msra.mxu0 %v6465_v45  ;;  %v13189_v45 = vld [vmem:[%s13548_s16 + $0x7bc] ss:$28 sps:$4 sm:$0xff]  }
0x154f   : > { %6543 = vmatprep.subr.bf16.mxu0 %v6525_v53  ;;  %v6523_v36 = vpop.permute.xlu0 %6522 }
0x1550   : > { %v6530_v31 = vsel %vm1005_vm14, %v6523_v36, %v6525_v53  ;;  %v13193_v36 = vld [vmem:[%s13548_s16 + $0x7f4] ss:$28 sps:$4 sm:$0xff]  }
0x1551   : > { %10940 = vmatmul.mubr.msk.bf16.vlgmr.msra.gmra.mrb[56].mxu0 %vm932_vm15, %v13183_v27  ;;  %v6529_v10 = vpop.permute.xlu1 %6528  ;;  %v13190_v27 = vld [vmem:[%s16970_s3 + $0x10] sm:$0xff]  }
0x1552   : > { %6544 = vmatpush1.bf16.msra.mxu0 %v6530_v31  ;;  %6575 = vmatprep.mubr.bf16.mxu0 %v13414_v0  ;;  %v13191_v31 = vld [vmem:[%s13548_s16 + $0x7f0] ss:$28 sps:$4 sm:$0xff]  }
0x1553   : > { %10946 = vmatprep.subr.msk.bf16.mxu0 %vm936_vm13, %v6529_v10  ;;  %v6527_v39 = vpop.permute.xlu0 %6526 }
0x1554   : > { %v6531_v29 = vsel %vm1005_vm14, %v6527_v39, %v6529_v10  ;;  %v13196_v10 = vld [vmem:[%s13548_s16 + $0x82c] ss:$28 sps:$4 sm:$0xff]  }
0x1555   : > { %v6538_v8 = vsel %vm936_vm13, %v6531_v29, 0  ;;  %v6596_v56 = vpop.permute.xlu1 %6595  ;;  %v13194_v39 = vld [vmem:[%s13548_s16 + $0x828] ss:$28 sps:$4 sm:$0xff]  }
0x1556   : > { %6546 = vmatpush1.bf16.msra.mxu0 %v6538_v8  ;;  %v13199_v29 = vld [vmem:[%s13548_s16 + $0x864] ss:$28 sps:$4 sm:$0xff]   ;;  %v13202_v8 = vld [vmem:[%s13548_s16 + $0x89c] ss:$28 sps:$4 sm:$0x3f]  }
0x1557   : > { %6614 = vmatprep.subr.bf16.mxu0 %v6596_v56  ;;  %v6594_v58 = vpop.permute.xlu0 %6593 }
0x1558   : > { %v6601_v35 = vsel %vm17107_vm12, %v6594_v58, %v6596_v56  ;;  %v13197_v56 = vld [vmem:[%s13548_s16 + $0x860] ss:$28 sps:$4 sm:$0xff]   ;;  %v13200_v58 = vld [vmem:[%s13548_s16 + $0x898] ss:$28 sps:$4 sm:$0x3f]  }
0x1559   : > { %v6600_v60 = vpop.permute.xlu1 %6599 }
0x155b   : > { %v6598_v30 = vpop.permute.xlu0 %6597 }
0x155c   : > { %v6602_v54 = vsel %vm17108_vm10, %v6598_v30, %v6600_v60 }
0x155d   : > { %10947 = vmatmul.mubr.msk.bf16.vlgmr.msra.gmra.mrb[56].mxu0 %vm932_vm15, %v13184_v21  ;;  %v6609_v43 = vsel %vm936_vm13, %v6602_v54, 0  ;;  %v6722_v62 = vpop.permute.xlu1 %6721  ;;  %v7094_v21 = vand.u32 %v13202_v8, %v13569_v20 }
0x155e   : > { %6615 = vmatpush1.bf16.msra.mxu0 %v6601_v35  ;;  %6646 = vmatprep.mubr.bf16.mxu0 %v13414_v0 }
0x155f   : > { %10951 = vmatprep.subr.msk.bf16.mxu0 %vm936_vm13, %v6600_v60  ;;  %v6720_v22 = vpop.permute.xlu0 %6719  ;;  %v7091_v60 = vand.u32 %v13200_v58, %v13569_v20 }
0x1561   : > { %v6726_v63 = vpop.permute.xlu1 %6725 }
0x1562   : > { %6617 = vmatpush1.bf16.msra.mxu0 %v6609_v43 }
0x1563   : > { %6671 = vmatprep.subr.bf16.mxu0 %v14996_v44  ;;  %v6724_v44 = vpop.permute.xlu0 %6723 }
0x1564   : > { %v6728_v46 = vsel %vm1205_vm0, %v6724_v44, %v6726_v63 }
0x1565   : > { %v6735_v53 = vsel %vm936_vm13, %v6728_v46, 0 }
0x1569   : > { %10952 = vmatmul.mubr.msk.bf16.vlgmr.msra.gmra.mrb[56].mxu0 %vm932_vm15, %v13185_v49 }
0x156a   : > { %6672 = vmatpush1.bf16.msra.mxu0 %v15000_v59  ;;  %6703 = vmatprep.mubr.bf16.mxu0 %v13414_v0  ;;  %v6727_v59 = vsel %vm1205_vm0, %v6720_v22, %v6722_v62 }
0x156b   : > { %10954 = vmatprep.subr.msk.bf16.mxu0 %vm936_vm13, %v15008_v14 }
0x156e   : > { %6674 = vmatpush1.bf16.msra.mxu0 %v6666_v48 }
0x156f   : > { %6740 = vmatprep.subr.bf16.mxu0 %v6722_v62 }
0x1574   : > { %v15089_v6 = vpop.permute.xlu0 %6899 }
0x1575   : > { %10955 = vmatmul.mubr.msk.bf16.vlgmr.msra.gmra.mrb[56].mxu0 %vm932_vm15, %v13186_v51  ;;  %v7257_v14 = vadd.f32 %v7256_v40, %v15089_v6  ;;  %v7177_v12 = vadd.f32 %v15051_v37, %v15089_v6  ;;  %v13187_v37 = vld [vmem:[%s13548_s16 + $0x7b8] ss:$28 sps:$4 sm:$0xff]   ;;  %v7175_v44 = vadd.f32 %v15046_v5, %v15089_v6 }
0x1576   : > { %6741 = vmatpush1.bf16.msra.mxu0 %v6727_v59  ;;  %6772 = vmatprep.mubr.bf16.mxu0 %v13414_v0 }
0x1577   : > { %10957 = vmatprep.subr.msk.bf16.mxu0 %vm936_vm13, %v6726_v63  ;;  %v7268_v41 = vmax.f32 %v7257_v14, 0.0  ;;  %v7265_v40 = vmax.f32 %v7177_v12, 0.0 }
0x1579   : > { %7291 = vrot.lane.b32.xlu0 %v7268_v41, %s17085_s25  ;;  %v7264_v41 = vmax.f32 %v7175_v44, 0.0 }
0x157a   : > { %6743 = vmatpush1.bf16.msra.mxu0 %v6735_v53 }
0x157b   : > { %7181 = vmatprep.subr.bf16.mxu0 %v13189_v45 }
0x157d   : > { %7276 = vrot.lane.b32.xlu0 %v7265_v40, %s17085_s25 }
0x1581   : > { %10958 = vmatmul.mubr.msk.bf16.vlgmr.msra.gmra.mrb[56].mxu0 %vm932_vm15, %v13190_v27 }
0x1582   : > { %7182 = vmatpush1.bf16.msra.mxu0 %v13187_v37  ;;  %7213 = vmatprep.mubr.bf16.mxu0 %v13414_v0 }
0x1583   : > { %7183 = vmatprep.subr.bf16.mxu0 %v13193_v36 }
0x1586   : > { %7184 = vmatpush1.bf16.msra.mxu0 %v13191_v31 }
0x1587   : > { %7185 = vmatprep.subr.bf16.mxu0 %v13196_v10 }
0x158a   : > { %7186 = vmatpush1.bf16.msra.mxu0 %v13194_v39 }
0x158b   : > { %7187 = vmatprep.subr.bf16.mxu0 %v13199_v29 }
0x158e   : > { %7188 = vmatpush1.bf16.msra.mxu0 %v13197_v56  ;;  %v7134_v56 = vadd.f32 %v15036_v25, %v15089_v6 }
0x158f   : > { %7189 = vmatprep.subr.bf16.mxu0 %v7094_v21 }
0x1592   : > { %7190 = vmatpush1.bf16.msra.mxu0 %v7091_v60 }
0x1595   : > { %11036 = vmatmul.mubr.msk.bf16.vlgmr.msra.gmra.mrb[60].mxu0 %vm611_vm2, %v14946_v57  ;;  %v7136_v57 = vadd.f32 %v15040_v38, %v15089_v6  ;;  %vm17110_vm2 = vcmask 1039360  }
0x1596   : > { %7422 = vmatprep.mubr.bf16.mxu0 %v13414_v0 }
0x1597   : > { %v7263_v46 = vmax.f32 %v7136_v57, 0.0 }
0x1599   : > { %v12577_v12 = vpack.i.bf16 %v7264_v41, %v7263_v46 }
0x15eb   : > { %v7292_v37 = vpop.permute.xlu0 %7291 }
0x15ef   : > { %v7277_v58 = vpop.permute.xlu0 %7276 }
0x1654   : > { %v15122_v30 = vpop.f32.mrb[56].mxu0 }
0x1655   : > { %v15124_v35 = vpop.f32.mrb[57].mxu0 }
0x1656   : > { %v15126_v54 = vpop.f32.mrb[58].mxu0 }
0x1657   : > { %v15128_v43 = vpop.f32.mrb[59].mxu0 }
0x1668   : > { %v7215_v49 = vpop.f32.mrb[60].mxu0 }
0x1669   : > { %v7216_v22 = vadd.f32 %v7215_v49, %v15089_v6  ;;  %v7217_v62 = vpop.f32.mrb[61].mxu0  ;;  %v7262_v49 = vmax.f32 %v7134_v56, 0.0 }
0x166a   : > { %v7218_v20 = vadd.f32 %v7217_v62, %v15089_v6  ;;  %v7219_v48 = vpop.f32.mrb[62].mxu0 }
0x166b   : > { %v7266_v51 = vmax.f32 %v7216_v22, 0.0  ;;  %v7220_v63 = vpop.f32.mrb[63].mxu0 }
0x166c   : > { %v7267_v59 = vmax.f32 %v7218_v20, 0.0 }
0x166e   : > { %v12572_v14 = vpack.i.bf16 %v7267_v59, %v7266_v51 }
0x1670   : > { %12573 = vrot.lane.b32.xlu1 %v12572_v14, %s17085_s25 }
0x1674   : > { %12578 = vrot.lane.b32.xlu1 %v12577_v12, %s17085_s25 }
0x16e2   : > { %v12574_v45 = vpop.permute.xlu1 %12573 }
0x16e3   : > { %v12576_v53 = vunpack.i.h.bf16 %v12574_v45  ;;  %v12575_v27 = vunpack.i.l.bf16 %v12574_v45 }
0x16e5   : > { %v7294_v38 = vsel %vm819_vm4, %v12576_v53, %v7292_v37  ;;  %v7293_v36 = vsel %vm819_vm4, %v12575_v27, %v12576_v53 }
0x16e6   : > { %v7298_v5 = vmax.f32 %v7266_v51, %v7294_v38  ;;  %v7297_v31 = vmax.f32 %v7265_v40, %v7293_v36  ;;  %v12579_v39 = vpop.permute.xlu1 %12578 }
0x16e7   : > { %v12581_v29 = vunpack.i.h.bf16 %v12579_v39  ;;  %v12580_v8 = vunpack.i.l.bf16 %v12579_v39 }
0x16e8   : > { %v12582_v10 = vpack.i.bf16 %v7298_v5, %v7297_v31 }
0x16e9   : > { %v7279_v21 = vsel %vm819_vm4, %v12581_v29, %v7277_v58  ;;  %v7278_v60 = vsel %vm819_vm4, %v12580_v8, %v12581_v29  ;;  %vm17111_vm4 = vmmov %vm17110_vm2 }
0x16ea   : > { %12583 = vrot.lane.b32.xlu1 %v12582_v10, %s17086_s24  ;;  %v7283_v48 = vmax.f32 %v7263_v46, %v7279_v21  ;;  %v7282_v40 = vmax.f32 %v7262_v49, %v7278_v60  ;;  %s380_s24 = sand.u32 1, %s13404_s18  }
0x175c   : > { %v12584_v22 = vpop.permute.xlu1 %12583 }
0x175d   : > { %v12586_v62 = vunpack.i.h.bf16 %v12584_v22  ;;  %v12585_v20 = vunpack.i.l.bf16 %v12584_v22 }
0x175f   : > { %v7305_v57 = vsel %vm847_vm5, %v12585_v20, %v12586_v62  ;;  %v7309_v44 = vmax.f32 %v7283_v48, %v12586_v62 }
0x1760   : > { %v7308_v51 = vmax.f32 %v7282_v40, %v7305_v57 }
0x1761   : > { %v7322_v63 = vrot.slane %v7309_v44, 4  ;;  %v7313_v59 = vrot.slane %v7309_v44, 2  ;;  %v7331_v45 = vrot.slane %v7309_v44, 6 }
0x1762   : > { %v7321_v14 = vrot.slane %v7308_v51, 4  ;;  %v7312_v41 = vrot.slane %v7308_v51, 2  ;;  %v7330_v12 = vrot.slane %v7308_v51, 6  ;;  %v12602_v53 = vpack.i.bf16 %v7309_v44, %v7308_v51 }
0x1764   : > { %v12592_v25 = vpack.i.bf16 %v7322_v63, %v7321_v14  ;;  %v12587_v6 = vpack.i.bf16 %v7313_v59, %v7312_v41  ;;  %v12597_v27 = vpack.i.bf16 %v7331_v45, %v7330_v12  ;;  %v1271_v41 = vld [vmem:[%s16971_s4 + $0x8] sm:$0xff] }
0x1766   : > { %12593 = vrot.lane.b32.xlu1 %v12592_v25, %s17087_s0  ;;  %12588 = vrot.lane.b32.xlu0 %v12587_v6, %s17077_s14  ;;  %v1270_v25 = vld [vmem:[%s16971_s4] sm:$0xff]  ;;  %s10282_s0 = sshll.u32 %s380_s24, 3 }
0x1767   : > { %s382_s26 = scalar_lea.vmem [#allocation3], %s10282_s0 }
0x1768   : > { %s10219_s16 = sshll.u32 %s382_s26, 4  ;;  %s16927_s16 = int_to_ptr.vmem [resolvable:$true] %s10219_s16 }
0x176a   : > { %12603 = vrot.lane.b32.xlu1 %v12602_v53, %s17078_s15  ;;  %12598 = vrot.lane.b32.xlu0 %v12597_v27, %s17079_s29  ;;  %s10206_s15 = scalar_lea.sflag [#allocation4], %s380_s24 }
0x17d8   : > { %v12594_v46 = vpop.permute.xlu1 %12593  ;;  %v12589_v37 = vpop.permute.xlu0 %12588 }
0x17d9   : > { %v12596_v38 = vunpack.i.h.bf16 %v12594_v46  ;;  %v12595_v36 = vunpack.i.l.bf16 %v12594_v46  ;;  %v12591_v5 = vunpack.i.h.bf16 %v12589_v37  ;;  %v12590_v31 = vunpack.i.l.bf16 %v12589_v37 }
0x17db   : > { %v7327_v10 = vsel %vm871_vm6, %v12595_v36, %v12596_v38  ;;  %v7347_v39 = vsel %vm616_vm1, %v7309_v44, %v12591_v5  ;;  %v7349_v29 = vsel %vm895_vm8, %v12591_v5, %v12596_v38  ;;  %v7318_v8 = vsel %vm861_vm7, %v12590_v31, %v12591_v5  ;;  %v13203_v36 = vld [vmem:[%s16970_s3 + $0x8] sm:$0xff]   ;;  %vm17112_vm6 = vmmov %vm17108_vm10 }
0x17dc   : > { %v15154_v56 = vpack.c.bf16 %v7349_v29, %v7347_v39  ;;  %v7346_v58 = vsel %vm616_vm1, %v7308_v51, %v7318_v8  ;;  %v7348_v21 = vsel %vm895_vm8, %v7318_v8, %v7327_v10  ;;  %v12604_v60 = vpop.permute.xlu1 %12603  ;;  %v12599_v49 = vpop.permute.xlu0 %12598  ;;  %vm17109_vm1 = vcmask 703488  }
0x17dd   : > { %v15158_v22 = vpack.c.bf16 %v7348_v21, %v7346_v58  ;;  %v12606_v62 = vunpack.i.h.bf16 %v12604_v60  ;;  %v12605_v20 = vunpack.i.l.bf16 %v12604_v60  ;;  %v12601_v48 = vunpack.i.h.bf16 %v12599_v49  ;;  %v13204_v60 = vld [vmem:[%s16970_s3 + $0x18] sm:$0xff]  }
0x17de   : > { %v12600_v40 = vunpack.i.l.bf16 %v12599_v49  ;;  %7371 = vrot.lane.b32.xlu1 %v15154_v56, %s17072_s30 }
0x17df   : > { %v7343_v57 = vsel %vm889_vm9, %v12605_v20, %v12606_v62  ;;  %v7351_v44 = vsel %vm898_vm11, %v12596_v38, %v12601_v48  ;;  %7369 = vrot.lane.b32.xlu0 %v15158_v22, %s17072_s30  ;;  %vm17113_vm9 = vmmov %vm17112_vm6 }
0x17e0   : > { %v15166_v51 = vpack.c.bf16 %v12606_v62, %v7351_v44  ;;  %v7336_v63 = vsel %vm17109_vm1, %v12600_v40, %v12601_v48 }
0x17e1   : > { %v7350_v59 = vsel %vm898_vm11, %v7327_v10, %v7336_v63 }
0x17e2   : > { %v15170_v14 = vpack.c.bf16 %v7343_v57, %v7350_v59  ;;  %7375 = vrot.lane.b32.xlu1 %v15166_v51, %s17072_s30  ;;  %v13205_v57 = vld [vmem:[%s16970_s3 + $0x20] sm:$0xff]  }
0x17e4   : > { %7373 = vrot.lane.b32.xlu0 %v15170_v14, %s17072_s30  ;;  %v7586_v59 = vsel %vm936_vm13, %v15170_v14, 0 }
0x17e6   : > { %7444 = vrot.lane.b32.xlu1 %v15154_v56, %s17073_s12 }
0x17e8   : > { %7442 = vrot.lane.b32.xlu0 %v15158_v22, %s17073_s12 }
0x17ea   : > { %7448 = vrot.lane.b32.xlu1 %v15166_v51, %s17073_s12 }
0x17ec   : > { %7446 = vrot.lane.b32.xlu0 %v15170_v14, %s17073_s12 }
0x17ee   : > { %7515 = vrot.lane.b32.xlu1 %v15154_v56, %s17074_s22 }
0x17f0   : > { %7513 = vrot.lane.b32.xlu0 %v15158_v22, %s17074_s22 }
0x17f2   : > { %7519 = vrot.lane.b32.xlu1 %v15166_v51, %s17074_s22 }
0x17f4   : > { %7517 = vrot.lane.b32.xlu0 %v15170_v14, %s17074_s22  ;;  %s13428_s22 = smov [#allocation3]  }
0x17f5   : > { %s13354_s25 = sshll.u32 %s13428_s22, 4  ;;  %s13355_s25 = int_to_ptr.vmem [resolvable:$false] %s13354_s25 }
0x17f6   : > { %7641 = vrot.lane.b32.xlu1 %v15154_v56, %s17089_s13  ;;  %s13356_s0 = scalar_lea.vmem %s13355_s25, 256  ;;  %p13357_p0 = scmp.lt.s32.totalorder %s16927_s16, %s13355_s25 }
0x17f8   : > { %7639 = vrot.lane.b32.xlu0 %v15158_v22, %s17089_s13 }
0x17fa   : > { %7645 = vrot.lane.b32.xlu1 %v15166_v51, %s17089_s13 }
0x17fc   : > { %7643 = vrot.lane.b32.xlu0 %v15170_v14, %s17089_s13 }
0x17fe   : > { %1279 = vperm.xlu1 %12607, %v1271_v41  }
0x1800   : > { %1274 = vperm.xlu0 %12326, %v1270_v25  }
0x1802   : > { %3120 = vperm.xlu1 %12607, %v1271_v41  }
0x1804   : > { %3115 = vperm.xlu0 %12326, %v1270_v25  }
0x1806   : > { %2200 = vperm.xlu1 %12607, %v1271_v41  }
0x1808   : > { %2195 = vperm.xlu0 %12326, %v1270_v25  }
0x180a   : > { %4040 = vperm.xlu1 %12607, %v1271_v41  }
0x180c   : > { %4035 = vperm.xlu0 %12326, %v1270_v25  }
0x180e   : > { %4960 = vperm.xlu1 %12607, %v1271_v41  }
0x1810   : > { %4955 = vperm.xlu0 %12326, %v1270_v25  }
0x1812   : > { %5880 = vperm.xlu1 %12607, %v1271_v41  }
0x1814   : > { %5875 = vperm.xlu0 %12326, %v1270_v25  }
0x1816   : > { %6800 = vperm.xlu1 %12607, %v1271_v41  }
0x1818   : > { %6795 = vperm.xlu0 %12326, %v1270_v25  }
0x181a   : > { %7720 = vperm.xlu1 %12607, %v1271_v41  }
0x181c   : > { %7715 = vperm.xlu0 %12326, %v1270_v25   ;;  %v13206_v25 = vld [vmem:[%s16970_s3] sm:$0xff]  }
0x1850   : > { %v7372_v6 = vpop.permute.xlu1 %7371 }
0x1851   : > { %7390 = vmatprep.subr.bf16.mxu0 %v7372_v6  ;;  %v7370_v12 = vpop.permute.xlu0 %7369 }
0x1852   : > { %v7377_v45 = vsel %vm17110_vm2, %v7370_v12, %v7372_v6 }
0x1853   : > { %7391 = vmatpush1.bf16.msra.mxu0 %v7377_v45 }
0x1854   : > { %v7376_v53 = vpop.permute.xlu1 %7375 }
0x1855   : > { %11041 = vmatprep.subr.msk.bf16.mxu0 %vm936_vm13, %v7376_v53 }
0x1856   : > { %v7374_v27 = vpop.permute.xlu0 %7373 }
0x1857   : > { %v7378_v46 = vsel %vm17111_vm4, %v7374_v27, %v7376_v53 }
0x1858   : > { %v7385_v37 = vsel %vm936_vm13, %v7378_v46, 0  ;;  %v7445_v38 = vpop.permute.xlu1 %7444 }
0x1859   : > { %7393 = vmatpush1.bf16.msra.mxu0 %v7385_v37 }
0x185a   : > { %7463 = vmatprep.subr.bf16.mxu0 %v7445_v38  ;;  %v7443_v5 = vpop.permute.xlu0 %7442 }
0x185b   : > { %v7450_v31 = vsel %vm1005_vm14, %v7443_v5, %v7445_v38 }
0x185c   : > { %11042 = vmatmul.mubr.msk.bf16.vlgmr.msra.gmra.mrb[64].mxu0 %vm932_vm15, %v13203_v36  ;;  %v7449_v10 = vpop.permute.xlu1 %7448 }
0x185d   : > { %7464 = vmatpush1.bf16.msra.mxu0 %v7450_v31  ;;  %7495 = vmatprep.mubr.bf16.mxu0 %v13414_v0 }
0x185e   : > { %11048 = vmatprep.subr.msk.bf16.mxu0 %vm936_vm13, %v7449_v10  ;;  %v7447_v39 = vpop.permute.xlu0 %7446 }
0x185f   : > { %v7451_v29 = vsel %vm1005_vm14, %v7447_v39, %v7449_v10 }
0x1860   : > { %v7458_v8 = vsel %vm936_vm13, %v7451_v29, 0  ;;  %v7516_v58 = vpop.permute.xlu1 %7515 }
0x1861   : > { %7466 = vmatpush1.bf16.msra.mxu0 %v7458_v8 }
0x1862   : > { %7534 = vmatprep.subr.bf16.mxu0 %v7516_v58  ;;  %v7514_v21 = vpop.permute.xlu0 %7513 }
0x1863   : > { %v7521_v20 = vsel %vm17112_vm6, %v7514_v21, %v7516_v58 }
0x1864   : > { %v7520_v49 = vpop.permute.xlu1 %7519 }
0x1866   : > { %v7518_v62 = vpop.permute.xlu0 %7517 }
0x1867   : > { %v7522_v48 = vsel %vm17113_vm9, %v7518_v62, %v7520_v49 }
0x1868   : > { %11049 = vmatmul.mubr.msk.bf16.vlgmr.msra.gmra.mrb[64].mxu0 %vm932_vm15, %v13204_v60  ;;  %v7529_v40 = vsel %vm936_vm13, %v7522_v48, 0  ;;  %v7642_v44 = vpop.permute.xlu1 %7641 }
0x1869   : > { %7535 = vmatpush1.bf16.msra.mxu0 %v7521_v20  ;;  %7566 = vmatprep.mubr.bf16.mxu0 %v13414_v0  ;;  %v13207_v20 = vld [vmem:[%s16970_s3 + $0x10] sm:$0xff]  }
0x186a   : > { %11053 = vmatprep.subr.msk.bf16.mxu0 %vm936_vm13, %v7520_v49  ;;  %v7640_v63 = vpop.permute.xlu0 %7639 }
0x186c   : > { %v7646_v41 = vpop.permute.xlu1 %7645 }
0x186d   : > { %7537 = vmatpush1.bf16.msra.mxu0 %v7529_v40 }
0x186e   : > { %7591 = vmatprep.subr.bf16.mxu0 %v15154_v56  ;;  %v7644_v56 = vpop.permute.xlu0 %7643 }
0x186f   : > { %v7648_v45 = vsel %vm1205_vm0, %v7644_v56, %v7646_v41 }
0x1874   : > { %11054 = vmatmul.mubr.msk.bf16.vlgmr.msra.gmra.mrb[64].mxu0 %vm932_vm15, %v13205_v57 }
0x1875   : > { %7592 = vmatpush1.bf16.msra.mxu0 %v15158_v22  ;;  %7623 = vmatprep.mubr.bf16.mxu0 %v13414_v0 }
0x1876   : > { %11056 = vmatprep.subr.msk.bf16.mxu0 %vm936_vm13, %v15166_v51  ;;  %v7647_v51 = vsel %vm1205_vm0, %v7640_v63, %v7642_v44  ;;  %vm17114_vm0 = vmmov %vm17110_vm2 }
0x1877   : > { %vm17116_vm14 = vmmov %vm17114_vm0 }
0x1878   : > { %vm17118_vm12 = vmmov %vm17114_vm0 }
0x1879   : > { %7594 = vmatpush1.bf16.msra.mxu0 %v7586_v59  ;;  %vm17119_vm10 = vmmov %vm17114_vm0 }
0x187a   : > { %7660 = vmatprep.subr.bf16.mxu0 %v7642_v44  ;;  %vm17121_vm1 = vmmov %vm17114_vm0 }
0x187b   : > { %vm17124_vm2 = vmmov %vm17114_vm0 }
0x187c   : > { %vm17127_vm4 = vmmov %vm17114_vm0 }
0x187d   : > { %v1280_v6 = vpop.permute.xlu1 %1279  ;;  %vm17130_vm6 = vmmov %vm17114_vm0 }
0x187e   : > { %v15243_v12 = vadd.f32 %v1280_v6, %v13834_v3  ;;  %v15246_v22 = vadd.f32 %v1280_v6, %v13836_v4  ;;  %vm17133_vm9 = vmmov %vm17114_vm0 }
0x187f   : > { %v1275_v14 = vpop.permute.xlu0 %1274 }
0x1880   : > { %v1288_v53 = vmax.f32 %v15243_v12, 0.0  ;;  %v1289_v27 = vmax.f32 %v15246_v22, 0.0  ;;  %v15253_v46 = vadd.f32 %v1275_v14, %v13830_v1  ;;  %v15256_v37 = vadd.f32 %v1275_v14, %v13832_v2  ;;  %11057 = vmatmul.mubr.msk.bf16.vlgmr.msra.gmra.mrb[64].mxu0 %vm932_vm15, %v13206_v25 }
0x1881   : > { %7661 = vmatpush1.bf16.msra.mxu0 %v7647_v51  ;;  %v3121_v3 = vpop.permute.xlu1 %3120  ;;  %7692 = vmatprep.mubr.bf16.mxu0 %v13414_v0  ;;  %v7655_v2 = vsel %vm936_vm13, %v7648_v45, 0 }
0x1882   : > { %v12613_v4 = vpack.i.bf16 %v1289_v27, %v1288_v53  ;;  %v1286_v38 = vmax.f32 %v15253_v46, 0.0  ;;  %v1287_v36 = vmax.f32 %v15256_v37, 0.0  ;;  %11059 = vmatprep.subr.msk.bf16.mxu0 %vm936_vm13, %v7646_v41  ;;  %v15268_v1 = vadd.f32 %v3121_v3, %v14264_v42  ;;  %vm17115_vm13 = vmmov %vm17114_vm0 }
0x1883   : > { %v15272_v5 = vadd.f32 %v3121_v3, %v14266_v34  ;;  %v3116_v0 = vpop.permute.xlu0 %3115 }
0x1884   : > { %v12608_v31 = vpack.i.bf16 %v1287_v36, %v1286_v38  ;;  %v3129_v10 = vmax.f32 %v15268_v1, 0.0  ;;  %v15280_v39 = vadd.f32 %v3116_v0, %v14260_v32  ;;  %v15283_v29 = vadd.f32 %v3116_v0, %v14262_v61  ;;  %12614 = vrot.lane.b32.xlu1 %v12613_v4, %s17072_s30 }
0x1885   : > { %v3130_v42 = vmax.f32 %v15272_v5, 0.0  ;;  %7663 = vmatpush1.bf16.msra.mxu0 %v7655_v2  ;;  %v2201_v34 = vpop.permute.xlu1 %2200 }
0x1886   : > { %v3127_v8 = vmax.f32 %v15280_v39, 0.0  ;;  %v3128_v58 = vmax.f32 %v15283_v29, 0.0  ;;  %v15290_v21 = vadd.f32 %v2201_v34, %v14049_v19  ;;  %v15293_v60 = vadd.f32 %v2201_v34, %v14051_v55  ;;  %12609 = vrot.lane.b32.xlu0 %v12608_v31, %s17072_s30  ;;  %11828 = vmatprep.subr.bf16.mxu0 %v17005_v33 }
0x1887   : > { %v12623_v32 = vpack.i.bf16 %v3130_v42, %v3129_v10  ;;  %v2196_v61 = vpop.permute.xlu0 %2195 }
0x1888   : > { %v12618_v49 = vpack.i.bf16 %v3128_v58, %v3127_v8  ;;  %v17023_v19 = vmax.f32 %v15290_v21, 0.0  ;;  %v17024_v55 = vmax.f32 %v15293_v60, 0.0  ;;  %v15308_v62 = vadd.f32 %v2196_v61, %v14045_v16 }
0x1889   : > { %v15314_v48 = vadd.f32 %v2196_v61, %v14047_v18  ;;  %12624 = vrot.lane.b32.xlu1 %v12623_v32, %s17072_s30  ;;  %v4041_v40 = vpop.permute.xlu1 %4040 }
0x188a   : > { %v12633_v57 = vpack.i.bf16 %v17024_v55, %v17023_v19  ;;  %v17025_v44 = vmax.f32 %v15308_v62, 0.0  ;;  %v15323_v16 = vadd.f32 %v4041_v40, %v14479_v23  ;;  %v15326_v63 = vadd.f32 %v4041_v40, %v14481_v24  ;;  %12619 = vrot.lane.b32.xlu0 %v12618_v49, %s17072_s30 }
0x188b   : > { %v2208_v18 = vmax.f32 %v15314_v48, 0.0  ;;  %v4036_v59 = vpop.permute.xlu0 %4035 }
0x188c   : > { %v17019_v41 = vmax.f32 %v15323_v16, 0.0  ;;  %v17020_v56 = vmax.f32 %v15326_v63, 0.0  ;;  %v15333_v25 = vadd.f32 %v4036_v59, %v14475_v52  ;;  %v15336_v6 = vadd.f32 %v4036_v59, %v14477_v47  ;;  %11060 = vmatmul.mubr.msk.bf16.vlgmr.msra.gmra.mrb[64].mxu0 %vm932_vm15, %v13207_v20  ;;  %vm17117_vm15 = vmmov %vm17114_vm0 }
0x188d   : > { %v12628_v23 = vpack.i.bf16 %v2208_v18, %v17025_v44  ;;  %12634 = vrot.lane.b32.xlu1 %v12633_v57, %s17072_s30  ;;  %v4961_v24 = vpop.permute.xlu1 %4960  ;;  %11844 = vmatprep.mubr.msk.bf16.mxu0 %vm13417_vm3, %v17005_v33 }
0x188e   : > { %v12643_v52 = vpack.i.bf16 %v17020_v56, %v17019_v41  ;;  %v17021_v47 = vmax.f32 %v15333_v25, 0.0  ;;  %v17022_v51 = vmax.f32 %v15336_v6, 0.0  ;;  %v15353_v45 = vadd.f32 %v4961_v24, %v14694_v26 }
0x188f   : > { %v15356_v14 = vadd.f32 %v4961_v24, %v14696_v28  ;;  %12629 = vrot.lane.b32.xlu0 %v12628_v23, %s17072_s30  ;;  %v4956_v3 = vpop.permute.xlu0 %4955 }
0x1890   : > { %v12638_v4 = vpack.i.bf16 %v17022_v51, %v17021_v47  ;;  %v17013_v2 = vmax.f32 %v15353_v45, 0.0  ;;  %v15365_v0 = vadd.f32 %v4956_v3, %v14690_v7  ;;  %v15368_v31 = vadd.f32 %v4956_v3, %v14692_v17 }
0x1891   : > { %v17014_v26 = vmax.f32 %v15356_v14, 0.0  ;;  %12644 = vrot.lane.b32.xlu1 %v12643_v52, %s17072_s30  ;;  %v5881_v28 = vpop.permute.xlu1 %5880 }
0x1892   : > { %v17017_v34 = vmax.f32 %v15365_v0, 0.0  ;;  %v17018_v32 = vmax.f32 %v15368_v31, 0.0  ;;  %v15375_v61 = vadd.f32 %v5881_v28, %v14909_v9  ;;  %v15378_v49 = vadd.f32 %v5881_v28, %v14911_v15 }
0x1893   : > { %v12653_v7 = vpack.i.bf16 %v17014_v26, %v17013_v2  ;;  %12639 = vrot.lane.b32.xlu0 %v12638_v4, %s17072_s30  ;;  %v5876_v17 = vpop.permute.xlu0 %5875 }
0x1894   : > { %v12648_v20 = vpack.i.bf16 %v17018_v32, %v17017_v34  ;;  %v17009_v40 = vmax.f32 %v15375_v61, 0.0  ;;  %v17010_v9 = vmax.f32 %v15378_v49, 0.0  ;;  %v15392_v15 = vadd.f32 %v5876_v17, %v14905_v50 }
0x1895   : > { %v15395_v57 = vadd.f32 %v5876_v17, %v14907_v13  ;;  %12654 = vrot.lane.b32.xlu1 %v12653_v7, %s17072_s30  ;;  %v6801_v59 = vpop.permute.xlu1 %6800 }
0x1896   : > { %v12663_v23 = vpack.i.bf16 %v17010_v9, %v17009_v40  ;;  %v17011_v24 = vmax.f32 %v15392_v15, 0.0  ;;  %v15404_v52 = vadd.f32 %v6801_v59, %v15126_v54  ;;  %v15407_v3 = vadd.f32 %v6801_v59, %v15128_v43 }
0x1897   : > { %v17012_v50 = vmax.f32 %v15395_v57, 0.0  ;;  %12649 = vrot.lane.b32.xlu0 %v12648_v20, %s17072_s30  ;;  %v6796_v13 = vpop.permute.xlu0 %6795 }
0x1898   : > { %v17007_v4 = vmax.f32 %v15404_v52, 0.0  ;;  %v17008_v28 = vmax.f32 %v15407_v3, 0.0  ;;  %v15414_v7 = vadd.f32 %v6796_v13, %v15122_v30  ;;  %v15417_v17 = vadd.f32 %v6796_v13, %v15124_v35 }
0x1899   : > { %v12658_v54 = vpack.i.bf16 %v17012_v50, %v17011_v24  ;;  %12664 = vrot.lane.b32.xlu1 %v12663_v23, %s17072_s30  ;;  %v7721_v23 = vpop.permute.xlu1 %7720 }
0x189a   : > { %v12673_v43 = vpack.i.bf16 %v17008_v28, %v17007_v4  ;;  %v17015_v20 = vmax.f32 %v15414_v7, 0.0  ;;  %v17016_v30 = vmax.f32 %v15417_v17, 0.0 }
0x189b   : > { %12659 = vrot.lane.b32.xlu0 %v12658_v54, %s17072_s30  ;;  %v7716_v59 = vpop.permute.xlu0 %7715 }
0x189c   : > { %v12668_v35 = vpack.i.bf16 %v17016_v30, %v17015_v20 }
0x189d   : > { %12674 = vrot.lane.b32.xlu1 %v12673_v43, %s17072_s30 }
0x189f   : > { %12669 = vrot.lane.b32.xlu0 %v12668_v35, %s17072_s30 }
0x18f6   : > { %v12615_v11 = vpop.permute.xlu1 %12614 }
0x18f7   : > { %v12617_v50 = vunpack.i.h.bf16 %v12615_v11  ;;  %v12616_v2 = vunpack.i.l.bf16 %v12615_v11 }
0x18f8   : > { %v12610_v13 = vpop.permute.xlu0 %12609 }
0x18f9   : > { %v12612_v40 = vunpack.i.h.bf16 %v12610_v13  ;;  %v12611_v9 = vunpack.i.l.bf16 %v12610_v13  ;;  %v1304_v19 = vsel %vm17115_vm13, %v12616_v2, %v12617_v50  ;;  %v1312_v44 = vmax.f32 %v1289_v27, %v12617_v50  ;;  %vm17138_vm13 = vmmov %vm17114_vm0 }
0x18fa   : > { %v15468_v37 = vmax.f32 %v1288_v53, %v1304_v19 }
0x18fb   : > { %v12625_v4 = vpop.permute.xlu1 %12624  ;;  %v1303_v43 = vsel %vm17114_vm0, %v12611_v9, %v12612_v40 }
0x18fc   : > { %v12620_v33 = vpop.permute.xlu0 %12619  ;;  %v12627_v9 = vunpack.i.h.bf16 %v12625_v4  ;;  %v12626_v55 = vunpack.i.l.bf16 %v12625_v4 }
0x18fd   : > { %v12622_v32 = vunpack.i.h.bf16 %v12620_v33  ;;  %v12621_v41 = vunpack.i.l.bf16 %v12620_v33  ;;  %v15456_v33 = vmax.f32 %v1286_v38, %v1303_v43 }
0x18fe   : > { %v3152_v50 = vmax.f32 %v3130_v42, %v12627_v9 }
0x18ff   : > { %v12635_v24 = vpop.permute.xlu1 %12634  ;;  %v3143_v2 = vsel %vm17116_vm14, %v12621_v41, %v12622_v32  ;;  %v3150_v22 = vmax.f32 %v3128_v58, %v12622_v32  ;;  %vm17141_vm14 = vmmov %vm17114_vm0 }
0x1900   : > { %v12637_v41 = vunpack.i.h.bf16 %v12635_v24  ;;  %v15481_v12 = vmax.f32 %v3127_v8, %v3143_v2 }
0x1901   : > { %v12630_v28 = vpop.permute.xlu0 %12629 }
0x1902   : > { %v12631_v4 = vunpack.i.l.bf16 %v12630_v28  ;;  %v12698_v32 = vpack.i.bf16 %v3150_v22, %v15481_v12  ;;  %v17128_v22 = vmax.f32 %v15326_v63, 0.0 }
0x1903   : > { %v12645_v51 = vpop.permute.xlu1 %12644 }
0x1904   : > { %v12647_v8 = vunpack.i.h.bf16 %v12645_v51  ;;  %v12646_v58 = vunpack.i.l.bf16 %v12645_v51  ;;  %v17122_v51 = vmax.f32 %v15293_v60, 0.0 }
0x1905   : > { %v15440_v30 = vpop.permute.xlu0 %12639 }
0x1906   : > { %v12642_v19 = vunpack.i.h.bf16 %v15440_v30 }
0x1907   : > { %v12655_v53 = vpop.permute.xlu1 %12654 }
0x1908   : > { %v12657_v2 = vunpack.i.h.bf16 %v12655_v53 }
0x1909   : > { %v12650_v46 = vpop.permute.xlu0 %12649 }
0x190a   : > { %v12651_v42 = vunpack.i.l.bf16 %v12650_v46 }
0x190d   : > { %v12660_v5 = vpop.permute.xlu0 %12659 }
0x195f   : > { %v7694_v54 = vpop.f32.mrb[64].mxu0 }
0x1960   : > { %v15437_v26 = vadd.f32 %v7716_v59, %v7694_v54  ;;  %v7696_v20 = vpop.f32.mrb[65].mxu0 }
0x1961   : > { %v15442_v35 = vadd.f32 %v7716_v59, %v7696_v20  ;;  %v7698_v34 = vpop.f32.mrb[66].mxu0  ;;  %v1310_v59 = vmax.f32 %v1287_v36, %v12612_v40  ;;  %v3144_v36 = vsel %vm17117_vm15, %v12626_v55, %v12627_v9  ;;  %v12636_v40 = vunpack.i.l.bf16 %v12635_v24  ;;  %vm17147_vm15 = vmmov %vm17114_vm0 }
0x1962   : > { %v7727_v56 = vmax.f32 %v15437_v26, 0.0  ;;  %v15445_v47 = vadd.f32 %v7721_v23, %v7698_v34  ;;  %v7700_v13 = vpop.f32.mrb[67].mxu0  ;;  %v12641_v55 = vunpack.i.l.bf16 %v15440_v30  ;;  %v12693_v24 = vpack.i.bf16 %v1312_v44, %v15468_v37  ;;  %v13219_v26 = vld [vmem:[%s16972_s5 + $0x168] sm:$0xff]  }
0x1963   : > { %v7728_v11 = vmax.f32 %v15442_v35, 0.0  ;;  %v15448_v54 = vadd.f32 %v7721_v23, %v7700_v13  ;;  %v12632_v13 = vunpack.i.h.bf16 %v12630_v28  ;;  %v12688_v28 = vpack.i.bf16 %v1310_v59, %v15456_v33 }
0x1964   : > { %v7729_v20 = vmax.f32 %v15445_v47, 0.0  ;;  %v15492_v29 = vmax.f32 %v3129_v10, %v3144_v36  ;;  %v2224_v39 = vsel %vm17119_vm10, %v12636_v40, %v12637_v41  ;;  %v17120_v44 = vmax.f32 %v15308_v62, 0.0  ;;  %v13222_v47 = vld [vmem:[%s16972_s5 + $0x78] sm:$0x1f]  }
0x1965   : > { %v12678_v34 = vpack.i.bf16 %v7728_v11, %v7727_v56  ;;  %v7730_v23 = vmax.f32 %v15448_v54, 0.0  ;;  %v2223_v27 = vsel %vm17118_vm12, %v12631_v4, %v12632_v13  ;;  %v2230_v30 = vmax.f32 %v2208_v18, %v12632_v13  ;;  %v12665_v18 = vpop.permute.xlu1 %12664  ;;  %vm17149_vm12 = vmmov %vm17114_vm0 }
0x1966   : > { %v15501_v43 = vmax.f32 %v17120_v44, %v2223_v27  ;;  %v4063_v1 = vsel %vm17121_vm1, %v12641_v55, %v12642_v19  ;;  %v12652_v10 = vunpack.i.h.bf16 %v12650_v46  ;;  %v12703_v9 = vpack.i.bf16 %v3152_v50, %v15492_v29 }
0x1967   : > { %v12683_v38 = vpack.i.bf16 %v7730_v23, %v7729_v20  ;;  %12679 = vrot.lane.b32.xlu0 %v12678_v34, %s17072_s30  ;;  %v2232_v59 = vmax.f32 %v17122_v51, %v12637_v41  ;;  %v17123_v34 = vmax.f32 %v15290_v21, 0.0  ;;  %v4064_v62 = vsel %vm17124_vm2, %v12646_v58, %v12647_v8 }
0x1968   : > { %v12656_v13 = vunpack.i.l.bf16 %v12655_v53  ;;  %v12708_v4 = vpack.i.bf16 %v2230_v30, %v15501_v43  ;;  %v17125_v46 = vmax.f32 %v15336_v6, 0.0  ;;  %v17126_v36 = vmax.f32 %v15333_v25, 0.0  ;;  %v12670_v6 = vpop.permute.xlu0 %12669 }
0x1969   : > { %12684 = vrot.lane.b32.xlu1 %v12683_v38, %s17072_s30  ;;  %v15510_v48 = vmax.f32 %v17123_v34, %v2224_v39  ;;  %v4983_v21 = vsel %vm17127_vm4, %v12651_v42, %v12652_v10  ;;  %v12662_v41 = vunpack.i.h.bf16 %v12660_v5  ;;  %v12661_v40 = vunpack.i.l.bf16 %v12660_v5 }
0x196a   : > { %v4070_v38 = vmax.f32 %v17125_v46, %v12642_v19  ;;  %v15519_v60 = vmax.f32 %v17126_v36, %v4063_v1  ;;  %v4072_v53 = vmax.f32 %v17128_v22, %v12647_v8  ;;  %v17129_v27 = vmax.f32 %v15323_v16, 0.0  ;;  %v12675_v8 = vpop.permute.xlu1 %12674 }
0x196b   : > { %12689 = vrot.lane.b32.xlu0 %v12688_v28, %s17077_s14  ;;  %v12713_v28 = vpack.i.bf16 %v2232_v59, %v15510_v48  ;;  %v4984_v25 = vsel %vm17130_vm6, %v12656_v13, %v12657_v2  ;;  %v12667_v19 = vunpack.i.h.bf16 %v12665_v18  ;;  %v17131_v39 = vmax.f32 %v15368_v31, 0.0 }
0x196c   : > { %v15528_v55 = vmax.f32 %v17129_v27, %v4064_v62  ;;  %v12718_v50 = vpack.i.bf16 %v4070_v38, %v15519_v60  ;;  %v5903_v16 = vsel %vm17133_vm9, %v12661_v40, %v12662_v41  ;;  %v12672_v30 = vunpack.i.h.bf16 %v12670_v6 }
0x196d   : > { %12694 = vrot.lane.b32.xlu1 %v12693_v24, %s17077_s14  ;;  %v12666_v24 = vunpack.i.l.bf16 %v12665_v18  ;;  %v4990_v58 = vmax.f32 %v17131_v39, %v12652_v10  ;;  %v12671_v44 = vunpack.i.l.bf16 %v12670_v6  ;;  %v17134_v1 = vmax.f32 %v15356_v14, 0.0  ;;  %v13211_v6 = vld [vmem:[%s16972_s5 + $0x148] sm:$0xff]   ;;  %v13215_v39 = vld [vmem:[%s16972_s5 + $0x158] sm:$0xff]  }
0x196e   : > { %v12723_v5 = vpack.i.bf16 %v4072_v53, %v15528_v55  ;;  %v12677_v10 = vunpack.i.h.bf16 %v12675_v8  ;;  %v12676_v51 = vunpack.i.l.bf16 %v12675_v8  ;;  %v17136_v34 = vmax.f32 %v15395_v57, 0.0 }
0x196f   : > { %12699 = vrot.lane.b32.xlu0 %v12698_v32, %s17077_s14  ;;  %v17132_v32 = vmax.f32 %v15365_v0, 0.0  ;;  %v4992_v42 = vmax.f32 %v17134_v1, %v12657_v2  ;;  %v5904_v0 = vsel %vm17114_vm0, %v12666_v24, %v12667_v19  ;;  %v17137_v62 = vmax.f32 %v15392_v15, 0.0  ;;  %v13213_v24 = vld [vmem:[%s16972_s5 + $0x150] sm:$0xff]  }
0x1970   : > { %v5910_v18 = vmax.f32 %v17136_v34, %v12662_v41  ;;  %v17139_v2 = vmax.f32 %v15378_v49, 0.0  ;;  %v17140_v46 = vmax.f32 %v15375_v61, 0.0  ;;  %v6824_v57 = vsel %vm17141_vm14, %v12676_v51, %v12677_v10  ;;  %v13218_v34 = vld [vmem:[%s16972_s5 + $0x68] sm:$0xff]  }
0x1971   : > { %12704 = vrot.lane.b32.xlu1 %v12703_v9, %s17077_s14  ;;  %v15537_v63 = vmax.f32 %v17132_v32, %v4983_v21  ;;  %v17135_v9 = vmax.f32 %v15353_v45, 0.0  ;;  %v15555_v13 = vmax.f32 %v17137_v62, %v5903_v16  ;;  %v6823_v45 = vsel %vm17138_vm13, %v12671_v44, %v12672_v30 }
0x1972   : > { %v15564_v38 = vmax.f32 %v17140_v46, %v5904_v0  ;;  %v17142_v36 = vmax.f32 %v15417_v17, 0.0  ;;  %v17143_v41 = vmax.f32 %v15414_v7, 0.0  ;;  %v17144_v61 = vmax.f32 %v15407_v3, 0.0  ;;  %v13208_v17 = vld [vmem:[%s16972_s5 + $0x40] sm:$0xff]  }
0x1973   : > { %12709 = vrot.lane.b32.xlu0 %v12708_v4, %s17077_s14  ;;  %v15546_v31 = vmax.f32 %v17135_v9, %v4984_v25  ;;  %v12728_v59 = vpack.i.bf16 %v4990_v58, %v15537_v63  ;;  %v5912_v4 = vmax.f32 %v17139_v2, %v12667_v19  ;;  %v12738_v15 = vpack.i.bf16 %v5910_v18, %v15555_v13  ;;  %v13209_v7 = vld [vmem:[%s16972_s5 + $0x140] sm:$0xff]   ;;  %v13212_v19 = vld [vmem:[%s16972_s5 + $0x50] sm:$0xff]  }
0x1974   : > { %v6830_v21 = vmax.f32 %v17142_v36, %v12672_v30  ;;  %v15573_v40 = vmax.f32 %v17143_v41, %v6823_v45  ;;  %v17145_v22 = vmax.f32 %v15404_v52, 0.0  ;;  %11789 = vmatpush3.bf16.msra.mxu1 %v13208_v17  ;;  %v13210_v52 = vld [vmem:[%s16972_s5 + $0x48] sm:$0xff]   ;;  %11829 = vmatpush3.bf16.msra.mxu0 %v13209_v7  ;;  %v17146_v3 = vmov 0.0   ;;  %v13217_v9 = vld [vmem:[%s16972_s5 + $0x160] sm:$0xff]   ;;  %v13220_v36 = vld [vmem:[%s16972_s5 + $0x70] sm:$0xff]  }
0x1975   : > { %12714 = vrot.lane.b32.xlu1 %v12713_v28, %s17077_s14  ;;  %v12733_v14 = vpack.i.bf16 %v4992_v42, %v15546_v31  ;;  %v12743_v49 = vpack.i.bf16 %v5912_v4, %v15564_v38  ;;  %v6832_v28 = vmax.f32 %v17144_v61, %v12677_v10  ;;  %11790 = vmatprep.subr.bf16.mxu1 %v17146_v3  ;;  %v13216_v42 = vld [vmem:[%s16972_s5 + $0x60] sm:$0xff]   ;;  %v17151_v18 = vmov 65535  }
0x1976   : > { %v15581_v53 = vmax.f32 %v17145_v22, %v6824_v57  ;;  %v12748_v27 = vpack.i.bf16 %v6830_v21, %v15573_v40  ;;  %11830 = vmatprep.subr.bf16.mxu0 %v17146_v3  ;;  %v7903_v62 = vsel %vm895_vm8, 4294967295, %v17151_v18  ;;  %v13221_v21 = vld [vmem:[%s16972_s5 + $0x170] sm:$0xff]   ;;  %vm17152_vm10 = vcmask 1044480  }
0x1977   : > { %12719 = vrot.lane.b32.xlu0 %v12718_v50, %s17077_s14  ;;  %v13214_v50 = vld [vmem:[%s16972_s5 + $0x58] sm:$0xff]   ;;  %v15666_v41 = vsel %vm17152_vm10, %v7903_v62, 0  ;;  %vm1332_vm1 = vcmask 990208   ;;  %vm7832_vm2 = vcmask 1041409   ;;  %vm7835_vm4 = vcmask 1042434  }
0x1978   : > { %v12753_v25 = vpack.i.bf16 %v6832_v28, %v15581_v53  ;;  %11791 = vmatpush3.bf16.msra.mxu1 %v13210_v52  ;;  %11831 = vmatpush3.bf16.msra.mxu0 %v13211_v6  ;;  %17153 = vst [vmem:[#allocation10_spill] sm:$0xff] %v15666_v41  ;;  %vm7838_vm6 = vcmask 1043459   ;;  %vm7841_vm9 = vcmask 1044484   ;;  %vm7844_vm0 = vcmask 1045509  }
0x1979   : > { %12724 = vrot.lane.b32.xlu1 %v12723_v5, %s17077_s14  ;;  %11792 = vmatprep.subr.bf16.mxu1 %v17146_v3  ;;  %vm7847_vm13 = vcmask 1046534  }
0x197a   : > { %11832 = vmatprep.subr.bf16.mxu0 %v17146_v3 }
0x197b   : > { %12729 = vrot.lane.b32.xlu0 %v12728_v59, %s17077_s14 }
0x197c   : > { %11793 = vmatpush3.bf16.msra.mxu1 %v13212_v19  ;;  %11833 = vmatpush3.bf16.msra.mxu0 %v13213_v24 }
0x197d   : > { %12734 = vrot.lane.b32.xlu1 %v12733_v14, %s17077_s14  ;;  %11794 = vmatprep.subr.bf16.mxu1 %v17146_v3 }
0x197e   : > { %11834 = vmatprep.subr.bf16.mxu0 %v17146_v3 }
0x197f   : > { %12739 = vrot.lane.b32.xlu0 %v12738_v15, %s17077_s14 }
0x1980   : > { %11795 = vmatpush3.bf16.msra.mxu1 %v13214_v50  ;;  %11835 = vmatpush3.bf16.msra.mxu0 %v13215_v39 }
0x1981   : > { %12744 = vrot.lane.b32.xlu1 %v12743_v49, %s17077_s14  ;;  %11796 = vmatprep.subr.bf16.mxu1 %v17146_v3  ;;  %v13223_v49 = vld [vmem:[%s16972_s5 + $0x178] sm:$0x1f]  }
0x1982   : > { %11836 = vmatprep.subr.bf16.mxu0 %v17146_v3  ;;  %v8238_v24 = vand.u32 %v13223_v49, %v15666_v41 }
0x1983   : > { %12749 = vrot.lane.b32.xlu0 %v12748_v27, %s17077_s14 }
0x1984   : > { %11797 = vmatpush3.bf16.msra.mxu1 %v13216_v42  ;;  %11837 = vmatpush3.bf16.msra.mxu0 %v13217_v9 }
0x1985   : > { %12754 = vrot.lane.b32.xlu1 %v12753_v25, %s17077_s14  ;;  %11798 = vmatprep.subr.bf16.mxu1 %v17146_v3  ;;  %v7906_v25 = vand.u32 %v13222_v47, %v15666_v41 }
0x1986   : > { %11838 = vmatprep.subr.bf16.mxu0 %v17146_v3 }
0x1988   : > { %11799 = vmatpush3.bf16.msra.mxu1 %v13218_v34  ;;  %11839 = vmatpush3.bf16.msra.mxu0 %v13219_v26 }
0x1989   : > { %11800 = vmatprep.subr.bf16.mxu1 %v17146_v3  ;;  %11840 = vmatprep.subr.bf16.mxu0 %v17146_v3 }
0x198c   : > { %11801 = vmatpush3.bf16.msra.mxu1 %v13220_v36  ;;  %11841 = vmatpush3.bf16.msra.mxu0 %v13221_v21 }
0x198d   : > { %11802 = vmatprep.subr.bf16.mxu1 %v17146_v3  ;;  %11842 = vmatprep.subr.bf16.mxu0 %v17146_v3 }
0x1990   : > { %11803 = vmatpush3.bf16.msra.mxu1 %v7906_v25  ;;  %11843 = vmatpush3.bf16.msra.mxu0 %v8238_v24 }
0x1991   : > { %11808 = vmatprep.subr.bf16.mxu1 %v17146_v3  ;;  %11868 = vmatprep.subr.bf16.mxu0 %v17146_v3 }
0x19d9   : > { %v12680_v58 = vpop.permute.xlu0 %12679 }
0x19da   : > { %v12682_v32 = vunpack.i.h.bf16 %v12680_v58  ;;  %v12681_v8 = vunpack.i.l.bf16 %v12680_v58 }
0x19db   : > { %v12685_v16 = vpop.permute.xlu1 %12684 }
0x19dc   : > { %v7750_v30 = vmax.f32 %v7728_v11, %v12682_v32  ;;  %v7743_v44 = vsel %vm17147_vm15, %v12681_v8, %v12682_v32  ;;  %v12687_v5 = vunpack.i.h.bf16 %v12685_v16  ;;  %v12686_v1 = vunpack.i.l.bf16 %v12685_v16 }
0x19dd   : > { %v15632_v0 = vmax.f32 %v7727_v56, %v7743_v44  ;;  %v12690_v10 = vpop.permute.xlu0 %12689 }
0x19de   : > { %v7752_v35 = vmax.f32 %v7730_v23, %v12687_v5  ;;  %v7744_v11 = vsel %vm17149_vm12, %v12686_v1, %v12687_v5  ;;  %v12692_v51 = vunpack.i.h.bf16 %v12690_v10  ;;  %v12691_v59 = vunpack.i.l.bf16 %v12690_v10 }
0x19df   : > { %17148 = vst [vmem:[#allocation8_spill] sm:$0xff] %v15632_v0  ;;  %v12758_v56 = vpack.i.bf16 %v7750_v30, %v15632_v0  ;;  %v15646_v54 = vmax.f32 %v7729_v20, %v7744_v11  ;;  %v12695_v23 = vpop.permute.xlu1 %12694 }
0x19e0   : > { %v1325_v45 = vsel %vm861_vm7, %v12691_v59, %v12692_v51  ;;  %v12697_v14 = vunpack.i.h.bf16 %v12695_v23  ;;  %v12696_v2 = vunpack.i.l.bf16 %v12695_v23 }
0x19e1   : > { %17150 = vst [vmem:[#allocation9_spill] sm:$0xff] %v15646_v54  ;;  %v12763_v4 = vpack.i.bf16 %v7752_v35, %v15646_v54  ;;  %12759 = vrot.lane.b32.xlu0 %v12758_v56, %s17077_s14  ;;  %v12700_v46 = vpop.permute.xlu0 %12699  ;;  %v1329_v61 = vmax.f32 %v15456_v33, %v1325_v45 }
0x19e2   : > { %v1326_v20 = vsel %vm861_vm7, %v12696_v2, %v12697_v14  ;;  %v12702_v57 = vunpack.i.h.bf16 %v12700_v46  ;;  %v12701_v15 = vunpack.i.l.bf16 %v12700_v46 }
0x19e3   : > { %v1330_v28 = vmax.f32 %v15468_v37, %v1326_v20  ;;  %v12705_v22 = vpop.permute.xlu1 %12704  ;;  %12764 = vrot.lane.b32.xlu1 %v12763_v4, %s17077_s14  ;;  %s11465_s14 = sshll.u32 %s13510_s21, 7  ;;  %s13350_s21 = scalar_lea.vmem %s16927_s16, 128 }
0x19e4   : > { %v3165_v17 = vsel %vm861_vm7, %v12701_v15, %v12702_v57  ;;  %v12707_v7 = vunpack.i.h.bf16 %v12705_v22  ;;  %v12706_v27 = vunpack.i.l.bf16 %v12705_v22  ;;  %s16925_s30 = scalar_lea.hbm %s16978_s11, %s11465_s14  ;;  %p13351_p11 = scmp.ne.s32.totalorder %s16927_s16, %s13350_s21 }
0x19e5   : > { %v1331_v52 = vpack.c.bf16 %v1330_v28, %v1329_v61  ;;  %v12710_v6 = vpop.permute.xlu0 %12709  ;;  %v3169_v50 = vmax.f32 %v15481_v12, %v3165_v17  ;;  %p13358_p1 = scmp.lt.s32.totalorder %s13356_s0, %s13350_s21 }
0x19e6   : > { %v3166_v33 = vsel %vm861_vm7, %v12706_v27, %v12707_v7  ;;  %v12712_v19 = vunpack.i.h.bf16 %v12710_v6  ;;  %v12711_v37 = vunpack.i.l.bf16 %v12710_v6  ;;  %p13352_p12 = pnand %p13351_p11, %p13527_p5 }
0x19e7   : > { %1333 = vst.msk [vmem:[#allocation2] sm:$0xff] %vm1332_vm1, %v1331_v52  ;;  %v3170_v39 = vmax.f32 %v15492_v29, %v3166_v33  ;;  %v12715_v58 = vpop.permute.xlu1 %12714  ;;  %p13359_p2 = por %p13358_p1, %p13357_p0 }
0x19e8   : > { %v2245_v32 = vsel %vm861_vm7, %v12711_v37, %v12712_v19  ;;  %v12717_v8 = vunpack.i.h.bf16 %v12715_v58  ;;  %v12716_v16 = vunpack.i.l.bf16 %v12715_v58  ;;  %p13353_p13 = pneg %p13352_p12 }
0x19e9   : > { %v3171_v30 = vpack.c.bf16 %v3170_v39, %v3169_v50  ;;  %v12720_v44 = vpop.permute.xlu0 %12719  ;;  %v2249_v12 = vmax.f32 %v15501_v43, %v2245_v32 }
0x19ea   : > { %v2246_v5 = vsel %vm861_vm7, %v12716_v16, %v12717_v8  ;;  %v12722_v1 = vunpack.i.h.bf16 %v12720_v44  ;;  %v12721_v42 = vunpack.i.l.bf16 %v12720_v44  ;;  %p13360_p3 = pnand %p13359_p2, %p13353_p13 }
0x19eb   : > { %3173 = vst.msk [vmem:[#allocation2 + $0x10] sm:$0xff] %vm1332_vm1, %v3171_v30  ;;  %v2250_v29 = vmax.f32 %v15510_v48, %v2246_v5  ;;  %v12725_v9 = vpop.permute.xlu1 %12724 }
0x19ec   : > { %v4085_v10 = vsel %vm861_vm7, %v12721_v42, %v12722_v1  ;;  %v12727_v35 = vunpack.i.h.bf16 %v12725_v9  ;;  %v12726_v11 = vunpack.i.l.bf16 %v12725_v9 }
0x19ed   : > { %v2251_v51 = vpack.c.bf16 %v2250_v29, %v2249_v12  ;;  %v12730_v59 = vpop.permute.xlu0 %12729  ;;  %v4089_v43 = vmax.f32 %v15519_v60, %v4085_v10 }
0x19ee   : > { %v4086_v34 = vsel %vm861_vm7, %v12726_v11, %v12727_v35  ;;  %v12732_v26 = vunpack.i.h.bf16 %v12730_v59  ;;  %v12731_v56 = vunpack.i.l.bf16 %v12730_v59  ;;  %v15712_v24 = vld [vmem:[#allocation2] sm:$0x1]  ;;  %v15718_v50 = vld [vmem:[#allocation2] sm:$0x10]  ;;  %v15737_v44 = vld [vmem:[#allocation2] sm:$0x8] }
0x19ef   : > { %2253 = vst.msk [vmem:[#allocation2 + $0x8] sm:$0xff] %vm1332_vm1, %v2251_v51  ;;  %v4090_v48 = vmax.f32 %v15528_v55, %v4086_v34  ;;  %v12735_v23 = vpop.permute.xlu1 %12734 }
0x19f0   : > { %v5005_v18 = vsel %vm861_vm7, %v12731_v56, %v12732_v26  ;;  %v12737_v62 = vunpack.i.h.bf16 %v12735_v23  ;;  %v12736_v45 = vunpack.i.l.bf16 %v12735_v23 }
0x19f1   : > { %v4091_v14 = vpack.c.bf16 %v4090_v48, %v4089_v43  ;;  %v12740_v2 = vpop.permute.xlu0 %12739  ;;  %v5009_v20 = vmax.f32 %v15537_v63, %v5005_v18 }
0x19f2   : > { %v5006_v4 = vsel %vm861_vm7, %v12736_v45, %v12737_v62  ;;  %v12742_v46 = vunpack.i.h.bf16 %v12740_v2  ;;  %v12741_v47 = vunpack.i.l.bf16 %v12740_v2  ;;  %v15721_v39 = vld [vmem:[#allocation2 + $0x10] sm:$0x1]  ;;  %v15723_v58 = vld [vmem:[#allocation2 + $0x10] sm:$0x4]  ;;  %v15725_v32 = vld [vmem:[#allocation2 + $0x10] sm:$0x2] }
0x19f3   : > { %4093 = vst.msk [vmem:[#allocation2 + $0x18] sm:$0xff] %vm1332_vm1, %v4091_v14  ;;  %v5010_v57 = vmax.f32 %v15546_v31, %v5006_v4  ;;  %v12745_v60 = vpop.permute.xlu1 %12744  ;;  %17155 = vst [vmem:[#allocation12_spill] sm:$0xff] %v15721_v39  ;;  %v15731_v8 = vld [vmem:[#allocation2 + $0x10] sm:$0x10]  ;;  %v15757_v26 = vld [vmem:[#allocation2 + $0x10] sm:$0x8] }
0x19f4   : > { %v5925_v55 = vsel %vm861_vm7, %v12741_v47, %v12742_v46  ;;  %v12747_v15 = vunpack.i.h.bf16 %v12745_v60  ;;  %v12746_v36 = vunpack.i.l.bf16 %v12745_v60  ;;  %17156 = vst [vmem:[#allocation13_spill] sm:$0xff] %v15723_v58 }
0x19f5   : > { %v5011_v21 = vpack.c.bf16 %v5010_v57, %v5009_v20  ;;  %v12750_v49 = vpop.permute.xlu0 %12749  ;;  %v5929_v17 = vmax.f32 %v15555_v13, %v5925_v55  ;;  %v15714_v13 = vld [vmem:[#allocation2] sm:$0x4] }
0x19f6   : > { %v5926_v61 = vsel %vm861_vm7, %v12746_v36, %v12747_v15  ;;  %v12752_v28 = vunpack.i.h.bf16 %v12750_v49  ;;  %v12751_v22 = vunpack.i.l.bf16 %v12750_v49  ;;  %v15733_v16 = vld [vmem:[#allocation2 + $0x8] sm:$0x2]  ;;  %v15735_v30 = vld [vmem:[#allocation2 + $0x8] sm:$0x10]  ;;  %v15739_v5 = vld [vmem:[#allocation2 + $0x8] sm:$0x8] }
0x19f7   : > { %5013 = vst.msk [vmem:[#allocation2 + $0x20] sm:$0xff] %vm1332_vm1, %v5011_v21  ;;  %v5930_v7 = vmax.f32 %v15564_v38, %v5926_v61  ;;  %v12755_v63 = vpop.permute.xlu1 %12754  ;;  %v15716_v38 = vld [vmem:[#allocation2] sm:$0x2]  ;;  %v17026_v61 = vunpack.c.l.b16 %v15737_v44 }
0x19f8   : > { %v6845_v31 = vsel %vm861_vm7, %v12751_v22, %v12752_v28  ;;  %v12757_v27 = vunpack.i.h.bf16 %v12755_v63  ;;  %v12756_v52 = vunpack.i.l.bf16 %v12755_v63  ;;  %17154 = vst [vmem:[#allocation11_spill] sm:$0xff] %v15716_v38  ;;  %v17027_v28 = vunpack.c.l.b16 %v15739_v5 }
0x19f9   : > { %v5931_v6 = vpack.c.bf16 %v5930_v7, %v5929_v17  ;;  %v6849_v33 = vmax.f32 %v15573_v40, %v6845_v31  ;;  %v15727_v40 = vld [vmem:[#allocation2 + $0x8] sm:$0x1]  ;;  %v15795_v31 = vld [vmem:[#allocation2] sm:$0x40]  ;;  %v8338_v23 = vrot.slane %v17026_v61, 7 }
0x19fa   : > { %v6846_v25 = vsel %vm861_vm7, %v12756_v52, %v12757_v27  ;;  %17157 = vst [vmem:[#allocation14_spill] sm:$0xff] %v15727_v40  ;;  %v15741_v1 = vld [vmem:[#allocation2 + $0x18] sm:$0x1]  ;;  %v15744_v12 = vld [vmem:[#allocation2 + $0x18] sm:$0x4]  ;;  %v17037_v51 = vunpack.c.h.b16 %v15795_v31  ;;  %v8339_v17 = vrot.slane %v17027_v28, 6 }
0x19fb   : > { %5933 = vst.msk [vmem:[#allocation2 + $0x28] sm:$0xff] %vm1332_vm1, %v5931_v6  ;;  %v6850_v19 = vmax.f32 %v15581_v53, %v6846_v25  ;;  %v15729_v53 = vld [vmem:[#allocation2 + $0x8] sm:$0x4]  ;;  %17158 = vst [vmem:[#allocation15_spill] sm:$0xff] %v15741_v1  ;;  %v15747_v9 = vld [vmem:[#allocation2 + $0x18] sm:$0x2] }
0x19fc   : > { %17159 = vst [vmem:[#allocation16_spill] sm:$0xff] %v15744_v12  ;;  %v15754_v59 = vld [vmem:[#allocation2 + $0x18] sm:$0x10]  ;;  %v15759_v56 = vld [vmem:[#allocation2 + $0x18] sm:$0x8]  ;;  %v8340_v35 = vsel %vm7832_vm2, %v8339_v17, %v8338_v23 }
0x19fd   : > { %v6851_v37 = vpack.c.bf16 %v6850_v19, %v6849_v33  ;;  %v15797_v27 = vld [vmem:[#allocation2 + $0x8] sm:$0x40]  ;;  %v15799_v52 = vld [vmem:[#allocation2 + $0x10] sm:$0x40]  ;;  %v17028_v19 = vunpack.c.l.b16 %v15757_v26  ;;  %v15809_v63 = vld [vmem:[#allocation2 + $0x18] sm:$0x40] }
0x19fe   : > { %v15749_v10 = vld [vmem:[#allocation2 + $0x20] sm:$0x1]  ;;  %v15762_v48 = vld [vmem:[#allocation2 + $0x20] sm:$0x4]  ;;  %v15765_v18 = vld [vmem:[#allocation2 + $0x20] sm:$0x2]  ;;  %v17038_v47 = vunpack.c.h.b16 %v15797_v27  ;;  %v17168_v3 = vunpack.c.h.b16 %v15809_v63 }
0x19ff   : > { %6853 = vst.msk [vmem:[#allocation2 + $0x30] sm:$0xff] %vm1332_vm1, %v6851_v37  ;;  %17160 = vst [vmem:[#allocation17_spill] sm:$0xff] %v15749_v10  ;;  %v15768_v45 = vld [vmem:[#allocation2 + $0x20] sm:$0x10]  ;;  %v15779_v60 = vld [vmem:[#allocation2 + $0x20] sm:$0x8]  ;;  %v17029_v37 = vunpack.c.l.b16 %v15759_v56 }
0x1a00   : > { %17162 = vst [vmem:[#allocation19_spill] sm:$0xff] %v15797_v27  ;;  %v17030_v34 = vunpack.c.l.b16 %v15779_v60  ;;  %v15830_v62 = vld [vmem:[#allocation2 + $0x20] sm:$0x40]  ;;  %v8341_v4 = vrot.slane %v17028_v19, 5  ;;  %v15849_v25 = vld [vmem:[#allocation2] sm:$0x20] }
0x1a01   : > { %17165 = vst [vmem:[#allocation22_spill] sm:$0xff] %v15830_v62  ;;  %v8343_v14 = vrot.slane %v17029_v37, 4  ;;  %v15856_v28 = vld [vmem:[#allocation2 + $0x8] sm:$0x20]  ;;  %v15858_v23 = vld [vmem:[#allocation2 + $0x10] sm:$0x20]  ;;  %v17167_v37 = vunpack.c.h.b16 %v15799_v52 }
0x1a02   : > { %v15771_v2 = vld [vmem:[#allocation2 + $0x28] sm:$0x1]  ;;  %v15774_v46 = vld [vmem:[#allocation2 + $0x28] sm:$0x4]  ;;  %v15781_v55 = vld [vmem:[#allocation2 + $0x28] sm:$0x2]  ;;  %v8342_v22 = vsel %vm7835_vm4, %v8341_v4, %v8340_v35 }
0x1a03   : > { %17161 = vst [vmem:[#allocation18_spill] sm:$0xff] %v15771_v2  ;;  %v15784_v36 = vld [vmem:[#allocation2 + $0x28] sm:$0x10]  ;;  %v15787_v49 = vld [vmem:[#allocation2 + $0x28] sm:$0x8]  ;;  %v8345_v43 = vrot.slane %v17030_v34, 3  ;;  %v8344_v17 = vsel %vm7838_vm6, %v8343_v14, %v8342_v22  ;;  %v17169_v22 = vunpack.c.h.b16 %v15830_v62 }
0x1a04   : > { %v17031_v7 = vunpack.c.l.b16 %v15787_v49  ;;  %v15832_v29 = vld [vmem:[#allocation2 + $0x28] sm:$0x40]  ;;  %17166 = vst [vmem:[#allocation23_spill] sm:$0xff] %v15858_v23  ;;  %v8837_v35 = vrot.slane %v17038_v47, 4  ;;  %v15866_v4 = vld [vmem:[#allocation2 + $0x18] sm:$0x20] }
0x1a05   : > { %v8346_v11 = vsel %vm7841_vm9, %v8345_v43, %v8344_v17  ;;  %v8839_v41 = vrot.slane %v17167_v37, 3  ;;  %v8841_v14 = vrot.slane %v17168_v3, 2  ;;  %v8843_v34 = vrot.slane %v17169_v22, 1  ;;  %v15877_v54 = vld [vmem:[#allocation2 + $0x28] sm:$0x20] }
0x1a06   : > { %v15801_v6 = vld [vmem:[#allocation2 + $0x30] sm:$0x1]  ;;  %v15804_v33 = vld [vmem:[#allocation2 + $0x30] sm:$0x8]  ;;  %v15811_v21 = vld [vmem:[#allocation2 + $0x30] sm:$0x4]  ;;  %v17042_v17 = vunpack.c.h.b16 %v15856_v28  ;;  %v17043_v22 = vunpack.c.h.b16 %v15858_v23 }
0x1a07   : > { %17163 = vst [vmem:[#allocation20_spill] sm:$0xff] %v15801_v6  ;;  %17164 = vst [vmem:[#allocation21_spill] sm:$0xff] %v15804_v33  ;;  %v15814_v57 = vld [vmem:[#allocation2 + $0x30] sm:$0x2]  ;;  %v15819_v15 = vld [vmem:[#allocation2 + $0x30] sm:$0x10]  ;;  %v17032_v20 = vunpack.c.l.b16 %v15804_v33 }
0x1a08   : > { %v15841_v61 = vld [vmem:[#allocation2 + $0x30] sm:$0x40]  ;;  %v8347_v42 = vrot.slane %v17031_v7, 2  ;;  %v8836_v7 = vrot.slane %v17037_v51, 5  ;;  %17170 = vst [vmem:[#allocation24_spill] sm:$0xff] %v15877_v54 }
0x1a09   : > { %v8349_v19 = vrot.slane %v17032_v20, 1  ;;  %v15868_v20 = vld [vmem:[#allocation2 + $0x20] sm:$0x20]  ;;  %v17171_v0 = vunpack.c.h.b16 %v15841_v61  ;;  %v15883_v27 = vld [vmem:[#allocation2 + $0x30] sm:$0x20] }
0x1a0a   : > { %v8348_v51 = vsel %vm7844_vm0, %v8347_v42, %v8346_v11  ;;  %v8838_v47 = vsel %vm7832_vm2, %v8837_v35, %v8836_v7  ;;  %17172 = vst [vmem:[#allocation25_spill] sm:$0xff] %v15883_v27  ;;  %v17045_v7 = vunpack.c.h.b16 %v15868_v20  ;;  %v17048_v43 = vunpack.c.h.b16 %v15883_v27  ;;  %v15923_v23 = vld [vmem:[#allocation2 + $0x10] sm:$0x80] }
0x1a0b   : > { %v8846_v33 = vrot.slane %v17171_v0, 7  ;;  %v15887_v37 = vsel %vm7847_vm13, %v8349_v19, %v8348_v51  ;;  %v8840_v3 = vsel %vm7835_vm4, %v8839_v41, %v8838_v47  ;;  %v17046_v0 = vunpack.c.h.b16 %v15877_v54  ;;  %v15950_v54 = vld [vmem:[#allocation2 + $0x30] sm:$0x80] }
0x1a0c   : > { %17173 = vst [vmem:[#allocation26_spill] sm:$0xff] %v15887_v37  ;;  %v8842_v42 = vsel %vm7838_vm6, %v8841_v14, %v8840_v3  ;;  %v17174_v51 = vunpack.c.h.b16 %v15849_v25  ;;  %v8671_v41 = vrot.slane %v17042_v17, 2  ;;  %v17175_v47 = vunpack.c.h.b16 %v15832_v29 }
0x1a0d   : > { %v8844_v35 = vsel %vm7841_vm9, %v8843_v34, %v8842_v42  ;;  %v8673_v3 = vrot.slane %v17043_v22, 1  ;;  %v8676_v11 = vrot.slane %v17045_v7, 7  ;;  %v8678_v34 = vrot.slane %v17046_v0, 6  ;;  %v15911_v42 = vld [vmem:[#allocation2] sm:$0x80] }
0x1a0e   : > { %v8670_v19 = vrot.slane %v17174_v51, 3  ;;  %v8845_v14 = vsel %vm7844_vm0, %v17175_v47, %v8844_v35  ;;  %v8680_v37 = vrot.slane %v17048_v43, 5  ;;  %v17177_v35 = vunpack.c.l.b16 %v15727_v40  ;;  %v15921_v22 = vld [vmem:[#allocation2 + $0x8] sm:$0x80] }
0x1a0f   : > { %v15914_v51 = vsel %vm7847_vm13, %v8846_v33, %v8845_v14  ;;  %v17178_v0 = vunpack.c.l.b16 %v15721_v39  ;;  %v17179_v33 = vunpack.c.l.b16 %v15741_v1  ;;  %v17181_v43 = vunpack.c.h.b16 %v15866_v4 }
0x1a10   : > { %17176 = vst [vmem:[#allocation27_spill] sm:$0xff] %v15914_v51  ;;  %v8672_v17 = vsel %vm7832_vm2, %v8671_v41, %v8670_v19  ;;  %v9110_v47 = vrot.slane %v17177_v35, 7  ;;  %v17180_v19 = vunpack.c.l.b16 %v15749_v10  ;;  %v15932_v51 = vld [vmem:[#allocation2 + $0x18] sm:$0x80]  ;;  %v17182_v40 = vunpack.c.l.b16 %v15712_v24  ;;  %v15946_v10 = vld [vmem:[#allocation2 + $0x28] sm:$0x80] }
0x1a11   : > { %v8674_v7 = vsel %vm7835_vm4, %v8673_v3, %v8672_v17  ;;  %v9112_v62 = vrot.slane %v17178_v0, 6  ;;  %v9114_v14 = vrot.slane %v17179_v33, 5  ;;  %v17183_v17 = vunpack.c.l.b16 %v15771_v2  ;;  %v15944_v33 = vld [vmem:[#allocation2 + $0x20] sm:$0x80] }
0x1a12   : > { %v9116_v41 = vrot.slane %v17180_v19, 4  ;;  %v8675_v35 = vsel %vm7838_vm6, %v17181_v43, %v8674_v7  ;;  %v9111_v27 = vsel %vm7832_vm2, %v9110_v47, %v17182_v40  ;;  %v17184_v0 = vunpack.c.l.b16 %v15801_v6 }
0x1a13   : > { %v9118_v3 = vrot.slane %v17183_v17, 3  ;;  %v8677_v19 = vsel %vm7841_vm9, %v8676_v11, %v8675_v35  ;;  %v9113_v1 = vsel %vm7835_vm4, %v9112_v62, %v9111_v27  ;;  %v17057_v43 = vunpack.c.h.b16 %v15911_v42 }
0x1a14   : > { %v9120_v39 = vrot.slane %v17184_v0, 2  ;;  %v8679_v7 = vsel %vm7844_vm0, %v8678_v34, %v8677_v19  ;;  %v9115_v47 = vsel %vm7838_vm6, %v9114_v14, %v9113_v1  ;;  %v17056_v17 = vunpack.c.h.b16 %v15923_v23 }
0x1a15   : > { %v17058_v0 = vunpack.c.h.b16 %v15932_v51  ;;  %v15959_v6 = vsel %vm7847_vm13, %v8680_v37, %v8679_v7  ;;  %v9117_v11 = vsel %vm7841_vm9, %v9116_v41, %v9115_v47  ;;  %v17059_v62 = vunpack.c.h.b16 %v15944_v33 }
0x1a16   : > { %17185 = vst [vmem:[#allocation28_spill] sm:$0xff] %v15959_v6  ;;  %v17060_v27 = vunpack.c.h.b16 %v15946_v10  ;;  %v9119_v35 = vsel %vm7844_vm0, %v9118_v3, %v9117_v11  ;;  %v17061_v40 = vunpack.c.h.b16 %v15950_v54  ;;  %v9002_v1 = vrot.slane %v17057_v43, 7 }
0x1a17   : > { %v17186_v34 = vunpack.c.h.b16 %v15921_v22  ;;  %v15971_v19 = vsel %vm7847_vm13, %v9120_v39, %v9119_v35  ;;  %v9005_v37 = vrot.slane %v17056_v17, 5  ;;  %v9007_v41 = vrot.slane %v17058_v0, 4 }
0x1a18   : > { %17187 = vst [vmem:[#allocation29_spill] sm:$0xff] %v15971_v19  ;;  %v9009_v3 = vrot.slane %v17059_v62, 3  ;;  %v9011_v47 = vrot.slane %v17060_v27, 2  ;;  %v9013_v11 = vrot.slane %v17061_v40, 1  ;;  %v17188_v39 = vunpack.c.l.b16 %v15714_v13 }
0x1a19   : > { %v9003_v14 = vrot.slane %v17186_v34, 6  ;;  %v17189_v17 = vunpack.c.l.b16 %v15729_v53  ;;  %v17190_v0 = vunpack.c.l.b16 %v15723_v58  ;;  %v17191_v62 = vunpack.c.l.b16 %v15744_v12 }
0x1a1a   : > { %v9326_v35 = vrot.slane %v17188_v39, 4  ;;  %v17192_v27 = vunpack.c.l.b16 %v15774_v46  ;;  %v17193_v40 = vunpack.c.l.b16 %v15811_v21  ;;  %v17194_v39 = vunpack.c.l.b16 %v15716_v38 }
0x1a1b   : > { %v9004_v7 = vsel %vm7832_vm2, %v9003_v14, %v9002_v1  ;;  %v9327_v43 = vrot.slane %v17189_v17, 3  ;;  %v9329_v6 = vrot.slane %v17190_v0, 2  ;;  %v9331_v1 = vrot.slane %v17191_v62, 1 }
0x1a1c   : > { %v9006_v34 = vsel %vm7835_vm4, %v9005_v37, %v9004_v7  ;;  %v9334_v19 = vrot.slane %v17192_v27, 7  ;;  %v9336_v2 = vrot.slane %v17193_v40, 6  ;;  %v9218_v37 = vrot.slane %v17194_v39, 2 }
0x1a1d   : > { %v9008_v14 = vsel %vm7838_vm6, %v9007_v41, %v9006_v34  ;;  %v9328_v17 = vsel %vm7832_vm2, %v9327_v43, %v9326_v35  ;;  %v17195_v0 = vunpack.c.l.b16 %v15733_v16  ;;  %v17196_v62 = vunpack.c.l.b16 %v15747_v9 }
0x1a1e   : > { %v9010_v7 = vsel %vm7841_vm9, %v9009_v3, %v9008_v14  ;;  %v9330_v27 = vsel %vm7835_vm4, %v9329_v6, %v9328_v17  ;;  %v17197_v34 = vunpack.c.l.b16 %v15765_v18  ;;  %v17198_v38 = vunpack.c.l.b16 %v15781_v55 }
0x1a1f   : > { %v9219_v58 = vrot.slane %v17195_v0, 1  ;;  %v9222_v12 = vrot.slane %v17196_v62, 7  ;;  %v9012_v41 = vsel %vm7844_vm0, %v9011_v47, %v9010_v7  ;;  %v9332_v43 = vsel %vm7838_vm6, %v9331_v1, %v9330_v27 }
0x1a20   : > { %v9224_v40 = vrot.slane %v17197_v34, 6  ;;  %v9226_v39 = vrot.slane %v17198_v38, 5  ;;  %v16013_v3 = vsel %vm7847_vm13, %v9013_v11, %v9012_v41  ;;  %v17199_v14 = vunpack.c.l.b16 %v15814_v57 }
0x1a21   : > { %v9220_v35 = vsel %vm7832_vm2, %v9219_v58, %v9218_v37  ;;  %v17200_v47 = vunpack.c.l.b16 %v15762_v48  ;;  %v17201_v7 = vunpack.c.l.b16 %v15725_v32  ;;  %v17202_v38 = vunpack.c.h.b16 %v15735_v30 }
0x1a22   : > { %v9228_v0 = vrot.slane %v17199_v14, 4  ;;  %v17203_v11 = vunpack.c.h.b16 %v15731_v8  ;;  %v17204_v37 = vunpack.c.h.b16 %v15754_v59  ;;  %v17205_v34 = vunpack.c.h.b16 %v15768_v45 }
0x1a23   : > { %v9333_v6 = vsel %vm7841_vm9, %v17200_v47, %v9332_v43  ;;  %v9221_v17 = vsel %vm7835_vm4, %v17201_v7, %v9220_v35  ;;  %v9542_v62 = vrot.slane %v17202_v38, 7  ;;  %v17206_v47 = vunpack.c.h.b16 %v15718_v50 }
0x1a24   : > { %v9544_v41 = vrot.slane %v17203_v11, 6  ;;  %v9335_v1 = vsel %vm7844_vm0, %v9334_v19, %v9333_v6  ;;  %v9223_v58 = vsel %vm7838_vm6, %v9222_v12, %v9221_v17  ;;  %v9546_v27 = vrot.slane %v17204_v37, 5 }
0x1a25   : > { %v9548_v43 = vrot.slane %v17205_v34, 4  ;;  %v16036_v14 = vsel %vm7847_vm13, %v9336_v2, %v9335_v1  ;;  %v9225_v35 = vsel %vm7841_vm9, %v9224_v40, %v9223_v58  ;;  %v9543_v7 = vsel %vm7832_vm2, %v9542_v62, %v17206_v47 }
0x1a26   : > { %v17207_v38 = vunpack.c.h.b16 %v15784_v36  ;;  %v9227_v12 = vsel %vm7844_vm0, %v9226_v39, %v9225_v35  ;;  %v9545_v6 = vsel %vm7835_vm4, %v9544_v41, %v9543_v7  ;;  %v17208_v17 = vunpack.c.h.b16 %v15819_v15 }
0x1a27   : > { %v16049_v37 = vsel %vm7847_vm13, %v9228_v0, %v9227_v12  ;;  %v9547_v2 = vsel %vm7838_vm6, %v9546_v27, %v9545_v6  ;;  %v17209_v40 = vunpack.c.l.b16 %v15737_v44  ;;  %v17210_v62 = vunpack.c.l.b16 %v15739_v5 }
0x1a28   : > { %v9550_v19 = vrot.slane %v17207_v38, 3  ;;  %v9552_v11 = vrot.slane %v17208_v17, 2  ;;  %v9549_v34 = vsel %vm7841_vm9, %v9548_v43, %v9547_v2  ;;  %v17211_v39 = vunpack.c.l.b16 %v15757_v26 }
0x1a29   : > { %v9434_v1 = vrot.slane %v17209_v40, 6  ;;  %v9435_v58 = vrot.slane %v17210_v62, 5  ;;  %v17212_v41 = vunpack.c.l.b16 %v15759_v56  ;;  %v17213_v7 = vunpack.c.l.b16 %v15779_v60  ;;  %v17216_v56 = vld [vmem:[#allocation19_spill] sm:$0xff] }
0x1a2a   : > { %v9437_v35 = vrot.slane %v17211_v39, 4  ;;  %v9551_v38 = vsel %vm7844_vm0, %v9550_v19, %v9549_v34  ;;  %v17214_v44 = vunpack.c.l.b16 %v15787_v49  ;;  %v17215_v26 = vunpack.c.h.b16 %v15795_v31 }
0x1a2b   : > { %v9439_v47 = vrot.slane %v17212_v41, 3  ;;  %v9441_v0 = vrot.slane %v17213_v7, 2  ;;  %v9436_v27 = vsel %vm7832_vm2, %v9435_v58, %v9434_v1  ;;  %v16068_v5 = vsel %vm7847_vm13, %v9552_v11, %v9551_v38 }
0x1a2c   : > { %v9443_v12 = vrot.slane %v17214_v44, 1  ;;  %v9438_v43 = vsel %vm7835_vm4, %v9437_v35, %v9436_v27  ;;  %v9758_v6 = vrot.slane %v17215_v26, 4  ;;  %v17217_v17 = vunpack.c.h.b16 %v17216_v56  ;;  %v17225_v27 = vld [vmem:[#allocation21_spill] sm:$0xff]  ;;  %v17228_v26 = vld [vmem:[#allocation24_spill] sm:$0xff]  ;;  %v17230_v56 = vld [vmem:[#allocation22_spill] sm:$0xff] }
0x1a2d   : > { %v9440_v60 = vsel %vm7838_vm6, %v9439_v47, %v9438_v43  ;;  %v17218_v19 = vunpack.c.h.b16 %v15799_v52  ;;  %v17219_v1 = vunpack.c.h.b16 %v15809_v63  ;;  %v17220_v62 = vunpack.c.h.b16 %v15832_v29 }
0x1a2e   : > { %v9759_v2 = vrot.slane %v17217_v17, 3  ;;  %v9442_v58 = vsel %vm7841_vm9, %v9441_v0, %v9440_v60  ;;  %v17221_v31 = vunpack.c.h.b16 %v15841_v61  ;;  %v17222_v35 = vunpack.c.h.b16 %v15849_v25 }
0x1a2f   : > { %v9761_v40 = vrot.slane %v17218_v19, 2  ;;  %v9763_v49 = vrot.slane %v17219_v1, 1  ;;  %v9766_v11 = vrot.slane %v17220_v62, 7  ;;  %v9444_v47 = vsel %vm7844_vm0, %v9443_v12, %v9442_v58  ;;  %v17235_v62 = vld [vmem:[#allocation23_spill] sm:$0xff] }
0x1a30   : > { %v9760_v34 = vsel %vm7832_vm2, %v9759_v2, %v9758_v6  ;;  %v9768_v39 = vrot.slane %v17221_v31, 6  ;;  %v9650_v41 = vrot.slane %v17222_v35, 2  ;;  %v17223_v63 = vunpack.c.h.b16 %v15856_v28  ;;  %v17232_v2 = vld [vmem:[#allocation25_spill] sm:$0xff] }
0x1a31   : > { %v9762_v52 = vsel %vm7835_vm4, %v9761_v40, %v9760_v34  ;;  %v17224_v29 = vunpack.c.h.b16 %v15866_v4  ;;  %v17226_v0 = vunpack.c.l.b16 %v17225_v27  ;;  %v17227_v25 = vunpack.c.h.b16 %v15868_v20 }
0x1a32   : > { %v9651_v7 = vrot.slane %v17223_v63, 1  ;;  %v9764_v61 = vsel %vm7838_vm6, %v9763_v49, %v9762_v52  ;;  %v17229_v12 = vunpack.c.h.b16 %v17228_v26  ;;  %v17231_v17 = vunpack.c.h.b16 %v17230_v56 }
0x1a33   : > { %v9654_v38 = vrot.slane %v17224_v29, 7  ;;  %v16097_v44 = vsel %vm7847_vm13, %v17226_v0, %v9444_v47  ;;  %v9656_v43 = vrot.slane %v17227_v25, 6  ;;  %v17233_v60 = vunpack.c.h.b16 %v17232_v2  ;;  %v17243_v2 = vld [vmem:[#allocation8_spill] sm:$0xff] }
0x1a34   : > { %v9658_v6 = vrot.slane %v17229_v12, 5  ;;  %v9765_v28 = vsel %vm7841_vm9, %v17231_v17, %v9764_v61  ;;  %v9652_v4 = vsel %vm7832_vm2, %v9651_v7, %v9650_v41  ;;  %v17234_v40 = vunpack.c.h.b16 %v15911_v42 }
0x1a35   : > { %v9660_v19 = vrot.slane %v17233_v60, 4  ;;  %v9767_v49 = vsel %vm7844_vm0, %v9766_v11, %v9765_v28  ;;  %v17236_v20 = vunpack.c.h.b16 %v17235_v62  ;;  %v17237_v34 = vunpack.c.h.b16 %v15921_v22 }
0x1a36   : > { %v9866_v1 = vrot.slane %v17234_v40, 6  ;;  %v17238_v35 = vunpack.c.h.b16 %v15923_v23  ;;  %v16121_v41 = vsel %vm7847_vm13, %v9768_v39, %v9767_v49  ;;  %v17239_v42 = vunpack.c.h.b16 %v15932_v51 }
0x1a37   : > { %v9653_v58 = vsel %vm7835_vm4, %v17236_v20, %v9652_v4  ;;  %v9867_v31 = vrot.slane %v17237_v34, 5  ;;  %v17240_v11 = vunpack.c.h.b16 %v15944_v33  ;;  %v17241_v22 = vunpack.c.h.b16 %v15946_v10 }
0x1a38   : > { %v9869_v47 = vrot.slane %v17238_v35, 4  ;;  %v9655_v52 = vsel %vm7838_vm6, %v9654_v38, %v9653_v58  ;;  %v9871_v63 = vrot.slane %v17239_v42, 3  ;;  %v17242_v25 = vunpack.c.h.b16 %v15950_v54  ;;  %v17248_v35 = vld [vmem:[#allocation16_spill] sm:$0xff]  ;;  %v17250_v42 = vld [vmem:[#allocation13_spill] sm:$0xff] }
0x1a39   : > { %v9873_v7 = vrot.slane %v17240_v11, 2  ;;  %v9657_v29 = vsel %vm7841_vm9, %v9656_v43, %v9655_v52  ;;  %v9868_v27 = vsel %vm7832_vm2, %v9867_v31, %v9866_v1  ;;  %v9875_v0 = vrot.slane %v17241_v22, 1  ;;  %v17255_v22 = vld [vmem:[#allocation15_spill] sm:$0xff] }
0x1a3a   : > { %v9659_v23 = vsel %vm7844_vm0, %v9658_v6, %v9657_v29  ;;  %v9870_v39 = vsel %vm7835_vm4, %v9869_v47, %v9868_v27  ;;  %v17245_v1 = vunpack.c.l.b16 %v15729_v53  ;;  %v17246_v62 = vunpack.c.l.b16 %v15714_v13  ;;  %v17253_v29 = vld [vmem:[#allocation14_spill] sm:$0xff] }
0x1a3b   : > { %v16135_v61 = vsel %vm7847_vm13, %v9660_v19, %v9659_v23  ;;  %v9872_v51 = vsel %vm7838_vm6, %v9871_v63, %v9870_v39  ;;  %v17244_v19 = vld [vmem:[#allocation9_spill] sm:$0xff]  ;;  %v17247_v58 = vunpack.c.l.b16 %v15712_v24  ;;  %v17249_v47 = vunpack.c.l.b16 %v17248_v35  ;;  %v17257_v24 = vld [vmem:[#allocation12_spill] sm:$0xff] }
0x1a3c   : > { %v9874_v38 = vsel %vm7841_vm9, %v9873_v7, %v9872_v51  ;;  %v8173_v54 = vrot.slane %v17245_v1, 4  ;;  %v8172_v20 = vrot.slane %v17246_v62, 5  ;;  %v17251_v63 = vunpack.c.l.b16 %v17250_v42 }
0x1a3d   : > { %v9876_v33 = vsel %vm7844_vm0, %v9875_v0, %v9874_v38  ;;  %v7831_v34 = vrot.slane %v17247_v58, 1  ;;  %v8177_v52 = vrot.slane %v17249_v47, 2  ;;  %v17252_v53 = vunpack.c.l.b16 %v15762_v48  ;;  %v17259_v38 = vld [vmem:[#allocation17_spill] sm:$0xff] }
0x1a3e   : > { %v16143_v43 = vsel %vm7847_vm13, %v17242_v25, %v9876_v33  ;;  %v8174_v31 = vsel %vm7832_vm2, %v8173_v54, %v8172_v20  ;;  %v8175_v11 = vrot.slane %v17251_v63, 3  ;;  %v17254_v27 = vunpack.c.l.b16 %v17253_v29 }
0x1a3f   : > { %v8179_v7 = vrot.slane %v17252_v53, 1  ;;  %v17256_v0 = vunpack.c.l.b16 %v17255_v22  ;;  %v17258_v39 = vunpack.c.l.b16 %v17257_v24  ;;  %v17260_v33 = vunpack.c.l.b16 %v17259_v38  ;;  %v17267_v22 = vld [vmem:[#allocation26_spill] sm:$0xff] }
0x1a40   : > { %v7833_v13 = vsel %vm7832_vm2, %v17254_v27, %v7831_v34  ;;  %v17265_v1 = vunpack.c.l.b16 %v15811_v21  ;;  %v17266_v35 = vunpack.c.l.b16 %v15774_v46  ;;  %v13225_v38 = vld [vmem:[%s16972_s5 + $0x240] sm:$0xff]  }
0x1a41   : > { %v7837_v23 = vrot.slane %v17256_v0, 6  ;;  %v7834_v51 = vrot.slane %v17258_v39, 7  ;;  %v7840_v25 = vrot.slane %v17260_v33, 5  ;;  %v13224_v39 = vld [vmem:[%s16972_s5 + $0xc0] sm:$0xff]  }
0x1a42   : > { %v8182_v54 = vrot.slane %v17265_v1, 7 }
0x1a53   : > { %v12760_v10 = vpop.permute.xlu0 %12759 }
0x1a54   : > { %v12762_v26 = vunpack.i.h.bf16 %v12760_v10  ;;  %v12761_v12 = vunpack.i.l.bf16 %v12760_v10  ;;  %v8176_v10 = vsel %vm7835_vm4, %v8175_v11, %v8174_v31 }
0x1a55   : > { %v12765_v6 = vpop.permute.xlu1 %12764  ;;  %v8178_v48 = vsel %vm7838_vm6, %v8177_v52, %v8176_v10 }
0x1a56   : > { %v7765_v56 = vsel %vm861_vm7, %v12761_v12, %v12762_v26  ;;  %v12767_v17 = vunpack.i.h.bf16 %v12765_v6  ;;  %v12766_v28 = vunpack.i.l.bf16 %v12765_v6  ;;  %v17261_v26 = vld [vmem:[#allocation18_spill] sm:$0xff] }
0x1a57   : > { %v7769_v60 = vmax.f32 %v17243_v2, %v7765_v56  ;;  %v17262_v12 = vunpack.c.l.b16 %v17261_v26  ;;  %v7836_v56 = vsel %vm7835_vm4, %v7834_v51, %v7833_v13  ;;  %v8180_v2 = vsel %vm7841_vm9, %v8179_v7, %v8178_v48 }
0x1a58   : > { %v7766_v4 = vsel %vm861_vm7, %v12766_v28, %v12767_v17  ;;  %v17263_v17 = vld [vmem:[#allocation20_spill] sm:$0xff]  ;;  %vm7850_vm7 = vcmask 1047559   ;;  %v8181_v47 = vsel %vm7844_vm0, %v17266_v35, %v8180_v2  ;;  %v13226_v2 = vld [vmem:[%s16972_s5 + $0xc8] sm:$0xff]  }
0x1a59   : > { %v7770_v40 = vmax.f32 %v17244_v19, %v7766_v4  ;;  %v7843_v6 = vrot.slane %v17262_v12, 4  ;;  %v17264_v28 = vunpack.c.l.b16 %v17263_v17  ;;  %v7839_v19 = vsel %vm7838_vm6, %v7837_v23, %v7836_v56  ;;  %v17269_v17 = vld [vmem:[#allocation29_spill] sm:$0xff] }
0x1a5a   : > { %v7842_v62 = vsel %vm7841_vm9, %v7840_v25, %v7839_v19  ;;  %v8183_v13 = vsel %vm7847_vm13, %v8182_v54, %v8181_v47  ;;  %v17270_v19 = vld [vmem:[#allocation28_spill] sm:$0xff] }
0x1a5b   : > { %v7771_v49 = vpack.c.bf16 %v7770_v40, %v7769_v60  ;;  %v7846_v4 = vrot.slane %v17264_v28, 3  ;;  %v7845_v31 = vsel %vm7844_vm0, %v7843_v6, %v7842_v62  ;;  %v17268_v6 = vld [vmem:[#allocation27_spill] sm:$0xff] }
0x1a5d   : > { %7773 = vst.msk [vmem:[#allocation2 + $0x38] sm:$0xff] %vm1332_vm1, %v7771_v49  ;;  %v7848_v21 = vsel %vm7847_vm13, %v7846_v4, %v7845_v31 }
0x1a64   : > { %v7781_v60 = vld [vmem:[#allocation2 + $0x38] sm:$0x1]  ;;  %v8121_v40 = vld [vmem:[#allocation2 + $0x38] sm:$0x4]  ;;  %v8287_v58 = vld [vmem:[#allocation2 + $0x38] sm:$0x8] }
0x1a65   : > { %v7830_v49 = vunpack.c.l.b16 %v7781_v60  ;;  %v8171_v20 = vunpack.c.l.b16 %v8121_v40  ;;  %v8785_v34 = vld [vmem:[#allocation2 + $0x38] sm:$0x40]  ;;  %v16188_v52 = vld [vmem:[#allocation2 + $0x38] sm:$0x2]  ;;  %v8337_v42 = vunpack.c.l.b16 %v8287_v58  ;;  %v8619_v11 = vld [vmem:[#allocation2 + $0x38] sm:$0x20] }
0x1a66   : > { %v8835_v63 = vunpack.c.h.b16 %v8785_v34  ;;  %v16191_v29 = vld [vmem:[#allocation2 + $0x38] sm:$0x10]  ;;  %v8669_v27 = vunpack.c.h.b16 %v8619_v11  ;;  %v8005_v33 = vunpack.c.l.b16 %v16188_v52  ;;  %v8951_v25 = vld [vmem:[#allocation2 + $0x38] sm:$0x80]  ;;  %v13227_v60 = vld [vmem:[%s16972_s5 + $0x248] sm:$0xff]  }
0x1a67   : > { %v7849_v53 = vrot.slane %v7830_v49, 2  ;;  %v8184_v7 = vrot.slane %v8171_v20, 6  ;;  %v16196_v0 = vsel %vm7850_vm7, %v8337_v42, %v17267_v22  ;;  %v9122_v23 = vrot.slane %v7830_v49, 1 }
0x1a68   : > { %v8848_v46 = vrot.slane %v8835_v63, 6  ;;  %v8503_v12 = vunpack.c.h.b16 %v16191_v29  ;;  %v8682_v56 = vrot.slane %v8669_v27, 4  ;;  %v9001_v4 = vunpack.c.h.b16 %v8951_v25 }
0x1a69   : > { %v7851_v24 = vsel %vm7850_vm7, %v7849_v53, %v7848_v21  ;;  %v8185_v51 = vsel %vm7850_vm7, %v8184_v7, %v8183_v13  ;;  %v16214_v28 = vsel %vm7850_vm7, %v9122_v23, %v17269_v17  ;;  %v9338_v1 = vrot.slane %v8171_v20, 5  ;;  %v13231_v21 = vld [vmem:[%s16972_s5 + $0x258] sm:$0xff]   ;;  %v13235_v23 = vld [vmem:[%s16972_s5 + $0x268] sm:$0xff]  }
0x1a6a   : > { %v7852_v10 = vpack.c.b16 %v7851_v24, %v7851_v24  ;;  %v8186_v26 = vpack.c.b16 %v8185_v51, %v8185_v51  ;;  %v16210_v48 = vsel %vm7850_vm7, %v8848_v46, %v17268_v6  ;;  %v16226_v40 = vsel %vm7850_vm7, %v8682_v56, %v17270_v19  ;;  %v13234_v46 = vld [vmem:[%s16972_s5 + $0xe8] sm:$0xff]   ;;  %v13238_v56 = vld [vmem:[%s16972_s5 + $0xf8] sm:$0x1f]   ;;  %v13237_v19 = vld [vmem:[%s16972_s5 + $0x270] sm:$0xff]  }
0x1a6b   : > { %v9230_v54 = vrot.slane %v8005_v33, 3  ;;  %v17271_v49 = vmov 0.0   ;;  %v16234_v62 = vsel %vm7850_vm7, %v9001_v4, %v16013_v3  ;;  %v9554_v58 = vrot.slane %v8503_v12, 1 }
0x1a6c   : > { %11805 = vmatmul.mubr.msk.bf16.vlgmr.msra.gmra.mrb[92].mxu1 %vm1332_vm1, %v7852_v10  ;;  %11845 = vmatmul.mubr.msk.bf16.vlgmr.msra.gmra.mrb[68].mxu0 %vm1332_vm1, %v8186_v26  ;;  %v9446_v34 = vrot.slane %v8337_v42, 7  ;;  %v16244_v20 = vsel %vm7850_vm7, %v9338_v1, %v16036_v14  ;;  %v9770_v3 = vrot.slane %v8835_v63, 5  ;;  %v13228_v14 = vld [vmem:[%s16972_s5 + $0xd0] sm:$0xff]   ;;  %v17272_v53 = vunpack.c.l.b16 %v15733_v16 }
0x1a6d   : > { %11809 = vmatpush3.bf16.msra.mxu1 %v13224_v39  ;;  %11869 = vmatpush3.bf16.msra.mxu0 %v13225_v38  ;;  %v16248_v31 = vsel %vm7850_vm7, %v9230_v54, %v16049_v37  ;;  %v16252_v35 = vsel %vm7850_vm7, %v9554_v58, %v16068_v5  ;;  %v13229_v37 = vld [vmem:[%s16972_s5 + $0x250] sm:$0xff]   ;;  %v9662_v5 = vrot.slane %v8669_v27, 3  ;;  %v17273_v27 = vld [vmem:[#allocation11_spill] sm:$0xff]  ;;  %v17275_v24 = vunpack.c.h.b16 %v15718_v50 }
0x1a6e   : > { %11810 = vmatprep.subr.bf16.mxu1 %v17271_v49  ;;  %11870 = vmatprep.subr.bf16.mxu0 %v17271_v49  ;;  %v16256_v47 = vsel %vm7850_vm7, %v9446_v34, %v16097_v44  ;;  %v16266_v42 = vsel %vm7850_vm7, %v9770_v3, %v16121_v41  ;;  %v9878_v44 = vrot.slane %v9001_v4, 7  ;;  %v13230_v41 = vld [vmem:[%s16972_s5 + $0xd8] sm:$0xff]   ;;  %v8007_v7 = vrot.slane %v17272_v53, 2 }
0x1a6f   : > { %11824 = vmatprep.mubr.msk.bf16.mxu1 %vm13417_vm3, %v17271_v49  ;;  %11884 = vmatprep.mubr.msk.bf16.mxu0 %vm13417_vm3, %v17271_v49  ;;  %v16272_v63 = vsel %vm7850_vm7, %v9662_v5, %v16135_v61  ;;  %v13232_v61 = vld [vmem:[%s16972_s5 + $0xe0] sm:$0xff]   ;;  %v17274_v13 = vunpack.c.l.b16 %v17273_v27  ;;  %v8504_v39 = vrot.slane %v17275_v24, 1  ;;  %v17276_v51 = vunpack.c.l.b16 %v15725_v32  ;;  %v13245_v24 = vld [vmem:[%s16972_s5 + $0x350] sm:$0xff]  }
0x1a70   : > { %v16276_v11 = vsel %vm7850_vm7, %v9878_v44, %v16143_v43  ;;  %v13233_v43 = vld [vmem:[%s16972_s5 + $0x260] sm:$0xff]   ;;  %v17277_v25 = vunpack.c.h.b16 %v15735_v30  ;;  %v17278_v26 = vunpack.c.h.b16 %v15754_v59  ;;  %v17279_v17 = vunpack.c.l.b16 %v15765_v18  ;;  %v13236_v59 = vld [vmem:[%s16972_s5 + $0xf0] sm:$0xff]   ;;  %v13239_v18 = vld [vmem:[%s16972_s5 + $0x278] sm:$0x1f]  }
0x1a71   : > { %11811 = vmatpush3.bf16.msra.mxu1 %v13226_v2  ;;  %11871 = vmatpush3.bf16.msra.mxu0 %v13227_v60  ;;  %v8006_v22 = vrot.slane %v17274_v13, 3  ;;  %v8009_v38 = vrot.slane %v17276_v51, 1  ;;  %v17280_v2 = vunpack.c.h.b16 %v15731_v8  ;;  %v17281_v60 = vunpack.c.h.b16 %v15768_v45  ;;  %v13241_v27 = vld [vmem:[%s16972_s5 + $0x340] sm:$0xff]   ;;  %v13247_v51 = vld [vmem:[%s16972_s5 + $0x358] sm:$0xff]  }
0x1a72   : > { %11812 = vmatprep.subr.bf16.mxu1 %v17271_v49  ;;  %11872 = vmatprep.subr.bf16.mxu0 %v17271_v49  ;;  %v8505_v10 = vsel %vm7832_vm2, %v17277_v25, %v8504_v39  ;;  %v8508_v6 = vrot.slane %v17278_v26, 6  ;;  %v8012_v4 = vrot.slane %v17279_v17, 7  ;;  %v17282_v8 = vunpack.c.l.b16 %v15781_v55  ;;  %v13246_v39 = vld [vmem:[%s16972_s5 + $0x1d8] sm:$0xff]   ;;  %v13249_v25 = vld [vmem:[%s16972_s5 + $0x360] sm:$0xff]   ;;  %v13251_v26 = vld [vmem:[%s16972_s5 + $0x368] sm:$0xff]  }
0x1a73   : > { %v8008_v16 = vsel %vm7832_vm2, %v8007_v7, %v8006_v22  ;;  %v8506_v32 = vrot.slane %v17280_v2, 7  ;;  %v8510_v30 = vrot.slane %v17281_v60, 5  ;;  %v17283_v45 = vunpack.c.h.b16 %v15784_v36  ;;  %v13240_v7 = vld [vmem:[%s16972_s5 + $0x1c0] sm:$0xff]   ;;  %v13255_v17 = vld [vmem:[%s16972_s5 + $0x378] sm:$0x1f]  }
0x1a74   : > { %v8010_v50 = vsel %vm7835_vm4, %v8009_v38, %v8008_v16  ;;  %v8014_v1 = vrot.slane %v17282_v8, 6  ;;  %v17284_v58 = vunpack.c.l.b16 %v15814_v57  ;;  %v17286_v5 = vunpack.c.l.b16 %v15747_v9  ;;  %v13244_v16 = vld [vmem:[%s16972_s5 + $0x1d0] sm:$0xff]   ;;  %v13248_v38 = vld [vmem:[%s16972_s5 + $0x1e0] sm:$0xff]   ;;  %v13262_v8 = vld [vmem:[%s16972_s5 + $0x2d8] sm:$0xff]  }
0x1a75   : > { %11813 = vmatpush3.bf16.msra.mxu1 %v13228_v14  ;;  %11873 = vmatpush3.bf16.msra.mxu0 %v13229_v37  ;;  %v8512_v54 = vrot.slane %v17283_v45, 4  ;;  %v8507_v3 = vsel %vm7835_vm4, %v8506_v32, %v8505_v10  ;;  %v17285_v14 = vunpack.c.h.b16 %v15819_v15  ;;  %v8018_v36 = vrot.slane %v8005_v33, 4  ;;  %v13250_v10 = vld [vmem:[%s16972_s5 + $0x1e8] sm:$0xff]   ;;  %v13256_v32 = vld [vmem:[%s16972_s5 + $0x2c0] sm:$0xff]  }
0x1a76   : > { %11814 = vmatprep.subr.bf16.mxu1 %v17271_v49  ;;  %11874 = vmatprep.subr.bf16.mxu0 %v17271_v49  ;;  %v8016_v34 = vrot.slane %v17284_v58, 5  ;;  %v8011_v55 = vsel %vm7838_vm6, %v17286_v5, %v8010_v50  ;;  %v8509_v44 = vsel %vm7838_vm6, %v8508_v6, %v8507_v3  ;;  %v13252_v6 = vld [vmem:[%s16972_s5 + $0x1f0] sm:$0xff]   ;;  %v13254_v50 = vld [vmem:[%s16972_s5 + $0x1f8] sm:$0x1f]   ;;  %v13257_v60 = vld [vmem:[%s16972_s5] sm:$0xff]  }
0x1a77   : > { %v8514_v37 = vrot.slane %v17285_v14, 3  ;;  %v13264_v45 = vld [vmem:[%s16972_s5 + $0x2e0] sm:$0xff]   ;;  %v13266_v58 = vld [vmem:[%s16972_s5 + $0x2e8] sm:$0xff]   ;;  %v13268_v3 = vld [vmem:[%s16972_s5 + $0x2f0] sm:$0xff]  }
0x1a78   : > { %v13269_v14 = vld [vmem:[%s16972_s5 + $0x30] sm:$0xff]   ;;  %v13271_v5 = vld [vmem:[%s16972_s5 + $0x38] sm:$0x1f]  }
0x1a79   : > { %11815 = vmatpush3.bf16.msra.mxu1 %v13230_v41  ;;  %11875 = vmatpush3.bf16.msra.mxu0 %v13231_v21  ;;  %v8516_v41 = vrot.slane %v8503_v12, 2  ;;  %v17287_v21 = vld [vmem:[#allocation10_spill] sm:$0xff] }
0x1a7a   : > { %11816 = vmatprep.subr.bf16.mxu1 %v17271_v49  ;;  %11876 = vmatprep.subr.bf16.mxu0 %v17271_v49  ;;  %v8072_v57 = vand.u32 %v13238_v56, %v17287_v21  ;;  %v8570_v9 = vand.u32 %v13239_v18, %v17287_v21  ;;  %v13253_v56 = vld [vmem:[%s16972_s5 + $0x370] sm:$0xff]   ;;  %v8902_v2 = vand.u32 %v13255_v17, %v17287_v21  ;;  %v13299_v17 = vld [vmem:[%s16972_s5 + $0x228] sm:$0xff]  }
0x1a7b   : > { %v13261_v18 = vld [vmem:[%s16972_s5 + $0x10] sm:$0xff]  }
0x1a7d   : > { %11817 = vmatpush3.bf16.msra.mxu1 %v13232_v61  ;;  %11877 = vmatpush3.bf16.msra.mxu0 %v13233_v43  ;;  %v8013_v61 = vsel %vm7841_vm9, %v8012_v4, %v8011_v55  ;;  %v8511_v43 = vsel %vm7841_vm9, %v8510_v30, %v8509_v44  ;;  %v8404_v4 = vand.u32 %v13254_v50, %v17287_v21  ;;  %v13272_v44 = vld [vmem:[%s16972_s5 + $0x3c0] sm:$0xff]   ;;  %v13298_v50 = vld [vmem:[%s16972_s5 + $0xa8] sm:$0xff]  }
0x1a7e   : > { %11818 = vmatprep.subr.bf16.mxu1 %v17271_v49  ;;  %11878 = vmatprep.subr.bf16.mxu0 %v17271_v49  ;;  %v8015_v15 = vsel %vm7844_vm0, %v8014_v1, %v8013_v61  ;;  %v8513_v52 = vsel %vm7844_vm0, %v8512_v54, %v8511_v43  ;;  %v8352_v30 = vpack.c.b16 %v16196_v0, %v16196_v0  ;;  %v13259_v0 = vld [vmem:[%s16972_s5 + $0x8] sm:$0xff]   ;;  %v13263_v1 = vld [vmem:[%s16972_s5 + $0x18] sm:$0xff]   ;;  %v13265_v54 = vld [vmem:[%s16972_s5 + $0x20] sm:$0xff]  }
0x1a7f   : > { %v8017_v29 = vsel %vm7847_vm13, %v8016_v34, %v8015_v15  ;;  %v8515_v33 = vsel %vm7847_vm13, %v8514_v37, %v8513_v52  ;;  %v13267_v34 = vld [vmem:[%s16972_s5 + $0x28] sm:$0xff]   ;;  %v13270_v37 = vld [vmem:[%s16972_s5 + $0x2f8] sm:$0x1f]   ;;  %v9124_v61 = vpack.c.b16 %v16214_v28, %v16214_v28  ;;  %v13276_v28 = vld [vmem:[%s16972_s5 + $0x3d0] sm:$0xff]  }
0x1a80   : > { %v8019_v12 = vsel %vm7850_vm7, %v8018_v36, %v8017_v29  ;;  %v8517_v53 = vsel %vm7850_vm7, %v8516_v41, %v8515_v33  ;;  %v8736_v55 = vand.u32 %v13270_v37, %v17287_v21  ;;  %v9176_v36 = vand.u32 %v13271_v5, %v17287_v21  ;;  %v13273_v41 = vld [vmem:[%s16972_s5 + $0x100] sm:$0xff]   ;;  %v13274_v43 = vld [vmem:[%s16972_s5 + $0x3c8] sm:$0xff]   ;;  %v13278_v15 = vld [vmem:[%s16972_s5 + $0x3d8] sm:$0xff]  }
0x1a81   : > { %11819 = vmatpush3.bf16.msra.mxu1 %v13234_v46  ;;  %11879 = vmatpush3.bf16.msra.mxu0 %v13235_v23  ;;  %v8020_v13 = vpack.c.b16 %v8019_v12, %v8019_v12  ;;  %v8518_v22 = vpack.c.b16 %v8517_v53, %v8517_v53  ;;  %v13242_v46 = vld [vmem:[%s16972_s5 + $0x1c8] sm:$0xff]   ;;  %v13279_v52 = vld [vmem:[%s16972_s5 + $0x118] sm:$0xff]   ;;  %v13280_v29 = vld [vmem:[%s16972_s5 + $0x3e0] sm:$0xff]  }
0x1a82   : > { %11820 = vmatprep.subr.bf16.mxu1 %v17271_v49  ;;  %11880 = vmatprep.subr.bf16.mxu0 %v17271_v49  ;;  %v13243_v23 = vld [vmem:[%s16972_s5 + $0x348] sm:$0xff]   ;;  %v13281_v33 = vld [vmem:[%s16972_s5 + $0x120] sm:$0xff]   ;;  %v13316_v37 = vld [vmem:[%s16972_s5 + $0x1b0] sm:$0xff]  }
0x1a83   : > { %v13282_v12 = vld [vmem:[%s16972_s5 + $0x3e8] sm:$0xff]   ;;  %v13317_v5 = vld [vmem:[%s16972_s5 + $0x330] sm:$0xff]  }
0x1a84   : > { %v13283_v53 = vld [vmem:[%s16972_s5 + $0x128] sm:$0xff]  }
0x1a85   : > { %11821 = vmatpush3.bf16.msra.mxu1 %v13236_v59  ;;  %11881 = vmatpush3.bf16.msra.mxu0 %v13237_v19  ;;  %v8850_v59 = vpack.c.b16 %v16210_v48, %v16210_v48  ;;  %v13258_v19 = vld [vmem:[%s16972_s5 + $0x2c8] sm:$0xff]   ;;  %v13260_v48 = vld [vmem:[%s16972_s5 + $0x2d0] sm:$0xff]  }
0x1a86   : > { %11822 = vmatprep.subr.bf16.mxu1 %v17271_v49  ;;  %11882 = vmatprep.subr.bf16.mxu0 %v17271_v49 }
0x1a89   : > { %11823 = vmatpush3.bf16.msra.mxu1 %v8072_v57  ;;  %11883 = vmatpush3.bf16.msra.mxu0 %v8570_v9  ;;  %v8684_v57 = vpack.c.b16 %v16226_v40, %v16226_v40  ;;  %v13275_v40 = vld [vmem:[%s16972_s5 + $0x108] sm:$0xff]   ;;  %v13277_v9 = vld [vmem:[%s16972_s5 + $0x110] sm:$0xff]  }
0x1a8a   : > { %11848 = vmatprep.subr.bf16.mxu1 %v17271_v49  ;;  %11908 = vmatprep.subr.bf16.mxu0 %v17271_v49 }
0x1a8c   : > { %11825 = vmatmul.mubr.msk.bf16.vlgmr.msra.gmra.mrb[96].mxu1 %vm1332_vm1, %v8020_v13  ;;  %11885 = vmatmul.mubr.msk.bf16.vlgmr.msra.gmra.mrb[72].mxu0 %vm1332_vm1, %v8518_v22  ;;  %v13286_v13 = vld [vmem:[%s16972_s5 + $0x3f8] sm:$0x1f]  }
0x1a8d   : > { %11849 = vmatpush3.bf16.msra.mxu1 %v13240_v7  ;;  %11909 = vmatpush3.bf16.msra.mxu0 %v13241_v27  ;;  %v13284_v7 = vld [vmem:[%s16972_s5 + $0x3f0] sm:$0xff]   ;;  %v13287_v22 = vld [vmem:[%s16972_s5 + $0x138] sm:$0x1f]  }
0x1a8e   : > { %11850 = vmatprep.subr.bf16.mxu1 %v17271_v49  ;;  %11910 = vmatprep.subr.bf16.mxu0 %v17271_v49  ;;  %v13285_v27 = vld [vmem:[%s16972_s5 + $0x130] sm:$0xff]  }
0x1a8f   : > { %11864 = vmatprep.mubr.msk.bf16.mxu1 %vm13417_vm3, %v17271_v49  ;;  %11924 = vmatprep.mubr.msk.bf16.mxu0 %vm13417_vm3, %v17271_v49 }
0x1a91   : > { %11851 = vmatpush3.bf16.msra.mxu1 %v13242_v46  ;;  %11911 = vmatpush3.bf16.msra.mxu0 %v13243_v23  ;;  %v9068_v46 = vand.u32 %v13286_v13, %v17287_v21  ;;  %v9392_v23 = vand.u32 %v13287_v22, %v17287_v21 }
0x1a92   : > { %11852 = vmatprep.subr.bf16.mxu1 %v17271_v49  ;;  %11912 = vmatprep.subr.bf16.mxu0 %v17271_v49 }
0x1a95   : > { %11853 = vmatpush3.bf16.msra.mxu1 %v13244_v16  ;;  %11913 = vmatpush3.bf16.msra.mxu0 %v13245_v24  ;;  %v13288_v16 = vld [vmem:[%s16972_s5 + $0x80] sm:$0xff]  }
0x1a96   : > { %11854 = vmatprep.subr.bf16.mxu1 %v17271_v49  ;;  %11914 = vmatprep.subr.bf16.mxu0 %v17271_v49  ;;  %v13289_v24 = vld [vmem:[%s16972_s5 + $0x200] sm:$0xff]  }
0x1a99   : > { %11855 = vmatpush3.bf16.msra.mxu1 %v13246_v39  ;;  %11915 = vmatpush3.bf16.msra.mxu0 %v13247_v51  ;;  %v9016_v39 = vpack.c.b16 %v16234_v62, %v16234_v62  ;;  %v9340_v51 = vpack.c.b16 %v16244_v20, %v16244_v20  ;;  %v13291_v62 = vld [vmem:[%s16972_s5 + $0x208] sm:$0xff]   ;;  %v13292_v20 = vld [vmem:[%s16972_s5 + $0x90] sm:$0xff]  }
0x1a9a   : > { %11856 = vmatprep.subr.bf16.mxu1 %v17271_v49  ;;  %11916 = vmatprep.subr.bf16.mxu0 %v17271_v49 }
0x1a9d   : > { %11857 = vmatpush3.bf16.msra.mxu1 %v13248_v38  ;;  %11917 = vmatpush3.bf16.msra.mxu0 %v13249_v25  ;;  %v13290_v38 = vld [vmem:[%s16972_s5 + $0x88] sm:$0xff]   ;;  %v13293_v25 = vld [vmem:[%s16972_s5 + $0x210] sm:$0xff]  }
0x1a9e   : > { %11858 = vmatprep.subr.bf16.mxu1 %v17271_v49  ;;  %11918 = vmatprep.subr.bf16.mxu0 %v17271_v49 }
0x1aa1   : > { %11859 = vmatpush3.bf16.msra.mxu1 %v13250_v10  ;;  %11919 = vmatpush3.bf16.msra.mxu0 %v13251_v26  ;;  %v13294_v10 = vld [vmem:[%s16972_s5 + $0x98] sm:$0xff]  }
0x1aa2   : > { %11860 = vmatprep.subr.bf16.mxu1 %v17271_v49  ;;  %11920 = vmatprep.subr.bf16.mxu0 %v17271_v49  ;;  %v13295_v26 = vld [vmem:[%s16972_s5 + $0x218] sm:$0xff]  }
0x1aa5   : > { %11861 = vmatpush3.bf16.msra.mxu1 %v13252_v6  ;;  %11921 = vmatpush3.bf16.msra.mxu0 %v13253_v56  ;;  %v13296_v6 = vld [vmem:[%s16972_s5 + $0xa0] sm:$0xff]  }
0x1aa6   : > { %11862 = vmatprep.subr.bf16.mxu1 %v17271_v49  ;;  %11922 = vmatprep.subr.bf16.mxu0 %v17271_v49  ;;  %v13297_v56 = vld [vmem:[%s16972_s5 + $0x220] sm:$0xff]  }
0x1aa9   : > { %11863 = vmatpush3.bf16.msra.mxu1 %v8404_v4  ;;  %11923 = vmatpush3.bf16.msra.mxu0 %v8902_v2  ;;  %v13300_v4 = vld [vmem:[%s16972_s5 + $0xb0] sm:$0xff]  }
0x1aaa   : > { %11888 = vmatprep.subr.bf16.mxu1 %v17271_v49  ;;  %11948 = vmatprep.subr.bf16.mxu0 %v17271_v49  ;;  %v13301_v2 = vld [vmem:[%s16972_s5 + $0x230] sm:$0xff]  }
0x1aac   : > { %11865 = vmatmul.mubr.msk.bf16.vlgmr.msra.gmra.mrb[100].mxu1 %vm1332_vm1, %v8352_v30  ;;  %11925 = vmatmul.mubr.msk.bf16.vlgmr.msra.gmra.mrb[76].mxu0 %vm1332_vm1, %v8850_v59 }
0x1aad   : > { %11889 = vmatpush3.bf16.msra.mxu1 %v13256_v32  ;;  %11949 = vmatpush3.bf16.msra.mxu0 %v13257_v60  ;;  %v13302_v32 = vld [vmem:[%s16972_s5 + $0xb8] sm:$0x1f]  }
0x1aae   : > { %11890 = vmatprep.subr.bf16.mxu1 %v17271_v49  ;;  %11950 = vmatprep.subr.bf16.mxu0 %v17271_v49  ;;  %v13303_v60 = vld [vmem:[%s16972_s5 + $0x238] sm:$0x1f]   ;;  %v9284_v30 = vand.u32 %v13302_v32, %v17287_v21  ;;  %v9880_v32 = vpack.c.b16 %v16276_v11, %v16276_v11 }
0x1aaf   : > { %11904 = vmatprep.mubr.msk.bf16.mxu1 %vm13417_vm3, %v17271_v49  ;;  %11964 = vmatprep.mubr.msk.bf16.mxu0 %vm13417_vm3, %v17271_v49  ;;  %v9608_v59 = vand.u32 %v13303_v60, %v17287_v21 }
0x1ab1   : > { %11891 = vmatpush3.bf16.msra.mxu1 %v13258_v19  ;;  %11951 = vmatpush3.bf16.msra.mxu0 %v13259_v0  ;;  %v13304_v19 = vld [vmem:[%s16972_s5 + $0x180] sm:$0xff]  }
0x1ab2   : > { %11892 = vmatprep.subr.bf16.mxu1 %v17271_v49  ;;  %11952 = vmatprep.subr.bf16.mxu0 %v17271_v49  ;;  %v13305_v0 = vld [vmem:[%s16972_s5 + $0x300] sm:$0xff]  }
0x1ab5   : > { %11893 = vmatpush3.bf16.msra.mxu1 %v13260_v48  ;;  %11953 = vmatpush3.bf16.msra.mxu0 %v13261_v18  ;;  %v9232_v48 = vpack.c.b16 %v16248_v31, %v16248_v31  ;;  %v9556_v18 = vpack.c.b16 %v16252_v35, %v16252_v35  ;;  %v13307_v31 = vld [vmem:[%s16972_s5 + $0x308] sm:$0xff]   ;;  %v13308_v35 = vld [vmem:[%s16972_s5 + $0x190] sm:$0xff]  }
0x1ab6   : > { %11894 = vmatprep.subr.bf16.mxu1 %v17271_v49  ;;  %11954 = vmatprep.subr.bf16.mxu0 %v17271_v49 }
0x1ab9   : > { %11895 = vmatpush3.bf16.msra.mxu1 %v13262_v8  ;;  %11955 = vmatpush3.bf16.msra.mxu0 %v13263_v1  ;;  %v13306_v8 = vld [vmem:[%s16972_s5 + $0x188] sm:$0xff]   ;;  %v13309_v1 = vld [vmem:[%s16972_s5 + $0x310] sm:$0xff]  }
0x1aba   : > { %11896 = vmatprep.subr.bf16.mxu1 %v17271_v49  ;;  %11956 = vmatprep.subr.bf16.mxu0 %v17271_v49 }
0x1abd   : > { %11897 = vmatpush3.bf16.msra.mxu1 %v13264_v45  ;;  %11957 = vmatpush3.bf16.msra.mxu0 %v13265_v54  ;;  %v13310_v45 = vld [vmem:[%s16972_s5 + $0x198] sm:$0xff]  }
0x1abe   : > { %11898 = vmatprep.subr.bf16.mxu1 %v17271_v49  ;;  %11958 = vmatprep.subr.bf16.mxu0 %v17271_v49  ;;  %v13311_v54 = vld [vmem:[%s16972_s5 + $0x318] sm:$0xff]  }
0x1ac1   : > { %11899 = vmatpush3.bf16.msra.mxu1 %v13266_v58  ;;  %11959 = vmatpush3.bf16.msra.mxu0 %v13267_v34  ;;  %v13312_v58 = vld [vmem:[%s16972_s5 + $0x1a0] sm:$0xff]  }
0x1ac2   : > { %11900 = vmatprep.subr.bf16.mxu1 %v17271_v49  ;;  %11960 = vmatprep.subr.bf16.mxu0 %v17271_v49  ;;  %v13313_v34 = vld [vmem:[%s16972_s5 + $0x320] sm:$0xff]  }
0x1ac5   : > { %11901 = vmatpush3.bf16.msra.mxu1 %v13268_v3  ;;  %11961 = vmatpush3.bf16.msra.mxu0 %v13269_v14  ;;  %v13314_v3 = vld [vmem:[%s16972_s5 + $0x1a8] sm:$0xff]  }
0x1ac6   : > { %11902 = vmatprep.subr.bf16.mxu1 %v17271_v49  ;;  %11962 = vmatprep.subr.bf16.mxu0 %v17271_v49  ;;  %v13315_v14 = vld [vmem:[%s16972_s5 + $0x328] sm:$0xff]  }
0x1ac9   : > { %11903 = vmatpush3.bf16.msra.mxu1 %v8736_v55  ;;  %11963 = vmatpush3.bf16.msra.mxu0 %v9176_v36  ;;  %v13318_v55 = vld [vmem:[%s16972_s5 + $0x1b8] sm:$0x1f]  }
0x1aca   : > { %11928 = vmatprep.subr.bf16.mxu1 %v17271_v49  ;;  %11988 = vmatprep.subr.bf16.mxu0 %v17271_v49  ;;  %v13319_v36 = vld [vmem:[%s16972_s5 + $0x338] sm:$0x1f]  }
0x1acc   : > { %11905 = vmatmul.mubr.msk.bf16.vlgmr.msra.gmra.mrb[104].mxu1 %vm1332_vm1, %v8684_v57  ;;  %11965 = vmatmul.mubr.msk.bf16.vlgmr.msra.gmra.mrb[80].mxu0 %vm1332_vm1, %v9124_v61  ;;  %v13320_v57 = vld [vmem:[%s16972_s5 + $0x280] sm:$0xff]   ;;  %v9448_v61 = vpack.c.b16 %v16256_v47, %v16256_v47  ;;  %v13322_v47 = vld [vmem:[%s16972_s5 + $0x290] sm:$0xff]  }
0x1acd   : > { %11929 = vmatpush3.bf16.msra.mxu1 %v13272_v44  ;;  %11989 = vmatpush3.bf16.msra.mxu0 %v13273_v41  ;;  %v9500_v44 = vand.u32 %v13318_v55, %v17287_v21  ;;  %v9824_v41 = vand.u32 %v13319_v36, %v17287_v21 }
0x1ace   : > { %11930 = vmatprep.subr.bf16.mxu1 %v17271_v49  ;;  %11990 = vmatprep.subr.bf16.mxu0 %v17271_v49 }
0x1acf   : > { %11944 = vmatprep.mubr.msk.bf16.mxu1 %vm13417_vm3, %v17271_v49  ;;  %12004 = vmatprep.mubr.msk.bf16.mxu0 %vm13417_vm3, %v17271_v49 }
0x1ad1   : > { %11931 = vmatpush3.bf16.msra.mxu1 %v13274_v43  ;;  %11991 = vmatpush3.bf16.msra.mxu0 %v13275_v40  ;;  %v9772_v43 = vpack.c.b16 %v16266_v42, %v16266_v42  ;;  %v13321_v40 = vld [vmem:[%s16972_s5 + $0x288] sm:$0xff]   ;;  %v13323_v42 = vld [vmem:[%s16972_s5 + $0x298] sm:$0xff]  }
0x1ad2   : > { %11932 = vmatprep.subr.bf16.mxu1 %v17271_v49  ;;  %11992 = vmatprep.subr.bf16.mxu0 %v17271_v49 }
0x1ad5   : > { %11933 = vmatpush3.bf16.msra.mxu1 %v13276_v28  ;;  %11993 = vmatpush3.bf16.msra.mxu0 %v13277_v9  ;;  %v13324_v28 = vld [vmem:[%s16972_s5 + $0x2a0] sm:$0xff]   ;;  %v13325_v9 = vld [vmem:[%s16972_s5 + $0x2a8] sm:$0xff]  }
0x1ad6   : > { %11934 = vmatprep.subr.bf16.mxu1 %v17271_v49  ;;  %11994 = vmatprep.subr.bf16.mxu0 %v17271_v49 }
0x1ad9   : > { %11935 = vmatpush3.bf16.msra.mxu1 %v13278_v15  ;;  %11995 = vmatpush3.bf16.msra.mxu0 %v13279_v52 }
0x1ada   : > { %11936 = vmatprep.subr.bf16.mxu1 %v17271_v49  ;;  %11996 = vmatprep.subr.bf16.mxu0 %v17271_v49 }
0x1add   : > { %11937 = vmatpush3.bf16.msra.mxu1 %v13280_v29  ;;  %11997 = vmatpush3.bf16.msra.mxu0 %v13281_v33 }
0x1ade   : > { %11938 = vmatprep.subr.bf16.mxu1 %v17271_v49  ;;  %11998 = vmatprep.subr.bf16.mxu0 %v17271_v49 }
0x1ae1   : > { %11939 = vmatpush3.bf16.msra.mxu1 %v13282_v12  ;;  %11999 = vmatpush3.bf16.msra.mxu0 %v13283_v53 }
0x1ae2   : > { %11940 = vmatprep.subr.bf16.mxu1 %v17271_v49  ;;  %12000 = vmatprep.subr.bf16.mxu0 %v17271_v49 }
0x1ae5   : > { %11941 = vmatpush3.bf16.msra.mxu1 %v13284_v7  ;;  %12001 = vmatpush3.bf16.msra.mxu0 %v13285_v27  ;;  %v13326_v7 = vld [vmem:[%s16972_s5 + $0x2b0] sm:$0xff]   ;;  %v13327_v27 = vld [vmem:[%s16972_s5 + $0x2b8] sm:$0x1f]  }
0x1ae6   : > { %11942 = vmatprep.subr.bf16.mxu1 %v17271_v49  ;;  %12002 = vmatprep.subr.bf16.mxu0 %v17271_v49 }
0x1ae9   : > { %11943 = vmatpush3.bf16.msra.mxu1 %v9068_v46  ;;  %12003 = vmatpush3.bf16.msra.mxu0 %v9392_v23  ;;  %v9716_v46 = vand.u32 %v13327_v27, %v17287_v21  ;;  %v13328_v23 = vld [vmem:[%s16972_s5 + $0x380] sm:$0xff]  }
0x1aea   : > { %11968 = vmatprep.subr.bf16.mxu1 %v17271_v49  ;;  %12028 = vmatprep.subr.bf16.mxu0 %v17271_v49 }
0x1aec   : > { %11945 = vmatmul.mubr.msk.bf16.vlgmr.msra.gmra.mrb[108].mxu1 %vm1332_vm1, %v9016_v39  ;;  %12005 = vmatmul.mubr.msk.bf16.vlgmr.msra.gmra.mrb[84].mxu0 %vm1332_vm1, %v9340_v51  ;;  %v13330_v39 = vld [vmem:[%s16972_s5 + $0x390] sm:$0xff]   ;;  %v13332_v51 = vld [vmem:[%s16972_s5 + $0x3a0] sm:$0xff]  }
0x1aed   : > { %11969 = vmatpush3.bf16.msra.mxu1 %v13288_v16  ;;  %12029 = vmatpush3.bf16.msra.mxu0 %v13289_v24  ;;  %v9664_v16 = vpack.c.b16 %v16272_v63, %v16272_v63  ;;  %v13329_v24 = vld [vmem:[%s16972_s5 + $0x388] sm:$0xff]   ;;  %v13331_v63 = vld [vmem:[%s16972_s5 + $0x398] sm:$0xff]  }
0x1aee   : > { %11970 = vmatprep.subr.bf16.mxu1 %v17271_v49  ;;  %12030 = vmatprep.subr.bf16.mxu0 %v17271_v49 }
0x1aef   : > { %11984 = vmatprep.mubr.msk.bf16.mxu1 %vm13417_vm3, %v17271_v49  ;;  %12044 = vmatprep.mubr.msk.bf16.mxu0 %vm13417_vm3, %v17271_v49 }
0x1af1   : > { %11971 = vmatpush3.bf16.msra.mxu1 %v13290_v38  ;;  %12031 = vmatpush3.bf16.msra.mxu0 %v13291_v62  ;;  %v13333_v38 = vld [vmem:[%s16972_s5 + $0x3a8] sm:$0xff]  }
0x1af2   : > { %11972 = vmatprep.subr.bf16.mxu1 %v17271_v49  ;;  %12032 = vmatprep.subr.bf16.mxu0 %v17271_v49 }
0x1af5   : > { %11973 = vmatpush3.bf16.msra.mxu1 %v13292_v20  ;;  %12033 = vmatpush3.bf16.msra.mxu0 %v13293_v25 }
0x1af6   : > { %11974 = vmatprep.subr.bf16.mxu1 %v17271_v49  ;;  %12034 = vmatprep.subr.bf16.mxu0 %v17271_v49 }
0x1af9   : > { %11975 = vmatpush3.bf16.msra.mxu1 %v13294_v10  ;;  %12035 = vmatpush3.bf16.msra.mxu0 %v13295_v26 }
0x1afa   : > { %11976 = vmatprep.subr.bf16.mxu1 %v17271_v49  ;;  %12036 = vmatprep.subr.bf16.mxu0 %v17271_v49 }
0x1afd   : > { %11977 = vmatpush3.bf16.msra.mxu1 %v13296_v6  ;;  %12037 = vmatpush3.bf16.msra.mxu0 %v13297_v56  ;;  %v13334_v56 = vld [vmem:[%s16972_s5 + $0x3b0] sm:$0xff]  }
0x1afe   : > { %11978 = vmatprep.subr.bf16.mxu1 %v17271_v49  ;;  %12038 = vmatprep.subr.bf16.mxu0 %v17271_v49 }
0x1b01   : > { %11979 = vmatpush3.bf16.msra.mxu1 %v13298_v50  ;;  %12039 = vmatpush3.bf16.msra.mxu0 %v13299_v17  ;;  %v13335_v50 = vld [vmem:[%s16972_s5 + $0x3b8] sm:$0x1f]  }
0x1b02   : > { %11980 = vmatprep.subr.bf16.mxu1 %v17271_v49  ;;  %12040 = vmatprep.subr.bf16.mxu0 %v17271_v49 }
0x1b05   : > { %11981 = vmatpush3.bf16.msra.mxu1 %v13300_v4  ;;  %12041 = vmatpush3.bf16.msra.mxu0 %v13301_v2  ;;  %v9932_v2 = vand.u32 %v13335_v50, %v17287_v21 }
0x1b06   : > { %11982 = vmatprep.subr.bf16.mxu1 %v17271_v49  ;;  %12042 = vmatprep.subr.bf16.mxu0 %v17271_v49 }
0x1b09   : > { %11983 = vmatpush3.bf16.msra.mxu1 %v9284_v30  ;;  %12043 = vmatpush3.bf16.msra.mxu0 %v9608_v59 }
0x1b0a   : > { %12008 = vmatprep.subr.bf16.mxu1 %v17271_v49  ;;  %12068 = vmatprep.subr.bf16.mxu0 %v17271_v49 }
0x1b0c   : > { %11985 = vmatmul.mubr.msk.bf16.vlgmr.msra.gmra.mrb[112].mxu1 %vm1332_vm1, %v9232_v48  ;;  %12045 = vmatmul.mubr.msk.bf16.vlgmr.msra.gmra.mrb[88].mxu0 %vm1332_vm1, %v9556_v18 }
0x1b0d   : > { %12009 = vmatpush3.bf16.msra.mxu1 %v13304_v19  ;;  %12069 = vmatpush3.bf16.msra.mxu0 %v13305_v0 }
0x1b0e   : > { %12010 = vmatprep.subr.bf16.mxu1 %v17271_v49  ;;  %12070 = vmatprep.subr.bf16.mxu0 %v17271_v49 }
0x1b0f   : > { %12024 = vmatprep.mubr.msk.bf16.mxu1 %vm13417_vm3, %v17271_v49  ;;  %12084 = vmatprep.mubr.msk.bf16.mxu0 %vm13417_vm3, %v17271_v49 }
0x1b11   : > { %12011 = vmatpush3.bf16.msra.mxu1 %v13306_v8  ;;  %12071 = vmatpush3.bf16.msra.mxu0 %v13307_v31 }
0x1b12   : > { %12012 = vmatprep.subr.bf16.mxu1 %v17271_v49  ;;  %12072 = vmatprep.subr.bf16.mxu0 %v17271_v49 }
0x1b15   : > { %12013 = vmatpush3.bf16.msra.mxu1 %v13308_v35  ;;  %12073 = vmatpush3.bf16.msra.mxu0 %v13309_v1 }
0x1b16   : > { %12014 = vmatprep.subr.bf16.mxu1 %v17271_v49  ;;  %12074 = vmatprep.subr.bf16.mxu0 %v17271_v49 }
0x1b19   : > { %12015 = vmatpush3.bf16.msra.mxu1 %v13310_v45  ;;  %12075 = vmatpush3.bf16.msra.mxu0 %v13311_v54 }
0x1b1a   : > { %12016 = vmatprep.subr.bf16.mxu1 %v17271_v49  ;;  %12076 = vmatprep.subr.bf16.mxu0 %v17271_v49 }
0x1b1d   : > { %12017 = vmatpush3.bf16.msra.mxu1 %v13312_v58  ;;  %12077 = vmatpush3.bf16.msra.mxu0 %v13313_v34 }
0x1b1e   : > { %12018 = vmatprep.subr.bf16.mxu1 %v17271_v49  ;;  %12078 = vmatprep.subr.bf16.mxu0 %v17271_v49 }
0x1b21   : > { %12019 = vmatpush3.bf16.msra.mxu1 %v13314_v3  ;;  %12079 = vmatpush3.bf16.msra.mxu0 %v13315_v14  ;;  %v13336_v3 = vld [vmem:[%s16974_s7] sm:$0xff]   ;;  %v13337_v14 = vld [vmem:[%s16974_s7 + $0x8] sm:$0xff]  }
0x1b22   : > { %12020 = vmatprep.subr.bf16.mxu1 %v17271_v49  ;;  %12080 = vmatprep.subr.bf16.mxu0 %v17271_v49 }
0x1b25   : > { %12021 = vmatpush3.bf16.msra.mxu1 %v13316_v37  ;;  %12081 = vmatpush3.bf16.msra.mxu0 %v13317_v5  ;;  %v13338_v37 = vld [vmem:[%s16974_s7 + $0x10] sm:$0xff]   ;;  %v13339_v5 = vld [vmem:[%s16974_s7 + $0x18] sm:$0xff]  }
0x1b26   : > { %12022 = vmatprep.subr.bf16.mxu1 %v17271_v49  ;;  %12082 = vmatprep.subr.bf16.mxu0 %v17271_v49 }
0x1b29   : > { %12023 = vmatpush3.bf16.msra.mxu1 %v9500_v44  ;;  %12083 = vmatpush3.bf16.msra.mxu0 %v9824_v41 }
0x1b2a   : > { %12048 = vmatprep.subr.bf16.mxu1 %v17271_v49  ;;  %12108 = vmatprep.subr.bf16.mxu0 %v17271_v49 }
0x1b2c   : > { %12025 = vmatmul.mubr.msk.bf16.vlgmr.msra.gmra.mrb[116].mxu1 %vm1332_vm1, %v9448_v61  ;;  %12085 = vmatmul.mubr.msk.bf16.vlgmr.msra.gmra.mrb[92].mxu0 %vm1332_vm1, %v9772_v43 }
0x1b2d   : > { %12049 = vmatpush3.bf16.msra.mxu1 %v13320_v57  ;;  %12064 = vmatprep.mubr.msk.bf16.mxu1 %vm13417_vm3, %v17271_v49 }
0x1b2e   : > { %12050 = vmatprep.subr.bf16.mxu1 %v17271_v49  ;;  %12124 = vmatprep.mubr.msk.bf16.mxu0 %vm13417_vm3, %v17271_v49 }
0x1b2f   : > { %12109 = vmatpush3.bf16.msra.mxu0 %v13336_v3  ;;  %v13348_v3 = vld [vmem:[%s16976_s9 + $0x20] sm:$0xff]  }
0x1b30   : > { %12110 = vmatprep.subr.bf16.mxu0 %v17271_v49 }
0x1b31   : > { %12051 = vmatpush3.bf16.msra.mxu1 %v13321_v40 }
0x1b32   : > { %12052 = vmatprep.subr.bf16.mxu1 %v17271_v49 }
0x1b33   : > { %12111 = vmatpush3.bf16.msra.mxu0 %v13337_v14  ;;  %v13349_v14 = vld [vmem:[%s16976_s9 + $0x28] ss:$0 sps:$4 sm:$0x33]  }
0x1b34   : > { %12112 = vmatprep.subr.bf16.mxu0 %v17271_v49 }
0x1b35   : > { %12053 = vmatpush3.bf16.msra.mxu1 %v13322_v47 }
0x1b36   : > { %12054 = vmatprep.subr.bf16.mxu1 %v17271_v49 }
0x1b37   : > { %12113 = vmatpush3.bf16.msra.mxu0 %v13338_v37  ;;  %v10162_v37 = vsel %vm898_vm11, %v13349_v14, 0 }
0x1b38   : > { %12114 = vmatprep.subr.bf16.mxu0 %v17271_v49 }
0x1b39   : > { %12055 = vmatpush3.bf16.msra.mxu1 %v13323_v42  ;;  %v13340_v42 = vld [vmem:[%s16974_s7 + $0x20] sm:$0xff]  }
0x1b3a   : > { %12056 = vmatprep.subr.bf16.mxu1 %v17271_v49 }
0x1b3b   : > { %12115 = vmatpush3.bf16.msra.mxu0 %v13339_v5  ;;  %v11446_v5 = vld [vmem:[%s16975_s8] ss:$0 sm:$0xff] }
0x1b3c   : > { %12116 = vmatprep.subr.bf16.mxu0 %v17271_v49 }
0x1b3d   : > { %12057 = vmatpush3.bf16.msra.mxu1 %v13324_v28  ;;  %v13341_v28 = vld [vmem:[%s16974_s7 + $0x28] sm:$0xff]  }
0x1b3e   : > { %12058 = vmatprep.subr.bf16.mxu1 %v17271_v49 }
0x1b3f   : > { %v16777_v15 = vpop.f32.mrb[92].mxu1  ;;  %v16779_v52 = vpop.f32.mrb[68].mxu0  ;;  %12117 = vmatpush3.bf16.msra.mxu0 %v13340_v42 }
0x1b40   : > { %v11806_v29 = vpop.f32.mrb[93].mxu1  ;;  %v11846_v33 = vpop.f32.mrb[69].mxu0  ;;  %12118 = vmatprep.subr.bf16.mxu0 %v17271_v49 }
0x1b41   : > { %12059 = vmatpush3.bf16.msra.mxu1 %v13325_v9  ;;  %v7945_v12 = vpop.f32.mrb[94].mxu1  ;;  %v8277_v53 = vpop.f32.mrb[70].mxu0  ;;  %v13344_v9 = vld [vmem:[%s16976_s9] sm:$0xff]   ;;  %v13343_v29 = vld [vmem:[%s16974_s7 + $0x38] ss:$0 sps:$4 sm:$0xff]   ;;  %v13346_v33 = vld [vmem:[%s16976_s9 + $0x10] sm:$0xff]  }
0x1b42   : > { %v11807_v13 = vpop.f32.mrb[95].mxu1  ;;  %v11847_v22 = vpop.f32.mrb[71].mxu0  ;;  %12060 = vmatprep.subr.bf16.mxu1 %v17271_v49  ;;  %v10062_v12 = vsel %vm895_vm8, %v13343_v29, 0  ;;  %v13347_v53 = vld [vmem:[%s16976_s9 + $0x18] sm:$0xff]  }
0x1b43   : > { %12119 = vmatpush3.bf16.msra.mxu0 %v13341_v28 }
0x1b44   : > { %12120 = vmatprep.subr.bf16.mxu0 %v17271_v49 }
0x1b45   : > { %12061 = vmatpush3.bf16.msra.mxu1 %v13326_v7 }
0x1b46   : > { %12062 = vmatprep.subr.bf16.mxu1 %v17271_v49 }
0x1b49   : > { %12063 = vmatpush3.bf16.msra.mxu1 %v9716_v46 }
0x1b4a   : > { %12088 = vmatprep.subr.bf16.mxu1 %v17271_v49 }
0x1b4c   : > { %12065 = vmatmul.mubr.msk.bf16.vlgmr.msra.gmra.mrb[120].mxu1 %vm1332_vm1, %v9664_v16 }
0x1b4d   : > { %12089 = vmatpush3.bf16.msra.mxu1 %v13328_v23  ;;  %12104 = vmatprep.mubr.msk.bf16.mxu1 %vm13417_vm3, %v17271_v49 }
0x1b4e   : > { %12090 = vmatprep.subr.bf16.mxu1 %v17271_v49 }
0x1b51   : > { %12091 = vmatpush3.bf16.msra.mxu1 %v13329_v24 }
0x1b52   : > { %12092 = vmatprep.subr.bf16.mxu1 %v17271_v49 }
0x1b55   : > { %12093 = vmatpush3.bf16.msra.mxu1 %v13330_v39 }
0x1b56   : > { %12094 = vmatprep.subr.bf16.mxu1 %v17271_v49 }
0x1b59   : > { %12095 = vmatpush3.bf16.msra.mxu1 %v13331_v63 }
0x1b5a   : > { %12096 = vmatprep.subr.bf16.mxu1 %v17271_v49 }
0x1b5d   : > { %12097 = vmatpush3.bf16.msra.mxu1 %v13332_v51 }
0x1b5e   : > { %12098 = vmatprep.subr.bf16.mxu1 %v17271_v49 }
0x1b5f   : > { %v16819_v62 = vpop.f32.mrb[96].mxu1  ;;  %v16821_v20 = vpop.f32.mrb[72].mxu0 }
0x1b60   : > { %v11826_v25 = vpop.f32.mrb[97].mxu1  ;;  %v11886_v10 = vpop.f32.mrb[73].mxu0 }
0x1b61   : > { %v8111_v26 = vpop.f32.mrb[98].mxu1  ;;  %v8609_v6 = vpop.f32.mrb[74].mxu0  ;;  %12099 = vmatpush3.bf16.msra.mxu1 %v13333_v38 }
0x1b62   : > { %v11827_v17 = vpop.f32.mrb[99].mxu1  ;;  %v11887_v4 = vpop.f32.mrb[75].mxu0  ;;  %12100 = vmatprep.subr.bf16.mxu1 %v17271_v49 }
0x1b65   : > { %12101 = vmatpush3.bf16.msra.mxu1 %v13334_v56 }
0x1b66   : > { %12102 = vmatprep.subr.bf16.mxu1 %v17271_v49 }
0x1b69   : > { %12103 = vmatpush3.bf16.msra.mxu1 %v9932_v2 }
0x1b6a   : > { %12128 = vmatprep.subr.bf16.mxu1 %v17271_v49 }
0x1b6c   : > { %12105 = vmatmul.mubr.msk.bf16.vlgmr.msra.gmra.mrb[124].mxu1 %vm1332_vm1, %v9880_v32 }
0x1b6d   : > { %12140 = vmatprep.mubr.msk.bf16.mxu1 %vm13417_vm3, %v17271_v49  ;;  %12129 = vmatpush3.bf16.msra.mxu1 %v13344_v9  ;;  %vm10157_vm3 = vcmask 687104  }
0x1b6e   : > { %12130 = vmatprep.subr.bf16.mxu1 %v17271_v49 }
0x1b7f   : > { %v16838_v60 = vpop.f32.mrb[100].mxu1  ;;  %v16840_v30 = vpop.f32.mrb[76].mxu0 }
0x1b80   : > { %v11866_v59 = vpop.f32.mrb[101].mxu1  ;;  %v11926_v19 = vpop.f32.mrb[77].mxu0 }
0x1b81   : > { %v8443_v21 = vpop.f32.mrb[102].mxu1  ;;  %v8941_v0 = vpop.f32.mrb[78].mxu0 }
0x1b82   : > { %v11867_v48 = vpop.f32.mrb[103].mxu1  ;;  %v11927_v18 = vpop.f32.mrb[79].mxu0 }
0x1b9f   : > { %v16842_v8 = vpop.f32.mrb[104].mxu1  ;;  %v9212_v11 = vpop.f32.mrb[80].mxu0 }
0x1ba0   : > { %v9213_v31 = vadd.f32 %v9212_v11, %v16777_v15  ;;  %v11906_v35 = vpop.f32.mrb[105].mxu1  ;;  %v11966_v1 = vpop.f32.mrb[81].mxu0  ;;  %v13345_v15 = vld [vmem:[%s16976_s9 + $0x8] sm:$0xff]  }
0x1ba1   : > { %v8775_v45 = vpop.f32.mrb[106].mxu1  ;;  %v9215_v54 = vpop.f32.mrb[82].mxu0  ;;  %12131 = vmatpush3.bf16.msra.mxu1 %v13345_v15 }
0x1ba2   : > { %v11907_v58 = vpop.f32.mrb[107].mxu1  ;;  %v11967_v34 = vpop.f32.mrb[83].mxu0  ;;  %12132 = vmatprep.subr.bf16.mxu1 %v17271_v49  ;;  %v11445_v45 = vld [vmem:[%s16973_s6] ss:$0 sm:$0xff] }
0x1ba5   : > { %12133 = vmatpush3.bf16.msra.mxu1 %v13346_v33 }
0x1ba6   : > { %12134 = vmatprep.subr.bf16.mxu1 %v17271_v49 }
0x1ba9   : > { %12135 = vmatpush3.bf16.msra.mxu1 %v13347_v53 }
0x1baa   : > { %12136 = vmatprep.subr.bf16.mxu1 %v17271_v49 }
0x1bad   : > { %12137 = vmatpush3.bf16.msra.mxu1 %v13348_v3 }
0x1bae   : > { %12138 = vmatprep.subr.bf16.mxu1 %v17271_v49 }
0x1bb1   : > { %12139 = vmatpush3.bf16.msra.mxu1 %v10162_v37 }
0x1bbf   : > { %v16861_v55 = vpop.f32.mrb[108].mxu1  ;;  %v9428_v36 = vpop.f32.mrb[84].mxu0 }
0x1bc0   : > { %v9429_v44 = vadd.f32 %v9428_v36, %v16779_v52  ;;  %v11946_v41 = vpop.f32.mrb[109].mxu1  ;;  %v12006_v57 = vpop.f32.mrb[85].mxu0  ;;  %v13342_v52 = vld [vmem:[%s16974_s7 + $0x30] sm:$0xff]  }
0x1bc1   : > { %v9107_v61 = vpop.f32.mrb[110].mxu1  ;;  %v9431_v43 = vpop.f32.mrb[86].mxu0  ;;  %12121 = vmatpush3.bf16.msra.mxu0 %v13342_v52 }
0x1bc2   : > { %v11947_v40 = vpop.f32.mrb[111].mxu1  ;;  %v12007_v47 = vpop.f32.mrb[87].mxu0  ;;  %12122 = vmatprep.subr.bf16.mxu0 %v17271_v49  ;;  %v11456_v49 = vld [vmem:[%s16977_s10] ss:$0 sm:$0xff] }
0x1bc5   : > { %12123 = vmatpush3.bf16.msra.mxu0 %v10062_v12 }
0x1bdf   : > { %v9320_v7 = vpop.f32.mrb[112].mxu1  ;;  %v9644_v27 = vpop.f32.mrb[88].mxu0 }
0x1be0   : > { %v9321_v13 = vadd.f32 %v9320_v7, %v16819_v62  ;;  %v9645_v22 = vadd.f32 %v9644_v27, %v16821_v20  ;;  %v11986_v46 = vpop.f32.mrb[113].mxu1  ;;  %v12046_v23 = vpop.f32.mrb[89].mxu0 }
0x1be1   : > { %v9323_v16 = vpop.f32.mrb[114].mxu1  ;;  %v9647_v24 = vpop.f32.mrb[90].mxu0 }
0x1be2   : > { %v9974_v39 = vadd.f32 %v9321_v13, %v9213_v31  ;;  %v11987_v63 = vpop.f32.mrb[115].mxu1  ;;  %v12047_v51 = vpop.f32.mrb[91].mxu0 }
0x1bff   : > { %v9536_v38 = vpop.f32.mrb[116].mxu1  ;;  %v9860_v25 = vpop.f32.mrb[92].mxu0 }
0x1c00   : > { %v9537_v10 = vadd.f32 %v9536_v38, %v16838_v60  ;;  %v9861_v26 = vadd.f32 %v9860_v25, %v16840_v30  ;;  %v12026_v6 = vpop.f32.mrb[117].mxu1  ;;  %v12086_v56 = vpop.f32.mrb[93].mxu0 }
0x1c01   : > { %v9539_v50 = vpop.f32.mrb[118].mxu1  ;;  %v9863_v17 = vpop.f32.mrb[94].mxu0 }
0x1c02   : > { %v9975_v62 = vadd.f32 %v9537_v10, %v9429_v44  ;;  %v12027_v4 = vpop.f32.mrb[119].mxu1  ;;  %v12087_v20 = vpop.f32.mrb[95].mxu0 }
0x1c04   : > { %v9978_v2 = vadd.f32 %v9975_v62, %v9974_v39 }
0x1c1f   : > { %v9752_v32 = vpop.f32.mrb[120].mxu1 }
0x1c20   : > { %v9753_v59 = vadd.f32 %v9752_v32, %v16842_v8  ;;  %v12066_v19 = vpop.f32.mrb[121].mxu1 }
0x1c21   : > { %v9755_v21 = vpop.f32.mrb[122].mxu1 }
0x1c22   : > { %v9976_v0 = vadd.f32 %v9753_v59, %v9645_v22  ;;  %v12067_v48 = vpop.f32.mrb[123].mxu1 }
0x1c3f   : > { %v9968_v18 = vpop.f32.mrb[124].mxu1 }
0x1c40   : > { %v9969_v60 = vadd.f32 %v9968_v18, %v16861_v55  ;;  %v12106_v11 = vpop.f32.mrb[125].mxu1 }
0x1c41   : > { %v9971_v30 = vpop.f32.mrb[126].mxu1 }
0x1c42   : > { %v9977_v31 = vadd.f32 %v9969_v60, %v9861_v26  ;;  %v12107_v35 = vpop.f32.mrb[127].mxu1 }
0x1c44   : > { %v9979_v1 = vadd.f32 %v9977_v31, %v9976_v0 }
0x1c46   : > { %v9980_v54 = vadd.f32 %v9979_v1, %v9978_v2 }
0x1c48   : > { %v9988_v58 = vadd.f32 %v11445_v45, %v9980_v54 }
0x1c4a   : > { %v9989_v34 = vmax.f32 %v9988_v58, 0.0 }
0x1c4c   : > { %v9990_v8 = vpack.c.bf16 %v9989_v34, %v9989_v34 }
0x1c4e   : > { %12125 = vmatmul.mubr.msk.bf16.vlgmr.msra.gmra.mrb[96].mxu0 %vm847_vm5, %v9990_v8 }
0x1d21   : > { %v10098_v55 = vpop.f32.mrb[96].mxu0 }
0x1d22   : > { %v10099_v36 = vadd.f32 %v11446_v5, %v10098_v55  ;;  %v12126_v44 = vpop.f32.mrb[97].mxu0 }
0x1d23   : > { %v10101_v41 = vpop.f32.mrb[98].mxu0 }
0x1d24   : > { %v10104_v57 = vmax.f32 %v10099_v36, 0.0  ;;  %v12127_v61 = vpop.f32.mrb[99].mxu0 }
0x1d26   : > { %v10105_v43 = vpack.c.bf16 %v10104_v57, %v10104_v57 }
0x1d28   : > { %12141 = vmatmul.mubr.msk.bf16.vlgmr.msra.gmra.mrb[128].mxu1 %vm10157_vm3, %v10105_v43 }
0x1dfb   : > { %v10198_v40 = vpop.f32.mrb[128].mxu1 }
0x1dfc   : > { %v10199_v47 = vadd.f32 %v11456_v49, %v10198_v40  ;;  %v12142_v42 = vpop.f32.mrb[129].mxu1 }
0x1dfd   : > { %v10201_v28 = vpop.f32.mrb[130].mxu1 }
0x1dfe   : > { %10204 = vst [vmem:[%s382_s26] sm:$0xff] %v10199_v47  ;;  %v12143_v9 = vpop.f32.mrb[131].mxu1 }
0x1dff   : > { %13363 = shalt.err (!%p13360_p3)
}
0x1e00   : > { %s13364_s24 = scalar_lea.hbm %s16925_s30, 128  ;;  %s13368_s14 = scalar_lea.hbm %s16978_s11, 256 }
0x1e01   : > { %p13365_p4 = scmp.ne.s32.totalorder %s16925_s30, %s13364_s24  ;;  %p13369_p9 = scmp.lt.u32.totalorder %s16925_s30, %s16978_s11 }
0x1e02   : > { %p13370_p10 = scmp.lt.u32.totalorder %s13368_s14, %s13364_s24  ;;  %p13372_p12 = scmp.lt.u32.totalorder %s13364_s24, %s16925_s30 }
0x1e03   : > { %p13366_p7 = pnand %p13365_p4, %p13527_p5 }
0x1e04   : > { %p13371_p11 = por %p13370_p10, %p13369_p9 }
0x1e05   : > { %p13367_p8 = pneg %p13366_p7 }
0x1e06   : > { %p13373_p13 = por %p13372_p12, %p13371_p11 }
0x1e08   : > { %p13374_p0 = pnand %p13373_p13, %p13367_p8 }
0x1e0a   : > { %13377 = shalt.err (!%p13374_p0)
}
0x1e0b   : > { %12273 = dma.vmem_to_hbm [thread:$0]  (%p13527_p5), %s16927_s16, 128, %s16925_s30, %s10206_s15  }
0x1e0c PF: > { %p12279_p1 = scmp.ge.s32.totalorder %s13412_s20, 2  ;;  %s10231_s12 = sand.u32 1, %s13400_s17  }
0x1e0d   : > { %s10232_s21 = scalar_lea.sflag [#allocation4], %s10231_s12 }
0x1e0e   : > { %p12276_p2 = pnand %p12279_p1, %p13531_p6 }
0x1e10   : > { %13395 = dma.done.wait (!%p12276_p2), %s10232_s21, 128  }
0x1e11   : > { %13397 = vsyncadd (!%p12276_p2), %s10232_s21, 4294967168  ;;  %s17288_s22 = sld [smem:[#allocation6_spill]]  ;;  %s17289_s19 = sld [smem:[#allocation7_spill]] }
0x1e12   : > { %p21_p3 = scmp.ge.s32.totalorder %s13514_s23, 4   ;;  %s17290_s17 = smov %s13404_s18 }
0x1e13   : > { %s17292_s20 = smov %s13514_s23 }
0x1e14   :  { %23 = sbr.rel (!%p21_p3) target bundleno = 5 (0x5), region = 132 }
0x1e17   : > { %s17291_s18 = smov %s17288_s22 }
0x1e1b   :  { %10237 = vsyncpa [#allocation4], 1 }
0x1e1c   :  { %10239 = vsyncpa [#allocation4 + $0x1], 1 }

</bundles_post_ra>
